<compile_context>
chip_gen: v5e
topology: v5e:2x2
jax: 0.10.0
libtpu: 0.0.40
codegen_flags: <defaults>
</compile_context>

<pallas_src>
import jax
import jax.numpy as jnp
from jax import lax
from jax.experimental import pallas as pl
from jax.experimental.pallas import tpu as pltpu

EPS = 1e-5          # nn.InstanceNorm2d default (affine=False, biased variance)
NEG_SLOPE = 0.01    # nn.LeakyReLU default negative_slope
KH = KW = 3
MXU_DTYPE = jnp.bfloat16   # matmul operand dtype (accumulation stays f32)


def _round_up(x, m):
    return (x + m - 1) // m * m


def _make_context_kernel(H, W, Wp):
    """Fused (conv3x3 -> InstanceNorm -> LeakyReLU) x2 for one sample."""
    Np = (H + 2) * Wp            # rows of the flattened zero-padded image
    q0 = Wp + 1                  # flat row index of interior pixel (0, 0)
    Lv = (H - 1) * Wp + W        # contiguous flat span covering all interior pixels
    inv_hw = 1.0 / float(H * W)
    # Slice start for tap (dy, dx): interior pixel p reads flat row p + dy*Wp + dx.
    tap_starts = [dy * Wp + dx for dy in range(KH) for dx in range(KW)]

    def kernel(x_ref, w1_ref, w2_ref, o_ref, y1_ref):
        cqp = o_ref.shape[-1]

        # Span row p sits in padded column (p + q0) % Wp == (p + 1) % Wp;
        # it is a real pixel iff that column is in [1, W].
        col = (lax.broadcasted_iota(jnp.int32, (Lv, 1), 0) + 1) % Wp
        mask = jnp.logical_and(col >= 1, col <= W).astype(jnp.float32)   # (Lv, 1)

        def conv3x3(src_ref, w_ref):
            # Fold the 9 taps into the contraction dim: one (Lv, 9*Cin) operand
            # and a single MXU dot (f32 accumulation) -- no per-tap VPU adds.
            taps = [src_ref[s:s + Lv, :] for s in tap_starts]   # static, in-bounds
            xs = jnp.concatenate(taps, axis=1)                  # (Lv, 9*Cin)
            return jnp.dot(xs, w_ref[...], preferred_element_type=jnp.float32)

        def inorm_lrelu(y, mask_out):
            # InstanceNorm2d (affine=False, biased var, eps=1e-5) over the masked
            # interior -- single pass (sum & sum of squares) -- then LeakyReLU.
            ym = y * mask
            ssum = jnp.sum(ym, axis=0, keepdims=True)
            ssq = jnp.sum(ym * y, axis=0, keepdims=True)
            mean = ssum * inv_hw
            var = jnp.maximum(ssq * inv_hw - mean * mean, 0.0)
            z = (y - mean) * lax.rsqrt(var + EPS)
            z = jnp.where(z >= 0, z, NEG_SLOPE * z)
            return z * mask if mask_out else z

        # ---- layer 1: conv3x3 -> InstanceNorm2d -> LeakyReLU -----------------
        # Mask the output (conv2 needs a zero halo inside the span).
        y1 = inorm_lrelu(conv3x3(x_ref, w1_ref), mask_out=True)

        # Layer-1 activation stays resident in VMEM in the padded flat layout:
        # zero the (few) top/bottom halo rows per step (megacore-safe), store
        # only the interior span -- no full-tile pad/concatenate materialization.
        y1_ref[0:q0, :] = jnp.zeros((q0, cqp), y1_ref.dtype)
        y1_ref[q0 + Lv:Np, :] = jnp.zeros((Np - q0 - Lv, cqp), y1_ref.dtype)
        y1_ref[q0:q0 + Lv, :] = y1.astype(y1_ref.dtype)

        # TODO(synk): nn.Dropout2d(p=0.3) is identity in eval/inference mode;
        #             train-mode per-channel dropout (RNG) is intentionally omitted.

        # ---- layer 2: conv3x3 -> InstanceNorm2d -> LeakyReLU -----------------
        # No output mask: the wrapper slices the non-pixel rows away.
        y2 = inorm_lrelu(conv3x3(y1_ref, w2_ref), mask_out=False)
        o_ref[...] = y2.astype(o_ref.dtype)

    return kernel


@jax.jit
def context_block_forward(x_nchw, w1_hwio, b1, w2_hwio, b2):
    """ContextBlock.forward (eval mode). x_nchw: (N, Cin, H, W) -> (N, Cout, H, W).

    Conv weights are HWIO.  b1/b2 are accepted for API parity with nn.Conv2d but
    unused: a per-channel bias right before affine-free InstanceNorm2d is a no-op.
    """
    del b1, b2
    N, Cin, H, W = x_nchw.shape
    Cout = w1_hwio.shape[-1]
    Wp = _round_up(W + 2, 8)                # padded flat row stride (sublane-aligned)
    Np = (H + 2) * Wp
    Lv = (H - 1) * Wp + W                   # interior span length
    Cinp = _round_up(max(Cin, 8), 8)        # sublane-aligned contraction dim
    Cqp = _round_up(Cout, 128)              # lane-dense channel dim (unmasked stores)

    # NCHW -> NHWC, cast to the MXU dtype already in HBM, zero-pad spatial
    # (conv padding=1 + row-stride padding) and channels, flatten HW.
    x = jnp.transpose(x_nchw, (0, 2, 3, 1)).astype(MXU_DTYPE)
    x = jnp.pad(x, ((0, 0), (1, 1), (1, Wp - W - 1), (0, Cinp - Cin)))
    x_flat = x.reshape(N, Np, Cinp)

    # HWIO weights -> folded tap matrices (9*Cin_pad, Cout_pad) in the MXU dtype.
    w1 = jnp.pad(w1_hwio.reshape(KH * KW, Cin, Cout),
                 ((0, 0), (0, Cinp - Cin), (0, Cqp - Cout)))
    w1 = w1.astype(MXU_DTYPE).reshape(KH * KW * Cinp, Cqp)
    w2 = jnp.pad(w2_hwio.reshape(KH * KW, Cout, Cout),
                 ((0, 0), (0, Cqp - Cout), (0, Cqp - Cout)))
    w2 = w2.astype(MXU_DTYPE).reshape(KH * KW * Cqp, Cqp)

    # Explicit VMEM budget from the actual per-step working set (+ headroom).
    bpe = jnp.dtype(MXU_DTYPE).itemsize
    est = (2 * Np * Cinp * bpe                    # x double buffer
           + 2 * w1.size * bpe + 2 * w2.size * bpe  # weight buffers
           + 2 * Lv * Cqp * 4                    # f32 output double buffer
           + Np * Cqp * bpe                      # layer-1 activation scratch
           + Lv * KH * KW * (Cinp + Cqp) * bpe   # folded conv operands
           + 4 * Lv * Cqp * 4)                   # f32 conv/IN temporaries
    vmem_limit = int(min(max(2 * est, 16 * 1024 * 1024), 64 * 1024 * 1024))

    kernel = _make_context_kernel(H, W, Wp)

    out = pl.pallas_call(
        kernel,
        out_shape=jax.ShapeDtypeStruct((N, Lv, Cqp), jnp.float32),
        grid_spec=pltpu.PrefetchScalarGridSpec(
            num_scalar_prefetch=0,
            grid=(N,),
            in_specs=[
                pl.BlockSpec((None, Np, Cinp), lambda n: (n, 0, 0)),        # per-sample image
                pl.BlockSpec((KH * KW * Cinp, Cqp), lambda n: (0, 0)),      # conv1 folded taps
                pl.BlockSpec((KH * KW * Cqp, Cqp), lambda n: (0, 0)),       # conv2 folded taps
            ],
            out_specs=pl.BlockSpec((None, Lv, Cqp), lambda n: (n, 0, 0)),   # interior span only
            scratch_shapes=[pltpu.VMEM((Np, Cqp), MXU_DTYPE)],              # layer-1 act
        ),
        compiler_params=pltpu.CompilerParams(
            dimension_semantics=("parallel",),
            vmem_limit_bytes=vmem_limit),
    )(x_flat, w1, w2)

    # Re-embed the interior span into the (H, Wp) grid, drop halo columns and
    # channel padding, back to NCHW.
    out = jnp.pad(out, ((0, 0), (1, H * Wp - Lv - 1), (0, 0)))
    out = out.reshape(N, H, Wp, Cqp)[:, :, 1:1 + W, :Cout]
    return jnp.transpose(out, (0, 3, 1, 2))


def reference_forward(x_nchw, w1, b1, w2, b2):
    """Pure-JAX f32 reference matching PyTorch eval semantics (bias included)."""
    def conv(x, w, b):
        y = lax.conv_general_dilated(
            x, w, window_strides=(1, 1), padding="SAME",
            dimension_numbers=("NHWC", "HWIO", "NHWC"))
        return y + b

    def inorm_lrelu(y):
        mean = jnp.mean(y, axis=(1, 2), keepdims=True)
        var = jnp.mean((y - mean) ** 2, axis=(1, 2), keepdims=True)
        y = (y - mean) * lax.rsqrt(var + EPS)
        return jnp.where(y >= 0, y, NEG_SLOPE * y)

    x = jnp.transpose(x_nchw, (0, 2, 3, 1))
    y = inorm_lrelu(conv(x, w1, b1))
    z = inorm_lrelu(conv(y, w2, b2))
    return jnp.transpose(z, (0, 3, 1, 2))


if __name__ == "__main__":
    key = jax.random.PRNGKey(0)
    N, Cin, Cout, H, W = 2, 4, 8, 16, 16
    k1, k2, k3, k4, k5 = jax.random.split(key, 5)

    x = jax.random.normal(k1, (N, Cin, H, W), jnp.float32)
    w1 = jax.random.normal(k2, (KH, KW, Cin, Cout), jnp.float32) / jnp.sqrt(KH * KW * Cin)
    b1 = 0.1 * jax.random.normal(k3, (Cout,), jnp.float32)
    w2 = jax.random.normal(k4, (KH, KW, Cout, Cout), jnp.float32) / jnp.sqrt(KH * KW * Cout)
    b2 = 0.1 * jax.random.normal(k5, (Cout,), jnp.float32)

    out = jax.block_until_ready(context_block_forward(x, w1, b1, w2, b2))
    ref = jax.block_until_ready(reference_forward(x, w1, b1, w2, b2))

    assert out.shape == (N, Cout, H, W), out.shape
    # bf16 MXU operands (f32 accumulation + f32 InstanceNorm stats) give ~1e-2
    # absolute error vs the all-f32 reference after two instance-normalised
    # layers; with MXU_DTYPE = jnp.float32 agreement tightens to ~1e-5.
    tol = 5e-2 if MXU_DTYPE == jnp.bfloat16 else 5e-4
    max_err = float(jnp.max(jnp.abs(out - ref)))
    assert max_err < tol, f"mismatch vs reference: {max_err}"
    print("KERNEL_OK")
</pallas_src>

<mosaic_0001>
module attributes {stable_mosaic.version = 11 : i64} {
  func.func @kernel(%arg0: i32, %arg1: memref<1x432x8xbf16, #tpu.memory_space<vmem>>, %arg2: memref<72x128xbf16, #tpu.memory_space<vmem>>, %arg3: memref<1152x128xbf16, #tpu.memory_space<vmem>>, %arg4: memref<1x376x128xf32, #tpu.memory_space<vmem>>, %arg5: memref<432x128xbf16, #tpu.memory_space<vmem>>) attributes {dimension_semantics = [#tpu.dimension_semantics<parallel>], iteration_bounds = array<i64: 2>, scalar_prefetch = 0 : i64, scratch_operands = 1 : i64, tpu.core_type = #tpu.core_type<tc>, window_params = [{transform_indices = @transform_0, window_bounds = array<i64: 1, 432, 8>}, {pipeline_mode = #tpu.pipeline_mode<synchronous>, transform_indices = @transform_1, window_bounds = array<i64: 72, 128>}, {pipeline_mode = #tpu.pipeline_mode<synchronous>, transform_indices = @transform_2, window_bounds = array<i64: 1152, 128>}, {transform_indices = @transform_3, window_bounds = array<i64: 1, 376, 128>}]} {
    %0 = tpu.iota {dimensions = array<i32: 0>} : vector<376x1xi32>
    %c1_i32 = arith.constant 1 : i32
    %1 = vector.broadcast %c1_i32 : i32 to vector<376x1xi32>
    %2 = arith.addi %0, %1 : vector<376x1xi32>
    %c24_i32 = arith.constant 24 : i32
    %c0_i32 = arith.constant 0 : i32
    %3 = arith.cmpi eq, %c24_i32, %c0_i32 : i32
    %c1_i32_0 = arith.constant 1 : i32
    %4 = arith.select %3, %c1_i32_0, %c24_i32 : i32
    %5 = vector.broadcast %4 : i32 to vector<376x1xi32>
    %6 = arith.remsi %2, %5 : vector<376x1xi32>
    %c0_i32_1 = arith.constant 0 : i32
    %7 = vector.broadcast %c0_i32_1 : i32 to vector<376x1xi32>
    %8 = arith.cmpi ne, %6, %7 : vector<376x1xi32>
    %c0_i32_2 = arith.constant 0 : i32
    %9 = vector.broadcast %c0_i32_2 : i32 to vector<376x1xi32>
    %10 = arith.cmpi slt, %6, %9 : vector<376x1xi32>
    %c0_i32_3 = arith.constant 0 : i32
    %11 = arith.cmpi slt, %4, %c0_i32_3 : i32
    %12 = vector.broadcast %11 : i1 to vector<376x1xi1>
    %13 = vector.broadcast %12 : vector<376x1xi1> to vector<376x1xi1>
    %14 = arith.xori %10, %13 : vector<376x1xi1>
    %15 = arith.andi %14, %8 : vector<376x1xi1>
    %16 = vector.broadcast %4 : i32 to vector<376x1xi32>
    %17 = arith.addi %6, %16 : vector<376x1xi32>
    %18 = arith.select %15, %17, %6 : vector<376x1xi1>, vector<376x1xi32>
    %c1_i32_4 = arith.constant 1 : i32
    %19 = vector.broadcast %c1_i32_4 : i32 to vector<376x1xi32>
    %20 = arith.cmpi sge, %18, %19 : vector<376x1xi32>
    %c16_i32 = arith.constant 16 : i32
    %21 = vector.broadcast %c16_i32 : i32 to vector<376x1xi32>
    %22 = arith.cmpi sle, %18, %21 : vector<376x1xi32>
    %23 = arith.andi %20, %22 : vector<376x1xi1>
    %24 = arith.extui %23 : vector<376x1xi1> to vector<376x1xi32>
    %25 = arith.sitofp %24 : vector<376x1xi32> to vector<376x1xf32>
    %c0 = arith.constant 0 : index
    %c0_5 = arith.constant 0 : index
    %c0_6 = arith.constant 0 : index
    %26 = vector.load %arg1[%c0, %c0_5, %c0_6] : memref<1x432x8xbf16, #tpu.memory_space<vmem>>, vector<1x376x8xbf16>
    %27 = vector.shape_cast %26 : vector<1x376x8xbf16> to vector<376x8xbf16>
    %c0_7 = arith.constant 0 : index
    %c1 = arith.constant 1 : index
    %c0_8 = arith.constant 0 : index
    %28 = vector.load %arg1[%c0_7, %c1, %c0_8] : memref<1x432x8xbf16, #tpu.memory_space<vmem>>, vector<1x376x8xbf16>
    %29 = vector.shape_cast %28 : vector<1x376x8xbf16> to vector<376x8xbf16>
    %c0_9 = arith.constant 0 : index
    %c2 = arith.constant 2 : index
    %c0_10 = arith.constant 0 : index
    %30 = vector.load %arg1[%c0_9, %c2, %c0_10] : memref<1x432x8xbf16, #tpu.memory_space<vmem>>, vector<1x376x8xbf16>
    %31 = vector.shape_cast %30 : vector<1x376x8xbf16> to vector<376x8xbf16>
    %c0_11 = arith.constant 0 : index
    %c24 = arith.constant 24 : index
    %c0_12 = arith.constant 0 : index
    %32 = vector.load %arg1[%c0_11, %c24, %c0_12] : memref<1x432x8xbf16, #tpu.memory_space<vmem>>, vector<1x376x8xbf16>
    %33 = vector.shape_cast %32 : vector<1x376x8xbf16> to vector<376x8xbf16>
    %c0_13 = arith.constant 0 : index
    %c25 = arith.constant 25 : index
    %c0_14 = arith.constant 0 : index
    %34 = vector.load %arg1[%c0_13, %c25, %c0_14] : memref<1x432x8xbf16, #tpu.memory_space<vmem>>, vector<1x376x8xbf16>
    %35 = vector.shape_cast %34 : vector<1x376x8xbf16> to vector<376x8xbf16>
    %c0_15 = arith.constant 0 : index
    %c26 = arith.constant 26 : index
    %c0_16 = arith.constant 0 : index
    %36 = vector.load %arg1[%c0_15, %c26, %c0_16] : memref<1x432x8xbf16, #tpu.memory_space<vmem>>, vector<1x376x8xbf16>
    %37 = vector.shape_cast %36 : vector<1x376x8xbf16> to vector<376x8xbf16>
    %c0_17 = arith.constant 0 : index
    %c48 = arith.constant 48 : index
    %c0_18 = arith.constant 0 : index
    %38 = vector.load %arg1[%c0_17, %c48, %c0_18] : memref<1x432x8xbf16, #tpu.memory_space<vmem>>, vector<1x376x8xbf16>
    %39 = vector.shape_cast %38 : vector<1x376x8xbf16> to vector<376x8xbf16>
    %c0_19 = arith.constant 0 : index
    %c49 = arith.constant 49 : index
    %c0_20 = arith.constant 0 : index
    %40 = vector.load %arg1[%c0_19, %c49, %c0_20] : memref<1x432x8xbf16, #tpu.memory_space<vmem>>, vector<1x376x8xbf16>
    %41 = vector.shape_cast %40 : vector<1x376x8xbf16> to vector<376x8xbf16>
    %c0_21 = arith.constant 0 : index
    %c50 = arith.constant 50 : index
    %c0_22 = arith.constant 0 : index
    %42 = vector.load %arg1[%c0_21, %c50, %c0_22] : memref<1x432x8xbf16, #tpu.memory_space<vmem>>, vector<1x376x8xbf16>
    %43 = vector.shape_cast %42 : vector<1x376x8xbf16> to vector<376x8xbf16>
    %44 = tpu.concatenate %27, %29, %31, %33, %35, %37, %39, %41, %43 in 1 : vector<376x8xbf16>, vector<376x8xbf16>, vector<376x8xbf16>, vector<376x8xbf16>, vector<376x8xbf16>, vector<376x8xbf16>, vector<376x8xbf16>, vector<376x8xbf16>, vector<376x8xbf16> -> vector<376x72xbf16>
    %c0_23 = arith.constant 0 : index
    %c0_24 = arith.constant 0 : index
    %45 = vector.load %arg2[%c0_23, %c0_24] : memref<72x128xbf16, #tpu.memory_space<vmem>>, vector<72x128xbf16>
    %cst = arith.constant dense<0.000000e+00> : vector<376x128xf32>
    %46 = tpu.matmul %44, %45, %cst {dimension_numbers = #tpu.dot_dimension_numbers<[1], [0], [0], [1], [0, 0, 1, 1], [], []>} : vector<376x72xbf16>, vector<72x128xbf16>, vector<376x128xf32> -> vector<376x128xf32>
    %47 = vector.broadcast %25 : vector<376x1xf32> to vector<376x128xf32>
    %48 = arith.mulf %46, %47 : vector<376x128xf32>
    %cst_25 = arith.constant dense<0.000000e+00> : vector<128xf32>
    %49 = vector.multi_reduction <add>, %48, %cst_25 [0] : vector<376x128xf32> to vector<128xf32>
    %50 = vector.shape_cast %49 : vector<128xf32> to vector<1x128xf32>
    %51 = arith.mulf %48, %46 : vector<376x128xf32>
    %cst_26 = arith.constant dense<0.000000e+00> : vector<128xf32>
    %52 = vector.multi_reduction <add>, %51, %cst_26 [0] : vector<376x128xf32> to vector<128xf32>
    %53 = vector.shape_cast %52 : vector<128xf32> to vector<1x128xf32>
    %cst_27 = arith.constant 3.906250e-03 : f32
    %54 = vector.broadcast %cst_27 : f32 to vector<1x128xf32>
    %55 = arith.mulf %50, %54 : vector<1x128xf32>
    %cst_28 = arith.constant 3.906250e-03 : f32
    %56 = vector.broadcast %cst_28 : f32 to vector<1x128xf32>
    %57 = arith.mulf %53, %56 : vector<1x128xf32>
    %58 = arith.mulf %55, %55 : vector<1x128xf32>
    %59 = arith.subf %57, %58 : vector<1x128xf32>
    %cst_29 = arith.constant 0.000000e+00 : f32
    %60 = vector.broadcast %cst_29 : f32 to vector<1x128xf32>
    %61 = arith.maximumf %59, %60 : vector<1x128xf32>
    %62 = vector.broadcast %55 : vector<1x128xf32> to vector<376x128xf32>
    %63 = arith.subf %46, %62 : vector<376x128xf32>
    %cst_30 = arith.constant 9.99999974E-6 : f32
    %64 = vector.broadcast %cst_30 : f32 to vector<1x128xf32>
    %65 = arith.addf %61, %64 : vector<1x128xf32>
    %66 = math.rsqrt %65 : vector<1x128xf32>
    %67 = vector.broadcast %66 : vector<1x128xf32> to vector<376x128xf32>
    %68 = arith.mulf %63, %67 : vector<376x128xf32>
    %cst_31 = arith.constant 0.000000e+00 : f32
    %69 = vector.broadcast %cst_31 : f32 to vector<376x128xf32>
    %70 = arith.cmpf oge, %68, %69 : vector<376x128xf32>
    %cst_32 = arith.constant 0.00999999977 : f32
    %71 = vector.broadcast %cst_32 : f32 to vector<376x128xf32>
    %72 = arith.mulf %71, %68 : vector<376x128xf32>
    %73 = arith.select %70, %68, %72 : vector<376x128xi1>, vector<376x128xf32>
    %74 = vector.broadcast %25 : vector<376x1xf32> to vector<376x128xf32>
    %75 = arith.mulf %73, %74 : vector<376x128xf32>
    %cst_33 = arith.constant 0.000000e+00 : bf16
    %76 = vector.broadcast %cst_33 : bf16 to vector<25x128xbf16>
    %c0_34 = arith.constant 0 : index
    %c0_35 = arith.constant 0 : index
    %77 = vector.load %arg5[%c0_34, %c0_35] : memref<432x128xbf16, #tpu.memory_space<vmem>>, vector<25x128xbf16>
    tpu.vector_store %arg5[%c0_34, %c0_35], %76 {strides = array<i32>} : memref<432x128xbf16, #tpu.memory_space<vmem>>, vector<25x128xbf16>,
    %cst_36 = arith.constant 0.000000e+00 : bf16
    %78 = vector.broadcast %cst_36 : bf16 to vector<31x128xbf16>
    %c401 = arith.constant 401 : index
    %c0_37 = arith.constant 0 : index
    %79 = vector.load %arg5[%c401, %c0_37] : memref<432x128xbf16, #tpu.memory_space<vmem>>, vector<31x128xbf16>
    tpu.vector_store %arg5[%c401, %c0_37], %78 {strides = array<i32>} : memref<432x128xbf16, #tpu.memory_space<vmem>>, vector<31x128xbf16>,
    %80 = arith.truncf %75 : vector<376x128xf32> to vector<376x128xbf16>
    %c25_38 = arith.constant 25 : index
    %c0_39 = arith.constant 0 : index
    %81 = vector.load %arg5[%c25_38, %c0_39] : memref<432x128xbf16, #tpu.memory_space<vmem>>, vector<376x128xbf16>
    tpu.vector_store %arg5[%c25_38, %c0_39], %80 {strides = array<i32>} : memref<432x128xbf16, #tpu.memory_space<vmem>>, vector<376x128xbf16>,
    %c0_40 = arith.constant 0 : index
    %c0_41 = arith.constant 0 : index
    %82 = vector.load %arg5[%c0_40, %c0_41] : memref<432x128xbf16, #tpu.memory_space<vmem>>, vector<376x128xbf16>
    %c1_42 = arith.constant 1 : index
    %c0_43 = arith.constant 0 : index
    %83 = vector.load %arg5[%c1_42, %c0_43] : memref<432x128xbf16, #tpu.memory_space<vmem>>, vector<376x128xbf16>
    %c2_44 = arith.constant 2 : index
    %c0_45 = arith.constant 0 : index
    %84 = vector.load %arg5[%c2_44, %c0_45] : memref<432x128xbf16, #tpu.memory_space<vmem>>, vector<376x128xbf16>
    %c24_46 = arith.constant 24 : index
    %c0_47 = arith.constant 0 : index
    %85 = vector.load %arg5[%c24_46, %c0_47] : memref<432x128xbf16, #tpu.memory_space<vmem>>, vector<376x128xbf16>
    %c25_48 = arith.constant 25 : index
    %c0_49 = arith.constant 0 : index
    %86 = vector.load %arg5[%c25_48, %c0_49] : memref<432x128xbf16, #tpu.memory_space<vmem>>, vector<376x128xbf16>
    %c26_50 = arith.constant 26 : index
    %c0_51 = arith.constant 0 : index
    %87 = vector.load %arg5[%c26_50, %c0_51] : memref<432x128xbf16, #tpu.memory_space<vmem>>, vector<376x128xbf16>
    %c48_52 = arith.constant 48 : index
    %c0_53 = arith.constant 0 : index
    %88 = vector.load %arg5[%c48_52, %c0_53] : memref<432x128xbf16, #tpu.memory_space<vmem>>, vector<376x128xbf16>
    %c49_54 = arith.constant 49 : index
    %c0_55 = arith.constant 0 : index
    %89 = vector.load %arg5[%c49_54, %c0_55] : memref<432x128xbf16, #tpu.memory_space<vmem>>, vector<376x128xbf16>
    %c50_56 = arith.constant 50 : index
    %c0_57 = arith.constant 0 : index
    %90 = vector.load %arg5[%c50_56, %c0_57] : memref<432x128xbf16, #tpu.memory_space<vmem>>, vector<376x128xbf16>
    %91 = tpu.concatenate %82, %83, %84, %85, %86, %87, %88, %89, %90 in 1 : vector<376x128xbf16>, vector<376x128xbf16>, vector<376x128xbf16>, vector<376x128xbf16>, vector<376x128xbf16>, vector<376x128xbf16>, vector<376x128xbf16>, vector<376x128xbf16>, vector<376x128xbf16> -> vector<376x1152xbf16>
    %c0_58 = arith.constant 0 : index
    %c0_59 = arith.constant 0 : index
    %92 = vector.load %arg3[%c0_58, %c0_59] : memref<1152x128xbf16, #tpu.memory_space<vmem>>, vector<1152x128xbf16>
    %cst_60 = arith.constant dense<0.000000e+00> : vector<376x128xf32>
    %93 = tpu.matmul %91, %92, %cst_60 {dimension_numbers = #tpu.dot_dimension_numbers<[1], [0], [0], [1], [0, 0, 1, 1], [], []>} : vector<376x1152xbf16>, vector<1152x128xbf16>, vector<376x128xf32> -> vector<376x128xf32>
    %94 = vector.broadcast %25 : vector<376x1xf32> to vector<376x128xf32>
    %95 = arith.mulf %93, %94 : vector<376x128xf32>
    %cst_61 = arith.constant dense<0.000000e+00> : vector<128xf32>
    %96 = vector.multi_reduction <add>, %95, %cst_61 [0] : vector<376x128xf32> to vector<128xf32>
    %97 = vector.shape_cast %96 : vector<128xf32> to vector<1x128xf32>
    %98 = arith.mulf %95, %93 : vector<376x128xf32>
    %cst_62 = arith.constant dense<0.000000e+00> : vector<128xf32>
    %99 = vector.multi_reduction <add>, %98, %cst_62 [0] : vector<376x128xf32> to vector<128xf32>
    %100 = vector.shape_cast %99 : vector<128xf32> to vector<1x128xf32>
    %cst_63 = arith.constant 3.906250e-03 : f32
    %101 = vector.broadcast %cst_63 : f32 to vector<1x128xf32>
    %102 = arith.mulf %97, %101 : vector<1x128xf32>
    %cst_64 = arith.constant 3.906250e-03 : f32
    %103 = vector.broadcast %cst_64 : f32 to vector<1x128xf32>
    %104 = arith.mulf %100, %103 : vector<1x128xf32>
    %105 = arith.mulf %102, %102 : vector<1x128xf32>
    %106 = arith.subf %104, %105 : vector<1x128xf32>
    %cst_65 = arith.constant 0.000000e+00 : f32
    %107 = vector.broadcast %cst_65 : f32 to vector<1x128xf32>
    %108 = arith.maximumf %106, %107 : vector<1x128xf32>
    %109 = vector.broadcast %102 : vector<1x128xf32> to vector<376x128xf32>
    %110 = arith.subf %93, %109 : vector<376x128xf32>
    %cst_66 = arith.constant 9.99999974E-6 : f32
    %111 = vector.broadcast %cst_66 : f32 to vector<1x128xf32>
    %112 = arith.addf %108, %111 : vector<1x128xf32>
    %113 = math.rsqrt %112 : vector<1x128xf32>
    %114 = vector.broadcast %113 : vector<1x128xf32> to vector<376x128xf32>
    %115 = arith.mulf %110, %114 : vector<376x128xf32>
    %cst_67 = arith.constant 0.000000e+00 : f32
    %116 = vector.broadcast %cst_67 : f32 to vector<376x128xf32>
    %117 = arith.cmpf oge, %115, %116 : vector<376x128xf32>
    %cst_68 = arith.constant 0.00999999977 : f32
    %118 = vector.broadcast %cst_68 : f32 to vector<376x128xf32>
    %119 = arith.mulf %118, %115 : vector<376x128xf32>
    %120 = arith.select %117, %115, %119 : vector<376x128xi1>, vector<376x128xf32>
    %c0_69 = arith.constant 0 : index
    %c0_70 = arith.constant 0 : index
    %c0_71 = arith.constant 0 : index
    %121 = vector.load %arg4[%c0_69, %c0_70, %c0_71] : memref<1x376x128xf32, #tpu.memory_space<vmem>>, vector<1x376x128xf32>
    %122 = vector.shape_cast %121 : vector<1x376x128xf32> to vector<376x128xf32>
    %123 = vector.shape_cast %120 : vector<376x128xf32> to vector<1x376x128xf32>
    tpu.vector_store %arg4[%c0_69, %c0_70, %c0_71], %123 {strides = array<i32>} : memref<1x376x128xf32, #tpu.memory_space<vmem>>, vector<1x376x128xf32>,
    return
  }
  func.func @transform_0(%arg0: i32) -> (i32, i32, i32) {
    %c0_i32 = arith.constant 0 : i32
    %c0_i32_0 = arith.constant 0 : i32
    %c0_i32_1 = arith.constant 0 : i32
    return %arg0, %c0_i32, %c0_i32_0 : i32, i32, i32
  }
  func.func @transform_1(%arg0: i32) -> (i32, i32) {
    %c0_i32 = arith.constant 0 : i32
    %c0_i32_0 = arith.constant 0 : i32
    %c0_i32_1 = arith.constant 0 : i32
    return %c0_i32, %c0_i32_0 : i32, i32
  }
  func.func @transform_2(%arg0: i32) -> (i32, i32) {
    %c0_i32 = arith.constant 0 : i32
    %c0_i32_0 = arith.constant 0 : i32
    %c0_i32_1 = arith.constant 0 : i32
    return %c0_i32, %c0_i32_0 : i32, i32
  }
  func.func @transform_3(%arg0: i32) -> (i32, i32, i32) {
    %c0_i32 = arith.constant 0 : i32
    %c0_i32_0 = arith.constant 0 : i32
    %c0_i32_1 = arith.constant 0 : i32
    return %arg0, %c0_i32, %c0_i32_0 : i32, i32, i32
  }
}

</mosaic_0001>

<bundles_post_ra>
// kernel: context_block_forward.1
= control target key start
LH: loop header
LB: loop body
LE: loop exit
PB: predicated region body
PF: predicated region fallthrough
CT: control target
= control target key end

     0   :  { %s9814_s12 = smov 0   ;;  %s16885_s0 = inlined_call_operand.vmem [shape: bf16[2,432,8], index: 0, kind: input, shape index: {}]   ;;  %s16886_s1 = inlined_call_operand.vmem [shape: bf16[72,128], index: 1, kind: input, shape index: {}]   ;;  %s16887_s2 = inlined_call_operand.vmem [shape: bf16[1152,128], index: 2, kind: input, shape index: {}]   ;;  %s16888_s3 = inlined_call_operand.vmem [shape: f32[2,376,128], index: 3, kind: output, shape index: {}]  }
   0x1 LB: > { %s8522_s13 = sadd.s32 4294967295, %s9782_s12   ;;  %p8526_p0 = scmp.ge.s32.totalorder %s9782_s12, 1  ;;  %s9782_s12 = sphi %s9814_s12, %s13_s12  }
   0x2   : > { %p137_p1 = scmp.lt.s32.totalorder %s9782_s12, 3 }
   0x4   : > { %p138_p2 = pnand %p8526_p0, %p137_p1 }
   0x6   : > { %141 = sbr.rel (%p138_p2) target bundleno = 2169 (0x879), region = 32 }
   0xb   : > { %p161_p3 = scmp.lt.s32.totalorder %s8522_s13, 1  ;;  %s9784_s18 = smov 48   ;;  %vm17063_vm0 = vcmask 1046528   ;;  %vm16949_vm1 = vsmask.f32 7424  ;;  %vm3717_vm2 = vcmask 1043456  }
   0xc   : > { %s9785_s19 = smov 24   ;;  %s9786_s20 = smov 16   ;;  %vm4355_vm3 = vsmask.f32 7938  ;;  %vm3239_vm5 = vcmask 64512   ;;  %vm3289_vm6 = vcmask 130048  }
   0xd   : > { %s18423_s13 = smov (!%p161_p3, %s8522_s13), 1  ;;  %s9787_s21 = smov 64   ;;  %vm9995_vm4 = vmand %vm3717_vm2, %vm4355_vm3  ;;  %vm16924_vm7 = vcmask 195584   ;;  %vm16918_vm8 = vcmask 261120   ;;  %vm16912_vm9 = vcmask 326656   ;;  %vm16911_vm10 = vcmask 392192  }
   0xe   : > { %s9669_s14 = smul.u32 216, %s18423_s13  ;;  %s9788_s22 = smov 8   ;;  %vm16910_vm11 = vcmask 457728   ;;  %vm16908_vm12 = vcmask 523264   ;;  %vm16909_vm13 = vcmask 588800   ;;  %vm4348_vm14 = vcmask 1040384  }
   0xf   : > { %s9789_s23 = smov 40   ;;  %s9790_s24 = smov 32   ;;  %vm16906_vm15 = vsmask.f32 256 }
  0x10   : > { %s9828_s17 = scalar_lea.vmem %s16885_s0, %s9669_s14  ;;  %s9791_s25 = smov 56  }
  0x11   : > { %v9831_v0 = vld [vmem:[%s9828_s17 + $0x8] sm:$0xff]   ;;  %v9834_v1 = vld [vmem:[%s9828_s17 + $0x10] sm:$0xff]   ;;  %v9335_v2 = vld [vmem:[%s9828_s17] sm:$0xf0]  ;;  %s9670_s30 = smul.u32 376, %s18423_s13 }
  0x12   : > { %v9114_v3 = vunpack.c.h.b16 %v9831_v0  ;;  %v9117_v4 = vunpack.c.l.b16 %v9834_v1  ;;  %v9336_v5 = vld [vmem:[%s9828_s17] sm:$0xe]  ;;  %v9841_v6 = vld [vmem:[%s9828_s17 + $0x18] sm:$0xff]   ;;  %v2525_v8 = vrot.slane %v9831_v0, 1  ;;  %v2289_v18 = vshll.u32 %v9831_v0, 16 }
  0x13   : > { %v9337_v7 = vor.u32 %v9336_v5, %v9335_v2  ;;  %v9122_v9 = vunpack.c.h.b16 %v9841_v6  ;;  %v2158_v10 = vld [vmem:[%s9828_s17 + $0x18] sm:$0xe]  ;;  %v9847_v11 = vld [vmem:[%s9828_s17] sm:$0xff]   ;;  %3047 = vrot.lane.b32.xlu2 %v9841_v6, %s9784_s18  ;;  %v2153_v22 = vld [vmem:[%s9828_s17 + $0xc] sm:$0xe]  ;;  %v2305_v29 = vshll.u32 %v9841_v6, 16  ;;  %s16698_s6 = scalar_lea.vmem %s16888_s3, %s9670_s30 }
  0x14   : > { %v2625_v12 = vpack.c.b16 %v9117_v4, %v9114_v3  ;;  %v9852_v13 = vld [vmem:[%s9828_s17 + $0x20] sm:$0xff]   ;;  %v3179_v14 = vunpack.c.l.b16 %v2158_v10  ;;  %v2284_v15 = vshll.u32 %v9847_v11, 16  ;;  %v2282_v17 = vshrl.u32 %v9847_v11, 16  ;;  %v9859_v21 = vld [vmem:[%s9828_s17 + $0x14] sm:$0xff]   ;;  %v9903_v2 = vld [vmem:[%s9828_s17 + $0x28] sm:$0xff]  }
  0x15   : > { %v2524_v16 = vrot.slane %v9337_v7, 1  ;;  %v9866_v25 = vrot.slane %v9852_v13, 1  ;;  %v2291_v28 = vrot.slane %v2289_v18, 1  ;;  %v2940_v30 = vunpack.c.l.b16 %v2153_v22 }
  0x16   : > { %2649 = vrot.lane.b32.xlu1 %v2625_v12, %s9785_s19  ;;  %v3180_v19 = vpack.c.b16 %v9122_v9, %v3179_v14  ;;  %v2286_v20 = vrot.slane %v2284_v15, 1  ;;  %v2703_v23 = vshll.u32 %v2625_v12, 16  ;;  %v2701_v31 = vshrl.u32 %v2625_v12, 16  ;;  %v9568_v14 = vld [vmem:[%s9828_s17 + $0x24] sm:$0xff]  }
  0x17   : > { %v2526_v24 = vsel %vm17063_vm0, %v2524_v16, %v2525_v8  ;;  %v2708_v32 = vshll.u32 %v9859_v21, 16  ;;  %v2941_v35 = vpack.c.b16 %v9117_v4, %v2940_v30  ;;  %v2943_v36 = vrot.slane %v9859_v21, 1 }
  0x18   : > { %2571 = vrot.lane.b32.xlu0 %v2526_v24, %s9786_s20  ;;  %v3181_v26 = vrot.slane %v3180_v19, 1  ;;  %v2287_v27 = vor.u32 %v2286_v20, %v2282_v17  ;;  %v2705_v34 = vrot.slane %v2703_v23, 1  ;;  %v2309_v37 = vshrl.u32 %v9841_v6, 16  ;;  %v9316_v24 = vld [vmem:[%s9828_s17 + $0x30] sm:$0xff]  }
  0x19   : > { %v2313_v38 = vshll.u32 %v9852_v13, 16  ;;  %v2307_v40 = vrot.slane %v2305_v29, 1  ;;  %v2942_v41 = vrot.slane %v2941_v35, 1  ;;  %v2293_v42 = vshrl.u32 %v9831_v0, 16 }
  0x1a   : > { %v3182_v33 = vsel %vm17063_vm0, %v3181_v26, %v9866_v25  ;;  %v2292_v39 = vsel %vm16949_vm1, %v2287_v27, %v2291_v28  ;;  %v2706_v43 = vor.u32 %v2705_v34, %v2701_v31  ;;  %v2710_v44 = vrot.slane %v2708_v32, 1 }
  0x1b   : > { %v2944_v45 = vsel %vm17063_vm0, %v2942_v41, %v2943_v36  ;;  %v2297_v46 = vshll.u32 %v9834_v1, 16  ;;  %v9125_v47 = vunpack.c.l.b16 %v9852_v13  ;;  %v2311_v48 = vor.u32 %v2309_v37, %v2307_v40 }
  0x1c   : > { %2989 = vrot.lane.b32.xlu2 %v2944_v45, %s9789_s23  ;;  %v2315_v49 = vrot.slane %v2313_v38, 1  ;;  %v2295_v50 = vor.u32 %v2293_v42, %v2291_v28  ;;  %v2711_v51 = vsel %vm16949_vm1, %v2706_v43, %v2710_v44  ;;  %v2712_v56 = vshrl.u32 %v9859_v21, 16  ;;  %v9962_v43 = vld [vmem:[%s9828_s17 + $0x38] sm:$0xff]  }
  0x1d   : > { %v2299_v52 = vrot.slane %v2297_v46, 1  ;;  %v2627_v53 = vpack.c.b16 %v9125_v47, %v9122_v9  ;;  %v2527_v58 = vrot.slane %v9834_v1, 1  ;;  %v2317_v63 = vshrl.u32 %v9852_v13, 16 }
  0x1e   : > { %3191 = vrot.lane.b32.xlu1 %v3182_v33, %s9787_s21  ;;  %v9886_v54 = vsel %vm16949_vm1, %v2311_v48, %v2315_v49  ;;  %v2714_v59 = vor.u32 %v2712_v56, %v2710_v44  ;;  %v2321_v3 = vshll.u32 %v9903_v2, 16  ;;  %v2301_v7 = vshrl.u32 %v9834_v1, 16 }
  0x1f   : > { %v2300_v55 = vsel %vm16949_vm1, %v2295_v50, %v2299_v52  ;;  %v2716_v57 = vshll.u32 %v2627_v53, 16  ;;  %v2528_v61 = vsel %vm17063_vm0, %v2525_v8, %v2527_v58  ;;  %v2945_v4 = vrot.slane %v2627_v53, 1 }
  0x20   : > { %2472 = vrot.lane.b32.xlu0 %v2292_v39, %s9788_s22  ;;  %v2319_v5 = vor.u32 %v2317_v63, %v2315_v49  ;;  %v2323_v8 = vrot.slane %v2321_v3, 1  ;;  %v2303_v12 = vor.u32 %v2301_v7, %v2299_v52  ;;  %v2533_v15 = vrot.slane %v9903_v2, 1  ;;  %v10000_v63 = vld [vmem:[%s9828_s17 + $0x68] sm:$0xff]   ;;  %v10003_v3 = vld [vmem:[%s9828_s17 + $0x40] sm:$0xff]  }
  0x21   : > { %v2718_v60 = vrot.slane %v2716_v57, 1  ;;  %v2946_v9 = vsel %vm17063_vm0, %v2943_v36, %v2945_v4  ;;  %v2529_v16 = vrot.slane %v9841_v6, 1  ;;  %v2720_v18 = vshrl.u32 %v2627_v53, 16  ;;  %v9951_v36 = vld [vmem:[%s9828_s17 + $0x2c] sm:$0xff]  }
  0x22   : > { %v9911_v10 = vsel %vm16949_vm1, %v2319_v5, %v2323_v8  ;;  %v2308_v17 = vsel %vm16949_vm1, %v2303_v12, %v2307_v40  ;;  %v2724_v19 = vshll.u32 %v9568_v14, 16  ;;  %v9924_v20 = vsel %vm17063_vm0, %v9866_v25, %v2533_v15  ;;  %v10020_v12 = vld [vmem:[%s9828_s17 + $0x70] sm:$0xff]  }
  0x23   : > { %v2719_v62 = vsel %vm16949_vm1, %v2714_v59, %v2718_v60  ;;  %v2722_v22 = vor.u32 %v2720_v18, %v2718_v60  ;;  %v2947_v26 = vrot.slane %v9568_v14, 1  ;;  %v2325_v28 = vshrl.u32 %v9903_v2, 16  ;;  %v4357_v60 = vld [vmem:[#allocation2 + $0xc8] sm:$0xf]  ;;  %v9009_v18 = vld [vmem:[%s16886_s1 + $0x10] sm:$0xff] }
  0x24   : > { %2474 = vrot.lane.b32.xlu2 %v2300_v55, %s9788_s22  ;;  %v2726_v23 = vrot.slane %v2724_v19, 1  ;;  %v2329_v29 = vshll.u32 %v9316_v24, 16  ;;  %v2535_v33 = vrot.slane %v9316_v24, 1  ;;  %v2532_v37 = vsel %vm17063_vm0, %v2529_v16, %v9866_v25  ;;  %v3640_v55 = vld [vmem:[%s16886_s1 + $0x20] sm:$0xf] }
  0x25   : > { %v2948_v30 = vsel %vm17063_vm0, %v2945_v4, %v2947_v26  ;;  %v2327_v31 = vor.u32 %v2325_v28, %v2323_v8  ;;  %v2728_v38 = vshrl.u32 %v9568_v14, 16  ;;  %v2732_v39 = vshll.u32 %v9951_v36, 16 }
  0x26   : > { %2891 = vrot.lane.b32.xlu1 %v2711_v51, %s9790_s24  ;;  %v2727_v27 = vsel %vm16949_vm1, %v2722_v22, %v2726_v23  ;;  %v2331_v32 = vrot.slane %v2329_v29, 1  ;;  %v9942_v35 = vsel %vm17063_vm0, %v2533_v15, %v2535_v33  ;;  %v2949_v40 = vrot.slane %v9951_v36, 1  ;;  %v9977_v51 = vld [vmem:[%s9828_s17 + $0x34] sm:$0xff]   ;;  %v10054_v29 = vld [vmem:[%s9828_s17 + $0x7c] sm:$0xff]  }
  0x27   : > { %v2730_v41 = vor.u32 %v2728_v38, %v2726_v23  ;;  %v2734_v42 = vrot.slane %v2732_v39, 1  ;;  %v2333_v45 = vshrl.u32 %v9316_v24, 16  ;;  %v2337_v46 = vshll.u32 %v9962_v43, 16  ;;  %v10036_v22 = vld [vmem:[%s9828_s17 + $0x74] sm:$0xff]  }
  0x28   : > { %3130 = vrot.lane.b32.xlu0 %v9886_v54, %s9791_s25  ;;  %v9939_v34 = vsel %vm16949_vm1, %v2327_v31, %v2331_v32  ;;  %v2950_v44 = vsel %vm17063_vm0, %v2947_v26, %v2949_v40  ;;  %v2537_v47 = vrot.slane %v9962_v43, 1  ;;  %v3658_v56 = vunpack.c.l.b16 %v3640_v55  ;;  %17132 = vst [vmem:[#allocation4_spill] sm:$0xff] %v10036_v22  ;;  %v9008_v26 = vld [vmem:[%s16886_s1 + $0x8] sm:$0xff] }
  0x29   : > { %v2735_v25 = vsel %vm16949_vm1, %v2730_v41, %v2734_v42  ;;  %v2335_v48 = vor.u32 %v2333_v45, %v2331_v32  ;;  %v2339_v49 = vrot.slane %v2337_v46, 1  ;;  %v4358_v4 = vsel %vm9995_vm4, 0, %v4357_v60 }
  0x2a   : > { %v9974_v50 = vsel %vm17063_vm0, %v2535_v33, %v2537_v47  ;;  %v3663_v59 = vpack.c.b16 %v3658_v56, %v3658_v56  ;;  %4359 = vst [vmem:[#allocation2 + $0xc8] sm:$0xf] %v4358_v4  ;;  %v2341_v7 = vshrl.u32 %v9962_v43, 16  ;;  %v2345_v8 = vshll.u32 %v10003_v3, 16  ;;  %v10124_v4 = vld [vmem:[%s9828_s17 + $0x3c] sm:$0xff]  }
  0x2b   : > { %v9980_v52 = vsel %vm16949_vm1, %v2335_v48, %v2339_v49  ;;  %v2951_v15 = vrot.slane %v9977_v51, 1  ;;  %v2539_v31 = vrot.slane %v10003_v3, 1  ;;  %v16890_v32 = vrot.slane %v10000_v63, 1 }
  0x2c   : > { %2893 = vrot.lane.b32.xlu2 %v2719_v62, %s9790_s24  ;;  %v17129_v62 = vmov 0  ;;  %v2551_v33 = vrot.slane %v10020_v12, 1  ;;  %v2812_v41 = vshll.u32 %v10054_v29, 16  ;;  %v2969_v55 = vrot.slane %v10054_v29, 1 }
  0x2d   : > { %v17130_v62 = vsel %vm9995_vm4, 4294967295, %v17129_v62  ;;  %v2952_v23 = vsel %vm17063_vm0, %v2949_v40, %v2951_v15  ;;  %v2808_v40 = vshrl.u32 %v10036_v22, 16 }
  0x2e   : > { %2651 = vrot.lane.b32.xlu1 %v9859_v21, %s9785_s19  ;;  %v2530_v21 = vsel %vm17063_vm0, %v2527_v58, %v2529_v16  ;;  %17131 = vst [vmem:[#allocation3_spill] sm:$0xff] %v17130_v62  ;;  %v2343_v16 = vor.u32 %v2341_v7, %v2339_v49  ;;  %v10093_v45 = vrot.slane %v2812_v41, 1  ;;  %v2748_v7 = vshll.u32 %v10124_v4, 16 }
  0x30   : > { %2573 = vrot.lane.b32.xlu0 %v2528_v61, %s9786_s20  ;;  %v3719_v61 = vsel %vm3717_vm2, %v3663_v59, 0  ;;  %vm10535_vm2 = vmand %vm4348_vm14, %vm16906_vm15 }
  0x31   : > { %3724 = vmatpush.bf16.msra.mxu0 %v3719_v61  ;;  %9652 = vmatpush.bf16.msra.mxu3 %v3719_v61 }
  0x34   : > { %3132 = vrot.lane.b32.xlu2 %v9911_v10, %s9791_s25 }
  0x36   : > { %3049 = vrot.lane.b32.xlu1 %v9852_v13, %s9784_s18 }
  0x38   : > { %2991 = vrot.lane.b32.xlu0 %v2946_v9, %s9789_s23  ;;  %v9010_v9 = vld [vmem:[%s16886_s1 + $0x18] sm:$0xff] }
  0x39   : > { %3725 = vmatpush.bf16.msra.mxu0 %v9010_v9  ;;  %9653 = vmatpush.bf16.msra.mxu3 %v9010_v9 }
  0x3c   : > { %2575 = vrot.lane.b32.xlu2 %v2530_v21, %s9786_s20  ;;  %v2393_v21 = vshll.u32 %v10020_v12, 16 }
  0x3d   : > { %3726 = vmatpush.bf16.msra.mxu0 %v9009_v18  ;;  %9654 = vmatpush.bf16.msra.mxu3 %v9009_v18  ;;  %v10142_v18 = vrot.slane %v2748_v7, 1 }
  0x3e   : > { %2476 = vrot.lane.b32.xlu1 %v2308_v17, %s9788_s22  ;;  %v10026_v17 = vrot.slane %v2345_v8, 1  ;;  %v10051_v28 = vrot.slane %v2393_v21, 1 }
  0x40   : > { %3193 = vrot.lane.b32.xlu0 %v9924_v20, %s9787_s21 }
  0x41   : > { %3727 = vmatpush.bf16.msra.mxu0 %v9008_v26  ;;  %9655 = vmatpush.bf16.msra.mxu3 %v9008_v26 }
  0x44   : > { %2993 = vrot.lane.b32.xlu2 %v2948_v30, %s9789_s23  ;;  %v2804_v30 = vshll.u32 %v10036_v22, 16 }
  0x46   : > { %2895 = vrot.lane.b32.xlu1 %v2727_v27, %s9790_s24  ;;  %v10072_v39 = vrot.slane %v2804_v30, 1 }
  0x48   : > { %2653 = vrot.lane.b32.xlu0 %v2627_v53, %s9785_s19  ;;  %v2736_v53 = vshrl.u32 %v9951_v36, 16  ;;  %17133 = vst [vmem:[#allocation5_spill] sm:$0xff] %v10072_v39 }
  0x4a   : > { %v2738_v57 = vor.u32 %v2736_v53, %v2734_v42  ;;  %v10081_v42 = vsel %vm17063_vm0, %v2537_v47, %v2539_v31  ;;  %v10104_v47 = vld [vmem:[%s9828_s17 + $0x80] sm:$0xff]   ;;  %v10111_v53 = vld [vmem:[%s9828_s17 + $0x88] sm:$0xff]  }
  0x4b   : > { %v2409_v48 = vshll.u32 %v10104_v47, 16  ;;  %v2413_v60 = vshrl.u32 %v10104_v47, 16  ;;  %v2417_v61 = vshll.u32 %v10111_v53, 16  ;;  %v2557_v41 = vrot.slane %v10111_v53, 1 }
  0x4c   : > { %3195 = vrot.lane.b32.xlu2 %v9942_v35, %s9787_s21 }
  0x4d   : > { %v10119_v59 = vrot.slane %v2409_v48, 1  ;;  %v10136_v9 = vrot.slane %v2417_v61, 1 }
  0x4e   : > { %3134 = vrot.lane.b32.xlu1 %v9939_v34, %s9791_s25 }
  0x4f   : > { %v2415_v8 = vor.u32 %v2413_v60, %v10119_v59 }
  0x50   : > { %3051 = vrot.lane.b32.xlu0 %v9903_v2, %s9784_s18 }
  0x54   : > { %2655 = vrot.lane.b32.xlu2 %v9568_v14, %s9785_s19 }
  0x56   : > { %2577 = vrot.lane.b32.xlu1 %v2532_v37, %s9786_s20  ;;  %v9007_v37 = vld [vmem:[%s16886_s1] sm:$0xff] }
  0x57   : > { %3728 = vmatpush.bf16.msra.mxu0 %v9007_v37  ;;  %9656 = vmatpush.bf16.msra.mxu3 %v9007_v37 }
  0x58   : > { %2478 = vrot.lane.b32.xlu0 %v9886_v54, %s9788_s22  ;;  %v2740_v54 = vshll.u32 %v9977_v51, 16 }
  0x5a   : > { %v9993_v58 = vrot.slane %v2740_v54, 1  ;;  %v16889_v54 = vrot.slane %v10036_v22, 1 }
  0x5c   : > { %3053 = vrot.lane.b32.xlu2 %v9316_v24, %s9784_s18  ;;  %v2743_v5 = vsel %vm16949_vm1, %v2738_v57, %v9993_v58  ;;  %v10043_v24 = vsel %vm16949_vm1, %v2343_v16, %v10026_v17 }
  0x5e   : > { %2995 = vrot.lane.b32.xlu1 %v2950_v44, %s9789_s23  ;;  %v10088_v44 = vsel %vm17063_vm0, %v16890_v32, %v2551_v33 }
  0x60   : > { %2897 = vrot.lane.b32.xlu0 %v2735_v25, %s9790_s24  ;;  %v2810_v25 = vor.u32 %v2808_v40, %v10072_v39  ;;  %v2555_v40 = vrot.slane %v10104_v47, 1 }
  0x62   : > { %v2815_v46 = vsel %vm16949_vm1, %v2810_v25, %v10093_v45  ;;  %v10166_v25 = vld [vmem:[%s9828_s17 + $0x48] sm:$0xff]  }
  0x64   : > { %2480 = vrot.lane.b32.xlu2 %v9911_v10, %s9788_s22  ;;  %v2385_v10 = vshll.u32 %v10000_v63, 16 }
  0x66   : > { %3197 = vrot.lane.b32.xlu1 %v9974_v50, %s9787_s21  ;;  %v10031_v19 = vrot.slane %v2385_v10, 1 }
  0x68   : > { %3136 = vrot.lane.b32.xlu0 %v9980_v52, %s9791_s25 }
  0x6c   : > { %2899 = vrot.lane.b32.xlu2 %v2743_v5, %s9790_s24  ;;  %v2744_v5 = vshrl.u32 %v9977_v51, 16 }
  0x6d   : > { %v10023_v14 = vpop.permute.xlu2 %3047 }
  0x6e   : > { %2657 = vrot.lane.b32.xlu1 %v9951_v36, %s9785_s19  ;;  %v2746_v16 = vor.u32 %v2744_v5, %v9993_v58  ;;  %v10183_v5 = vld [vmem:[%s9828_s17 + $0x78] sm:$0xff]  }
  0x70   : > { %2579 = vrot.lane.b32.xlu0 %v9924_v20, %s9786_s20  ;;  %v2389_v20 = vshrl.u32 %v10000_v63, 16  ;;  %v2751_v58 = vsel %vm16949_vm1, %v2746_v16, %v10142_v18 }
  0x72   : > { %v2391_v27 = vor.u32 %v2389_v20, %v10031_v19 }
  0x74   : > { %3138 = vrot.lane.b32.xlu2 %v10043_v24, %s9791_s25  ;;  %v10070_v38 = vsel %vm16949_vm1, %v2391_v27, %v10051_v28  ;;  %v2953_v27 = vrot.slane %v10124_v4, 1 }
  0x76   : > { %3055 = vrot.lane.b32.xlu1 %v9962_v43, %s9784_s18  ;;  %v10063_v36 = vpop.permute.xlu2 %2989  ;;  %v2954_v60 = vsel %vm17063_vm0, %v2951_v15, %v2953_v27  ;;  %v2401_v15 = vshll.u32 %v10183_v5, 16 }
  0x78   : > { %2997 = vrot.lane.b32.xlu0 %v2952_v23, %s9789_s23  ;;  %v10150_v23 = vsel %vm16949_vm1, %v2415_v8, %v10136_v9  ;;  %v2541_v8 = vrot.slane %v10166_v25, 1 }
  0x7c   : > { %2597 = vrot.lane.b32.xlu2 %v10088_v44, %s9786_s20 }
  0x7e   : > { %2498 = vrot.lane.b32.xlu1 %v10070_v38, %s9788_s22  ;;  %v10099_v43 = vpop.permute.xlu2 %2474 }
  0x80   : > { %3199 = vrot.lane.b32.xlu0 %v10081_v42, %s9787_s21 }
  0x84   : > { %2482 = vrot.lane.b32.xlu2 %v9939_v34, %s9788_s22  ;;  %v2970_v34 = vsel %vm17063_vm0, %v16889_v54, %v2969_v55 }
  0x86   : > { %2917 = vrot.lane.b32.xlu1 %v2815_v46, %s9790_s24  ;;  %v10117_v57 = vpop.permute.xlu2 %2893 }
  0x88   : > { %2675 = vrot.lane.b32.xlu0 %v10036_v22, %s9785_s19  ;;  %v2650_v49 = vpop.permute.xlu1 %2649 }
  0x8a   : > { %v2572_v56 = vpop.permute.xlu0 %2571 }
  0x8c   : > { %3073 = vrot.lane.b32.xlu2 %v10104_v47, %s9784_s18 }
  0x8e   : > { %2581 = vrot.lane.b32.xlu1 %v9942_v35, %s9786_s20  ;;  %v10144_v21 = vpop.permute.xlu2 %3132 }
  0x90   : > { %3015 = vrot.lane.b32.xlu0 %v2970_v34, %s9789_s23  ;;  %v3192_v10 = vpop.permute.xlu1 %3191  ;;  %v2349_v34 = vshrl.u32 %v10003_v3, 16 }
  0x92   : > { %v2473_v20 = vpop.permute.xlu0 %2472  ;;  %v2351_v16 = vor.u32 %v2349_v34, %v10026_v17  ;;  %v10218_v17 = vld [vmem:[%s9828_s17 + $0x84] sm:$0xff]  }
  0x93   : > { %v3241_v35 = vsel %vm3239_vm5, %v9847_v11, %v2473_v20 }
  0x94   : > { %v3291_v26 = vsel %vm3289_vm6, %v3241_v35, %v2572_v56  ;;  %2901 = vrot.lane.b32.xlu2 %v2751_v58, %s9790_s24 }
  0x95   : > { %v3340_v30 = vsel %vm16924_vm7, %v3291_v26, %v2650_v49  ;;  %v10206_v26 = vrot.slane %v2401_v15, 1 }
  0x96   : > { %3156 = vrot.lane.b32.xlu1 %v10150_v23, %s9791_s25  ;;  %v10170_v56 = vpop.permute.xlu2 %2575 }
  0x98   : > { %2659 = vrot.lane.b32.xlu0 %v9977_v51, %s9785_s19  ;;  %v2892_v11 = vpop.permute.xlu1 %2891  ;;  %v2397_v51 = vshrl.u32 %v10020_v12, 16 }
  0x99   : > { %v3389_v37 = vsel %vm16918_vm8, %v3340_v30, %v2892_v11  ;;  %v10215_v30 = vsel %vm17063_vm0, %v2539_v31, %v2541_v8  ;;  %v2820_v31 = vshll.u32 %v10218_v17, 16 }
  0x9a   : > { %v3438_v46 = vsel %vm16912_vm9, %v3389_v37, %v10063_v36  ;;  %v3131_v48 = vpop.permute.xlu0 %3130  ;;  %v2353_v36 = vshll.u32 %v10166_v25, 16  ;;  %v2399_v35 = vor.u32 %v2397_v51, %v10051_v28  ;;  %v3243_v37 = vsel %vm3239_vm5, %v9831_v0, %v10099_v43 }
  0x9b   : > { %v3487_v49 = vsel %vm16911_vm10, %v3438_v46, %v10023_v14  ;;  %v10191_v14 = vsel %vm17063_vm0, %v2555_v40, %v2557_v41  ;;  %v2553_v43 = vrot.slane %v10183_v5, 1 }
  0x9c   : > { %v3536_v61 = vsel %vm16910_vm11, %v3487_v49, %v3131_v48  ;;  %v10201_v20 = vrot.slane %v2353_v36, 1  ;;  %3057 = vrot.lane.b32.xlu2 %v10003_v3, %s9784_s18  ;;  %v10230_v48 = vsel %vm16949_vm1, %v2399_v35, %v10206_v26  ;;  %v2816_v3 = vshrl.u32 %v10054_v29, 16 }
  0x9d   : > { %v3585_v7 = vsel %vm16908_vm12, %v3536_v61, %v3192_v10  ;;  %17134 = vst [vmem:[#allocation6_spill] sm:$0xff] %v10230_v48  ;;  %v10243_v61 = vrot.slane %v2820_v31, 1  ;;  %v10253_v15 = vsel %vm17063_vm0, %v2551_v33, %v2553_v43  ;;  %v2421_v31 = vshrl.u32 %v10111_v53, 16 }
  0x9e   : > { %2999 = vrot.lane.b32.xlu1 %v2954_v60, %s9789_s23  ;;  %8596 = vmatmul.msk.bf16.vlgmr.msra.gmra.mxu0 %vm16909_vm13, %v3585_v7  ;;  %v10208_v11 = vpop.permute.xlu2 %2993  ;;  %v10225_v28 = vsel %vm16949_vm1, %v2351_v16, %v10201_v20  ;;  %v2818_v60 = vor.u32 %v2816_v3, %v10093_v45  ;;  %17135 = vst [vmem:[#allocation7_spill] sm:$0xff] %v10253_v15  ;;  %v10276_v3 = vld [vmem:[%s9828_s17 + $0x90] sm:$0xff]  }
  0xa0   : > { %3217 = vrot.lane.b32.xlu0 %v10191_v14, %s9787_s21  ;;  %v2652_v10 = vpop.permute.xlu1 %2651  ;;  %v2823_v45 = vsel %vm16949_vm1, %v2818_v60, %v10243_v61 }
  0xa2   : > { %v2574_v58 = vpop.permute.xlu0 %2573 }
  0xa3   : > { %v3293_v46 = vsel %vm3289_vm6, %v3243_v37, %v2574_v58 }
  0xa4   : > { %v3342_v49 = vsel %vm16924_vm7, %v3293_v46, %v2652_v10  ;;  %2500 = vrot.lane.b32.xlu2 %v10230_v48, %s9788_s22 }
  0xa5   : > { %v3391_v7 = vsel %vm16918_vm8, %v3342_v49, %v10117_v57  ;;  %v2971_v57 = vrot.slane %v10218_v17, 1  ;;  %v2425_v49 = vshll.u32 %v10276_v3, 16 }
  0xa6   : > { %3201 = vrot.lane.b32.xlu1 %v10215_v30, %s9787_s21  ;;  %v3196_v36 = vpop.permute.xlu2 %3195 }
  0xa7   : > { %v2972_v46 = vsel %vm17063_vm0, %v2969_v55, %v2971_v57  ;;  %v2423_v55 = vor.u32 %v2421_v31, %v10136_v9  ;;  %v10291_v60 = vrot.slane %v2425_v49, 1 }
  0xa8   : > { %3140 = vrot.lane.b32.xlu0 %v10225_v28, %s9791_s25  ;;  %v3050_v0 = vpop.permute.xlu1 %3049 }
  0xaa   : > { %v2992_v34 = vpop.permute.xlu0 %2991 }
  0xab   : > { %v3440_v51 = vsel %vm16912_vm9, %v3391_v7, %v2992_v34 }
  0xac   : > { %v3489_v10 = vsel %vm16911_vm10, %v3440_v51, %v3050_v0  ;;  %2919 = vrot.lane.b32.xlu2 %v2823_v45, %s9790_s24 }
  0xad   : > { %v3538_v33 = vsel %vm16910_vm11, %v3489_v10, %v10144_v21  ;;  %v2559_v10 = vrot.slane %v10276_v3, 1 }
  0xae   : > { %2677 = vrot.lane.b32.xlu1 %v10054_v29, %s9785_s19  ;;  %v10266_v58 = vpop.permute.xlu2 %2655  ;;  %v10288_v29 = vld [vmem:[%s9828_s17 + $0x44] sm:$0xff]  }
  0xaf   : > { %v2756_v45 = vshll.u32 %v10288_v29, 16 }
  0xb0   : > { %2599 = vrot.lane.b32.xlu0 %v10253_v15, %s9786_s20  ;;  %v2477_v16 = vpop.permute.xlu1 %2476 }
  0xb1   : > { %v3245_v21 = vsel %vm3239_vm5, %v9834_v1, %v2477_v16  ;;  %v10311_v16 = vld [vmem:[%s9828_s17 + $0x50] sm:$0xff]  }
  0xb2   : > { %v3194_v35 = vpop.permute.xlu0 %3193  ;;  %v3295_v1 = vsel %vm3289_vm6, %v3245_v21, %v10170_v56 }
  0xb3   : > { %v3587_v37 = vsel %vm16908_vm12, %v3538_v33, %v3194_v35  ;;  %v10316_v33 = vrot.slane %v2756_v45, 1 }
  0xb4   : > { %8597 = vmatmul.msk.bf16.gmra.mxu0 %vm16909_vm13, %v3587_v37  ;;  %2583 = vrot.lane.b32.xlu2 %v9974_v50, %s9786_s20  ;;  %v10302_v50 = vsel %vm16949_vm1, %v2423_v55, %v10291_v60  ;;  %v2955_v37 = vrot.slane %v10288_v29, 1  ;;  %v2361_v55 = vshll.u32 %v10311_v16, 16 }
  0xb6   : > { %3017 = vrot.lane.b32.xlu1 %v2972_v46, %s9789_s23  ;;  %v10293_v7 = vpop.permute.xlu2 %3053 }
  0xb8   : > { %2484 = vrot.lane.b32.xlu0 %v9980_v52, %s9788_s22  ;;  %v2896_v0 = vpop.permute.xlu1 %2895  ;;  %v2752_v52 = vshrl.u32 %v10124_v4, 16 }
  0xba   : > { %v2654_v34 = vpop.permute.xlu0 %2653  ;;  %v2754_v35 = vor.u32 %v2752_v52, %v10142_v18  ;;  %v2357_v18 = vshrl.u32 %v10166_v25, 16  ;;  %v2543_v52 = vrot.slane %v10311_v16, 1 }
  0xbb   : > { %v3344_v51 = vsel %vm16924_vm7, %v3295_v1, %v2654_v34 }
  0xbc   : > { %v3393_v9 = vsel %vm16918_vm8, %v3344_v51, %v2896_v0  ;;  %3158 = vrot.lane.b32.xlu2 %v10302_v50, %s9791_s25  ;;  %v10329_v0 = vsel %vm17063_vm0, %v2557_v41, %v2559_v10  ;;  %v2759_v1 = vsel %vm16949_vm1, %v2754_v35, %v10316_v33  ;;  %v2359_v41 = vor.u32 %v2357_v18, %v10201_v20 }
  0xbd   : > { %v3442_v46 = vsel %vm16912_vm9, %v3393_v9, %v10208_v11  ;;  %v10346_v51 = vrot.slane %v2361_v55, 1  ;;  %v2405_v9 = vshrl.u32 %v10183_v5, 16 }
  0xbe   : > { %2661 = vrot.lane.b32.xlu1 %v10124_v4, %s9785_s19  ;;  %v10321_v49 = vpop.permute.xlu2 %2480 }
  0xc0   : > { %3075 = vrot.lane.b32.xlu0 %v10111_v53, %s9784_s18  ;;  %v3135_v56 = vpop.permute.xlu1 %3134  ;;  %v2956_v53 = vsel %vm17063_vm0, %v2953_v27, %v2955_v37  ;;  %v10355_v27 = vsel %vm16949_vm1, %v2359_v41, %v10346_v51 }
  0xc2   : > { %v3052_v31 = vpop.permute.xlu0 %3051 }
  0xc3   : > { %v3491_v21 = vsel %vm16911_vm10, %v3442_v46, %v3052_v31  ;;  %v10376_v31 = vld [vmem:[%s9828_s17 + $0x8c] sm:$0xff]  }
  0xc4   : > { %v3540_v34 = vsel %vm16910_vm11, %v3491_v21, %v3135_v56  ;;  %3001 = vrot.lane.b32.xlu2 %v2956_v53, %s9789_s23  ;;  %v10365_v56 = vsel %vm17063_vm0, %v2541_v8, %v2543_v52 }
  0xc5   : > { %v3589_v11 = vsel %vm16908_vm12, %v3540_v34, %v3196_v36  ;;  %v2824_v34 = vshrl.u32 %v10218_v17, 16 }
  0xc6   : > { %8598 = vmatmul.msk.bf16.gmra.mxu0 %vm16909_vm13, %v3589_v11  ;;  %3219 = vrot.lane.b32.xlu1 %v10329_v0, %s9787_s21  ;;  %v10351_v45 = vpop.permute.xlu2 %2899  ;;  %v2828_v11 = vshll.u32 %v10376_v31, 16 }
  0xc8   : > { %2903 = vrot.lane.b32.xlu0 %v2759_v1, %s9790_s24  ;;  %v2578_v36 = vpop.permute.xlu1 %2577  ;;  %v10404_v5 = vrot.slane %v2828_v11, 1 }
  0xca   : > { %v2479_v4 = vpop.permute.xlu0 %2478 }
  0xcb   : > { %v3247_v20 = vsel %vm3239_vm5, %v9841_v6, %v2479_v4  ;;  %v2407_v6 = vor.u32 %v2405_v9, %v10206_v26 }
  0xcc   : > { %v3297_v35 = vsel %vm3289_vm6, %v3247_v20, %v2578_v36  ;;  %3203 = vrot.lane.b32.xlu2 %v10365_v56, %s9787_s21 }
  0xcd   : > { %v3346_v8 = vsel %vm16924_vm7, %v3297_v35, %v10266_v58  ;;  %v10392_v26 = vsel %vm16949_vm1, %v2407_v6, %v10119_v59  ;;  %v2826_v59 = vor.u32 %v2824_v34, %v10243_v61  ;;  %v10429_v35 = vld [vmem:[%s9828_s17 + $0x98] sm:$0xff]   ;;  %v2760_v6 = vshrl.u32 %v10288_v29, 16 }
  0xce   : > { %3142 = vrot.lane.b32.xlu1 %v10355_v27, %s9791_s25  ;;  %v10378_v18 = vpop.permute.xlu2 %3138  ;;  %17137 = vst [vmem:[#allocation9_spill] sm:$0xff] %v10392_v26 }
  0xcf   : > { %v2831_v61 = vsel %vm16949_vm1, %v2826_v59, %v10404_v5 }
  0xd0   : > { %3059 = vrot.lane.b32.xlu0 %v10166_v25, %s9784_s18  ;;  %v2996_v46 = vpop.permute.xlu1 %2995  ;;  %v10387_v25 = vsel %vm17063_vm0, %v2553_v43, %v2555_v40  ;;  %v2973_v43 = vrot.slane %v10376_v31, 1 }
  0xd1   : > { %17136 = vst [vmem:[#allocation8_spill] sm:$0xff] %v10387_v25 }
  0xd2   : > { %v2898_v21 = vpop.permute.xlu0 %2897  ;;  %v2974_v4 = vsel %vm17063_vm0, %v2971_v57, %v2973_v43 }
  0xd3   : > { %v3395_v55 = vsel %vm16918_vm8, %v3346_v8, %v2898_v21  ;;  %v2429_v21 = vshrl.u32 %v10276_v3, 16  ;;  %v2433_v8 = vshll.u32 %v10429_v35, 16 }
  0xd4   : > { %v3444_v47 = vsel %vm16912_vm9, %v3395_v55, %v2996_v46  ;;  %2679 = vrot.lane.b32.xlu2 %v10218_v17, %s9785_s19  ;;  %v2762_v55 = vor.u32 %v2760_v6, %v10316_v33  ;;  %v16893_v33 = vrot.slane %v10429_v35, 1 }
  0xd5   : > { %v3493_v58 = vsel %vm16911_vm10, %v3444_v47, %v10293_v7  ;;  %v10424_v7 = vld [vmem:[%s9828_s17 + $0x4c] sm:$0xff]   ;;  %v2431_v47 = vor.u32 %v2429_v21, %v10291_v60 }
  0xd6   : > { %2601 = vrot.lane.b32.xlu1 %v10387_v25, %s9786_s20  ;;  %v10409_v53 = vpop.permute.xlu2 %2597  ;;  %v2764_v17 = vshll.u32 %v10424_v7, 16 }
  0xd8   : > { %2502 = vrot.lane.b32.xlu0 %v10392_v26, %s9788_s22  ;;  %v3198_v40 = vpop.permute.xlu1 %3197  ;;  %v10444_v34 = vrot.slane %v2764_v17, 1 }
  0xda   : > { %v3137_v1 = vpop.permute.xlu0 %3136 }
  0xdb   : > { %v3542_v41 = vsel %vm16910_vm11, %v3493_v58, %v3137_v1  ;;  %v2767_v1 = vsel %vm16949_vm1, %v2762_v55, %v10444_v34 }
  0xdc   : > { %v3591_v36 = vsel %vm16908_vm12, %v3542_v41, %v3198_v40  ;;  %3019 = vrot.lane.b32.xlu2 %v2974_v4, %s9789_s23  ;;  %v10453_v40 = vrot.slane %v2433_v8, 1  ;;  %v10467_v41 = vld [vmem:[%s9828_s17 + $0x58] sm:$0xff]  }
  0xdd   : > { %8599 = vmatmul.msk.bf16.gmra.mxu0 %vm16909_vm13, %v3591_v36  ;;  %v2369_v4 = vshll.u32 %v10467_v41, 16  ;;  %v17149_v48 = vrot.slane %v10467_v41, 1 }
  0xde   : > { %2486 = vrot.lane.b32.xlu1 %v10043_v24, %s9788_s22  ;;  %v10431_v46 = vpop.permute.xlu2 %2482  ;;  %v3249_v24 = vsel %vm3239_vm5, %v9852_v13, %v10321_v49  ;;  %v16895_v49 = vmov 0   ;;  %v10472_v36 = vsel %vm16949_vm1, %v2431_v47, %v10453_v40 }
  0xdf   : > { %4345 = vst [vmem:[#allocation2] sm:$0xf] %v16895_v49  ;;  %v10492_v6 = vrot.slane %v2369_v4, 1  ;;  %v17138_v4 = vmov 0 }
  0xe0   : > { %2921 = vrot.lane.b32.xlu0 %v2831_v61, %s9790_s24  ;;  %v2658_v20 = vpop.permute.xlu1 %2657  ;;  %4346 = vst [vmem:[#allocation2 + $0x4] sm:$0xf] %v16895_v49  ;;  %v2365_v61 = vshrl.u32 %v10311_v16, 16  ;;  %v17139_v4 = vsel %vm10535_vm2, 4294967295, %v17138_v4 }
  0xe1   : > { %4347 = vst [vmem:[#allocation2 + $0x8] sm:$0xf] %v16895_v49 }
  0xe2   : > { %v2580_v9 = vpop.permute.xlu0 %2579  ;;  %4360 = vst [vmem:[#allocation2 + $0xcc] sm:$0xf] %v16895_v49 }
  0xe3   : > { %v3299_v57 = vsel %vm3289_vm6, %v3249_v24, %v2580_v9  ;;  %4361 = vst [vmem:[#allocation2 + $0xd0] sm:$0xf] %v16895_v49 }
  0xe4   : > { %v3348_v11 = vsel %vm16924_vm7, %v3299_v57, %v2658_v20  ;;  %2663 = vrot.lane.b32.xlu2 %v10288_v29, %s9785_s19  ;;  %4362 = vst [vmem:[#allocation2 + $0xd4] sm:$0xf] %v16895_v49 }
  0xe5   : > { %17140 = vst [vmem:[#allocation10_spill] sm:$0xff] %v17139_v4 }
  0xe6   : > { %3077 = vrot.lane.b32.xlu1 %v10276_v3, %s9784_s18  ;;  %v10457_v58 = vpop.permute.xlu2 %3073  ;;  %v16894_v3 = vrot.slane %v10424_v7, 1 }
  0xe8   : > { %2585 = vrot.lane.b32.xlu0 %v10081_v42, %s9786_s20  ;;  %v3056_v13 = vpop.permute.xlu1 %3055  ;;  %v3397_v42 = vsel %vm16918_vm8, %v3348_v11, %v10351_v45  ;;  %v10479_v45 = vsel %vm17063_vm0, %v2559_v10, %v16893_v33  ;;  %v2367_v10 = vor.u32 %v2365_v61, %v10346_v51  ;;  %v2958_v8 = vsel %vm17063_vm0, %v2955_v37, %v16894_v3 }
  0xe9   : > { %v16891_v11 = vrot.slane %v10467_v41, 1  ;;  %v2832_v37 = vshrl.u32 %v10376_v31, 16 }
  0xea   : > { %v2998_v59 = vpop.permute.xlu0 %2997  ;;  %v10507_v51 = vsel %vm16949_vm1, %v2367_v10, %v10492_v6 }
  0xeb   : > { %v3446_v60 = vsel %vm16912_vm9, %v3397_v42, %v2998_v59  ;;  %v10527_v59 = vsel %vm17063_vm0, %v2543_v52, %v16891_v11  ;;  %v172_v42 = vlaneseq }
  0xec   : > { %v3495_v20 = vsel %vm16911_vm10, %v3446_v60, %v3056_v13  ;;  %3221 = vrot.lane.b32.xlu2 %v10479_v45, %s9787_s21  ;;  %v2834_v60 = vor.u32 %v2832_v37, %v10404_v5 }
  0xed   : > { %v3544_v24 = vsel %vm16910_vm11, %v3495_v20, %v10378_v18  ;;  %v10512_v18 = vld [vmem:[%s9828_s17 + $0x94] sm:$0xff]   ;;  %v10547_v20 = vshrl.u32 %v172_v42, 7 }
  0xee   : > { %2905 = vrot.lane.b32.xlu1 %v2767_v1, %s9790_s24  ;;  %v10496_v57 = vpop.permute.xlu2 %2901  ;;  %v2836_v47 = vshll.u32 %v10512_v18, 16  ;;  %v4351_v1 = vld [vmem:[#allocation2 + $0xc] sm:$0x1]  ;;  %v16892_v37 = vrot.slane %v10512_v18, 1 }
  0xf0   : > { %3160 = vrot.lane.b32.xlu0 %v10472_v36, %s9791_s25  ;;  %v2499_v9 = vpop.permute.xlu1 %2498  ;;  %v10532_v61 = vrot.slane %v2836_v47, 1 }
  0xf2   : > { %v3200_v17 = vpop.permute.xlu0 %3199  ;;  %v2839_v10 = vsel %vm16949_vm1, %v2834_v60, %v10532_v61  ;;  %v2437_v60 = vshrl.u32 %v10429_v35, 16 }
  0xf3   : > { %v3593_v21 = vsel %vm16908_vm12, %v3544_v24, %v3200_v17  ;;  %v3267_v17 = vsel %vm3239_vm5, %v10000_v63, %v2499_v9 }
  0xf4   : > { %8600 = vmatmul.msk.bf16.gmra.mxu0 %vm16909_vm13, %v3593_v21  ;;  %3144 = vrot.lane.b32.xlu2 %v10507_v51, %s9791_s25  ;;  %v10560_v21 = vld [vmem:[%s9828_s17 + $0xa0] sm:$0xff]  }
  0xf6   : > { %3061 = vrot.lane.b32.xlu1 %v10311_v16, %s9784_s18  ;;  %v10518_v13 = vpop.permute.xlu2 %3057 }
  0xf8   : > { %3003 = vrot.lane.b32.xlu0 %v2958_v8, %s9789_s23  ;;  %v2918_v55 = vpop.permute.xlu1 %2917  ;;  %v3317_v8 = vsel %vm3289_vm6, %v3267_v17, %v10409_v53  ;;  %v2976_v53 = vsel %vm17063_vm0, %v2973_v43, %v16892_v37  ;;  %v3251_v43 = vsel %vm3239_vm5, %v9903_v2, %v10431_v46 }
  0xfa   : > { %v2676_v29 = vpop.permute.xlu0 %2675 }
  0xfb   : > { %v3366_v9 = vsel %vm16924_vm7, %v3317_v8, %v2676_v29  ;;  %v2768_v29 = vshrl.u32 %v10424_v7, 16 }
  0xfc   : > { %2603 = vrot.lane.b32.xlu2 %v10191_v14, %s9786_s20  ;;  %v10555_v14 = vadd.s32 1, %v10547_v20  ;;  %v3415_v54 = vsel %vm16918_vm8, %v3366_v9, %v2918_v55  ;;  %v2439_v55 = vor.u32 %v2437_v60, %v10453_v40 }
  0xfd   : > { %v2770_v60 = vor.u32 %v2768_v29, %v10444_v34 }
  0xfe   : > { %2504 = vrot.lane.b32.xlu1 %v10150_v23, %s9788_s22  ;;  %v4352_v23 = vsel %vm10535_vm2, 0, %v4351_v1  ;;  %v10545_v5 = vpop.permute.xlu2 %2500  ;;  %v270_v42 = vand.u32 65535, %v10555_v14  ;;  %v271_v32 = vshrl.u32 %v10555_v14, 16 }
  0xff   : > { %4353 = vst [vmem:[#allocation2 + $0xc] sm:$0x1] %v4352_v23  ;;  %v2441_v23 = vshll.u32 %v10560_v21, 16 }
 0x100   : > { %3205 = vrot.lane.b32.xlu0 %v10527_v59, %s9787_s21  ;;  %v2582_v16 = vpop.permute.xlu1 %2581  ;;  %v10589_v11 = vmul.u32 43690, %v270_v42  ;;  %v273_v40 = vmul.u32 43691, %v270_v42 }
 0x101   : > { %v10592_v9 = vrot.slane %v2441_v23, 1 }
 0x102   : > { %v3016_v52 = vpop.permute.xlu0 %3015  ;;  %v277_v37 = vshll.u32 %v10589_v11, 16  ;;  %v278_v62 = vshrl.u32 %v10589_v11, 16 }
 0x103   : > { %v3464_v8 = vsel %vm16912_vm9, %v3415_v54, %v3016_v52  ;;  %v10619_v34 = vsel %vm16949_vm1, %v2439_v55, %v10592_v9 }
 0x104   : > { %2488 = vrot.lane.b32.xlu2 %v10225_v28, %s9788_s22  ;;  %v174_v28 = vadd.s32 8, %v10547_v20  ;;  %v3513_v52 = vsel %vm16911_vm10, %v3464_v8, %v10457_v58  ;;  %vm281_vm3 = vc.u32 %v273_v40, %v277_v37 }
 0x106   : > { %2923 = vrot.lane.b32.xlu1 %v2839_v10, %s9790_s24  ;;  %v10569_v1 = vpop.permute.xlu2 %2919  ;;  %v10574_v10 = vld [vmem:[%s9828_s17 + $0x54] sm:$0xff]  }
 0x107   : > { %v2772_v17 = vshll.u32 %v10574_v10, 16  ;;  %v16897_v55 = vrot.slane %v10574_v10, 1 }
 0x108   : > { %2681 = vrot.lane.b32.xlu0 %v10376_v31, %s9785_s19  ;;  %v3157_v24 = vpop.permute.xlu1 %3156  ;;  %v10594_v31 = vadd.s32 1, %v174_v28  ;;  %v3301_v28 = vsel %vm3289_vm6, %v3251_v43, %v2582_v16 }
 0x109   : > { %v10606_v23 = vrot.slane %v2772_v17, 1  ;;  %v3562_v2 = vsel %vm16910_vm11, %v3513_v52, %v3157_v24  ;;  %v283_v17 = vadd.s32 %v277_v37, %v273_v40  ;;  %v276_v52 = vmul.u32 43690, %v271_v32 }
 0x10a   : > { %v2660_v47 = vpop.permute.xlu0 %2659  ;;  %v299_v42 = vand.u32 65535, %v10594_v31  ;;  %v300_v43 = vshrl.u32 %v10594_v31, 16  ;;  %v16898_v37 = vrot.slane %v10560_v21, 1 }
 0x10b   : > { %v3350_v3 = vsel %vm16924_vm7, %v3301_v28, %v2660_v47  ;;  %v2775_v24 = vsel %vm16949_vm1, %v2770_v60, %v10606_v23  ;;  %v282_v60 = vsel %vm281_vm3, 1, %v16895_v49 }
 0x10c   : > { %3079 = vrot.lane.b32.xlu2 %v10429_v35, %s9784_s18  ;;  %v3399_v29 = vsel %vm16918_vm8, %v3350_v3, %v10496_v57  ;;  %v284_v49 = vadd.s32 %v282_v60, %v276_v52  ;;  %v305_v22 = vmul.u32 43690, %v300_v43 }
 0x10e   : > { %2587 = vrot.lane.b32.xlu1 %v10215_v30, %s9786_s20  ;;  %v175_v30 = vadd.s32 16, %v10547_v20  ;;  %v10613_v33 = vpop.permute.xlu2 %2583 }
 0x110   : > { %3021 = vrot.lane.b32.xlu0 %v2976_v53, %s9789_s23  ;;  %v3000_v54 = vpop.permute.xlu1 %2999  ;;  %v10610_v53 = vmul.u32 43691, %v271_v32  ;;  %v10623_v16 = vadd.s32 1, %v175_v30  ;;  %v10635_v30 = vmul.u32 43690, %v299_v42  ;;  %v17143_v32 = vrot.slane %v10424_v7, 1 }
 0x111   : > { %v3448_v8 = vsel %vm16912_vm9, %v3399_v29, %v3000_v54  ;;  %v10660_v29 = vmul.u32 43691, %v300_v43 }
 0x112   : > { %v3218_v46 = vpop.permute.xlu0 %3217  ;;  %v279_v47 = vshll.u32 %v10610_v53, 16  ;;  %v328_v57 = vand.u32 65535, %v10623_v16  ;;  %v3497_v54 = vsel %vm16911_vm10, %v3448_v8, %v10518_v13  ;;  %v2960_v13 = vsel %vm17063_vm0, %v17143_v32, %v16897_v55 }
 0x113   : > { %v3611_v58 = vsel %vm16908_vm12, %v3562_v2, %v3218_v46  ;;  %v302_v2 = vmul.u32 43691, %v299_v42  ;;  %v10650_v46 = vld [vmem:[%s9828_s17 + $0x60] sm:$0xff]   ;;  %v329_v42 = vshrl.u32 %v10623_v16, 16  ;;  %v17145_v55 = vmov 0  }
 0x114   : > { %8609 = vmatmul.msk.bf16.vlgmr.msra.gmra.mxu3 %vm16909_vm13, %v3611_v58  ;;  %2907 = vrot.lane.b32.xlu2 %v2775_v24, %s9790_s24  ;;  %vm10645_vm14 = vc.u32 %v283_v17, %v279_v47  ;;  %v306_v47 = vshll.u32 %v10635_v30, 16  ;;  %v10665_v8 = vmul.u32 43690, %v328_v57  ;;  %v2377_v32 = vshll.u32 %v10650_v46, 16 }
 0x115   : > { %v308_v52 = vshll.u32 %v10660_v29, 16  ;;  %v334_v60 = vmul.u32 43690, %v329_v42 }
 0x116   : > { %3162 = vrot.lane.b32.xlu1 %v10619_v34, %s9791_s25  ;;  %v10652_v58 = vpop.permute.xlu2 %3158  ;;  %vm10682_vm3 = vc.u32 %v302_v2, %v306_v47  ;;  %v312_v28 = vadd.s32 %v306_v47, %v302_v2  ;;  %v10699_v25 = vrot.slane %v2377_v32, 1  ;;  %v17148_v47 = vrot.slane %v10650_v46, 1 }
 0x117   : > { %v311_v2 = vsel %vm10682_vm3, 1, %v17145_v55 }
 0x118   : > { %2665 = vrot.lane.b32.xlu0 %v10424_v7, %s9785_s19  ;;  %v3202_v3 = vpop.permute.xlu1 %3201 }
 0x11a   : > { %v3141_v40 = vpop.permute.xlu0 %3140 }
 0x11b   : > { %v3546_v24 = vsel %vm16910_vm11, %v3497_v54, %v3141_v40  ;;  %v17144_v54 = vrot.slane %v10429_v35, 1  ;;  %v2373_v40 = vshrl.u32 %v10467_v41, 16 }
 0x11c   : > { %v3595_v17 = vsel %vm16908_vm12, %v3546_v24, %v3202_v3  ;;  %v286_v3 = vsel %vm10645_vm14, 1, %v17145_v55  ;;  %v176_v24 = vadd.s32 24, %v10547_v20  ;;  %3063 = vrot.lane.b32.xlu2 %v10467_v41, %s9784_s18  ;;  %vm314_vm14 = vc.u32 %v312_v28, %v308_v52 }
 0x11d   : > { %8601 = vmatmul.msk.bf16.gmra.mxu0 %vm16909_vm13, %v3595_v17  ;;  %v10673_v7 = vsel %vm17063_vm0, %v17144_v54, %v16898_v37  ;;  %v331_v54 = vmul.u32 43691, %v328_v57  ;;  %v10692_v37 = vmul.u32 43691, %v329_v42  ;;  %v288_v35 = vadd.s32 %v286_v3, %v284_v49 }
 0x11e   : > { %3005 = vrot.lane.b32.xlu1 %v2960_v13, %s9789_s23  ;;  %v335_v13 = vshll.u32 %v10665_v8, 16  ;;  %v2375_v4 = vor.u32 %v2373_v40, %v10492_v6  ;;  %v10701_v39 = vpop.permute.xlu2 %3001  ;;  %v280_v57 = vshrl.u32 %v10610_v53, 16  ;;  %v10712_v49 = vsel %vm17063_vm0, %v17149_v48, %v17148_v47  ;;  %v10715_v6 = vld [vmem:[%s9828_s17 + $0x9c] sm:$0xff]  }
 0x11f   : > { %17150 = vst [vmem:[#allocation11_spill] sm:$0xff] %v10712_v49  ;;  %v10717_v11 = vadd.s32 1, %v176_v24  ;;  %v337_v43 = vshll.u32 %v10692_v37, 16  ;;  %v289_v40 = vadd.s32 %v288_v35, %v278_v62  ;;  %v2840_v3 = vshrl.u32 %v10512_v18, 16 }
 0x120   : > { %3223 = vrot.lane.b32.xlu0 %v10673_v7, %s9787_s21  ;;  %v10690_v17 = vpop.permute.xlu1 %2677  ;;  %vm339_vm15 = vc.u32 %v331_v54, %v335_v13  ;;  %v341_v53 = vadd.s32 %v335_v13, %v331_v54  ;;  %v10722_v32 = vsel %vm16949_vm1, %v2375_v4, %v10699_v25  ;;  %v2844_v41 = vshll.u32 %v10715_v6, 16 }
 0x121   : > { %v313_v48 = vadd.s32 %v311_v2, %v305_v22  ;;  %v315_v52 = vsel %vm314_vm14, 1, %v17145_v55  ;;  %v340_v24 = vsel %vm339_vm15, 1, %v17145_v55  ;;  %v357_v28 = vand.u32 65535, %v10717_v11 }
 0x122   : > { %v2600_v26 = vpop.permute.xlu0 %2599  ;;  %vm343_vm3 = vc.u32 %v341_v53, %v337_v43  ;;  %v177_v22 = vadd.s32 32, %v10547_v20  ;;  %v290_v4 = vadd.s32 %v289_v40, %v280_v57  ;;  %v2842_v35 = vor.u32 %v2840_v3, %v10532_v61 }
 0x123   : > { %v10737_v42 = vrot.slane %v2844_v41, 1  ;;  %v307_v54 = vshrl.u32 %v10635_v30, 16  ;;  %v317_v13 = vadd.s32 %v315_v52, %v313_v48  ;;  %v342_v47 = vadd.s32 %v340_v24, %v334_v60 }
 0x124   : > { %2506 = vrot.lane.b32.xlu2 %v10302_v50, %s9788_s22  ;;  %v344_v43 = vsel %vm343_vm3, 1, %v17145_v55  ;;  %v358_v53 = vshrl.u32 %v10717_v11, 16  ;;  %v10746_v50 = vmul.u32 43690, %v357_v28  ;;  %v3269_v61 = vsel %vm3239_vm5, %v10020_v12, %v10545_v5 }
 0x125   : > { %v10751_v57 = vadd.s32 1, %v177_v22  ;;  %v291_v40 = vshrl.u32 %v290_v4, 4  ;;  %v3319_v30 = vsel %vm3289_vm6, %v3269_v61, %v2600_v26  ;;  %v2847_v3 = vsel %vm16949_vm1, %v2842_v35, %v10737_v42 }
 0x126   : > { %3207 = vrot.lane.b32.xlu1 %v10712_v49, %s9787_s21  ;;  %v10742_v15 = vpop.permute.xlu2 %3203  ;;  %v309_v41 = vshrl.u32 %v10660_v29, 16  ;;  %v318_v48 = vadd.s32 %v317_v13, %v307_v54  ;;  %v336_v60 = vshrl.u32 %v10665_v8, 16  ;;  %v346_v52 = vadd.s32 %v344_v43, %v342_v47 }
 0x127   : > { %v16915_v24 = vrot.slane %v10715_v6, 1  ;;  %v360_v12 = vmul.u32 43691, %v357_v28  ;;  %v10761_v5 = vmul.u32 43691, %v358_v53  ;;  %v364_v22 = vshll.u32 %v10746_v50, 16 }
 0x128   : > { %3146 = vrot.lane.b32.xlu0 %v10722_v32, %s9791_s25  ;;  %v3018_v62 = vpop.permute.xlu1 %3017  ;;  %v3368_v26 = vsel %vm16924_vm7, %v3319_v30, %v10690_v17  ;;  %v386_v4 = vand.u32 65535, %v10751_v57  ;;  %v292_v8 = vmul.u32 24, %v291_v40  ;;  %v319_v35 = vadd.s32 %v318_v48, %v309_v41  ;;  %v10786_v41 = vld [vmem:[%s9828_s17 + $0xa8] sm:$0xff]  }
 0x129   : > { %v338_v28 = vshrl.u32 %v10692_v37, 16  ;;  %v347_v54 = vadd.s32 %v346_v52, %v336_v60  ;;  %v3417_v17 = vsel %vm16918_vm8, %v3368_v26, %v10569_v1  ;;  %v366_v61 = vshll.u32 %v10761_v5, 16 }
 0x12a   : > { %v10740_v2 = vpop.permute.xlu0 %2484  ;;  %v370_v30 = vadd.s32 %v364_v22, %v360_v12  ;;  %v3466_v40 = vsel %vm16912_vm9, %v3417_v17, %v3018_v62  ;;  %vm368_vm15 = vc.u32 %v360_v12, %v364_v22  ;;  %v387_v37 = vshrl.u32 %v10751_v57, 16  ;;  %v10812_v17 = vld [vmem:[%s9828_s17 + $0x5c] sm:$0xff]  }
 0x12b   : > { %v2445_v48 = vshrl.u32 %v10560_v21, 16  ;;  %v10792_v60 = vsub.s32 %v10555_v14, %v292_v8  ;;  %v348_v52 = vadd.s32 %v347_v54, %v338_v28  ;;  %v363_v62 = vmul.u32 43690, %v358_v53 }
 0x12c   : > { %2925 = vrot.lane.b32.xlu2 %v2847_v3, %s9790_s24  ;;  %v10783_v3 = vmul.u32 43690, %v386_v4  ;;  %v320_v12 = vshrl.u32 %v319_v35, 4  ;;  %v369_v22 = vsel %vm368_vm15, 1, %v17145_v55  ;;  %vm10796_vm14 = vc.u32 %v370_v30, %v366_v61 }
 0x12d   : > { %v389_v28 = vmul.u32 43691, %v386_v4  ;;  %v10805_v54 = vmul.u32 43691, %v387_v37  ;;  %v349_v4 = vshrl.u32 %v348_v52, 4  ;;  %v371_v61 = vadd.s32 %v369_v22, %v363_v62 }
 0x12e   : > { %2683 = vrot.lane.b32.xlu1 %v10512_v18, %s9785_s19  ;;  %v10771_v47 = vpop.permute.xlu2 %2679  ;;  %v393_v53 = vshll.u32 %v10783_v3, 16  ;;  %vm1630_vm3 = vcmp.ne.s32.totalorder %v10792_v60, 0  ;;  %vm1677_vm15 = vcmp.lt.s32.totalorder %v10792_v60, 0  ;;  %v2776_v62 = vshrl.u32 %v10574_v10, 16 }
 0x130   : > { %2605 = vrot.lane.b32.xlu0 %v10329_v0, %s9786_s20  ;;  %v2662_v29 = vpop.permute.xlu1 %2661  ;;  %v17151_v0 = vrot.slane %v10512_v18, 1  ;;  %v2449_v18 = vshll.u32 %v10786_v41, 16 }
 0x132   : > { %v3076_v13 = vpop.permute.xlu0 %3075  ;;  %v2978_v43 = vsel %vm17063_vm0, %v17151_v0, %v16915_v24  ;;  %v2447_v0 = vor.u32 %v2445_v48, %v10592_v9  ;;  %v373_v9 = vsel %vm10796_vm14, 1, %v17145_v55  ;;  %v399_v48 = vadd.s32 %v393_v53, %v389_v28 }
 0x133   : > { %v3515_v1 = vsel %vm16911_vm10, %v3466_v40, %v3076_v13  ;;  %v178_v13 = vadd.s32 40, %v10547_v20 }
 0x134   : > { %v3564_v8 = vsel %vm16910_vm11, %v3515_v1, %v10652_v58  ;;  %2589 = vrot.lane.b32.xlu2 %v10365_v56, %s9786_s20  ;;  %v321_v56 = vmul.u32 24, %v320_v12  ;;  %v395_v1 = vshll.u32 %v10805_v54, 16  ;;  %v2780_v12 = vshll.u32 %v10812_v17, 16 }
 0x136   : > { %3023 = vrot.lane.b32.xlu1 %v2978_v43, %s9789_s23  ;;  %v10815_v43 = vrot.slane %v2449_v18, 1  ;;  %v10821_v40 = vpop.permute.xlu2 %3019  ;;  %v10833_v18 = vadd.s32 1, %v178_v13  ;;  %v1771_v13 = vadd.s32 24, %v10792_v60  ;;  %vm10858_vm14 = vc.u32 %v399_v48, %v395_v1 }
 0x138   : > { %2490 = vrot.lane.b32.xlu0 %v10355_v27, %s9788_s22  ;;  %v3220_v14 = vpop.permute.xlu1 %3219  ;;  %v9693_v27 = vld [vmem:[%s9828_s17 + $0x30] sm:$0xff]   ;;  %v10841_v22 = vsel %vm16949_vm1, %v2447_v0, %v10815_v43 }
 0x139   : > { %v3613_v35 = vsel %vm16908_vm12, %v3564_v8, %v3220_v14  ;;  %v3253_v58 = vsel %vm3239_vm5, %v9693_v27, %v10740_v2  ;;  %vm10829_vm12 = vc.u32 %v389_v28, %v393_v53  ;;  %17156 = vst [vmem:[#allocation12_spill] sm:$0xff] %v10841_v22  ;;  %v350_v14 = vmul.u32 24, %v349_v4 }
 0x13a   : > { %v2904_v30 = vpop.permute.xlu0 %2903  ;;  %8610 = vmatmul.msk.bf16.gmra.mxu3 %vm16909_vm13, %v3613_v35  ;;  %v3303_v52 = vsel %vm3289_vm6, %v3253_v58, %v10613_v33  ;;  %v365_v8 = vshrl.u32 %v10746_v50, 16  ;;  %v375_v35 = vadd.s32 %v373_v9, %v371_v61  ;;  %v392_v28 = vmul.u32 43690, %v387_v37 }
 0x13b   : > { %v3352_v26 = vsel %vm16924_vm7, %v3303_v52, %v2662_v29  ;;  %v16914_v53 = vrot.slane %v10786_v41, 1  ;;  %v10851_v27 = vsub.s32 %v10594_v31, %v321_v56  ;;  %v398_v50 = vsel %vm10829_vm12, 1, %v17145_v55  ;;  %vm1724_vm12 = vmand %vm1677_vm15, %vm1630_vm3 }
 0x13c   : > { %v3401_v33 = vsel %vm16918_vm8, %v3352_v26, %v2904_v30  ;;  %3164 = vrot.lane.b32.xlu2 %v10841_v22, %s9791_s25  ;;  %v179_v37 = vadd.s32 48, %v10547_v20  ;;  %v2778_v31 = vor.u32 %v2776_v62, %v10606_v23  ;;  %v10866_v58 = vrot.slane %v2780_v12, 1 }
 0x13d   : > { %v415_v4 = vand.u32 65535, %v10833_v18  ;;  %v16913_v61 = vrot.slane %v10812_v17, 1  ;;  %v351_v30 = vsub.s32 %v10623_v16, %v350_v14  ;;  %v367_v56 = vshrl.u32 %v10761_v5, 16 }
 0x13e   : > { %2667 = vrot.lane.b32.xlu1 %v10574_v10, %s9785_s19  ;;  %v376_v9 = vadd.s32 %v375_v35, %v365_v8  ;;  %v3450_v1 = vsel %vm16912_vm9, %v3401_v33, %v10701_v39  ;;  %v10874_v48 = vpop.permute.xlu2 %2663  ;;  %v400_v52 = vadd.s32 %v398_v50, %v392_v28  ;;  %v17159_v16 = vrot.slane %v10560_v21, 1 }
 0x13f   : > { %v2381_v39 = vshrl.u32 %v10650_v46, 16  ;;  %v402_v62 = vsel %vm10858_vm14, 1, %v17145_v55  ;;  %v416_v26 = vshrl.u32 %v10833_v18, 16  ;;  %v10894_v14 = vadd.s32 1, %v179_v37 }
 0x140   : > { %3081 = vrot.lane.b32.xlu0 %v10560_v21, %s9784_s18  ;;  %v3143_v29 = vpop.permute.xlu1 %3142  ;;  %v10886_v5 = vsel %vm17063_vm0, %v17159_v16, %v16914_v53  ;;  %vm17161_vm3 = vcmask 523264   ;;  %v2783_v21 = vsel %vm16949_vm1, %v2778_v31, %v10866_v58  ;;  %v10900_v35 = vmul.u32 43690, %v415_v4 }
 0x141   : > { %17160 = vst [vmem:[#allocation13_spill] sm:$0xff] %v10886_v5  ;;  %v17162_v33 = vrot.slane %v10574_v10, 1  ;;  %v377_v50 = vadd.s32 %v376_v9, %v367_v56  ;;  %v404_v0 = vadd.s32 %v402_v62, %v400_v52  ;;  %v2383_v37 = vor.u32 %v2381_v39, %v10699_v25 }
 0x142   : > { %v3060_v2 = vpop.permute.xlu0 %3059  ;;  %vm1631_vm15 = vcmp.ne.s32.totalorder %v10851_v27, 0  ;;  %vm1678_vm14 = vcmp.lt.s32.totalorder %v10851_v27, 0  ;;  %v10920_v31 = vmul.u32 43691, %v416_v26  ;;  %v1772_v25 = vadd.s32 24, %v10851_v27 }
 0x143   : > { %v3499_v23 = vsel %vm16911_vm10, %v3450_v1, %v3060_v2  ;;  %v2962_v28 = vsel %vm17063_vm0, %v17162_v33, %v16913_v61  ;;  %v396_v56 = vshrl.u32 %v10805_v54, 16  ;;  %v180_v2 = vadd.s32 56, %v10547_v20 }
 0x144   : > { %v3548_v12 = vsel %vm16910_vm11, %v3499_v23, %v3143_v29  ;;  %v1818_v29 = vsel %vm1724_vm12, %v1771_v13, %v10792_v60  ;;  %v444_v60 = vand.u32 65535, %v10894_v14  ;;  %3007 = vrot.lane.b32.xlu2 %v2962_v28, %s9789_s23  ;;  %vm1679_vm12 = vcmp.lt.s32.totalorder %v351_v30, 0 }
 0x145   : > { %v3597_v8 = vsel %vm17161_vm3, %v3548_v12, %v10742_v15  ;;  %v394_v15 = vshrl.u32 %v10783_v3, 16  ;;  %vm1632_vm3 = vcmp.ne.s32.totalorder %v351_v30, 0  ;;  %v418_v13 = vmul.u32 43691, %v415_v4 }
 0x146   : > { %8602 = vmatmul.msk.bf16.gmra.mxu0 %vm16909_vm13, %v3597_v8  ;;  %3225 = vrot.lane.b32.xlu1 %v10886_v5, %s9787_s21  ;;  %v422_v3 = vshll.u32 %v10900_v35, 16  ;;  %v10925_v1 = vpop.permute.xlu2 %3221  ;;  %vm10932_vm13 = vmand %vm1678_vm14, %vm1631_vm15  ;;  %v1773_v4 = vadd.s32 24, %v351_v30  ;;  %v378_v52 = vshrl.u32 %v377_v50, 4  ;;  %v10938_v39 = vsel %vm16949_vm1, %v2383_v37, %v10031_v19 }
 0x147   : > { %v405_v16 = vadd.s32 %v404_v0, %v394_v15  ;;  %17165 = vst [vmem:[#allocation14_spill] sm:$0xff] %v10938_v39  ;;  %vm1865_vm11 = vcmp.ge.s32.totalorder %v1818_v29, 1  ;;  %vm1912_vm10 = vcmp.le.s32.totalorder %v1818_v29, 16  ;;  %vm1726_vm9 = vmand %vm1679_vm12, %vm1632_vm3  ;;  %v445_v54 = vshrl.u32 %v10894_v14, 16 }
 0x148   : > { %2909 = vrot.lane.b32.xlu0 %v2783_v21, %s9790_s24  ;;  %v10916_v10 = vpop.permute.xlu1 %2601  ;;  %v10943_v62 = vmul.u32 43690, %v444_v60  ;;  %v424_v12 = vshll.u32 %v10920_v31, 16  ;;  %v428_v8 = vadd.s32 %v422_v3, %v418_v13  ;;  %v17166_v21 = vrot.slane %v10000_v63, 1  ;;  %vm10957_vm14 = vmand %vm1865_vm11, %vm1912_vm10 }
 0x149   : > { %v17167_v33 = vrot.slane %v10650_v46, 1  ;;  %vm426_vm15 = vc.u32 %v418_v13, %v422_v3  ;;  %v10955_v19 = vadd.s32 1, %v180_v2  ;;  %v1819_v63 = vsel %vm10932_vm13, %v1772_v25, %v10851_v27  ;;  %v10975_v27 = vld [vmem:[%s9828_s17 + $0xa4] sm:$0xff]  }
 0x14a   : > { %v2503_v9 = vpop.permute.xlu0 %2502  ;;  %v1820_v50 = vsel %vm1726_vm9, %v1773_v4, %v351_v30  ;;  %v379_v15 = vmul.u32 24, %v378_v52  ;;  %v406_v0 = vadd.s32 %v405_v16, %v396_v56  ;;  %v421_v37 = vmul.u32 43690, %v416_v26 }
 0x14b   : > { %v10951_v28 = vsel %vm17063_vm0, %v17167_v33, %v17166_v21  ;;  %v447_v3 = vmul.u32 43691, %v444_v60  ;;  %v10968_v2 = vmul.u32 43691, %v445_v54  ;;  %v451_v21 = vshll.u32 %v10943_v62, 16  ;;  %v10988_v33 = vpop.f32.mrf.mxu0 }
 0x14c   : > { %17168 = vst [vmem:[#allocation15_spill] sm:$0xff] %v10951_v28  ;;  %3209 = vrot.lane.b32.xlu2 %v10951_v28, %s9787_s21  ;;  %v427_v23 = vsel %vm426_vm15, 1, %v17145_v55  ;;  %vm430_vm10 = vc.u32 %v428_v8, %v424_v12  ;;  %v16916_v30 = vmov 0.0   ;;  %vm1866_vm9 = vcmp.ge.s32.totalorder %v1819_v63, 1 }
 0x14d   : > { %v473_v60 = vand.u32 65535, %v10955_v19  ;;  %vm1913_vm11 = vcmp.le.s32.totalorder %v1819_v63, 16  ;;  %vm1867_vm13 = vcmp.ge.s32.totalorder %v1820_v50, 1  ;;  %v380_v56 = vsub.s32 %v10717_v11, %v379_v15  ;;  %17172 = vst [vmem:[#allocation17_spill] sm:$0xff] %v10988_v33 }
 0x14e   : > { %3148 = vrot.lane.b32.xlu1 %v10938_v39, %s9791_s25  ;;  %v10983_v25 = vpop.permute.xlu2 %3144  ;;  %v407_v4 = vshrl.u32 %v406_v0, 4  ;;  %v429_v52 = vadd.s32 %v427_v23, %v421_v37  ;;  %v431_v16 = vsel %vm430_vm10, 1, %v17145_v55  ;;  %v453_v12 = vshll.u32 %v10968_v2, 16  ;;  %vm11007_vm10 = vmand %vm1866_vm9, %vm1913_vm11 }
 0x14f   : > { %v457_v8 = vadd.s32 %v451_v21, %v447_v3  ;;  %vm10990_vm3 = vc.u32 %v447_v3, %v451_v21  ;;  %v2848_v61 = vshrl.u32 %v10715_v6, 16  ;;  %v2852_v53 = vshll.u32 %v10975_v27, 16  ;;  %v9694_v3 = vld [vmem:[%s9828_s17 + $0x78] sm:$0xff]  }
 0x150   : > { %3065 = vrot.lane.b32.xlu0 %v10650_v46, %s9784_s18  ;;  %v10966_v13 = vpop.permute.xlu1 %2486  ;;  %v10980_v46 = vsel %vm10957_vm14, 1.0, %v16916_v30  ;;  %vm1914_vm12 = vcmp.le.s32.totalorder %v1820_v50, 16  ;;  %v423_v15 = vshrl.u32 %v10900_v35, 16  ;;  %v11000_v0 = vmul.u32 43690, %v473_v60 }
 0x151   : > { %17171 = vst [vmem:[#allocation16_spill] sm:$0xff] %v10980_v46  ;;  %v181_v37 = vadd.s32 64, %v10547_v20  ;;  %vm1633_vm15 = vcmp.ne.s32.totalorder %v380_v56, 0  ;;  %vm1680_vm14 = vcmp.lt.s32.totalorder %v380_v56, 0  ;;  %v3271_v21 = vsel %vm3239_vm5, %v9694_v3, %v2503_v9  ;;  %vm11044_vm9 = vmand %vm1867_vm13, %vm1914_vm12 }
 0x152   : > { %v2922_v26 = vpop.permute.xlu0 %2921  ;;  %v450_v23 = vmul.u32 43690, %v445_v54  ;;  %v408_v35 = vmul.u32 24, %v407_v4  ;;  %v433_v30 = vadd.s32 %v431_v16, %v429_v52  ;;  %v456_v11 = vsel %vm10990_vm3, 1, %v17145_v55  ;;  %vm11053_vm11 = vmand %vm1680_vm14, %vm1633_vm15 }
 0x153   : > { %vm11016_vm8 = vc.u32 %v457_v8, %v453_v12  ;;  %v2850_v9 = vor.u32 %v2848_v61, %v10737_v42  ;;  %v11023_v54 = vrot.slane %v2852_v53, 1  ;;  %v17179_v63 = vshrl.u32 %v10955_v19, 16 }
 0x154   : > { %2685 = vrot.lane.b32.xlu2 %v10715_v6, %s9785_s19  ;;  %v3321_v52 = vsel %vm3289_vm6, %v3271_v21, %v10916_v10  ;;  %v476_v12 = vmul.u32 43691, %v473_v60  ;;  %v480_v8 = vshll.u32 %v11000_v0, 16  ;;  %v11035_v29 = vadd.s32 1, %v181_v37 }
 0x155   : > { %v11027_v4 = vmul.u32 43691, %v17179_v63  ;;  %v17180_v3 = vmov 0.0   ;;  %v1774_v61 = vadd.s32 24, %v380_v56  ;;  %v425_v10 = vshrl.u32 %v10920_v31, 16 }
 0x156   : > { %2607 = vrot.lane.b32.xlu1 %v10479_v45, %s9786_s20  ;;  %v11040_v42 = vsel %vm11007_vm10, 1.0, %v17180_v3  ;;  %v458_v21 = vadd.s32 %v456_v11, %v450_v23  ;;  %v11049_v60 = vpop.permute.xlu2 %2603  ;;  %v11058_v24 = vsub.s32 %v10751_v57, %v408_v35  ;;  %v434_v50 = vadd.s32 %v433_v30, %v423_v15 }
 0x157   : > { %17181 = vst [vmem:[#allocation18_spill] sm:$0xff] %v11040_v42  ;;  %v460_v63 = vsel %vm11016_vm8, 1, %v17145_v55  ;;  %v182_v31 = vadd.s32 72, %v10547_v20  ;;  %v3370_v11 = vsel %vm16924_vm7, %v3321_v52, %v10771_v47  ;;  %v2855_v23 = vsel %vm16949_vm1, %v2850_v9, %v11023_v54  ;;  %v11082_v9 = vpop.f32.mrf.mxu0  ;;  %v11095_v52 = vld [vmem:[%s9828_s17 + $0x64] sm:$0xff]  }
 0x158   : > { %2508 = vrot.lane.b32.xlu0 %v10472_v36, %s9788_s22  ;;  %v3078_v45 = vpop.permute.xlu1 %3077  ;;  %v482_v36 = vshll.u32 %v11027_v4, 16  ;;  %v17186_v39 = vrot.slane %v10975_v27, 1  ;;  %v17187_v57 = vrot.slane %v10715_v6, 1  ;;  %vm17188_vm13 = vcmask 261120   ;;  %17191 = vst [vmem:[#allocation19_spill] sm:$0xff] %v11082_v9 }
 0x159   : > { %v3419_v28 = vsel %vm17188_vm13, %v3370_v11, %v2922_v26  ;;  %vm11077_vm8 = vc.u32 %v476_v12, %v480_v8  ;;  %v486_v47 = vadd.s32 %v480_v8, %v476_v12  ;;  %v502_v35 = vand.u32 65535, %v11035_v29 }
 0x15a   : > { %v11032_v16 = vpop.permute.xlu0 %2585  ;;  %v2980_v30 = vsel %vm17063_vm0, %v17187_v57, %v17186_v39  ;;  %v11087_v6 = vsel %vm11044_vm9, 1.0, %v17180_v3  ;;  %v11091_v39 = vsel %vm11053_vm11, %v1774_v61, %v380_v56  ;;  %v462_v26 = vadd.s32 %v460_v63, %v458_v21  ;;  %v11113_v63 = vld [vmem:[%s9828_s17 + $0xb0] sm:$0xff]  }
 0x15b   : > { %17192 = vst [vmem:[#allocation20_spill] sm:$0xff] %v11087_v6  ;;  %vm1634_vm3 = vcmp.ne.s32.totalorder %v11058_v24, 0  ;;  %vm1681_vm12 = vcmp.lt.s32.totalorder %v11058_v24, 0  ;;  %v435_v12 = vadd.s32 %v434_v50, %v425_v10  ;;  %v11101_v53 = vadd.s32 1, %v182_v31 }
 0x15c   : > { %3025 = vrot.lane.b32.xlu2 %v2980_v30, %s9789_s23  ;;  %vm17193_vm15 = vcmask 326656   ;;  %v17194_v61 = vshrl.u32 %v10955_v19, 16  ;;  %v485_v37 = vsel %vm11077_vm8, 1, %v17145_v55  ;;  %vm17195_vm14 = vcmask 392192  }
 0x15d   : > { %v3468_v56 = vsel %vm17193_vm15, %v3419_v28, %v10821_v40  ;;  %vm488_vm10 = vc.u32 %v486_v47, %v482_v36  ;;  %v503_v31 = vshrl.u32 %v11035_v29, 16  ;;  %v11116_v11 = vmul.u32 43690, %v502_v35  ;;  %vm1728_vm15 = vmand %vm1681_vm12, %vm1634_vm3 }
 0x15e   : > { %2492 = vrot.lane.b32.xlu1 %v10507_v51, %s9788_s22  ;;  %v452_v51 = vshrl.u32 %v10943_v62, 16  ;;  %v454_v62 = vshrl.u32 %v10968_v2, 16  ;;  %v479_v21 = vmul.u32 43690, %v17194_v61  ;;  %v3517_v10 = vsel %vm17195_vm14, %v3468_v56, %v3078_v45  ;;  %v11121_v30 = vpop.permute.xlu2 %2488  ;;  %v9695_v61 = vld [vmem:[%s9828_s17 + $0x38] sm:$0xff]  }
 0x15f   : > { %vm17196_vm9 = vcmask 457728   ;;  %v2788_v57 = vshll.u32 %v11095_v52, 16  ;;  %v1775_v45 = vadd.s32 24, %v11058_v24  ;;  %v436_v36 = vshrl.u32 %v435_v12, 4 }
 0x160   : > { %2927 = vrot.lane.b32.xlu0 %v2855_v23, %s9790_s24  ;;  %v2906_v8 = vpop.permute.xlu1 %2905  ;;  %v463_v40 = vadd.s32 %v462_v26, %v452_v51  ;;  %v2784_v23 = vshrl.u32 %v10812_v17, 16  ;;  %vm17197_vm11 = vcmask 523264   ;;  %v531_v15 = vand.u32 65535, %v11101_v53 }
 0x161   : > { %v487_v47 = vadd.s32 %v485_v37, %v479_v21  ;;  %v489_v56 = vsel %vm488_vm10, 1, %v17145_v55  ;;  %vm17198_vm13 = vcmask 588800   ;;  %v2453_v51 = vshrl.u32 %v10786_v41, 16  ;;  %v11139_v37 = vpop.f32.mrf.mxu0 }
 0x162   : > { %v3161_v50 = vpop.permute.xlu0 %3160  ;;  %v2457_v26 = vshll.u32 %v11113_v63, 16  ;;  %v505_v12 = vmul.u32 43691, %v502_v35  ;;  %v509_v21 = vshll.u32 %v11116_v11, 16  ;;  %17199 = vst [vmem:[#allocation21_spill] sm:$0xff] %v11139_v37  ;;  %v11144_v5 = vrot.slane %v2788_v57, 1 }
 0x163   : > { %v3566_v2 = vsel %vm17196_vm9, %v3517_v10, %v3161_v50  ;;  %v3255_v10 = vsel %vm3239_vm5, %v9695_v61, %v10966_v13  ;;  %v464_v50 = vadd.s32 %v463_v40, %v454_v62  ;;  %v437_v22 = vmul.u32 24, %v436_v36 }
 0x164   : > { %v3615_v28 = vsel %vm17197_vm11, %v3566_v2, %v10925_v1  ;;  %v11136_v1 = vmul.u32 43691, %v503_v31  ;;  %v3305_v2 = vsel %vm3289_vm6, %v3255_v10, %v11032_v16  ;;  %v481_v13 = vshrl.u32 %v11000_v0, 16  ;;  %2669 = vrot.lane.b32.xlu2 %v10812_v17, %s9785_s19 }
 0x165   : > { %8611 = vmatmul.msk.bf16.gmra.mxu3 %vm17198_vm13, %v3615_v28  ;;  %v2786_v28 = vor.u32 %v2784_v23, %v10866_v58  ;;  %v532_v61 = vshrl.u32 %v11101_v53, 16  ;;  %v11150_v49 = vmul.u32 43690, %v531_v15  ;;  %v491_v62 = vadd.s32 %v489_v56, %v487_v47 }
 0x166   : > { %3083 = vrot.lane.b32.xlu1 %v10786_v41, %s9784_s18  ;;  %v2455_v16 = vor.u32 %v2453_v51, %v10815_v43  ;;  %v11155_v58 = vrot.slane %v2457_v26, 1  ;;  %v11158_v40 = vrot.slane %v11113_v63, 1  ;;  %v3354_v0 = vsel %vm16924_vm7, %v3305_v2, %v10874_v48  ;;  %v11170_v51 = vpop.permute.xlu2 %3079 }
 0x167   : > { %v511_v23 = vshll.u32 %v11136_v1, 16  ;;  %vm513_vm8 = vc.u32 %v505_v12, %v509_v21  ;;  %v515_v57 = vadd.s32 %v509_v21, %v505_v12  ;;  %v465_v36 = vshrl.u32 %v464_v50, 4 }
 0x168   : > { %2591 = vrot.lane.b32.xlu0 %v10527_v59, %s9786_s20  ;;  %v3062_v35 = vpop.permute.xlu1 %3061  ;;  %vm17200_vm14 = vcmask 261120   ;;  %v2791_v47 = vsel %vm16949_vm1, %v2786_v28, %v11144_v5  ;;  %v508_v56 = vmul.u32 43690, %v503_v31  ;;  %vm17201_vm10 = vcmask 326656  }
 0x169   : > { %v3403_v43 = vsel %vm17200_vm14, %v3354_v0, %v2906_v8  ;;  %v534_v26 = vmul.u32 43691, %v531_v15  ;;  %v11173_v10 = vmul.u32 43691, %v532_v61  ;;  %v538_v12 = vshll.u32 %v11150_v49, 16 }
 0x16a   : > { %v3004_v59 = vpop.permute.xlu0 %3003  ;;  %v11178_v21 = vmul.f32 %v10980_v46, %v10988_v33  ;;  %v11182_v8 = vsel %vm16949_vm1, %v2455_v16, %v11155_v58  ;;  %v514_v50 = vsel %vm513_vm8, 1, %v17145_v55  ;;  %v17203_v31 = vrot.slane %v10786_v41, 1 }
 0x16b   : > { %v3452_v48 = vsel %vm17201_vm10, %v3403_v43, %v3004_v59  ;;  %17202 = vst [vmem:[#allocation22_spill] sm:$0xff] %v11182_v8  ;;  %v1822_v15 = vsel %vm1728_vm15, %v1775_v45, %v11058_v24  ;;  %v483_v28 = vshrl.u32 %v11027_v4, 16  ;;  %v492_v0 = vadd.s32 %v491_v62, %v481_v13  ;;  %v11264_v4 = vld [vmem:[%s9828_s17 + $0xac] sm:$0xff]  }
 0x16c   : > { %v11189_v2 = vsel %vm17063_vm0, %v17203_v31, %v11158_v40  ;;  %vm517_vm3 = vc.u32 %v515_v57, %v511_v23  ;;  %vm1868_vm12 = vcmp.ge.s32.totalorder %v11091_v39, 1  ;;  %v438_v16 = vsub.s32 %v10833_v18, %v437_v22  ;;  %v11209_v18 = vpop.f32.mrf.mxu0 }
 0x16d   : > { %17204 = vst [vmem:[#allocation23_spill] sm:$0xff] %v11189_v2  ;;  %v466_v59 = vmul.u32 24, %v465_v36  ;;  %vm17205_vm9 = vcmask 392192   ;;  %v516_v31 = vadd.s32 %v514_v50, %v508_v56  ;;  %v540_v24 = vshll.u32 %v11173_v10, 16  ;;  %3227 = vrot.lane.b32.xlu2 %v11189_v2, %s9787_s21  ;;  %v9698_v2 = vld [vmem:[%s9828_s17 + $0x40] sm:$0xff]  }
 0x16e   : > { %2911 = vrot.lane.b32.xlu1 %v2791_v47, %s9790_s24  ;;  %v3501_v43 = vsel %vm17205_vm9, %v3452_v48, %v3062_v35  ;;  %vm11202_vm11 = vc.u32 %v534_v26, %v538_v12  ;;  %v544_v45 = vadd.s32 %v538_v12, %v534_v26  ;;  %vm1915_vm13 = vcmp.le.s32.totalorder %v11091_v39, 16  ;;  %17208 = vst [vmem:[#allocation24_spill] sm:$0xff] %v11209_v18  ;;  %v11219_v56 = vpop.permute.xlu2 %2907 }
 0x16f   : > { %vm1869_vm8 = vcmp.ge.s32.totalorder %v1822_v15, 1  ;;  %v518_v22 = vsel %vm517_vm3, 1, %v17145_v55  ;;  %v16925_v13 = vrot.slane %v11095_v52, 1  ;;  %vm1916_vm15 = vcmp.le.s32.totalorder %v1822_v15, 16  ;;  %vm11225_vm3 = vmand %vm1868_vm12, %vm1915_vm13 }
 0x170   : > { %3166 = vrot.lane.b32.xlu0 %v11182_v8, %s9791_s25  ;;  %v11199_v41 = vpop.permute.xlu1 %2504  ;;  %v493_v35 = vadd.s32 %v492_v0, %v483_v28  ;;  %vm17209_vm14 = vcmask 457728   ;;  %v537_v57 = vmul.u32 43690, %v532_v61  ;;  %vm1635_vm10 = vcmp.ne.s32.totalorder %v438_v16, 0 }
 0x171   : > { %v3550_v23 = vsel %vm17209_vm14, %v3501_v43, %v10983_v25  ;;  %vm1682_vm9 = vcmp.lt.s32.totalorder %v438_v16, 0  ;;  %vm17210_vm7 = vcmask 523264   ;;  %v543_v47 = vsel %vm11202_vm11, 1, %v17145_v55  ;;  %vm11236_vm11 = vmand %vm1869_vm8, %vm1916_vm15 }
 0x172   : > { %v3206_v62 = vpop.permute.xlu0 %3205  ;;  %v467_v25 = vsub.s32 %v10894_v14, %v466_v59  ;;  %v510_v61 = vshrl.u32 %v11116_v11, 16  ;;  %v520_v26 = vadd.s32 %v518_v22, %v516_v31  ;;  %vm546_vm14 = vc.u32 %v544_v45, %v540_v24  ;;  %vm11249_vm12 = vmand %vm1682_vm9, %vm1635_vm10  ;;  %v9696_v59 = vld [vmem:[%s9828_s17 + $0x68] sm:$0xff]  }
 0x173   : > { %v3599_v36 = vsel %vm17210_vm7, %v3550_v23, %v3206_v62  ;;  %vm17213_vm7 = vcmask 588800   ;;  %v3850_v12 = vmul.f32 %v11040_v42, %v11082_v9  ;;  %v1776_v50 = vadd.s32 24, %v438_v16 }
 0x174   : > { %8603 = vmatmul.msk.bf16.gmra.mxu0 %vm17213_vm7, %v3599_v36  ;;  %v17216_v14 = vrot.slane %v10812_v17, 1  ;;  %v3948_v28 = vmul.f32 %v11178_v21, %v10988_v33  ;;  %v494_v15 = vshrl.u32 %v493_v35, 4  ;;  %v545_v43 = vadd.s32 %v543_v47, %v537_v57  ;;  %v11279_v36 = vpop.f32.mrf.mxu0 }
 0x175   : > { %v3851_v31 = vmul.f32 %v11087_v6, %v11139_v37  ;;  %v11260_v17 = vsel %vm11225_vm3, 1.0, %v17180_v3  ;;  %v547_v24 = vsel %vm546_vm14, 1, %v17145_v55  ;;  %v183_v45 = vadd.s32 80, %v10547_v20  ;;  %3150 = vrot.lane.b32.xlu2 %v10070_v38, %s9791_s25  ;;  %17221 = vst [vmem:[#allocation27_spill] sm:$0xff] %v11279_v36 }
 0x176   : > { %v2964_v11 = vsel %vm17063_vm0, %v17216_v14, %v16925_v13  ;;  %3067 = vrot.lane.b32.xlu1 %v9696_v59, %s9784_s18  ;;  %17219 = vst [vmem:[#allocation25_spill] sm:$0xff] %v11260_v17  ;;  %vm1636_vm13 = vcmp.ne.s32.totalorder %v467_v25, 0  ;;  %vm1683_vm8 = vcmp.lt.s32.totalorder %v467_v25, 0  ;;  %v512_v22 = vshrl.u32 %v11136_v1, 16  ;;  %v11292_v0 = vpop.permute.xlu2 %3063 }
 0x177   : > { %v521_v35 = vadd.s32 %v520_v26, %v510_v61  ;;  %v3949_v23 = vmul.f32 %v3850_v12, %v11082_v9  ;;  %v11277_v57 = vsel %vm11236_vm11, 1.0, %v17180_v3  ;;  %v1823_v1 = vsel %vm11249_vm12, %v1776_v50, %v438_v16  ;;  %vm1730_vm15 = vmand %vm1683_vm8, %vm1636_vm13 }
 0x178   : > { %3009 = vrot.lane.b32.xlu0 %v2964_v11, %s9789_s23  ;;  %v11269_v62 = vpop.permute.xlu1 %2923  ;;  %17220 = vst [vmem:[#allocation26_spill] sm:$0xff] %v11277_v57  ;;  %v199_v47 = vadd.s32 208, %v10547_v20  ;;  %v1777_v48 = vadd.s32 24, %v467_v25  ;;  %v495_v61 = vmul.u32 24, %v494_v15  ;;  %v539_v26 = vshrl.u32 %v11150_v49, 16 }
 0x179   : > { %v549_v14 = vadd.s32 %v547_v24, %v545_v43  ;;  %v3896_v11 = vadd.f32 %v3850_v12, %v11178_v21  ;;  %v2856_v39 = vshrl.u32 %v10975_v27, 16  ;;  %v2860_v59 = vshll.u32 %v11264_v4, 16 }
 0x17a   : > { %v11285_v38 = vpop.permute.xlu0 %2681  ;;  %v11294_v16 = vadd.s32 1, %v183_v45  ;;  %v3950_v50 = vmul.f32 %v3851_v31, %v11139_v37  ;;  %v3852_v49 = vmul.f32 %v11260_v17, %v11209_v18  ;;  %v3853_v15 = vmul.f32 %v11277_v57, %v11279_v36 }
 0x17b   : > { %v522_v21 = vadd.s32 %v521_v35, %v512_v22  ;;  %v3897_v12 = vadd.f32 %v3896_v11, %v3851_v31  ;;  %v3995_v43 = vadd.f32 %v3949_v23, %v3948_v28  ;;  %vm1870_vm10 = vcmp.ge.s32.totalorder %v1823_v1, 1 }
 0x17c   : > { %v11301_v24 = vadd.s32 1, %v199_v47  ;;  %v1824_v13 = vsel %vm1730_vm15, %v1777_v48, %v467_v25  ;;  %v496_v6 = vsub.s32 %v10955_v19, %v495_v61  ;;  %v541_v45 = vshrl.u32 %v11173_v10, 16 }
 0x17d   : > { %v550_v42 = vadd.s32 %v549_v14, %v539_v26  ;;  %vm1917_vm9 = vcmp.le.s32.totalorder %v1823_v1, 16  ;;  %v2858_v17 = vor.u32 %v2856_v39, %v11023_v54  ;;  %v11308_v46 = vrot.slane %v2860_v59, 1  ;;  %2609 = vrot.lane.b32.xlu2 %v10673_v7, %s9786_s20 }
 0x17e   : > { %2510 = vrot.lane.b32.xlu1 %v10619_v34, %s9788_s22  ;;  %v560_v31 = vand.u32 65535, %v11294_v16  ;;  %v3996_v28 = vadd.f32 %v3995_v43, %v3950_v50  ;;  %v3951_v22 = vmul.f32 %v3852_v49, %v11209_v18  ;;  %v3952_v25 = vmul.f32 %v3853_v15, %v11279_v36  ;;  %vm11323_vm14 = vmand %vm1870_vm10, %vm1917_vm9  ;;  %v11330_v61 = vpop.permute.xlu2 %2506 }
 0x17f   : > { %v523_v35 = vshrl.u32 %v522_v21, 4  ;;  %vm1871_vm3 = vcmp.ge.s32.totalorder %v1824_v13, 1  ;;  %vm1918_vm7 = vcmp.le.s32.totalorder %v1824_v13, 16  ;;  %v1024_v34 = vand.u32 65535, %v11301_v24  ;;  %v9697_v21 = vld [vmem:[%s9828_s17 + $0x80] sm:$0xff]  }
 0x180   : > { %3211 = vrot.lane.b32.xlu0 %v10088_v44, %s9787_s21  ;;  %v11315_v19 = vpop.permute.xlu1 %2587  ;;  %v200_v54 = vadd.s32 216, %v10547_v20  ;;  %vm1637_vm11 = vcmp.ne.s32.totalorder %v496_v6, 0  ;;  %vm1684_vm12 = vcmp.lt.s32.totalorder %v496_v6, 0  ;;  %v551_v44 = vadd.s32 %v550_v42, %v541_v45  ;;  %vm1965_vm13 = vmand %vm1871_vm3, %vm1918_vm7 }
 0x181   : > { %v1025_v47 = vshrl.u32 %v11301_v24, 16  ;;  %v3898_v48 = vadd.f32 %v3897_v12, %v3852_v49  ;;  %v2863_v7 = vsel %vm16949_vm1, %v2858_v17, %v11308_v46  ;;  %v561_v26 = vshrl.u32 %v11294_v16, 16  ;;  %v11344_v17 = vpop.f32.mrf.mxu0  ;;  %vm1731_vm8 = vmand %vm1684_vm12, %vm1637_vm11 }
 0x182   : > { %v3022_v23 = vpop.permute.xlu0 %3021  ;;  %v11333_v1 = vmul.u32 43690, %v560_v31  ;;  %v3997_v14 = vadd.f32 %v3996_v28, %v3951_v22  ;;  %v1778_v11 = vadd.s32 24, %v496_v6  ;;  %v524_v42 = vmul.u32 24, %v523_v35  ;;  %17225 = vst [vmem:[#allocation29_spill] sm:$0xff] %v11344_v17 }
 0x183   : > { %v11337_v39 = vadd.f32 %v3898_v48, %v3853_v15  ;;  %v11342_v59 = vsel %vm11323_vm14, 1.0, %v17180_v3  ;;  %v11348_v50 = vmul.u32 43690, %v1024_v34  ;;  %v11350_v49 = vadd.s32 1, %v200_v54 }
 0x184   : > { %17224 = vst [vmem:[#allocation28_spill] sm:$0xff] %v11342_v59  ;;  %v11352_v13 = vadd.f32 %v3997_v14, %v3952_v25  ;;  %v3273_v15 = vsel %vm3239_vm5, %v9697_v21, %v11199_v41  ;;  %v552_v12 = vshrl.u32 %v551_v44, 4  ;;  %v11358_v43 = vmul.u32 43691, %v1025_v47 }
 0x185   : > { %17226 = vst [vmem:[#allocation30_spill] sm:$0xff] %v11350_v49  ;;  %v11361_v45 = vsel %vm1965_vm13, 1.0, %v17180_v3  ;;  %v563_v28 = vmul.u32 43691, %v560_v31  ;;  %v11363_v22 = vmul.u32 43691, %v561_v26  ;;  %v567_v35 = vshll.u32 %v11333_v1, 16  ;;  %v11379_v31 = vld [vmem:[%s9828_s17 + $0xb8] sm:$0xff]   ;;  %2494 = vrot.lane.b32.xlu2 %v10722_v32, %s9788_s22 }
 0x186   : > { %2929 = vrot.lane.b32.xlu1 %v2863_v7, %s9790_s24  ;;  %17227 = vst [vmem:[#allocation31_spill] sm:$0xff] %v11361_v45  ;;  %v11368_v25 = vmul.f32 %v11342_v59, %v11344_v17  ;;  %v11370_v54 = vsel %vm1731_vm8, %v1778_v11, %v496_v6  ;;  %v11373_v41 = vsub.s32 %v11035_v29, %v524_v42  ;;  %v1027_v6 = vmul.u32 43691, %v1024_v34 }
 0x187   : > { %v3323_v48 = vsel %vm3289_vm6, %v3273_v15, %v11049_v60  ;;  %v1031_v7 = vshll.u32 %v11348_v50, 16  ;;  %v1053_v29 = vand.u32 65535, %v11350_v49  ;;  %v553_v14 = vmul.u32 24, %v552_v12  ;;  %v11398_v15 = vld [vmem:[%s9828_s17 + $0x6c] sm:$0xff]   ;;  %v11400_v12 = vpop.permute.xlu2 %2925 }
 0x188   : > { %2687 = vrot.lane.b32.xlu0 %v10975_v27, %s9785_s19  ;;  %v3163_v10 = vpop.permute.xlu1 %3162  ;;  %vm17228_vm15 = vcmask 195584   ;;  %v1030_v21 = vmul.u32 43690, %v1025_v47  ;;  %v1033_v44 = vshll.u32 %v11358_v43, 16  ;;  %v2461_v59 = vshrl.u32 %v11113_v63, 16 }
 0x189   : > { %v3372_v11 = vsel %vm17228_vm15, %v3323_v48, %v11285_v38  ;;  %v3099_v32 = vshll.u32 %v11379_v31, 16  ;;  %v569_v60 = vshll.u32 %v11363_v22, 16  ;;  %vm11393_vm10 = vc.u32 %v563_v28, %v567_v35  ;;  %vm17244_vm8 = vmmov %vm17228_vm15 }
 0x18a   : > { %v2666_v42 = vpop.permute.xlu0 %2665  ;;  %v17231_v38 = vrot.slane %v11264_v4, 1  ;;  %v17232_v47 = vrot.slane %v10975_v27, 1  ;;  %v573_v57 = vadd.s32 %v567_v35, %v563_v28  ;;  %v1054_v36 = vshrl.u32 %v11350_v49, 16  ;;  %v17235_v28 = vld [vmem:[#allocation11_spill] sm:$0xff] }
 0x18b   : > { %v184_v18 = vadd.s32 88, %v10547_v20  ;;  %vm17233_vm9 = vcmask 261120   ;;  %v11411_v9 = vmul.u32 43690, %v1053_v29  ;;  %v2792_v33 = vshrl.u32 %v11095_v52, 16 }
 0x18c   : > { %v2982_v48 = vsel %vm17063_vm0, %v17232_v47, %v17231_v38  ;;  %v3421_v37 = vsel %vm17233_vm9, %v3372_v11, %v11269_v62  ;;  %v2796_v8 = vshll.u32 %v11398_v15, 16  ;;  %v3257_v27 = vsel %vm3239_vm5, %v9698_v2, %v11121_v30 }
 0x18d   : > { %vm17234_vm3 = vcmask 326656   ;;  %vm11421_vm7 = vc.u32 %v1027_v6, %v1031_v7  ;;  %v1037_v62 = vadd.s32 %v1031_v7, %v1027_v6  ;;  %v11426_v11 = vor.u32 %v2461_v59, %v11155_v58  ;;  %3085 = vrot.lane.b32.xlu2 %v11113_v63, %s9784_s18 }
 0x18e   : > { %v3470_v38 = vsel %vm17234_vm3, %v3421_v37, %v3022_v23  ;;  %2593 = vrot.lane.b32.xlu1 %v17235_v28, %s9786_s20  ;;  %v11428_v47 = vrot.slane %v3099_v32, 1  ;;  %v566_v49 = vmul.u32 43690, %v561_v26  ;;  %v572_v30 = vsel %vm11393_vm10, 1, %v17145_v55 }
 0x18f   : > { %vm11434_vm14 = vc.u32 %v573_v57, %v569_v60  ;;  %v1056_v23 = vmul.u32 43691, %v1053_v29  ;;  %v11438_v28 = vmul.u32 43691, %v1054_v36  ;;  %v11440_v6 = vadd.s32 1, %v184_v18 }
 0x190   : > { %3027 = vrot.lane.b32.xlu0 %v2982_v48, %s9789_s23  ;;  %v3006_v37 = vpop.permute.xlu1 %3005  ;;  %vm17240_vm11 = vcmask 392192   ;;  %v1060_v26 = vshll.u32 %v11411_v9, 16  ;;  %v2794_v59 = vor.u32 %v2792_v33, %v11144_v5  ;;  %v11448_v7 = vrot.slane %v2796_v8, 1 }
 0x191   : > { %v3519_v58 = vsel %vm17240_vm11, %v3470_v38, %v11170_v51  ;;  %v3307_v57 = vsel %vm3289_vm6, %v3257_v27, %v11315_v19  ;;  %vm17241_vm12 = vcmask 457728   ;;  %v1036_v18 = vsel %vm11421_vm7, 1, %v17145_v55  ;;  %v11465_v19 = vpop.permute.xlu2 %2589 }
 0x192   : > { %v3568_v29 = vsel %vm17241_vm12, %v3519_v58, %v3163_v10  ;;  %v3224_v32 = vpop.permute.xlu0 %3223  ;;  %vm11456_vm13 = vc.u32 %v1037_v62, %v1033_v44  ;;  %v3356_v51 = vsel %vm17244_vm8, %v3307_v57, %v2666_v42  ;;  %vm17245_vm15 = vcmask 523264  }
 0x193   : > { %v3617_v5 = vsel %vm17245_vm15, %v3568_v29, %v3224_v32  ;;  %v3102_v33 = vsel %vm16949_vm1, %v11426_v11, %v11428_v47  ;;  %v574_v8 = vadd.s32 %v572_v30, %v566_v49  ;;  %vm1638_vm10 = vcmp.ne.s32.totalorder %v11373_v41, 0 }
 0x194   : > { %vm1685_vm9 = vcmp.lt.s32.totalorder %v11373_v41, 0  ;;  %v11470_v10 = vsub.s32 %v11101_v53, %v553_v14  ;;  %vm17246_vm3 = vcmask 588800   ;;  %v576_v44 = vsel %vm11434_vm14, 1, %v17145_v55 }
 0x195   : > { %8612 = vmatmul.msk.bf16.gmra.mxu3 %vm17246_vm3, %v3617_v5  ;;  %v1062_v42 = vshll.u32 %v11438_v28, 16  ;;  %v1066_v34 = vadd.s32 %v1060_v26, %v1056_v23  ;;  %v589_v49 = vand.u32 65535, %v11440_v6  ;;  %v2799_v48 = vsel %vm16949_vm1, %v2794_v59, %v11448_v7  ;;  %v11503_v59 = vpop.f32.mrf.mxu0 }
 0x196   : > { %vm17247_vm7 = vcmask 261120   ;;  %3168 = vrot.lane.b32.xlu1 %v3102_v33, %s9791_s25  ;;  %v1038_v53 = vadd.s32 %v1036_v18, %v1030_v21  ;;  %v1040_v14 = vsel %vm11456_vm13, 1, %v17145_v55  ;;  %vm1064_vm11 = vc.u32 %v1056_v23, %v1060_v26  ;;  %2913 = vrot.lane.b32.xlu2 %v2799_v48, %s9790_s24  ;;  %17251 = vst [vmem:[#allocation11_spill] sm:$0xff] %v11503_v59 }
 0x197   : > { %v3405_v27 = vsel %vm17247_vm7, %v3356_v51, %v11219_v56  ;;  %vm17248_vm14 = vcmask 326656   ;;  %v568_v35 = vshrl.u32 %v11333_v1, 16  ;;  %v578_v62 = vadd.s32 %v576_v44, %v574_v8  ;;  %vm11522_vm7 = vmand %vm1685_vm9, %vm1638_vm10 }
 0x198   : > { %v3454_v38 = vsel %vm17248_vm14, %v3405_v27, %v3006_v37  ;;  %v16946_v30 = vrot.slane %v11398_v15, 1  ;;  %v1779_v2 = vadd.s32 24, %v11373_v41  ;;  %vm1639_vm12 = vcmp.ne.s32.totalorder %v11470_v10, 0  ;;  %2671 = vrot.lane.b32.xlu0 %v11095_v52, %s9785_s19  ;;  %v3208_v56 = vpop.permute.xlu1 %3207 }
 0x199   : > { %v1059_v21 = vmul.u32 43690, %v1054_v36  ;;  %v590_v58 = vshrl.u32 %v11440_v6, 16  ;;  %v1065_v37 = vsel %vm1064_vm11, 1, %v17145_v55  ;;  %vm11496_vm13 = vc.u32 %v1066_v34, %v1062_v42  ;;  %v11516_v8 = vpop.permute.xlu2 %3164 }
 0x19a   : > { %v16947_v23 = vrot.slane %v11379_v31, 1  ;;  %v11501_v26 = vmul.u32 43690, %v589_v49  ;;  %vm1686_vm8 = vcmp.lt.s32.totalorder %v11470_v10, 0  ;;  %vm17252_vm15 = vcmask 392192   ;;  %v3147_v32 = vpop.permute.xlu0 %3146 }
 0x19b   : > { %v3503_v36 = vsel %vm17252_vm15, %v3454_v38, %v11292_v0  ;;  %v1032_v57 = vshrl.u32 %v11348_v50, 16  ;;  %v1042_v29 = vadd.s32 %v1040_v14, %v1038_v53  ;;  %v570_v18 = vshrl.u32 %v11363_v22, 16 }
 0x19c   : > { %v579_v60 = vadd.s32 %v578_v62, %v568_v35  ;;  %vm17253_vm3 = vcmask 457728   ;;  %v17254_v5 = vrot.slane %v11095_v52, 1  ;;  %vm17257_vm11 = vcmask 523264  }
 0x19d   : > { %v3552_v51 = vsel %vm17253_vm3, %v3503_v36, %v3147_v32  ;;  %v1067_v22 = vadd.s32 %v1065_v37, %v1059_v21  ;;  %v1069_v44 = vsel %vm11496_vm13, 1, %v17145_v55  ;;  %v592_v52 = vmul.u32 43691, %v589_v49  ;;  %vm11557_vm13 = vmand %vm1686_vm8, %vm1639_vm12  ;;  %v11588_v0 = vpop.f32.mrf.mxu0 }
 0x19e   : > { %v2966_v33 = vsel %vm17063_vm0, %v17254_v5, %v16946_v30  ;;  %v3601_v50 = vsel %vm17257_vm11, %v3552_v51, %v3208_v56  ;;  %vm17258_vm14 = vcmask 588800   ;;  %v3184_v42 = vsel %vm17063_vm0, %v11158_v40, %v16947_v23  ;;  %17263 = vst [vmem:[#allocation32_spill] sm:$0xff] %v11588_v0 }
 0x19f   : > { %8604 = vmatmul.msk.bf16.gmra.mxu0 %vm17258_vm14, %v3601_v50  ;;  %v11535_v34 = vmul.u32 43691, %v590_v58  ;;  %v596_v48 = vshll.u32 %v11501_v26, 16  ;;  %v201_v27 = vadd.s32 224, %v10547_v20  ;;  %v3953_v53 = vmul.f32 %v11368_v25, %v11344_v17  ;;  %3011 = vrot.lane.b32.xlu1 %v2966_v33, %s9789_s23 }
 0x1a0   : > { %v3855_v49 = vmul.f32 %v11361_v45, %v11503_v59  ;;  %v1034_v14 = vshrl.u32 %v11358_v43, 16  ;;  %v1043_v38 = vadd.s32 %v1042_v29, %v1032_v57  ;;  %v3900_v35 = vadd.f32 %v11337_v39, %v11368_v25  ;;  %3229 = vrot.lane.b32.xlu0 %v3184_v42, %s9787_s21  ;;  %v11563_v37 = vpop.permute.xlu1 %2683 }
 0x1a1   : > { %vm1872_vm10 = vcmp.ge.s32.totalorder %v11370_v54, 1  ;;  %v1826_v62 = vsel %vm11522_vm7, %v1779_v2, %v11373_v41  ;;  %v1780_v56 = vadd.s32 24, %v11470_v10  ;;  %vm1919_vm9 = vcmp.le.s32.totalorder %v11370_v54, 16  ;;  %v9699_v41 = vld [vmem:[%s9828_s17 + $0x70] sm:$0xff]   ;;  %v11586_v33 = vpop.permute.xlu2 %3007 }
 0x1a2   : > { %v580_v21 = vadd.s32 %v579_v60, %v570_v18  ;;  %v1061_v39 = vshrl.u32 %v11411_v9, 16  ;;  %v1071_v25 = vadd.s32 %v1069_v44, %v1067_v22  ;;  %3069 = vrot.lane.b32.xlu2 %v9699_v41, %s9784_s18  ;;  %v598_v2 = vshll.u32 %v11535_v34, 16  ;;  %v2606_v32 = vpop.permute.xlu0 %2605  ;;  %vm1966_vm3 = vmand %vm1872_vm10, %vm1919_vm9 }
 0x1a3   : > { %vm11568_vm15 = vc.u32 %v592_v52, %v596_v48  ;;  %v602_v36 = vadd.s32 %v596_v48, %v592_v52  ;;  %v11572_v57 = vadd.s32 1, %v201_v27  ;;  %v3954_v29 = vmul.f32 %v3855_v49, %v11503_v59  ;;  %v17265_v48 = vld [vmem:[#allocation7_spill] sm:$0xff] }
 0x1a4   : > { %vm1873_vm12 = vcmp.ge.s32.totalorder %v1826_v62, 1  ;;  %vm1920_vm8 = vcmp.le.s32.totalorder %v1826_v62, 16  ;;  %v1044_v9 = vadd.s32 %v1043_v38, %v1034_v14  ;;  %v1827_v18 = vsel %vm11557_vm13, %v1780_v56, %v11470_v10  ;;  %v17268_v56 = vld [vmem:[#allocation6_spill] sm:$0xff]  ;;  %v17269_v62 = vld [vmem:[#allocation12_spill] sm:$0xff] }
 0x1a5   : > { %v11583_v60 = vunpack.c.l.b16 %v11379_v31  ;;  %v595_v51 = vmul.u32 43690, %v590_v58  ;;  %v9198_v5 = vunpack.c.h.b16 %v11113_v63  ;;  %v581_v50 = vshrl.u32 %v580_v21, 4  ;;  %vm11606_vm11 = vmand %vm1873_vm12, %vm1920_vm8 }
 0x1a6   : > { %v1063_v22 = vshrl.u32 %v11438_v28, 16  ;;  %v1072_v44 = vadd.s32 %v1071_v25, %v1061_v39  ;;  %v601_v54 = vsel %vm11568_vm15, 1, %v17145_v55  ;;  %v3999_v10 = vadd.f32 %v11352_v13, %v3953_v53 }
 0x1a7   : > { %vm604_vm7 = vc.u32 %v602_v36, %v598_v2  ;;  %v1082_v52 = vand.u32 65535, %v11572_v57  ;;  %v3901_v58 = vadd.f32 %v3900_v35, %v3855_v49  ;;  %v11597_v63 = vsel %vm1966_vm3, 1.0, %v17180_v3  ;;  %3213 = vrot.lane.b32.xlu1 %v17265_v48, %s9787_s21 }
 0x1a8   : > { %17264 = vst [vmem:[#allocation33_spill] sm:$0xff] %v11597_v63  ;;  %v1045_v42 = vshrl.u32 %v1044_v9, 4  ;;  %v185_v28 = vadd.s32 96, %v10547_v20  ;;  %v11602_v27 = vadd.f32 %v3999_v10, %v3954_v29  ;;  %vm1874_vm14 = vcmp.ge.s32.totalorder %v1827_v18, 1  ;;  %3152 = vrot.lane.b32.xlu0 %v17268_v56, %s9791_s25  ;;  %v3024_v43 = vpop.permute.xlu1 %3023  ;;  %v11646_v10 = vpop.f32.mrf.mxu0 }
 0x1a9   : > { %v603_v13 = vadd.s32 %v601_v54, %v595_v51  ;;  %v11611_v53 = vpack.c.b16 %v11583_v60, %v9198_v5  ;;  %vm1921_vm10 = vcmp.le.s32.totalorder %v1827_v18, 16  ;;  %v582_v49 = vmul.u32 24, %v581_v50  ;;  %17273 = vst [vmem:[#allocation6_spill] sm:$0xff] %v11646_v10 }
 0x1aa   : > { %v1073_v38 = vadd.s32 %v1072_v44, %v1063_v22  ;;  %v605_v35 = vsel %vm604_vm7, 1, %v17145_v55  ;;  %2512 = vrot.lane.b32.xlu2 %v17269_v62, %s9788_s22  ;;  %v1083_v21 = vshrl.u32 %v11572_v57, 16  ;;  %v11619_v39 = vmul.u32 43690, %v1082_v52  ;;  %v11630_v29 = vpop.permute.xlu0 %2490  ;;  %vm11636_vm9 = vmand %vm1874_vm14, %vm1921_vm10  ;;  %v11641_v22 = vpop.permute.xlu2 %3209 }
 0x1ab   : > { %v2864_v25 = vshrl.u32 %v11264_v4, 16  ;;  %v2868_v41 = vshll.u32 %v11611_v53, 16  ;;  %v3856_v2 = vmul.f32 %v11597_v63, %v11588_v0  ;;  %v11628_v1 = vsel %vm11606_vm11, 1.0, %v17180_v3 }
 0x1ac   : > { %17270 = vst [vmem:[#allocation7_spill] sm:$0xff] %v11628_v1  ;;  %v1046_v36 = vmul.u32 24, %v1045_v42  ;;  %v11632_v9 = vadd.s32 1, %v185_v28  ;;  %v597_v5 = vshrl.u32 %v11501_v26, 16  ;;  %v607_v50 = vadd.s32 %v605_v35, %v603_v13  ;;  %v9700_v42 = vld [vmem:[%s9828_s17 + $0x88] sm:$0xff]  }
 0x1ad   : > { %v2866_v44 = vor.u32 %v2864_v25, %v11308_v46  ;;  %v11644_v54 = vrot.slane %v2868_v41, 1  ;;  %v3275_v48 = vsel %vm3239_vm5, %v9700_v42, %v11330_v61  ;;  %v583_v18 = vsub.s32 %v11294_v16, %v582_v49 }
 0x1ae   : > { %v1074_v28 = vshrl.u32 %v1073_v38, 4  ;;  %v1085_v14 = vmul.u32 43691, %v1082_v52  ;;  %v3325_v56 = vsel %vm3289_vm6, %v3275_v48, %v2606_v32  ;;  %v11653_v26 = vmul.u32 43691, %v1083_v21 }
 0x1af   : > { %v1089_v13 = vshll.u32 %v11619_v39, 16  ;;  %v2871_v46 = vsel %vm16949_vm1, %v2866_v44, %v11644_v54  ;;  %v11659_v35 = vmul.f32 %v3856_v2, %v11588_v0  ;;  %v11661_v62 = vadd.f32 %v3901_v58, %v3856_v2  ;;  %2689 = vrot.lane.b32.xlu1 %v11264_v4, %s9785_s19  ;;  %v17276_v2 = vld [vmem:[#allocation13_spill] sm:$0xff] }
 0x1b0   : > { %v11666_v16 = vsel %vm11636_vm9, 1.0, %v17180_v3  ;;  %v618_v61 = vand.u32 65535, %v11632_v9  ;;  %v11673_v32 = vmul.f32 %v11628_v1, %v11646_v10  ;;  %v599_v52 = vshrl.u32 %v11535_v34, 16  ;;  %2611 = vrot.lane.b32.xlu0 %v17276_v2, %s9786_s20  ;;  %v11684_v51 = vpop.permute.xlu1 %2667 }
 0x1b1   : > { %17274 = vst [vmem:[#allocation12_spill] sm:$0xff] %v11666_v16  ;;  %v608_v49 = vadd.s32 %v607_v50, %v597_v5  ;;  %v16948_v58 = vrot.slane %v11611_v53, 1  ;;  %v11678_v38 = vsub.s32 %v11301_v24, %v1046_v36  ;;  %v1075_v25 = vmul.u32 24, %v1074_v28 }
 0x1b2   : > { %vm17275_vm13 = vcmask 195584   ;;  %v202_v44 = vadd.s32 232, %v10547_v20  ;;  %2931 = vrot.lane.b32.xlu2 %v2871_v46, %s9790_s24  ;;  %vm1640_vm15 = vcmp.ne.s32.totalorder %v583_v18, 0  ;;  %v1091_v34 = vshll.u32 %v11653_v26, 16  ;;  %v3082_v5 = vpop.permute.xlu0 %3081  ;;  %v11699_v2 = vpop.permute.xlu2 %2685 }
 0x1b3   : > { %v3374_v41 = vsel %vm17275_vm13, %v3325_v56, %v11563_v37  ;;  %vm1093_vm12 = vc.u32 %v1085_v14, %v1089_v13  ;;  %v1095_v24 = vadd.s32 %v1089_v13, %v1085_v14  ;;  %vm1687_vm8 = vcmp.lt.s32.totalorder %v583_v18, 0  ;;  %v17279_v14 = vld [vmem:[#allocation30_spill] sm:$0xff] }
 0x1b4   : > { %v1781_v36 = vadd.s32 24, %v583_v18  ;;  %v619_v37 = vshrl.u32 %v11632_v9, 16  ;;  %v11690_v50 = vmul.u32 43690, %v618_v61  ;;  %v609_v42 = vadd.s32 %v608_v49, %v599_v52  ;;  %v11709_v49 = vld [vmem:[%s9828_s17 + $0xc0] sm:$0xff]   ;;  %vm1734_vm11 = vmand %vm1687_vm8, %vm1640_vm15 }
 0x1b5   : > { %vm17277_vm3 = vcmask 261120   ;;  %v17278_v28 = vrot.slane %v11264_v4, 1  ;;  %v1088_v46 = vmul.u32 43690, %v1083_v21  ;;  %v11702_v13 = vsub.s32 %v17279_v14, %v1075_v25  ;;  %v17286_v14 = vld [vmem:[#allocation15_spill] sm:$0xff] }
 0x1b6   : > { %v3423_v48 = vsel %vm17277_vm3, %v3374_v41, %v11400_v12  ;;  %vm17280_vm7 = vcmask 326656   ;;  %v1094_v23 = vsel %vm1093_vm12, 1, %v17145_v55  ;;  %v11706_v52 = vadd.s32 1, %v202_v44 }
 0x1b7   : > { %v2984_v56 = vsel %vm17063_vm0, %v17278_v28, %v16948_v58  ;;  %v3472_v30 = vsel %vm17280_vm7, %v3423_v48, %v3024_v43  ;;  %vm17281_vm14 = vcmask 392192   ;;  %vm11714_vm10 = vc.u32 %v1095_v24, %v1091_v34  ;;  %v17284_v48 = vld [vmem:[#allocation14_spill] sm:$0xff] }
 0x1b8   : > { %v3521_v4 = vsel %vm17281_vm14, %v3472_v30, %v3082_v5  ;;  %v3103_v21 = vshrl.u32 %v11379_v31, 16  ;;  %v3107_v25 = vshll.u32 %v11709_v49, 16  ;;  %vm1656_vm9 = vcmp.ne.s32.totalorder %v11678_v38, 0  ;;  %3029 = vrot.lane.b32.xlu1 %v2984_v56, %s9789_s23  ;;  %2496 = vrot.lane.b32.xlu0 %v17284_v48, %s9788_s22  ;;  %v3226_v28 = vpop.permute.xlu1 %3225 }
 0x1b9   : > { %v621_v43 = vmul.u32 43691, %v618_v61  ;;  %v11722_v41 = vmul.u32 43691, %v619_v37  ;;  %v625_v44 = vshll.u32 %v11690_v50, 16  ;;  %vm1703_vm13 = vcmp.lt.s32.totalorder %v11678_v38, 0 }
 0x1ba   : > { %v1797_v30 = vadd.s32 24, %v11678_v38  ;;  %v610_v34 = vshrl.u32 %v609_v42, 4  ;;  %v1096_v24 = vadd.s32 %v1094_v23, %v1088_v46  ;;  %v11727_v5 = vsel %vm1734_vm11, %v1781_v36, %v583_v18  ;;  %2595 = vrot.lane.b32.xlu2 %v17286_v14, %s9786_s20  ;;  %v9701_v46 = vld [vmem:[%s9828_s17 + $0x48] sm:$0xff]   ;;  %vm1750_vm14 = vmand %vm1703_vm13, %vm1656_vm9 }
 0x1bb   : > { %vm1657_vm15 = vcmp.ne.s32.totalorder %v11702_v13, 0  ;;  %vm17285_vm12 = vcmask 457728   ;;  %v1098_v56 = vsel %vm11714_vm10, 1, %v17145_v55  ;;  %vm17287_vm8 = vcmask 523264  }
 0x1bc   : > { %v3570_v61 = vsel %vm17285_vm12, %v3521_v4, %v11516_v8  ;;  %v1111_v18 = vand.u32 65535, %v11706_v52  ;;  %v3105_v36 = vor.u32 %v3103_v21, %v11428_v47  ;;  %v11742_v42 = vrot.slane %v3107_v25, 1  ;;  %v2910_v8 = vpop.permute.xlu0 %2909  ;;  %v11751_v47 = vpop.permute.xlu2 %3025 }
 0x1bd   : > { %v3619_v23 = vsel %vm17287_vm8, %v3570_v61, %v3226_v28  ;;  %v3259_v48 = vsel %vm3239_vm5, %v9701_v46, %v11630_v29  ;;  %vm17288_vm3 = vcmask 588800   ;;  %v627_v4 = vshll.u32 %v11722_v41, 16 }
 0x1be   : > { %8613 = vmatmul.msk.bf16.gmra.mxu3 %vm17288_vm3, %v3619_v23  ;;  %vm629_vm7 = vc.u32 %v621_v43, %v625_v44  ;;  %v631_v12 = vadd.s32 %v625_v44, %v621_v43  ;;  %vm1704_vm11 = vcmp.lt.s32.totalorder %v11702_v13, 0  ;;  %v611_v28 = vmul.u32 24, %v610_v34 }
 0x1bf   : > { %v1090_v61 = vshrl.u32 %v11619_v39, 16  ;;  %v1100_v14 = vadd.s32 %v1098_v56, %v1096_v24  ;;  %v1798_v21 = vadd.s32 24, %v11702_v13  ;;  %v1092_v25 = vshrl.u32 %v11653_v26, 16  ;;  %vm11768_vm10 = vmand %vm1704_vm11, %vm1657_vm15 }
 0x1c0   : > { %v624_v29 = vmul.u32 43690, %v619_v37  ;;  %v186_v46 = vadd.s32 104, %v10547_v20  ;;  %v3309_v43 = vsel %vm3289_vm6, %v3259_v48, %v11465_v19  ;;  %v630_v39 = vsel %vm629_vm7, 1, %v17145_v55  ;;  %2673 = vrot.lane.b32.xlu1 %v11398_v15, %s9785_s19  ;;  %3087 = vrot.lane.b32.xlu0 %v11379_v31, %s9784_s18  ;;  %v17302_v19 = vld [vmem:[#allocation4_spill] sm:$0xff] }
 0x1c1   : > { %v2800_v44 = vshrl.u32 %v11398_v15, 16  ;;  %v3110_v34 = vsel %vm16949_vm1, %v3105_v36, %v11742_v42  ;;  %vm17291_vm12 = vcmask 195584   ;;  %vm11776_vm9 = vc.u32 %v631_v12, %v627_v4  ;;  %v3149_v4 = vpop.permute.xlu1 %3148 }
 0x1c2   : > { %v3358_v37 = vsel %vm17291_vm12, %v3309_v43, %v11684_v51  ;;  %v1112_v24 = vshrl.u32 %v11706_v52, 16  ;;  %v11781_v56 = vmul.u32 43690, %v1111_v18  ;;  %v11784_v23 = vsub.s32 %v11440_v6, %v611_v28  ;;  %3170 = vrot.lane.b32.xlu2 %v3110_v34, %s9791_s25 }
 0x1c3   : > { %vm17294_vm13 = vcmask 261120   ;;  %v1101_v48 = vadd.s32 %v1100_v14, %v1090_v61  ;;  %v16950_v58 = vrot.slane %v11709_v49, 1  ;;  %v1844_v51 = vsel %vm1750_vm14, %v1797_v30, %v11678_v38 }
 0x1c4   : > { %v3407_v36 = vsel %vm17294_vm13, %v3358_v37, %v2910_v8  ;;  %vm1875_vm15 = vcmp.ge.s32.totalorder %v11727_v5, 1  ;;  %vm1922_vm8 = vcmp.le.s32.totalorder %v11727_v5, 16  ;;  %v11793_v12 = vadd.s32 1, %v186_v46  ;;  %v3066_v61 = vpop.permute.xlu0 %3065  ;;  %v17301_v37 = vld [vmem:[#allocation5_spill] sm:$0xff] }
 0x1c5   : > { %v1845_v6 = vsel %vm11768_vm10, %v1798_v21, %v11702_v13  ;;  %v632_v8 = vadd.s32 %v630_v39, %v624_v29  ;;  %v634_v38 = vsel %vm11776_vm9, 1, %v17145_v55  ;;  %v2802_v30 = vor.u32 %v2800_v44, %v11448_v7  ;;  %v11815_v29 = vpop.permute.xlu2 %2669 }
 0x1c6   : > { %vm17295_vm3 = vcmask 326656   ;;  %v1114_v14 = vmul.u32 43691, %v1111_v18  ;;  %v11805_v46 = vmul.u32 43691, %v1112_v24  ;;  %v1118_v43 = vshll.u32 %v11781_v56, 16 }
 0x1c7   : > { %v3456_v28 = vsel %vm17295_vm3, %v3407_v36, %v11586_v33  ;;  %vm1641_vm7 = vcmp.ne.s32.totalorder %v11784_v23, 0  ;;  %v1102_v34 = vadd.s32 %v1101_v48, %v1092_v25  ;;  %vm17296_vm11 = vcmask 392192   ;;  %v11817_v33 = vpop.f32.mrf.mxu0 }
 0x1c8   : > { %v3505_v13 = vsel %vm17296_vm11, %v3456_v28, %v3066_v61  ;;  %v17297_v21 = vrot.slane %v11379_v31, 1  ;;  %17298 = vst [vmem:[#allocation13_spill] sm:$0xff] %v11817_v33  ;;  %vm1688_vm14 = vcmp.lt.s32.totalorder %v11784_v23, 0  ;;  %v626_v18 = vshrl.u32 %v11690_v50, 16  ;;  %v11832_v61 = vpop.f32.mrf.mxu3 }
 0x1c9   : > { %vm17299_vm10 = vcmask 457728   ;;  %v647_v25 = vand.u32 65535, %v11793_v12  ;;  %v636_v44 = vadd.s32 %v634_v38, %v632_v8  ;;  %vm17300_vm12 = vcmask 523264   ;;  %17305 = vst [vmem:[#allocation30_spill] sm:$0xff] %v11832_v61  ;;  %v11859_v5 = vpop.permute.xlu1 %2607 }
 0x1ca   : > { %v3186_v7 = vsel %vm17063_vm0, %v17297_v21, %v16950_v58  ;;  %v3554_v39 = vsel %vm17299_vm10, %v3505_v13, %v3149_v4  ;;  %v2807_v31 = vsel %vm16949_vm1, %v2802_v30, %v17301_v37  ;;  %v17303_v36 = vrot.slane %v17302_v19, 1  ;;  %vm11845_vm10 = vmand %vm1875_vm15, %vm1922_vm8 }
 0x1cb   : > { %v3603_v26 = vsel %vm17300_vm12, %v3554_v39, %v11641_v22  ;;  %v17304_v48 = vrot.slane %v11398_v15, 1  ;;  %vm1891_vm9 = vcmp.ge.s32.totalorder %v1844_v51, 1  ;;  %vm17306_vm13 = vcmask 588800   ;;  %3231 = vrot.lane.b32.xlu1 %v3186_v7, %s9787_s21  ;;  %vm11854_vm1 = vmand %vm1688_vm14, %vm1641_vm7  ;;  %2915 = vrot.lane.b32.xlu0 %v2807_v31, %s9790_s24 }
 0x1cc   : > { %8605 = vmatmul.msk.bf16.gmra.mxu0 %vm17306_vm13, %v3603_v26  ;;  %v1120_v50 = vshll.u32 %v11805_v46, 16  ;;  %vm11836_vm3 = vc.u32 %v1114_v14, %v1118_v43  ;;  %v1124_v22 = vadd.s32 %v1118_v43, %v1114_v14  ;;  %vm1938_vm11 = vcmp.le.s32.totalorder %v1844_v51, 16  ;;  %v11883_v31 = vpop.permute.xlu0 %2508  ;;  %v9702_v26 = vld [vmem:[%s9828_s17 + $0x78] sm:$0xff]  }
 0x1cd   : > { %v2968_v28 = vsel %vm17063_vm0, %v17304_v48, %v17303_v36  ;;  %vm1892_vm12 = vcmp.ge.s32.totalorder %v1845_v6, 1  ;;  %v1782_v8 = vadd.s32 24, %v11784_v23  ;;  %v1103_v38 = vshrl.u32 %v1102_v34, 4  ;;  %vm11875_vm15 = vmand %vm1891_vm9, %vm1938_vm11  ;;  %v11897_v51 = vpop.permute.xlu2 %3227 }
 0x1ce   : > { %vm1939_vm13 = vcmp.le.s32.totalorder %v1845_v6, 16  ;;  %v1117_v14 = vmul.u32 43690, %v1112_v24  ;;  %v648_v43 = vshrl.u32 %v11793_v12, 16  ;;  %v11862_v13 = vmul.u32 43690, %v647_v25  ;;  %3013 = vrot.lane.b32.xlu2 %v2968_v28, %s9789_s23 }
 0x1cf   : > { %v3858_v34 = vmul.f32 %v11666_v16, %v11817_v33  ;;  %v628_v21 = vshrl.u32 %v11722_v41, 16  ;;  %v637_v7 = vadd.s32 %v636_v44, %v626_v18  ;;  %v1123_v24 = vsel %vm11836_vm3, 1, %v17145_v55  ;;  %vm1986_vm7 = vmand %vm1892_vm12, %vm1939_vm13  ;;  %v11899_v44 = vpop.f32.mrf.mxu0 }
 0x1d0   : > { %v4001_v39 = vadd.f32 %v11602_v27, %v11659_v35  ;;  %vm11879_vm8 = vc.u32 %v1124_v22, %v1120_v50  ;;  %v3903_v41 = vadd.f32 %v11661_v62, %v11673_v32  ;;  %v11890_v18 = vsel %vm11845_vm10, 1.0, %v17180_v3  ;;  %17318 = vst [vmem:[#allocation15_spill] sm:$0xff] %v11899_v44  ;;  %v17321_v22 = vld [vmem:[#allocation9_spill] sm:$0xff]  ;;  %v11927_v30 = vpop.f32.mrf.mxu3 }
 0x1d1   : > { %17317 = vst [vmem:[#allocation14_spill] sm:$0xff] %v11890_v18  ;;  %v1829_v27 = vsel %vm11854_vm1, %v1782_v8, %v11784_v23  ;;  %v1104_v35 = vmul.u32 24, %v1103_v38  ;;  %v1125_v19 = vadd.s32 %v1123_v24, %v1117_v14  ;;  %v650_v36 = vmul.u32 43691, %v647_v25  ;;  %v11936_v37 = vpop.permute.xlu1 %2492 }
 0x1d2   : > { %v11901_v62 = vmul.u32 43691, %v648_v43  ;;  %v654_v48 = vshll.u32 %v11862_v13, 16  ;;  %v3956_v28 = vmul.f32 %v11673_v32, %v11646_v10  ;;  %v3957_v6 = vmul.f32 %v3858_v34, %v11817_v33  ;;  %17322 = vst [vmem:[#allocation9_spill] sm:$0xff] %v11927_v30 }
 0x1d3   : > { %v638_v50 = vadd.s32 %v637_v7, %v628_v21  ;;  %v1127_v23 = vsel %vm11879_vm8, 1, %v17145_v55  ;;  %v11913_v4 = vsel %vm11875_vm15, 1.0, %v17180_v3  ;;  %v11916_v25 = vsel %vm1986_vm7, 1.0, %v17180_v3  ;;  %3154 = vrot.lane.b32.xlu1 %v17321_v22, %s9791_s25  ;;  %3071 = vrot.lane.b32.xlu0 %v9702_v26, %s9784_s18  ;;  %v11941_v22 = vld [vmem:[%s9828_s17 + $0xbc] sm:$0xff]  }
 0x1d4   : > { %17319 = vst [vmem:[#allocation5_spill] sm:$0xff] %v11913_v4  ;;  %vm1876_vm1 = vcmp.ge.s32.totalorder %v1829_v27, 1  ;;  %v203_v32 = vadd.s32 240, %v10547_v20  ;;  %v3859_v15 = vmul.f32 %v11890_v18, %v11899_v44  ;;  %vm1923_vm14 = vcmp.le.s32.totalorder %v1829_v27, 16  ;;  %v2928_v18 = vpop.permute.xlu0 %2927 }
 0x1d5   : > { %17320 = vst [vmem:[#allocation4_spill] sm:$0xff] %v11916_v25  ;;  %v11924_v8 = vsub.s32 %v11572_v57, %v1104_v35  ;;  %v1119_v38 = vshrl.u32 %v11781_v56, 16  ;;  %v1129_v14 = vadd.s32 %v1127_v23, %v1125_v19  ;;  %v656_v21 = vshll.u32 %v11901_v62, 16  ;;  %v17325_v57 = vld [vmem:[#allocation8_spill] sm:$0xff]  ;;  %vm1970_vm3 = vmand %vm1876_vm1, %vm1923_vm14 }
 0x1d6   : > { %vm11930_vm9 = vc.u32 %v650_v36, %v654_v48  ;;  %v660_v24 = vadd.s32 %v654_v48, %v650_v36  ;;  %3215 = vrot.lane.b32.xlu2 %v17325_v57, %s9787_s21  ;;  %v4002_v35 = vadd.f32 %v4001_v39, %v3956_v28  ;;  %v639_v56 = vshrl.u32 %v638_v50, 4 }
 0x1d7   : > { %v11945_v19 = vmul.f32 %v11913_v4, %v11832_v61  ;;  %v3904_v23 = vadd.f32 %v3903_v41, %v3858_v34  ;;  %v653_v58 = vmul.u32 43690, %v648_v43  ;;  %v11947_v36 = vadd.s32 1, %v203_v32  ;;  %v11959_v34 = vpop.permute.xlu2 %3150 }
 0x1d8   : > { %v3958_v48 = vmul.f32 %v3859_v15, %v11899_v44  ;;  %v4003_v26 = vadd.f32 %v4002_v35, %v3957_v6  ;;  %v11952_v16 = vmul.f32 %v11916_v25, %v11927_v30  ;;  %v659_v39 = vsel %vm11930_vm9, 1, %v17145_v55  ;;  %v11999_v35 = vld [vmem:[%s9828_s17 + $0xc8] sm:$0xff] }
 0x1d9   : > { %vm1658_vm11 = vcmp.ne.s32.totalorder %v11924_v8, 0  ;;  %v1121_v43 = vshrl.u32 %v11805_v46, 16  ;;  %v1130_v41 = vadd.s32 %v1129_v14, %v1119_v38  ;;  %vm662_vm10 = vc.u32 %v660_v24, %v656_v21  ;;  %v17327_v46 = vld [vmem:[#allocation23_spill] sm:$0xff]  ;;  %v9703_v21 = vld [vmem:[%s9828_s17 + $0x90] sm:$0xff]  }
 0x1da   : > { %vm1705_vm12 = vcmp.lt.s32.totalorder %v11924_v8, 0  ;;  %v640_v28 = vmul.u32 24, %v639_v56  ;;  %v2872_v6 = vshrl.u32 %v11611_v53, 16  ;;  %v2876_v27 = vshll.u32 %v11941_v22, 16 }
 0x1db   : > { %v11968_v50 = vmul.f32 %v11945_v19, %v11832_v61  ;;  %v11971_v32 = vsel %vm1970_vm3, 1.0, %v17180_v3  ;;  %v661_v7 = vadd.s32 %v659_v39, %v653_v58  ;;  %2613 = vrot.lane.b32.xlu1 %v17327_v46, %s9786_s20  ;;  %v1140_v38 = vand.u32 65535, %v11947_v36  ;;  %v11986_v58 = vpop.f32.mrf.mxu0  ;;  %vm11992_vm13 = vmand %vm1705_vm12, %vm1658_vm11 }
 0x1dc   : > { %17326 = vst [vmem:[#allocation8_spill] sm:$0xff] %v11971_v32  ;;  %v1799_v14 = vadd.s32 24, %v11924_v8  ;;  %v3277_v24 = vsel %vm3239_vm5, %v9703_v21, %v11883_v31  ;;  %v663_v57 = vsel %vm662_vm10, 1, %v17145_v55  ;;  %v11982_v56 = vadd.f32 %v3904_v23, %v3859_v15  ;;  %v17331_v31 = vld [vmem:[#allocation22_spill] sm:$0xff]  ;;  %v3084_v21 = vpop.permute.xlu1 %3083  ;;  %v2147_v23 = vld [vmem:[%s9828_s17 + $0xbc] sm:$0x1]  ;;  %v12018_v1 = vpop.permute.xlu0 %2591 }
 0x1dd   : > { %v11984_v25 = vadd.f32 %v4003_v26, %v3958_v48  ;;  %17328 = vst [vmem:[#allocation23_spill] sm:$0xff] %v11986_v58  ;;  %v1131_v46 = vadd.s32 %v1130_v41, %v1121_v43  ;;  %2514 = vrot.lane.b32.xlu0 %v17331_v31, %s9788_s22  ;;  %v12007_v48 = vmul.f32 %v11952_v16, %v11927_v30  ;;  %v12013_v41 = vrot.slane %v2876_v27, 1 }
 0x1de   : > { %2691 = vrot.lane.b32.xlu2 %v11611_v53, %s9785_s19  ;;  %v12010_v26 = vsub.s32 %v11632_v9, %v640_v28  ;;  %v2874_v43 = vor.u32 %v2872_v6, %v11644_v54  ;;  %v3327_v31 = vsel %vm3289_vm6, %v3277_v24, %v11859_v5  ;;  %v655_v15 = vshrl.u32 %v11862_v13, 16 }
 0x1df   : > { %v665_v4 = vadd.s32 %v663_v57, %v661_v7  ;;  %v12020_v63 = vmul.u32 43690, %v1140_v38  ;;  %v12024_v45 = vmul.f32 %v11971_v32, %v11986_v58  ;;  %v12029_v9 = vsel %vm11992_vm13, %v1799_v14, %v11924_v8  ;;  %v12036_v6 = vpop.permute.xlu2 %2609 }
 0x1e0   : > { %v17332_v54 = vrot.slane %v11941_v22, 1  ;;  %v17333_v5 = vrot.slane %v11611_v53, 1  ;;  %v2278_v28 = vunpack.c.l.b16 %v2147_v23  ;;  %v1132_v27 = vshrl.u32 %v1131_v46, 4 }
 0x1e1   : > { %v3111_v7 = vshrl.u32 %v11709_v49, 16  ;;  %v3115_v24 = vshll.u32 %v11999_v35, 16  ;;  %v17334_v57 = vshrl.u32 %v11947_v36, 16  ;;  %vm1642_vm15 = vcmp.ne.s32.totalorder %v12010_v26, 0 }
 0x1e2   : > { %v2986_v13 = vsel %vm17063_vm0, %v17333_v5, %v17332_v54  ;;  %v657_v8 = vshrl.u32 %v11901_v62, 16  ;;  %vm17335_vm8 = vcmask 195584   ;;  %vm17336_vm7 = vsmask.f32 7424 }
 0x1e3   : > { %v12042_v39 = vmul.u32 43691, %v17334_v57  ;;  %v3376_v53 = vsel %vm17335_vm8, %v3327_v31, %v11699_v2  ;;  %v2879_v14 = vsel %vm17336_vm7, %v2874_v43, %v12013_v41  ;;  %v666_v23 = vadd.s32 %v665_v4, %v655_v15  ;;  %3031 = vrot.lane.b32.xlu1 %v2986_v13, %s9789_s23  ;;  %v2152_v57 = vld [vmem:[%s9828_s17 + $0xc8] sm:$0x1] }
 0x1e4   : > { %vm17337_vm1 = vcmask 261120   ;;  %v1143_v54 = vmul.u32 43691, %v1140_v38  ;;  %v1147_v5 = vshll.u32 %v12020_v63, 16  ;;  %vm1689_vm14 = vcmp.lt.s32.totalorder %v12010_v26, 0  ;;  %v2912_v4 = vpop.permute.xlu1 %2911 }
 0x1e5   : > { %v3425_v46 = vsel %vm17337_vm1, %v3376_v53, %v2928_v18  ;;  %v12057_v62 = vpack.c.b16 %v2278_v28, %v11583_v60  ;;  %v204_v2 = vadd.s32 248, %v10547_v20  ;;  %v1133_v31 = vmul.u32 24, %v1132_v27  ;;  %2933 = vrot.lane.b32.xlu0 %v2879_v14, %s9790_s24  ;;  %vm12101_vm13 = vmand %vm1689_vm14, %vm1642_vm15 }
 0x1e6   : > { %v3113_v18 = vor.u32 %v3111_v7, %v11742_v42  ;;  %v12062_v15 = vrot.slane %v3115_v24, 1  ;;  %v1149_v38 = vshll.u32 %v12042_v39, 16  ;;  %3089 = vrot.lane.b32.xlu2 %v11709_v49, %s9784_s18  ;;  %vm17338_vm9 = vcmask 326656   ;;  %v3167_v42 = vpop.permute.xlu0 %3166  ;;  %vm17350_vm1 = vmmov %vm17336_vm7 }
 0x1e7   : > { %v3474_v43 = vsel %vm17338_vm9, %v3425_v46, %v11751_v47  ;;  %v12070_v13 = vunpack.c.h.b16 %v11709_v49  ;;  %v2698_v28 = vunpack.c.l.b16 %v2152_v57  ;;  %v2465_v27 = vshll.u32 %v12057_v62, 16 }
 0x1e8   : > { %v667_v53 = vadd.s32 %v666_v23, %v657_v8  ;;  %vm17339_vm3 = vcmask 392192   ;;  %vm12074_vm11 = vc.u32 %v1143_v54, %v1147_v5  ;;  %v1153_v24 = vadd.s32 %v1147_v5, %v1143_v54  ;;  %v12086_v8 = vpop.permute.xlu2 %2494 }
 0x1e9   : > { %v3523_v14 = vsel %vm17339_vm3, %v3474_v43, %v3084_v21  ;;  %vm17342_vm10 = vcmask 457728   ;;  %v17343_v30 = vrot.slane %v11999_v35, 1  ;;  %v17344_v47 = vrot.slane %v11709_v49, 1 }
 0x1ea   : > { %v3572_v32 = vsel %vm17342_vm10, %v3523_v14, %v3167_v42  ;;  %v12084_v57 = vadd.s32 1, %v204_v2  ;;  %v12088_v21 = vrot.slane %v2465_v27, 1  ;;  %v1783_v23 = vadd.s32 24, %v12010_v26  ;;  %v9704_v27 = vld [vmem:[%s9828_s17 + $0x50] sm:$0xff]  }
 0x1eb   : > { %v3188_v46 = vsel %vm17063_vm0, %v17344_v47, %v17343_v30  ;;  %v12092_v54 = vsub.s32 %v11706_v52, %v1133_v31  ;;  %vm17345_vm12 = vcmask 523264   ;;  %v187_v49 = vadd.s32 112, %v10547_v20  ;;  %v2157_v47 = vld [vmem:[%s9828_s17 + $0xd4] sm:$0x1] }
 0x1ec   : > { %v3621_v5 = vsel %vm17345_vm12, %v3572_v32, %v11897_v51  ;;  %vm17348_vm8 = vcmask 588800   ;;  %v3118_v52 = vsel %vm17336_vm7, %v3113_v18, %v12062_v15  ;;  %v17349_v2 = vshrl.u32 %v11947_v36, 16  ;;  %3233 = vrot.lane.b32.xlu1 %v3188_v46, %s9787_s21  ;;  %v3068_v7 = vpop.permute.xlu1 %3067 }
 0x1ed   : > { %8614 = vmatmul.msk.bf16.gmra.mxu3 %vm17348_vm8, %v3621_v5  ;;  %v12111_v51 = vpack.c.b16 %v2698_v28, %v12070_v13  ;;  %v2468_v32 = vsel %vm17350_vm1, %v11426_v11, %v12088_v21  ;;  %v668_v43 = vshrl.u32 %v667_v53, 4  ;;  %v3261_v14 = vsel %vm3239_vm5, %v9704_v27, %v11936_v37  ;;  %v2156_v28 = vld [vmem:[%s9828_s17 + $0xd0] sm:$0xf]  ;;  %3172 = vrot.lane.b32.xlu0 %v3118_v52, %s9791_s25  ;;  %vm17356_vm8 = vmmov %vm17350_vm1 }
 0x1ee   : > { %v1146_v31 = vmul.u32 43690, %v17349_v2  ;;  %v1152_v42 = vsel %vm12074_vm11, 1, %v17145_v55  ;;  %vm12122_vm15 = vc.u32 %v1153_v24, %v1149_v38  ;;  %v3311_v11 = vsel %vm3289_vm6, %v3261_v14, %v12018_v1  ;;  %2516 = vrot.lane.b32.xlu2 %v2468_v32, %s9788_s22  ;;  %v3010_v52 = vpop.permute.xlu0 %3009 }
 0x1ef   : > { %v1169_v53 = vand.u32 65535, %v12084_v57  ;;  %v2884_v5 = vshll.u32 %v12111_v51, 16  ;;  %v2880_v37 = vshrl.u32 %v11941_v22, 16  ;;  %v12137_v38 = vsel %vm12101_vm13, %v1783_v23, %v12010_v26 }
 0x1f0   : > { %vm1659_vm14 = vcmp.ne.s32.totalorder %v12092_v54, 0  ;;  %vm1706_vm9 = vcmp.lt.s32.totalorder %v12092_v54, 0  ;;  %v12142_v24 = vadd.s32 1, %v187_v49  ;;  %v1154_v1 = vadd.s32 %v1152_v42, %v1146_v31 }
 0x1f1   : > { %v16969_v46 = vrot.slane %v12057_v62, 1  ;;  %v12146_v2 = vunpack.c.l.b16 %v2156_v28  ;;  %v3096_v27 = vunpack.c.l.b16 %v2157_v47  ;;  %v669_v30 = vmul.u32 24, %v668_v43  ;;  %v12160_v43 = vpop.permute.xlu2 %3085  ;;  %vm12182_vm7 = vmand %vm1706_vm9, %vm1659_vm14 }
 0x1f2   : > { %vm17353_vm3 = vcmask 195584   ;;  %v1156_v23 = vsel %vm12122_vm15, 1, %v17145_v55  ;;  %v2882_v49 = vor.u32 %v2880_v37, %v12013_v41  ;;  %vm1893_vm11 = vcmp.ge.s32.totalorder %v12029_v9, 1 }
 0x1f3   : > { %v3360_v26 = vsel %vm17353_vm3, %v3311_v11, %v11815_v29  ;;  %vm1940_vm10 = vcmp.le.s32.totalorder %v12029_v9, 16  ;;  %vm17354_vm12 = vcmask 261120   ;;  %v1170_v32 = vshrl.u32 %v12084_v57, 16  ;;  %v12317_v9 = vpop.f32.mrf.mxu0 }
 0x1f4   : > { %v3409_v31 = vsel %vm17354_vm12, %v3360_v26, %v2912_v4  ;;  %v12158_v14 = vmul.u32 43690, %v1169_v53  ;;  %v12162_v29 = vrot.slane %v2884_v5, 1  ;;  %v1800_v42 = vadd.s32 24, %v12092_v54  ;;  %2693 = vrot.lane.b32.xlu1 %v11941_v22, %s9785_s19  ;;  %17380 = vst [vmem:[#allocation36_spill] sm:$0xff] %v12317_v9 }
 0x1f5   : > { %v1148_v18 = vshrl.u32 %v12020_v63, 16  ;;  %vm17355_vm13 = vcmask 326656   ;;  %v676_v28 = vand.u32 65535, %v12142_v24  ;;  %v2570_v4 = vsel %vm17063_vm0, %v11158_v40, %v16969_v46 }
 0x1f6   : > { %v3458_v41 = vsel %vm17355_vm13, %v3409_v31, %v3010_v52  ;;  %v188_v47 = vadd.s32 120, %v10547_v20  ;;  %v12174_v11 = vpack.c.b16 %v3096_v27, %v12146_v2  ;;  %v2887_v5 = vsel %vm17356_vm8, %v2882_v49, %v12162_v29  ;;  %2615 = vrot.lane.b32.xlu0 %v2570_v4, %s9786_s20  ;;  %v3212_v44 = vpop.permute.xlu0 %3211 }
 0x1f7   : > { %v12187_v37 = vsub.s32 %v11793_v12, %v669_v30  ;;  %v1158_v40 = vadd.s32 %v1156_v23, %v1154_v1  ;;  %v1172_v26 = vmul.u32 43691, %v1169_v53  ;;  %v3119_v27 = vshrl.u32 %v11999_v35, 16  ;;  %v12200_v12 = vpop.permute.xlu1 %2510  ;;  %2935 = vrot.lane.b32.xlu2 %v2887_v5, %s9790_s24 }
 0x1f8   : > { %vm17359_vm1 = vcmask 392192   ;;  %v12193_v49 = vmul.u32 43691, %v1170_v32  ;;  %v1176_v31 = vshll.u32 %v12158_v14, 16  ;;  %v3123_v46 = vshll.u32 %v12174_v11, 16 }
 0x1f9   : > { %v3507_v52 = vsel %vm17359_vm1, %v3458_v41, %v3068_v7  ;;  %vm1877_vm15 = vcmp.ge.s32.totalorder %v12137_v38, 1  ;;  %vm1924_vm14 = vcmp.le.s32.totalorder %v12137_v38, 16  ;;  %v677_v53 = vshrl.u32 %v12142_v24, 16 }
 0x1fa   : > { %v12203_v1 = vmul.u32 43690, %v676_v28  ;;  %v1847_v7 = vsel %vm12182_vm7, %v1800_v42, %v12092_v54  ;;  %v16974_v30 = vrot.slane %v12111_v51, 1  ;;  %v12210_v23 = vadd.s32 1, %v188_v47  ;;  %v12223_v42 = vpop.permute.xlu2 %2913 }
 0x1fb   : > { %v3121_v41 = vor.u32 %v3119_v27, %v12062_v15  ;;  %vm1643_vm9 = vcmp.ne.s32.totalorder %v12187_v37, 0  ;;  %v1150_v4 = vshrl.u32 %v12042_v39, 16  ;;  %v1159_v61 = vadd.s32 %v1158_v40, %v1148_v18 }
 0x1fc   : > { %vm17360_vm3 = vcmask 457728   ;;  %v1178_v5 = vshll.u32 %v12193_v49, 16  ;;  %vm12218_vm12 = vc.u32 %v1172_v26, %v1176_v31  ;;  %vm17363_vm13 = vcmask 523264   ;;  %3091 = vrot.lane.b32.xlu1 %v11999_v35, %s9784_s18 }
 0x1fd   : > { %v3556_v33 = vsel %vm17360_vm3, %v3507_v52, %v11959_v34  ;;  %v12225_v15 = vrot.slane %v3123_v46, 1  ;;  %v1182_v47 = vadd.s32 %v1176_v31, %v1172_v26  ;;  %v679_v27 = vmul.u32 43691, %v676_v28  ;;  %vm12246_vm3 = vmand %vm1893_vm11, %vm1940_vm10 }
 0x1fe   : > { %v3605_v54 = vsel %vm17363_vm13, %v3556_v33, %v3212_v44  ;;  %v12227_v39 = vmul.u32 43691, %v677_v53  ;;  %v683_v18 = vshll.u32 %v12203_v1, 16  ;;  %vm17364_vm8 = vcmask 588800   ;;  %vm12261_vm13 = vmand %vm1877_vm15, %vm1924_vm14 }
 0x1ff   : > { %8606 = vmatmul.msk.bf16.gmra.mxu0 %vm17364_vm8, %v3605_v54  ;;  %vm1690_vm7 = vcmp.lt.s32.totalorder %v12187_v37, 0  ;;  %v17365_v34 = vrot.slane %v11941_v22, 1  ;;  %v705_v44 = vand.u32 65535, %v12210_v23  ;;  %vm17366_vm1 = vsmask.f32 7424 }
 0x200   : > { %v3126_v46 = vsel %vm17366_vm1, %v3121_v41, %v12225_v15  ;;  %v3959_v28 = vmul.f32 %v12024_v45, %v11986_v58  ;;  %v12252_v22 = vadd.f32 %v11982_v56, %v12024_v45  ;;  %v1175_v26 = vmul.u32 43690, %v1170_v32  ;;  %vm12273_vm8 = vmand %vm1690_vm7, %vm1643_vm9 }
 0x201   : > { %v2988_v33 = vsel %vm17063_vm0, %v17365_v34, %v16974_v30  ;;  %v2469_v52 = vshrl.u32 %v12057_v62, 16  ;;  %vm1894_vm11 = vcmp.ge.s32.totalorder %v1847_v7, 1  ;;  %v1784_v31 = vadd.s32 24, %v12187_v37  ;;  %3174 = vrot.lane.b32.xlu2 %v3126_v46, %s9791_s25  ;;  %v12306_v46 = vpop.permute.xlu0 %2687 }
 0x202   : > { %v1160_v41 = vadd.s32 %v1159_v61, %v1150_v4  ;;  %v1181_v45 = vsel %vm12218_vm12, 1, %v17145_v55  ;;  %vm1941_vm10 = vcmp.le.s32.totalorder %v1847_v7, 16  ;;  %vm12277_vm15 = vc.u32 %v1182_v47, %v1178_v5  ;;  %3033 = vrot.lane.b32.xlu0 %v2988_v33, %s9789_s23  ;;  %v12283_v4 = vpop.permute.xlu1 %2929  ;;  %v12299_v33 = vpop.f32.mrf.mxu3 }
 0x203   : > { %v685_v32 = vshll.u32 %v12227_v39, 16  ;;  %v689_v61 = vadd.s32 %v683_v18, %v679_v27  ;;  %vm12286_vm14 = vc.u32 %v679_v27, %v683_v18  ;;  %v706_v54 = vshrl.u32 %v12210_v23, 16  ;;  %17378 = vst [vmem:[#allocation34_spill] sm:$0xff] %v12299_v33  ;;  %v12315_v0 = vpop.permute.xlu2 %3069  ;;  %vm12321_vm9 = vmand %vm1894_vm11, %vm1941_vm10 }
 0x204   : > { %v12291_v34 = vmul.u32 43690, %v705_v44  ;;  %v12297_v47 = vsel %vm12246_vm3, 1.0, %v17180_v3  ;;  %v12304_v27 = vsel %vm12261_vm13, 1.0, %v17180_v3  ;;  %v1183_v18 = vadd.s32 %v1181_v45, %v1175_v26 }
 0x205   : > { %17377 = vst [vmem:[#allocation22_spill] sm:$0xff] %v12297_v47  ;;  %v2471_v30 = vor.u32 %v2469_v52, %v12088_v21  ;;  %v1831_v5 = vsel %vm12273_vm8, %v1784_v31, %v12187_v37  ;;  %v1161_v58 = vshrl.u32 %v1160_v41, 4  ;;  %v1185_v40 = vsel %vm12277_vm15, 1, %v17145_v55 }
 0x206   : > { %17379 = vst [vmem:[#allocation35_spill] sm:$0xff] %v12304_v27  ;;  %v682_v10 = vmul.u32 43690, %v677_v53  ;;  %v688_v21 = vsel %vm12286_vm14, 1, %v17145_v55  ;;  %vm12328_vm12 = vc.u32 %v689_v61, %v685_v32  ;;  %v708_v52 = vmul.u32 43691, %v705_v44 }
 0x207   : > { %v205_v53 = vadd.s32 256, %v10547_v20  ;;  %v12333_v31 = vmul.u32 43691, %v706_v54  ;;  %v712_v41 = vshll.u32 %v12291_v34, 16  ;;  %v17385_v7 = vrot.slane %v12174_v11, 1  ;;  %2518 = vrot.lane.b32.xlu1 %v2471_v30, %s9788_s22 }
 0x208   : > { %v17386_v45 = vrot.slane %v11999_v35, 1  ;;  %v189_v38 = vadd.s32 128, %v10547_v20  ;;  %v12343_v32 = vadd.f32 %v11984_v25, %v3959_v28  ;;  %v1177_v61 = vshrl.u32 %v12158_v14, 16 }
 0x209   : > { %v1187_v44 = vadd.s32 %v1185_v40, %v1183_v18  ;;  %v2888_v63 = vshrl.u32 %v12111_v51, 16  ;;  %v12350_v59 = vmul.f32 %v12297_v47, %v12299_v33  ;;  %v3861_v35 = vmul.f32 %v12304_v27, %v12317_v9 }
 0x20a   : > { %v3190_v56 = vsel %vm17063_vm0, %v17386_v45, %v17385_v7  ;;  %v12357_v7 = vsel %vm12321_vm9, 1.0, %v17180_v3  ;;  %v690_v25 = vadd.s32 %v688_v21, %v682_v10  ;;  %vm1878_vm7 = vcmp.ge.s32.totalorder %v1831_v5, 1  ;;  %v12363_v28 = vpop.permute.xlu1 %2593  ;;  %v3028_v45 = vpop.permute.xlu0 %3027 }
 0x20b   : > { %17387 = vst [vmem:[#allocation37_spill] sm:$0xff] %v12357_v7  ;;  %v1162_v14 = vmul.u32 24, %v1161_v58  ;;  %v692_v30 = vsel %vm12328_vm12, 1, %v17145_v55  ;;  %3235 = vrot.lane.b32.xlu0 %v3190_v56, %s9787_s21  ;;  %v12365_v18 = vadd.s32 1, %v205_v53  ;;  %v17388_v40 = vrot.slane %v12057_v62, 1  ;;  %v12380_v27 = vpop.permute.xlu2 %2512 }
 0x20c   : > { %v714_v26 = vshll.u32 %v12333_v31, 16  ;;  %vm716_vm1 = vc.u32 %v708_v52, %v712_v41  ;;  %v718_v10 = vadd.s32 %v712_v41, %v708_v52  ;;  %v12371_v21 = vadd.s32 1, %v189_v38  ;;  %v12385_v41 = vpop.f32.mrf.mxu3 }
 0x20d   : > { %2617 = vrot.lane.b32.xlu2 %v17388_v40, %s9786_s20  ;;  %vm1925_vm3 = vcmp.le.s32.totalorder %v1831_v5, 16  ;;  %v1179_v58 = vshrl.u32 %v12193_v49, 16  ;;  %v1188_v37 = vadd.s32 %v1187_v44, %v1177_v61  ;;  %v2890_v56 = vor.u32 %v2888_v63, %v12162_v29  ;;  %17389 = vst [vmem:[#allocation38_spill] sm:$0xff] %v12385_v41  ;;  %v9705_v44 = vld [vmem:[%s9828_s17 + $0x98] sm:$0xff]  }
 0x20e   : > { %v12377_v53 = vmul.f32 %v12350_v59, %v12299_v33  ;;  %v684_v62 = vshrl.u32 %v12203_v1, 16  ;;  %v694_v40 = vadd.s32 %v692_v30, %v690_v25  ;;  %v711_v47 = vmul.u32 43690, %v706_v54  ;;  %vm1972_vm13 = vmand %vm1878_vm7, %vm1925_vm3 }
 0x20f   : > { %v12383_v52 = vadd.f32 %v12252_v22, %v3861_v35  ;;  %v717_v49 = vsel %vm716_vm1, 1, %v17145_v55  ;;  %v2648_v29 = vpack.c.b16 %v12070_v13, %v12070_v13  ;;  %v1198_v38 = vand.u32 65535, %v12365_v18  ;;  %2937 = vrot.lane.b32.xlu1 %v2890_v56, %s9790_s24 }
 0x210   : > { %v12392_v61 = vmul.f32 %v3861_v35, %v12317_v9  ;;  %v12397_v1 = vsub.s32 %v11947_v36, %v1162_v14  ;;  %vm720_vm11 = vc.u32 %v718_v10, %v714_v26  ;;  %v734_v22 = vand.u32 65535, %v12371_v21  ;;  %v9706_v9 = vld [vmem:[%s9828_s17 + $0x58] sm:$0xff]  }
 0x211   : > { %v1189_v54 = vadd.s32 %v1188_v37, %v1179_v58  ;;  %v3279_v63 = vsel %vm3239_vm5, %v9705_v44, %v12200_v12  ;;  %v3127_v13 = vshrl.u32 %v12174_v11, 16  ;;  %v206_v35 = vadd.s32 264, %v10547_v20 }
 0x212   : > { %v12408_v5 = vmul.f32 %v12357_v7, %v12385_v41  ;;  %v686_v36 = vshrl.u32 %v12227_v39, 16  ;;  %v695_v25 = vadd.s32 %v694_v40, %v684_v62  ;;  %v719_v14 = vadd.s32 %v717_v49, %v711_v47  ;;  %v3169_v12 = vpop.permute.xlu1 %3168  ;;  %v2672_v49 = vpop.permute.xlu0 %2671 }
 0x213   : > { %v12412_v30 = vsel %vm1972_vm13, 1.0, %v17180_v3  ;;  %v721_v26 = vsel %vm720_vm11, 1, %v17145_v55  ;;  %2695 = vrot.lane.b32.xlu0 %v2648_v29, %s9785_s19  ;;  %v1199_v10 = vshrl.u32 %v12365_v18, 16  ;;  %v12417_v58 = vmul.u32 43690, %v1198_v38 }
 0x214   : > { %17390 = vst [vmem:[#allocation39_spill] sm:$0xff] %v12412_v30  ;;  %v17391_v37 = vrot.slane %v12111_v51, 1  ;;  %vm1660_vm10 = vcmp.ne.s32.totalorder %v12397_v1, 0  ;;  %v3329_v39 = vsel %vm3289_vm6, %v3279_v63, %v12036_v6  ;;  %v735_v47 = vshrl.u32 %v12371_v21, 16  ;;  %v12435_v6 = vpop.permute.xlu2 %2931 }
 0x215   : > { %v12426_v56 = vmul.u32 43690, %v734_v22  ;;  %v1190_v62 = vshrl.u32 %v1189_v54, 4  ;;  %vm17392_vm8 = vcmask 195584   ;;  %v3129_v29 = vor.u32 %v3127_v13, %v12225_v15 }
 0x216   : > { %3035 = vrot.lane.b32.xlu2 %v17391_v37, %s9789_s23  ;;  %v3378_v40 = vsel %vm17392_vm8, %v3329_v39, %v12306_v46  ;;  %v12431_v44 = vadd.s32 1, %v206_v35  ;;  %vm1707_vm15 = vcmp.lt.s32.totalorder %v12397_v1, 0  ;;  %v696_v51 = vadd.s32 %v695_v25, %v686_v36  ;;  %vm17400_vm13 = vmmov %vm17392_vm8 }
 0x217   : > { %v713_v37 = vshrl.u32 %v12291_v34, 16  ;;  %v723_v7 = vadd.s32 %v721_v26, %v719_v14  ;;  %v3046_v63 = vpack.c.b16 %v12146_v2, %v12146_v2  ;;  %v1201_v54 = vmul.u32 43691, %v1198_v38  ;;  %3176 = vrot.lane.b32.xlu1 %v3129_v29, %s9791_s25  ;;  %vm1754_vm8 = vmand %vm1707_vm15, %vm1660_vm10 }
 0x218   : > { %v12439_v33 = vmul.u32 43691, %v1199_v10  ;;  %v1205_v46 = vshll.u32 %v12417_v58, 16  ;;  %vm17393_vm14 = vcmask 261120   ;;  %v737_v13 = vmul.u32 43691, %v734_v22 }
 0x219   : > { %v3427_v15 = vsel %vm17393_vm14, %v3378_v40, %v12283_v4  ;;  %v12444_v35 = vmul.u32 43691, %v735_v47  ;;  %v741_v34 = vshll.u32 %v12426_v56, 16  ;;  %v1801_v36 = vadd.s32 24, %v12397_v1 }
 0x21a   : > { %v1191_v25 = vmul.u32 24, %v1190_v62  ;;  %vm17394_vm9 = vcmask 326656   ;;  %v1227_v2 = vand.u32 65535, %v12431_v44  ;;  %v697_v38 = vshrl.u32 %v696_v51, 4  ;;  %v3012_v22 = vpop.permute.xlu1 %3011 }
 0x21b   : > { %v3476_v14 = vsel %vm17394_vm9, %v3427_v15, %v3028_v45  ;;  %v715_v26 = vshrl.u32 %v12333_v31, 16  ;;  %v724_v39 = vadd.s32 %v723_v7, %v713_v37  ;;  %v3263_v4 = vsel %vm3239_vm5, %v9706_v9, %v12086_v8  ;;  %3093 = vrot.lane.b32.xlu0 %v3046_v63, %s9784_s18 }
 0x21c   : > { %v1207_v40 = vshll.u32 %v12439_v33, 16  ;;  %vm12457_vm12 = vc.u32 %v1201_v54, %v1205_v46  ;;  %v1211_v45 = vadd.s32 %v1205_v46, %v1201_v54  ;;  %v190_v29 = vadd.s32 136, %v10547_v20  ;;  %v3230_v54 = vpop.permute.xlu0 %3229 }
 0x21d   : > { %v17397_v31 = vrot.slane %v12174_v11, 1  ;;  %vm17398_vm7 = vcmask 392192   ;;  %v743_v8 = vshll.u32 %v12444_v35, 16  ;;  %v747_v9 = vadd.s32 %v741_v34, %v737_v13 }
 0x21e   : > { %v3525_v7 = vsel %vm17398_vm7, %v3476_v14, %v12160_v43  ;;  %v1228_v51 = vshrl.u32 %v12431_v44, 16  ;;  %v3313_v37 = vsel %vm3289_vm6, %v3263_v4, %v12363_v28  ;;  %vm17399_vm1 = vcmask 457728  }
 0x21f   : > { %3237 = vrot.lane.b32.xlu2 %v17397_v31, %s9787_s21  ;;  %v3574_v63 = vsel %vm17399_vm1, %v3525_v7, %v3169_v12  ;;  %vm745_vm3 = vc.u32 %v737_v13, %v741_v34  ;;  %v12472_v46 = vmul.u32 43690, %v1227_v2  ;;  %v1192_v11 = vsub.s32 %v12084_v57, %v1191_v25  ;;  %v12487_v57 = vpop.permute.xlu2 %2595 }
 0x220   : > { %v698_v15 = vmul.u32 24, %v697_v38  ;;  %v3362_v31 = vsel %vm17400_vm13, %v3313_v37, %v2672_v49  ;;  %vm17401_vm11 = vcmask 523264   ;;  %v725_v14 = vadd.s32 %v724_v39, %v715_v26 }
 0x221   : > { %v3623_v43 = vsel %vm17401_vm11, %v3574_v63, %v3230_v54  ;;  %vm17402_vm14 = vcmask 588800   ;;  %v1204_v28 = vmul.u32 43690, %v1199_v10  ;;  %v1210_v12 = vsel %vm12457_vm12, 1, %v17145_v55 }
 0x222   : > { %8615 = vmatmul.msk.bf16.gmra.mxu3 %vm17402_vm14, %v3623_v43  ;;  %v12485_v13 = vadd.s32 1, %v190_v29  ;;  %vm12489_vm9 = vc.u32 %v1211_v45, %v1207_v40  ;;  %v740_v34 = vmul.u32 43690, %v735_v47  ;;  %v746_v25 = vsel %vm745_vm3, 1, %v17145_v55  ;;  %v3214_v7 = vpop.permute.xlu1 %3213 }
 0x223   : > { %vm12494_vm10 = vc.u32 %v747_v9, %v743_v8  ;;  %vm17407_vm15 = vcmask 261120   ;;  %v1230_v26 = vmul.u32 43691, %v1227_v2  ;;  %v12500_v39 = vmul.u32 43691, %v1228_v51 }
 0x224   : > { %v3411_v10 = vsel %vm17407_vm15, %v3362_v31, %v12223_v42  ;;  %v1234_v4 = vshll.u32 %v12472_v46, 16  ;;  %v1848_v40 = vsel %vm1754_vm8, %v1801_v36, %v12397_v1  ;;  %vm1661_vm12 = vcmp.ne.s32.totalorder %v1192_v11, 0  ;;  %v3153_v36 = vpop.permute.xlu0 %3152 }
 0x225   : > { %v699_v62 = vsub.s32 %v12142_v24, %v698_v15  ;;  %vm17408_vm7 = vcmask 326656   ;;  %vm1708_vm1 = vcmp.lt.s32.totalorder %v1192_v11, 0  ;;  %v1802_v45 = vadd.s32 24, %v1192_v11 }
 0x226   : > { %v3460_v47 = vsel %vm17408_vm7, %v3411_v10, %v3012_v22  ;;  %v726_v29 = vshrl.u32 %v725_v14, 4  ;;  %v763_v8 = vand.u32 65535, %v12485_v13  ;;  %v1212_v9 = vadd.s32 %v1210_v12, %v1204_v28 }
 0x227   : > { %v1214_v42 = vsel %vm12489_vm9, 1, %v17145_v55  ;;  %v748_v2 = vadd.s32 %v746_v25, %v740_v34  ;;  %v750_v1 = vsel %vm12494_vm10, 1, %v17145_v55  ;;  %vm17409_vm3 = vcmask 392192   ;;  %vm12520_vm9 = vmand %vm1708_vm1, %vm1661_vm12  ;;  %v12535_v10 = vpop.permute.xlu2 %3170 }
 0x228   : > { %v3509_v24 = vsel %vm17409_vm3, %v3460_v47, %v12315_v0  ;;  %v1236_v22 = vshll.u32 %v12500_v39, 16  ;;  %vm1238_vm13 = vc.u32 %v1230_v26, %v1234_v4  ;;  %v1240_v37 = vadd.s32 %v1234_v4, %v1230_v26  ;;  %v12538_v26 = vpop.f32.mrf.mxu0 }
 0x229   : > { %vm1644_vm11 = vcmp.ne.s32.totalorder %v699_v62, 0  ;;  %vm1691_vm8 = vcmp.lt.s32.totalorder %v699_v62, 0  ;;  %v1206_v63 = vshrl.u32 %v12417_v58, 16  ;;  %vm17410_vm14 = vcmask 457728   ;;  %17417 = vst [vmem:[#allocation40_spill] sm:$0xff] %v12538_v26 }
 0x22a   : > { %v3558_v54 = vsel %vm17410_vm14, %v3509_v24, %v3153_v36  ;;  %vm17413_vm10 = vcmask 523264   ;;  %v1233_v0 = vmul.u32 43690, %v1228_v51  ;;  %v764_v43 = vshrl.u32 %v12485_v13, 16  ;;  %vm1738_vm3 = vmand %vm1691_vm8, %vm1644_vm11 }
 0x22b   : > { %v3607_v31 = vsel %vm17413_vm10, %v3558_v54, %v3214_v7  ;;  %v12526_v14 = vmul.u32 43690, %v763_v8  ;;  %v1216_v28 = vadd.s32 %v1214_v42, %v1212_v9  ;;  %v742_v12 = vshrl.u32 %v12426_v56, 16 }
 0x22c   : > { %v752_v49 = vadd.s32 %v750_v1, %v748_v2  ;;  %vm17414_vm15 = vcmask 588800   ;;  %v1239_v58 = vsel %vm1238_vm13, 1, %v17145_v55  ;;  %v1785_v34 = vadd.s32 24, %v699_v62 }
 0x22d   : > { %8607 = vmatmul.msk.bf16.gmra.mxu0 %vm17414_vm15, %v3607_v31  ;;  %v727_v25 = vmul.u32 24, %v726_v29  ;;  %vm12531_vm12 = vc.u32 %v1240_v37, %v1236_v22  ;;  %v207_v51 = vadd.s32 272, %v10547_v20  ;;  %vm1895_vm7 = vcmp.ge.s32.totalorder %v1848_v40, 1  ;;  %v12545_v29 = vpop.permute.xlu1 %2689  ;;  %v2612_v22 = vpop.permute.xlu0 %2611 }
 0x22e   : > { %vm1942_vm1 = vcmp.le.s32.totalorder %v1848_v40, 16  ;;  %v1849_v56 = vsel %vm12520_vm9, %v1802_v45, %v1192_v11  ;;  %v1208_v4 = vshrl.u32 %v12439_v33, 16  ;;  %v1241_v47 = vadd.s32 %v1239_v58, %v1233_v0  ;;  %v12559_v37 = vpop.f32.mrf.mxu3 }
 0x22f   : > { %v766_v7 = vmul.u32 43691, %v763_v8  ;;  %v12547_v9 = vmul.u32 43691, %v764_v43  ;;  %v770_v42 = vshll.u32 %v12526_v14, 16  ;;  %v1217_v2 = vadd.s32 %v1216_v28, %v1206_v63  ;;  %17418 = vst [vmem:[#allocation41_spill] sm:$0xff] %v12559_v37  ;;  %vm1989_vm8 = vmand %vm1895_vm7, %vm1942_vm1  ;;  %v12586_v38 = vpop.permute.xlu2 %3013 }
 0x230   : > { %v744_v1 = vshrl.u32 %v12444_v35, 16  ;;  %v753_v24 = vadd.s32 %v752_v49, %v742_v12  ;;  %v1243_v11 = vsel %vm12531_vm12, 1, %v17145_v55  ;;  %v3862_v45 = vmul.f32 %v12412_v30, %v12538_v26 }
 0x231   : > { %v1832_v33 = vsel %vm1738_vm3, %v1785_v34, %v699_v62  ;;  %v728_v36 = vsub.s32 %v12210_v23, %v727_v25  ;;  %v12557_v8 = vadd.s32 1, %v207_v51  ;;  %vm1896_vm13 = vcmp.ge.s32.totalorder %v1849_v56, 1 }
 0x232   : > { %vm1943_vm11 = vcmp.le.s32.totalorder %v1849_v56, 16  ;;  %v1235_v35 = vshrl.u32 %v12472_v46, 16  ;;  %v191_v63 = vadd.s32 144, %v10547_v20  ;;  %v1245_v54 = vadd.s32 %v1243_v11, %v1241_v47 }
 0x233   : > { %v772_v15 = vshll.u32 %v12547_v9, 16  ;;  %vm774_vm14 = vc.u32 %v766_v7, %v770_v42  ;;  %v776_v62 = vadd.s32 %v770_v42, %v766_v7  ;;  %vm1879_vm9 = vcmp.ge.s32.totalorder %v1832_v33, 1  ;;  %vm12574_vm7 = vmand %vm1896_vm13, %vm1943_vm11 }
 0x234   : > { %vm1926_vm10 = vcmp.le.s32.totalorder %v1832_v33, 16  ;;  %v1218_v23 = vadd.s32 %v1217_v2, %v1208_v4  ;;  %v754_v31 = vadd.s32 %v753_v24, %v744_v1  ;;  %vm1645_vm15 = vcmp.ne.s32.totalorder %v728_v36, 0 }
 0x235   : > { %vm1692_vm12 = vcmp.lt.s32.totalorder %v728_v36, 0  ;;  %v769_v0 = vmul.u32 43690, %v764_v43  ;;  %v1256_v28 = vand.u32 65535, %v12557_v8  ;;  %v4006_v46 = vadd.f32 %v12343_v32, %v12392_v61  ;;  %vm12581_vm1 = vmand %vm1879_vm9, %vm1926_vm10  ;;  %v3030_v25 = vpop.permute.xlu1 %3029  ;;  %v12598_v42 = vpop.permute.xlu0 %2496 }
 0x236   : > { %v12570_v40 = vsel %vm1989_vm8, 1.0, %v17180_v3  ;;  %v775_v49 = vsel %vm774_vm14, 1, %v17145_v55  ;;  %v12579_v58 = vadd.s32 1, %v191_v63  ;;  %v1786_v34 = vadd.s32 24, %v728_v36  ;;  %vm1739_vm13 = vmand %vm1692_vm12, %vm1645_vm15  ;;  %v9707_v63 = vld [vmem:[%s9828_s17 + $0xa0] sm:$0xff]  }
 0x237   : > { %17419 = vst [vmem:[#allocation42_spill] sm:$0xff] %v12570_v40  ;;  %v1237_v32 = vshrl.u32 %v12500_v39, 16  ;;  %v1246_v61 = vadd.s32 %v1245_v54, %v1235_v35  ;;  %vm778_vm3 = vc.u32 %v776_v62, %v772_v15  ;;  %v12590_v51 = vmul.f32 %v12408_v5, %v12385_v41  ;;  %v12624_v62 = vpop.f32.mrf.mxu3 }
 0x238   : > { %v3961_v56 = vmul.f32 %v3862_v45, %v12538_v26  ;;  %v1219_v4 = vshrl.u32 %v1218_v23, 4  ;;  %v755_v47 = vshrl.u32 %v754_v31, 4  ;;  %v12596_v7 = vadd.f32 %v12383_v52, %v3862_v45  ;;  %17426 = vst [vmem:[#allocation45_spill] sm:$0xff] %v12624_v62  ;;  %v12626_v23 = vpop.f32.mrf.mxu0 }
 0x239   : > { %v777_v39 = vadd.s32 %v775_v49, %v769_v0  ;;  %v1257_v2 = vshrl.u32 %v12557_v8, 16  ;;  %v12601_v1 = vmul.u32 43690, %v1256_v28  ;;  %v12605_v24 = vmul.f32 %v12570_v40, %v12559_v37  ;;  %17427 = vst [vmem:[#allocation46_spill] sm:$0xff] %v12626_v23 }
 0x23a   : > { %v12610_v11 = vsel %vm12574_vm7, 1.0, %v17180_v3  ;;  %v779_v33 = vsel %vm778_vm3, 1, %v17145_v55  ;;  %v792_v52 = vand.u32 65535, %v12579_v58  ;;  %v12617_v45 = vsel %vm12581_vm1, 1.0, %v17180_v3 }
 0x23b   : > { %17424 = vst [vmem:[#allocation43_spill] sm:$0xff] %v12610_v11  ;;  %v12619_v35 = vsel %vm1739_vm13, %v1786_v34, %v728_v36  ;;  %v3281_v54 = vsel %vm3239_vm5, %v9707_v63, %v12380_v27  ;;  %v1247_v15 = vadd.s32 %v1246_v61, %v1237_v32  ;;  %v1220_v31 = vmul.u32 24, %v1219_v4 }
 0x23c   : > { %17425 = vst [vmem:[#allocation44_spill] sm:$0xff] %v12617_v45  ;;  %v756_v0 = vmul.u32 24, %v755_v47  ;;  %v771_v12 = vshrl.u32 %v12526_v14, 16  ;;  %v3331_v49 = vsel %vm3289_vm6, %v3281_v54, %v2612_v22  ;;  %v781_v43 = vadd.s32 %v779_v33, %v777_v39 }
 0x23d   : > { %v1259_v40 = vmul.u32 43691, %v1256_v28  ;;  %v12630_v30 = vmul.u32 43691, %v1257_v2  ;;  %v1263_v36 = vshll.u32 %v12601_v1, 16  ;;  %v12635_v27 = vmul.f32 %v12605_v24, %v12559_v37  ;;  %v12652_v47 = vpop.permute.xlu1 %2673  ;;  %v3088_v63 = vpop.permute.xlu0 %3087 }
 0x23e   : > { %v12637_v34 = vadd.f32 %v4006_v46, %v3961_v56  ;;  %v793_v32 = vshrl.u32 %v12579_v58, 16  ;;  %v12640_v61 = vmul.u32 43690, %v792_v52  ;;  %v12644_v14 = vmul.f32 %v12610_v11, %v12624_v62 }
 0x23f   : > { %v12648_v22 = vmul.f32 %v12617_v45, %v12626_v23  ;;  %v1248_v28 = vshrl.u32 %v1247_v15, 4  ;;  %vm17428_vm11 = vcmask 195584   ;;  %vm1880_vm8 = vcmp.ge.s32.totalorder %v12619_v35, 1 }
 0x240   : > { %v3380_v4 = vsel %vm17428_vm11, %v3331_v49, %v12545_v29  ;;  %v12656_v46 = vsub.s32 %v12365_v18, %v1220_v31  ;;  %v757_v56 = vsub.s32 %v12371_v21, %v756_v0  ;;  %v773_v39 = vshrl.u32 %v12547_v9, 16  ;;  %v12665_v49 = vpop.permute.xlu2 %3215 }
 0x241   : > { %v782_v33 = vadd.s32 %v781_v43, %v771_v12  ;;  %v1265_v54 = vshll.u32 %v12630_v30, 16  ;;  %vm12661_vm14 = vc.u32 %v1259_v40, %v1263_v36  ;;  %v1269_v29 = vadd.s32 %v1263_v36, %v1259_v40 }
 0x242   : > { %vm17431_vm9 = vcmask 261120   ;;  %v795_v18 = vmul.u32 43691, %v792_v52  ;;  %v12669_v31 = vmul.u32 43691, %v793_v32  ;;  %v799_v21 = vshll.u32 %v12640_v61, 16 }
 0x243   : > { %v3429_v11 = vsel %vm17431_vm9, %v3380_v4, %v12435_v6  ;;  %vm1927_vm10 = vcmp.le.s32.totalorder %v12619_v35, 16  ;;  %v1249_v9 = vmul.u32 24, %v1248_v28  ;;  %vm17432_vm15 = vcmask 326656  }
 0x244   : > { %v3478_v0 = vsel %vm17432_vm15, %v3429_v11, %v3030_v25  ;;  %v208_v12 = vadd.s32 280, %v10547_v20  ;;  %vm1662_vm12 = vcmp.ne.s32.totalorder %v12656_v46, 0  ;;  %vm1709_vm7 = vcmp.lt.s32.totalorder %v12656_v46, 0 }
 0x245   : > { %vm17433_vm1 = vcmask 392192   ;;  %v1262_v43 = vmul.u32 43690, %v1257_v2  ;;  %vm1646_vm3 = vcmp.ne.s32.totalorder %v757_v56, 0  ;;  %vm1693_vm13 = vcmp.lt.s32.totalorder %v757_v56, 0 }
 0x246   : > { %v3527_v40 = vsel %vm17433_vm1, %v3478_v0, %v3088_v63  ;;  %v783_v6 = vadd.s32 %v782_v33, %v773_v39  ;;  %v1268_v52 = vsel %vm12661_vm14, 1, %v17145_v55  ;;  %vm12681_vm11 = vc.u32 %v1269_v29, %v1265_v54  ;;  %v3232_v33 = vpop.permute.xlu1 %3231  ;;  %vm12695_vm14 = vmand %vm1693_vm13, %vm1646_vm3 }
 0x247   : > { %v801_v25 = vshll.u32 %v12669_v31, 16  ;;  %vm12686_vm9 = vc.u32 %v795_v18, %v799_v21  ;;  %v805_v28 = vadd.s32 %v799_v21, %v795_v18  ;;  %v1787_v2 = vadd.s32 24, %v757_v56  ;;  %v9708_v21 = vld [vmem:[%s9828_s17 + $0x60] sm:$0xff]   ;;  %vm12721_vm3 = vmand %vm1880_vm8, %vm1927_vm10 }
 0x248   : > { %v1250_v4 = vsub.s32 %v12431_v44, %v1249_v9  ;;  %vm17438_vm15 = vcmask 457728   ;;  %v12693_v63 = vadd.s32 1, %v208_v12  ;;  %vm17441_vm1 = vcmask 523264   ;;  %v2916_v9 = vpop.permute.xlu0 %2915  ;;  %v12738_v11 = vpop.permute.xlu2 %2691 }
 0x249   : > { %v3576_v39 = vsel %vm17438_vm15, %v3527_v40, %v12535_v10  ;;  %v1270_v29 = vadd.s32 %v1268_v52, %v1262_v43  ;;  %v798_v0 = vmul.u32 43690, %v793_v32  ;;  %v192_v45 = vadd.s32 152, %v10547_v20 }
 0x24a   : > { %v3625_v15 = vsel %vm17441_vm1, %v3576_v39, %v3232_v33  ;;  %v784_v18 = vshrl.u32 %v783_v6, 4  ;;  %v3265_v44 = vsel %vm3239_vm5, %v9708_v21, %v12598_v42  ;;  %vm17442_vm15 = vcmask 588800  }
 0x24b   : > { %8616 = vmatmul.msk.bf16.gmra.mxu3 %vm17442_vm15, %v3625_v15  ;;  %v1272_v10 = vsel %vm12681_vm11, 1, %v17145_v55  ;;  %v804_v12 = vsel %vm12686_vm9, 1, %v17145_v55  ;;  %v12713_v32 = vmul.f32 %v12644_v14, %v12624_v62  ;;  %v3962_v40 = vmul.f32 %v12648_v22, %v12626_v23  ;;  %vm12730_vm11 = vmand %vm1709_vm7, %vm1662_vm12 }
 0x24c   : > { %v1803_v43 = vadd.s32 24, %v12656_v46  ;;  %vm807_vm13 = vc.u32 %v805_v28, %v801_v25  ;;  %v1834_v52 = vsel %vm12695_vm14, %v1787_v2, %v757_v56  ;;  %vm1663_vm9 = vcmp.ne.s32.totalorder %v1250_v4, 0  ;;  %v12752_v2 = vpop.f32.mrf.mxu0 }
 0x24d   : > { %v1264_v35 = vshrl.u32 %v12601_v1, 16  ;;  %v1285_v36 = vand.u32 65535, %v12693_v63  ;;  %vm1710_vm8 = vcmp.lt.s32.totalorder %v1250_v4, 0  ;;  %v3315_v25 = vsel %vm3289_vm6, %v3265_v44, %v12487_v57  ;;  %17449 = vst [vmem:[#allocation48_spill] sm:$0xff] %v12752_v2 }
 0x24e   : > { %v1274_v28 = vadd.s32 %v1272_v10, %v1270_v29  ;;  %v806_v39 = vadd.s32 %v804_v12, %v798_v0  ;;  %v785_v33 = vmul.u32 24, %v784_v18  ;;  %vm17447_vm10 = vcmask 195584   ;;  %vm1757_vm1 = vmand %vm1710_vm8, %vm1663_vm9 }
 0x24f   : > { %v3364_v15 = vsel %vm17447_vm10, %v3315_v25, %v12652_v47  ;;  %v808_v54 = vsel %vm807_vm13, 1, %v17145_v55  ;;  %v12745_v56 = vadd.s32 1, %v192_v45  ;;  %v12750_v1 = vsel %vm12721_vm3, 1.0, %v17180_v3  ;;  %v3155_v45 = vpop.permute.xlu1 %3154 }
 0x250   : > { %17448 = vst [vmem:[#allocation47_spill] sm:$0xff] %v12750_v1  ;;  %v1850_v57 = vsel %vm12730_vm11, %v1803_v43, %v12656_v46  ;;  %v1804_v29 = vadd.s32 24, %v1250_v4  ;;  %vm17450_vm12 = vcmask 261120   ;;  %vm1881_vm7 = vcmp.ge.s32.totalorder %v1834_v52, 1  ;;  %v3072_v43 = vpop.permute.xlu0 %3071 }
 0x251   : > { %v3413_v0 = vsel %vm17450_vm12, %v3364_v15, %v2916_v9  ;;  %vm1928_vm14 = vcmp.le.s32.totalorder %v1834_v52, 16  ;;  %v1286_v47 = vshrl.u32 %v12693_v63, 16  ;;  %v12761_v18 = vmul.u32 43690, %v1285_v36 }
 0x252   : > { %v1266_v21 = vshrl.u32 %v12630_v30, 16  ;;  %v1275_v44 = vadd.s32 %v1274_v28, %v1264_v35  ;;  %v800_v10 = vshrl.u32 %v12640_v61, 16  ;;  %v810_v12 = vadd.s32 %v808_v54, %v806_v39  ;;  %vm12774_vm9 = vmand %vm1881_vm7, %vm1928_vm14 }
 0x253   : > { %v3864_v46 = vmul.f32 %v12750_v1, %v12752_v2  ;;  %v786_v9 = vsub.s32 %v12485_v13, %v785_v33  ;;  %vm17451_vm15 = vcmask 326656   ;;  %v821_v6 = vand.u32 65535, %v12745_v56 }
 0x254   : > { %v3462_v42 = vsel %vm17451_vm15, %v3413_v0, %v12586_v38  ;;  %vm1897_vm3 = vcmp.ge.s32.totalorder %v1850_v57, 1  ;;  %vm1944_vm13 = vcmp.le.s32.totalorder %v1850_v57, 16  ;;  %v1851_v25 = vsel %vm1757_vm1, %v1804_v29, %v1250_v4 }
 0x255   : > { %vm17452_vm11 = vcmask 392192   ;;  %vm17455_vm8 = vcmask 457728   ;;  %v1288_v13 = vmul.u32 43691, %v1285_v36  ;;  %v12779_v28 = vmul.u32 43691, %v1286_v47  ;;  %v12789_v36 = vpop.permute.xlu2 %3089  ;;  %vm12802_vm14 = vmand %vm1897_vm3, %vm1944_vm13 }
 0x256   : > { %v3511_v30 = vsel %vm17452_vm11, %v3462_v42, %v3072_v43  ;;  %v1292_v38 = vshll.u32 %v12761_v18, 16  ;;  %v1276_v39 = vadd.s32 %v1275_v44, %v1266_v21  ;;  %v802_v33 = vshrl.u32 %v12669_v31, 16  ;;  %v12819_v42 = vpop.f32.mrf.mxu3 }
 0x257   : > { %v3560_v35 = vsel %vm17455_vm8, %v3511_v30, %v3155_v45  ;;  %v811_v15 = vadd.s32 %v810_v12, %v800_v10  ;;  %vm17456_vm10 = vcmask 523264   ;;  %vm1647_vm12 = vcmp.ne.s32.totalorder %v786_v9, 0  ;;  %17466 = vst [vmem:[#allocation51_spill] sm:$0xff] %v12819_v42 }
 0x258   : > { %v3609_v4 = vsel %vm17456_vm10, %v3560_v35, %v12665_v49  ;;  %vm1694_vm1 = vcmp.lt.s32.totalorder %v786_v9, 0  ;;  %vm17457_vm7 = vcmask 588800   ;;  %v822_v52 = vshrl.u32 %v12745_v56, 16  ;;  %v2515_v30 = vpop.permute.xlu0 %2514 }
 0x259   : > { %8608 = vmatmul.msk.bf16.gmra.mxu0 %vm17457_vm7, %v3609_v4  ;;  %v12787_v54 = vmul.u32 43690, %v821_v6  ;;  %v3909_v29 = vadd.f32 %v12596_v7, %v12648_v22  ;;  %v4008_v0 = vadd.f32 %v12637_v34, %v3962_v40  ;;  %v3963_v31 = vmul.f32 %v3864_v46, %v12752_v2  ;;  %v2614_v22 = vpop.permute.xlu1 %2613  ;;  %v12811_v40 = vpop.f32.mrf.mxu0  ;;  %vm12815_vm8 = vmand %vm1694_vm1, %vm1647_vm12 }
 0x25a   : > { %v12798_v49 = vsel %vm12774_vm9, 1.0, %v17180_v3  ;;  %v1788_v21 = vadd.s32 24, %v786_v9  ;;  %v1294_v44 = vshll.u32 %v12779_v28, 16  ;;  %vm12807_vm15 = vc.u32 %v1288_v13, %v1292_v38  ;;  %17463 = vst [vmem:[#allocation50_spill] sm:$0xff] %v12811_v40 }
 0x25b   : > { %17458 = vst [vmem:[#allocation49_spill] sm:$0xff] %v12798_v49  ;;  %v1298_v34 = vadd.s32 %v1292_v38, %v1288_v13  ;;  %vm1898_vm11 = vcmp.ge.s32.totalorder %v1851_v25, 1  ;;  %vm1945_vm9 = vcmp.le.s32.totalorder %v1851_v25, 16  ;;  %v1277_v10 = vshrl.u32 %v1276_v39, 4 }
 0x25c   : > { %v812_v12 = vadd.s32 %v811_v15, %v802_v33  ;;  %v1291_v43 = vmul.u32 43690, %v1286_v47  ;;  %v824_v61 = vmul.u32 43691, %v821_v6  ;;  %v12821_v35 = vmul.u32 43691, %v822_v52  ;;  %vm1992_vm3 = vmand %vm1898_vm11, %vm1945_vm9  ;;  %v9709_v15 = vld [vmem:[%s9828_s17 + $0xa8] sm:$0xff]  }
 0x25d   : > { %v828_v13 = vshll.u32 %v12787_v54, 16  ;;  %v3910_v38 = vadd.f32 %v3909_v29, %v3864_v46  ;;  %v4009_v4 = vadd.f32 %v4008_v0, %v3963_v31  ;;  %v1297_v1 = vsel %vm12807_vm15, 1, %v17145_v55 }
 0x25e   : > { %v193_v62 = vadd.s32 160, %v10547_v20  ;;  %v12831_v39 = vsel %vm12802_vm14, 1.0, %v17180_v3  ;;  %v3865_v47 = vmul.f32 %v12798_v49, %v12811_v40  ;;  %v1835_v46 = vsel %vm12815_vm8, %v1788_v21, %v786_v9 }
 0x25f   : > { %17467 = vst [vmem:[#allocation52_spill] sm:$0xff] %v12831_v39  ;;  %vm1300_vm13 = vc.u32 %v1298_v34, %v1294_v44  ;;  %v1278_v6 = vmul.u32 24, %v1277_v10  ;;  %v813_v33 = vshrl.u32 %v812_v12, 4  ;;  %v3283_v29 = vsel %vm3239_vm5, %v9709_v15, %v2515_v30  ;;  %v12855_v12 = vpop.permute.xlu2 %2516 }
 0x260   : > { %v209_v0 = vadd.s32 288, %v10547_v20  ;;  %v1299_v31 = vadd.s32 %v1297_v1, %v1291_v43  ;;  %v830_v45 = vshll.u32 %v12821_v35, 16  ;;  %vm832_vm10 = vc.u32 %v824_v61, %v828_v13 }
 0x261   : > { %v834_v7 = vadd.s32 %v828_v13, %v824_v61  ;;  %v12845_v25 = vmul.f32 %v12831_v39, %v12819_v42  ;;  %v12848_v57 = vsel %vm1992_vm3, 1.0, %v17180_v3  ;;  %v1301_v9 = vsel %vm1300_vm13, 1, %v17145_v55  ;;  %v3032_v10 = vpop.permute.xlu1 %3031  ;;  %v2934_v39 = vpop.permute.xlu0 %2933 }
 0x262   : > { %17468 = vst [vmem:[#allocation53_spill] sm:$0xff] %v12848_v57  ;;  %v12851_v21 = vadd.s32 1, %v193_v62  ;;  %v3964_v44 = vmul.f32 %v3865_v47, %v12811_v40  ;;  %vm1882_vm12 = vcmp.ge.s32.totalorder %v1835_v46, 1  ;;  %v3333_v1 = vsel %vm3289_vm6, %v3283_v29, %v2614_v22 }
 0x263   : > { %v827_v34 = vmul.u32 43690, %v822_v52  ;;  %v1279_v43 = vsub.s32 %v12557_v8, %v1278_v6  ;;  %v814_v30 = vmul.u32 24, %v813_v33  ;;  %v833_v61 = vsel %vm832_vm10, 1, %v17145_v55 }
 0x264   : > { %v12859_v13 = vadd.s32 1, %v209_v0  ;;  %vm1929_vm1 = vcmp.le.s32.totalorder %v1835_v46, 16  ;;  %v1293_v62 = vshrl.u32 %v12761_v18, 16  ;;  %v1303_v15 = vadd.s32 %v1301_v9, %v1299_v31  ;;  %v12874_v0 = vpop.f32.mrf.mxu3 }
 0x265   : > { %vm836_vm7 = vc.u32 %v834_v7, %v830_v45  ;;  %v12864_v22 = vmul.f32 %v12845_v25, %v12819_v42  ;;  %vm17470_vm14 = vcmask 195584   ;;  %v850_v8 = vand.u32 65535, %v12851_v21  ;;  %17471 = vst [vmem:[#allocation55_spill] sm:$0xff] %v12874_v0  ;;  %vm1976_vm11 = vmand %vm1882_vm12, %vm1929_vm1 }
 0x266   : > { %v3382_v52 = vsel %vm17470_vm14, %v3333_v1, %v12738_v11  ;;  %v194_v6 = vadd.s32 168, %v10547_v20  ;;  %v12870_v33 = vadd.f32 %v3910_v38, %v3865_v47  ;;  %v12872_v29 = vadd.f32 %v4009_v4, %v3964_v44 }
 0x267   : > { %17469 = vst [vmem:[#allocation54_spill] sm:$0xff] %v12864_v22  ;;  %v835_v18 = vadd.s32 %v833_v61, %v827_v34  ;;  %vm17472_vm15 = vcmask 261120   ;;  %vm1664_vm9 = vcmp.ne.s32.totalorder %v1279_v43, 0  ;;  %v815_v45 = vsub.s32 %v12579_v58, %v814_v30 }
 0x268   : > { %v3431_v31 = vsel %vm17472_vm15, %v3382_v52, %v2934_v39  ;;  %v837_v11 = vsel %vm836_vm7, 1, %v17145_v55  ;;  %v1314_v7 = vand.u32 65535, %v12859_v13  ;;  %vm1711_vm8 = vcmp.lt.s32.totalorder %v1279_v43, 0 }
 0x269   : > { %v1295_v38 = vshrl.u32 %v12779_v28, 16  ;;  %v1304_v47 = vadd.s32 %v1303_v15, %v1293_v62  ;;  %v851_v4 = vshrl.u32 %v12851_v21, 16  ;;  %v12885_v9 = vmul.f32 %v12848_v57, %v12874_v0  ;;  %v3234_v30 = vpop.permute.xlu1 %3233  ;;  %vm1758_vm13 = vmand %vm1711_vm8, %vm1664_vm9  ;;  %v3173_v52 = vpop.permute.xlu0 %3172 }
 0x26a   : > { %vm17474_vm3 = vcmask 326656   ;;  %v12888_v46 = vmul.u32 43690, %v850_v8  ;;  %v12890_v44 = vadd.s32 1, %v194_v6  ;;  %v12893_v58 = vsel %vm1976_vm11, 1.0, %v17180_v3  ;;  %v12902_v6 = vpop.permute.xlu2 %2935 }
 0x26b   : > { %17473 = vst [vmem:[#allocation56_spill] sm:$0xff] %v12885_v9  ;;  %v3480_v39 = vsel %vm17474_vm3, %v3431_v31, %v3032_v10  ;;  %v1805_v1 = vadd.s32 24, %v1279_v43  ;;  %v829_v34 = vshrl.u32 %v12787_v54, 16  ;;  %v839_v28 = vadd.s32 %v837_v11, %v835_v18 }
 0x26c   : > { %17475 = vst [vmem:[#allocation57_spill] sm:$0xff] %v12893_v58  ;;  %vm1648_vm10 = vcmp.ne.s32.totalorder %v815_v45, 0  ;;  %vm1695_vm12 = vcmp.lt.s32.totalorder %v815_v45, 0  ;;  %v1315_v61 = vshrl.u32 %v12859_v13, 16  ;;  %v12898_v62 = vmul.u32 43690, %v1314_v7 }
 0x26d   : > { %v1305_v10 = vadd.s32 %v1304_v47, %v1295_v38  ;;  %vm17476_vm1 = vcmask 392192   ;;  %v210_v31 = vadd.s32 296, %v10547_v20  ;;  %v12905_v54 = vmul.u32 43691, %v851_v4  ;;  %vm1742_vm11 = vmand %vm1695_vm12, %vm1648_vm10 }
 0x26e   : > { %v3529_v15 = vsel %vm17476_vm1, %v3480_v39, %v12789_v36  ;;  %vm17477_vm7 = vcmask 457728   ;;  %v853_v11 = vmul.u32 43691, %v850_v8  ;;  %v857_v57 = vshll.u32 %v12888_v46, 16  ;;  %v12912_v39 = vpop.f32.mrf.mxu0 }
 0x26f   : > { %v3578_v18 = vsel %vm17477_vm7, %v3529_v15, %v3173_v52  ;;  %v879_v49 = vand.u32 65535, %v12890_v44  ;;  %v1852_v42 = vsel %vm1758_vm13, %v1805_v1, %v1279_v43  ;;  %v831_v38 = vshrl.u32 %v12821_v35, 16  ;;  %17479 = vst [vmem:[#allocation58_spill] sm:$0xff] %v12912_v39 }
 0x270   : > { %v840_v47 = vadd.s32 %v839_v28, %v829_v34  ;;  %vm17478_vm14 = vcmask 523264   ;;  %v1789_v37 = vadd.s32 24, %v815_v45  ;;  %vm17480_vm15 = vcmask 588800  }
 0x271   : > { %v3627_v36 = vsel %vm17478_vm14, %v3578_v18, %v3234_v30  ;;  %v1317_v41 = vmul.u32 43691, %v1314_v7  ;;  %v12915_v40 = vmul.u32 43691, %v1315_v61  ;;  %v1321_v8 = vshll.u32 %v12898_v62, 16 }
 0x272   : > { %8617 = vmatmul.msk.bf16.gmra.mxu3 %vm17480_vm15, %v3627_v36  ;;  %v12920_v15 = vmul.f32 %v12885_v9, %v12874_v0  ;;  %v1306_v35 = vshrl.u32 %v1305_v10, 4  ;;  %v12924_v43 = vadd.s32 1, %v210_v31  ;;  %v859_v1 = vshll.u32 %v12905_v54, 16  ;;  %v2694_v31 = vpop.permute.xlu1 %2693  ;;  %v12959_v34 = vpop.permute.xlu2 %3174 }
 0x273   : > { %vm12927_vm9 = vc.u32 %v853_v11, %v857_v57  ;;  %v863_v7 = vadd.s32 %v857_v57, %v853_v11  ;;  %v880_v28 = vshrl.u32 %v12890_v44, 16  ;;  %v12932_v30 = vmul.u32 43690, %v879_v49  ;;  %v2616_v11 = vpop.permute.xlu0 %2615 }
 0x274   : > { %17481 = vst [vmem:[#allocation59_spill] sm:$0xff] %v12920_v15  ;;  %v12936_v52 = vmul.f32 %v12893_v58, %v12912_v39  ;;  %vm1899_vm8 = vcmp.ge.s32.totalorder %v1852_v42, 1  ;;  %vm1946_vm3 = vcmp.le.s32.totalorder %v1852_v42, 16  ;;  %v841_v10 = vadd.s32 %v840_v47, %v831_v38  ;;  %v9710_v47 = vld [vmem:[%s9828_s17 + $0xb0] sm:$0xff]  }
 0x275   : > { %v12938_v18 = vsel %vm1742_vm11, %v1789_v37, %v815_v45  ;;  %v1323_v36 = vshll.u32 %v12915_v40, 16  ;;  %v1327_v0 = vadd.s32 %v1321_v8, %v1317_v41  ;;  %v856_v2 = vmul.u32 43690, %v851_v4  ;;  %vm12945_vm10 = vmand %vm1899_vm8, %vm1946_vm3 }
 0x276   : > { %v1307_v57 = vmul.u32 24, %v1306_v35  ;;  %vm1325_vm13 = vc.u32 %v1317_v41, %v1321_v8  ;;  %v1343_v23 = vand.u32 65535, %v12924_v43  ;;  %v862_v58 = vsel %vm12927_vm9, 1, %v17145_v55 }
 0x277   : > { %vm12949_vm12 = vc.u32 %v863_v7, %v859_v1  ;;  %v882_v45 = vmul.u32 43691, %v879_v49  ;;  %v12953_v38 = vmul.u32 43691, %v880_v28  ;;  %v886_v4 = vshll.u32 %v12932_v30, 16 }
 0x278   : > { %v842_v41 = vshrl.u32 %v841_v10, 4  ;;  %v3285_v8 = vsel %vm3239_vm5, %v9710_v47, %v12855_v12  ;;  %v1320_v35 = vmul.u32 43690, %v1315_v61  ;;  %v1344_v26 = vshrl.u32 %v12924_v43, 16 }
 0x279   : > { %v3335_v1 = vsel %vm3289_vm6, %v3285_v8, %v2616_v11  ;;  %v1326_v7 = vsel %vm1325_vm13, 1, %v17145_v55  ;;  %vm1329_vm1 = vc.u32 %v1327_v0, %v1323_v36  ;;  %v864_v49 = vadd.s32 %v862_v58, %v856_v2 }
 0x27a   : > { %v12966_v17 = vmul.f32 %v12936_v52, %v12912_v39  ;;  %v12971_v10 = vsel %vm12945_vm10, 1.0, %v17180_v3  ;;  %v12973_v12 = vmul.u32 43690, %v1343_v23  ;;  %v866_v61 = vsel %vm12949_vm12, 1, %v17145_v55  ;;  %v3092_v39 = vpop.permute.xlu1 %3091  ;;  %v13006_v2 = vpop.permute.xlu2 %2617 }
 0x27b   : > { %17488 = vst [vmem:[#allocation60_spill] sm:$0xff] %v12971_v10  ;;  %v1308_v11 = vsub.s32 %v12693_v63, %v1307_v57  ;;  %v888_v0 = vshll.u32 %v12953_v38, 16  ;;  %vm12980_vm7 = vc.u32 %v882_v45, %v886_v4  ;;  %v892_v58 = vadd.s32 %v886_v4, %v882_v45  ;;  %v3034_v9 = vpop.permute.xlu0 %3033 }
 0x27c   : > { %vm1883_vm14 = vcmp.ge.s32.totalorder %v12938_v18, 1  ;;  %v843_v36 = vmul.u32 24, %v842_v41  ;;  %vm17491_vm15 = vcmask 195584   ;;  %v1328_v47 = vadd.s32 %v1326_v7, %v1320_v35 }
 0x27d   : > { %v3384_v42 = vsel %vm17491_vm15, %v3335_v1, %v2694_v31  ;;  %v1330_v8 = vsel %vm1329_vm1, 1, %v17145_v55  ;;  %v12987_v37 = vmul.u32 43691, %v1344_v26  ;;  %v858_v63 = vshrl.u32 %v12888_v46, 16 }
 0x27e   : > { %v868_v57 = vadd.s32 %v866_v61, %v864_v49  ;;  %v885_v15 = vmul.u32 43690, %v880_v28  ;;  %vm1930_vm11 = vcmp.le.s32.totalorder %v12938_v18, 16  ;;  %v1346_v22 = vmul.u32 43691, %v1343_v23 }
 0x27f   : > { %v1350_v45 = vshll.u32 %v12973_v12, 16  ;;  %v891_v31 = vsel %vm12980_vm7, 1, %v17145_v55  ;;  %vm1665_vm9 = vcmp.ne.s32.totalorder %v1308_v11, 0  ;;  %vm17492_vm8 = vcmask 261120  }
 0x280   : > { %v3433_v4 = vsel %vm17492_vm8, %v3384_v42, %v12902_v6  ;;  %v1322_v41 = vshrl.u32 %v12898_v62, 16  ;;  %vm894_vm3 = vc.u32 %v892_v58, %v888_v0  ;;  %vm1712_vm13 = vcmp.lt.s32.totalorder %v1308_v11, 0 }
 0x281   : > { %v844_v46 = vsub.s32 %v12745_v56, %v843_v36  ;;  %v1332_v28 = vadd.s32 %v1330_v8, %v1328_v47  ;;  %vm17493_vm10 = vcmask 326656   ;;  %v1352_v23 = vshll.u32 %v12987_v37, 16  ;;  %vm13015_vm7 = vmand %vm1712_vm13, %vm1665_vm9  ;;  %v13019_v47 = vpop.f32.mrf.mxu3 }
 0x282   : > { %v3482_v35 = vsel %vm17493_vm10, %v3433_v4, %v3034_v9  ;;  %v860_v1 = vshrl.u32 %v12905_v54, 16  ;;  %v869_v7 = vadd.s32 %v868_v57, %v858_v63  ;;  %v893_v49 = vadd.s32 %v891_v31, %v885_v15  ;;  %v2519_v42 = vpop.permute.xlu1 %2518  ;;  %17499 = vst [vmem:[#allocation61_spill] sm:$0xff] %v13019_v47  ;;  %vm1977_vm13 = vmand %vm1883_vm14, %vm1930_vm11 }
 0x283   : > { %vm13002_vm12 = vc.u32 %v1346_v22, %v1350_v45  ;;  %v1356_v6 = vadd.s32 %v1350_v45, %v1346_v22  ;;  %v895_v62 = vsel %vm894_vm3, 1, %v17145_v55  ;;  %v195_v56 = vadd.s32 176, %v10547_v20  ;;  %v3236_v31 = vpop.permute.xlu0 %3235 }
 0x284   : > { %v1806_v0 = vadd.s32 24, %v1308_v11  ;;  %v1324_v9 = vshrl.u32 %v12915_v40, 16  ;;  %vm17496_vm1 = vcmask 392192   ;;  %v211_v54 = vadd.s32 304, %v10547_v20 }
 0x285   : > { %v3531_v58 = vsel %vm17496_vm1, %v3482_v35, %v3092_v39  ;;  %vm1649_vm15 = vcmp.ne.s32.totalorder %v844_v46, 0  ;;  %vm1696_vm8 = vcmp.lt.s32.totalorder %v844_v46, 0  ;;  %v1333_v22 = vadd.s32 %v1332_v28, %v1322_v41 }
 0x286   : > { %v1349_v36 = vmul.u32 43690, %v1344_v26  ;;  %v1355_v40 = vsel %vm13002_vm12, 1, %v17145_v55  ;;  %v870_v39 = vadd.s32 %v869_v7, %v860_v1  ;;  %v887_v8 = vshrl.u32 %v12932_v30, 16  ;;  %vm1743_vm12 = vmand %vm1696_vm8, %vm1649_vm15 }
 0x287   : > { %v897_v63 = vadd.s32 %v895_v62, %v893_v49  ;;  %v3912_v57 = vadd.f32 %v12870_v33, %v12936_v52  ;;  %vm17500_vm9 = vcmask 457728   ;;  %vm1358_vm3 = vc.u32 %v1356_v6, %v1352_v23  ;;  %v13054_v49 = vpop.f32.mrf.mxu0 }
 0x288   : > { %v3580_v45 = vsel %vm17500_vm9, %v3531_v58, %v12959_v34  ;;  %v13029_v26 = vadd.s32 1, %v195_v56  ;;  %v1853_v4 = vsel %vm13015_vm7, %v1806_v0, %v1308_v11  ;;  %v1790_v30 = vadd.s32 24, %v844_v46  ;;  %17505 = vst [vmem:[#allocation64_spill] sm:$0xff] %v13054_v49 }
 0x289   : > { %vm17501_vm10 = vcmask 523264   ;;  %v13038_v28 = vadd.s32 1, %v211_v54  ;;  %v13042_v33 = vmul.f32 %v12971_v10, %v13019_v47  ;;  %v1334_v52 = vadd.s32 %v1333_v22, %v1324_v9  ;;  %v3036_v54 = vpop.permute.xlu2 %3035 }
 0x28a   : > { %v3629_v41 = vsel %vm17501_vm10, %v3580_v45, %v3236_v31  ;;  %v1357_v34 = vadd.s32 %v1355_v40, %v1349_v36  ;;  %v2276_v18 = vpack.c.b16 %v11583_v60, %v11583_v60  ;;  %vm17503_vm14 = vcmask 588800   ;;  %v2938_v58 = vpop.permute.xlu1 %2937 }
 0x28b   : > { %17502 = vst [vmem:[#allocation62_spill] sm:$0xff] %v13042_v33  ;;  %8618 = vmatmul.msk.bf16.gmra.mxu3 %vm17503_vm14, %v3629_v41  ;;  %v1359_v11 = vsel %vm1358_vm3, 1, %v17145_v55  ;;  %v871_v35 = vshrl.u32 %v870_v39, 4  ;;  %v889_v23 = vshrl.u32 %v12953_v38, 16  ;;  %v898_v1 = vadd.s32 %v897_v63, %v887_v8 }
 0x28c   : > { %v13052_v7 = vsel %vm1977_vm13, 1.0, %v17180_v3  ;;  %v13058_v61 = vadd.f32 %v12872_v29, %v12966_v17  ;;  %vm1900_vm11 = vcmp.ge.s32.totalorder %v1853_v4, 1  ;;  %v908_v60 = vand.u32 65535, %v13029_v26 }
 0x28d   : > { %17504 = vst [vmem:[#allocation63_spill] sm:$0xff] %v13052_v7  ;;  %vm1947_vm1 = vcmp.le.s32.totalorder %v1853_v4, 16  ;;  %v1837_v6 = vsel %vm1743_vm12, %v1790_v30, %v844_v46  ;;  %v1351_v62 = vshrl.u32 %v12973_v12, 16  ;;  %v1372_v56 = vand.u32 65535, %v13038_v28  ;;  %v2696_v12 = vpop.permute.xlu0 %2695 }
 0x28e   : > { %v1335_v38 = vshrl.u32 %v1334_v52, 4  ;;  %v1361_v0 = vadd.s32 %v1359_v11, %v1357_v34  ;;  %v3288_v9 = vsel %vm3239_vm5, %v2276_v18, %v2519_v42  ;;  %v196_v15 = vadd.s32 184, %v10547_v20  ;;  %vm1994_vm7 = vmand %vm1900_vm11, %vm1947_vm1 }
 0x28f   : > { %v13067_v17 = vmul.f32 %v13042_v33, %v13019_v47  ;;  %v3867_v29 = vmul.f32 %v13052_v7, %v13054_v49  ;;  %v872_v46 = vmul.u32 24, %v871_v35  ;;  %v899_v22 = vadd.s32 %v898_v1, %v889_v23  ;;  %v13239_v47 = vpop.f32.mrf.mxu3 }
 0x290   : > { %vm1884_vm15 = vcmp.ge.s32.totalorder %v1837_v6, 1  ;;  %vm1931_vm8 = vcmp.le.s32.totalorder %v1837_v6, 16  ;;  %v909_v36 = vshrl.u32 %v13029_v26, 16  ;;  %v13073_v42 = vmul.u32 43690, %v908_v60 }
 0x291   : > { %17506 = vst [vmem:[#allocation65_spill] sm:$0xff] %v13067_v17  ;;  %v1353_v40 = vshrl.u32 %v12987_v37, 16  ;;  %v3337_v39 = vsel %vm3289_vm6, %v3288_v9, %v13006_v2  ;;  %v1373_v8 = vshrl.u32 %v13038_v28, 16  ;;  %v13079_v63 = vmul.u32 43690, %v1372_v56  ;;  %vm1978_vm9 = vmand %vm1884_vm15, %vm1931_vm8 }
 0x292   : > { %v1336_v45 = vmul.u32 24, %v1335_v38  ;;  %v1362_v31 = vadd.s32 %v1361_v0, %v1351_v62  ;;  %vm17507_vm5 = vcmask 195584   ;;  %v13082_v30 = vadd.s32 1, %v196_v15  ;;  %v3177_v15 = vpop.permute.xlu1 %3176 }
 0x293   : > { %v3386_v4 = vsel %vm17507_vm5, %v3337_v39, %v2696_v12  ;;  %v13084_v41 = vadd.f32 %v3912_v57, %v3867_v29  ;;  %v13087_v52 = vsel %vm1994_vm7, 1.0, %v17180_v3  ;;  %v873_v37 = vsub.s32 %v12851_v21, %v872_v46 }
 0x294   : > { %17508 = vst [vmem:[#allocation66_spill] sm:$0xff] %v13087_v52  ;;  %v900_v2 = vshrl.u32 %v899_v22, 4  ;;  %v13092_v34 = vmul.f32 %v3867_v29, %v13054_v49  ;;  %v911_v18 = vmul.u32 43691, %v908_v60  ;;  %v13094_v11 = vmul.u32 43691, %v909_v36  ;;  %v3238_v29 = vpop.permute.xlu2 %3237 }
 0x295   : > { %v915_v35 = vshll.u32 %v13073_v42, 16  ;;  %vm17509_vm6 = vcmask 261120   ;;  %v1375_v57 = vmul.u32 43691, %v1372_v56  ;;  %v13098_v1 = vmul.u32 43691, %v1373_v8 }
 0x296   : > { %v3435_v23 = vsel %vm17509_vm6, %v3386_v4, %v2938_v58  ;;  %v1379_v62 = vshll.u32 %v13079_v63, 16  ;;  %v13102_v6 = vsel %vm1978_vm9, 1.0, %v17180_v3  ;;  %v13105_v21 = vsub.s32 %v12859_v13, %v1336_v45  ;;  %v3094_v58 = vpop.permute.xlu0 %3093 }
 0x297   : > { %17510 = vst [vmem:[#allocation67_spill] sm:$0xff] %v13102_v6  ;;  %v1363_v38 = vadd.s32 %v1362_v31, %v1353_v40  ;;  %v937_v60 = vand.u32 65535, %v13082_v30  ;;  %vm1650_vm3 = vcmp.ne.s32.totalorder %v873_v37, 0  ;;  %vm1697_vm13 = vcmp.lt.s32.totalorder %v873_v37, 0 }
 0x298   : > { %v1791_v0 = vadd.s32 24, %v873_v37  ;;  %v901_v9 = vmul.u32 24, %v900_v2  ;;  %vm17511_vm10 = vcmask 326656   ;;  %v917_v46 = vshll.u32 %v13094_v11, 16  ;;  %vm1744_vm1 = vmand %vm1697_vm13, %vm1650_vm3 }
 0x299   : > { %v3484_v56 = vsel %vm17511_vm10, %v3435_v23, %v3036_v54  ;;  %vm919_vm12 = vc.u32 %v911_v18, %v915_v35  ;;  %v921_v22 = vadd.s32 %v915_v35, %v911_v18  ;;  %vm17512_vm14 = vcmask 392192  }
 0x29a   : > { %v3533_v12 = vsel %vm17512_vm14, %v3484_v56, %v3094_v58  ;;  %v1381_v13 = vshll.u32 %v13098_v1, 16  ;;  %vm1383_vm11 = vc.u32 %v1375_v57, %v1379_v62  ;;  %v1385_v40 = vadd.s32 %v1379_v62, %v1375_v57 }
 0x29b   : > { %vm17513_vm7 = vcmask 457728   ;;  %v914_v45 = vmul.u32 43690, %v909_v36  ;;  %v938_v31 = vshrl.u32 %v13082_v30, 16  ;;  %v13115_v54 = vmul.u32 43690, %v937_v60  ;;  %v13123_v36 = vpop.f32.mrf.mxu0 }
 0x29c   : > { %v3582_v39 = vsel %vm17513_vm7, %v3533_v12, %v3177_v15  ;;  %vm1666_vm15 = vcmp.ne.s32.totalorder %v13105_v21, 0  ;;  %vm17514_vm8 = vcmask 523264   ;;  %v1378_v2 = vmul.u32 43690, %v1373_v8  ;;  %17516 = vst [vmem:[#allocation68_spill] sm:$0xff] %v13123_v36 }
 0x29d   : > { %v3631_v4 = vsel %vm17514_vm8, %v3582_v39, %v3238_v29  ;;  %v920_v18 = vsel %vm919_vm12, 1, %v17145_v55  ;;  %vm1713_vm5 = vcmp.lt.s32.totalorder %v13105_v21, 0  ;;  %v1364_v35 = vshrl.u32 %v1363_v38, 4 }
 0x29e   : > { %vm17515_vm9 = vcmask 588800   ;;  %v1384_v23 = vsel %vm1383_vm11, 1, %v17145_v55  ;;  %vm923_vm6 = vc.u32 %v921_v22, %v917_v46  ;;  %v1838_v57 = vsel %vm1744_vm1, %v1791_v0, %v873_v37  ;;  %vm1760_vm1 = vmand %vm1713_vm5, %vm1666_vm15 }
 0x29f   : > { %8619 = vmatmul.msk.bf16.gmra.mxu3 %vm17515_vm9, %v3631_v4  ;;  %v902_v62 = vsub.s32 %v12890_v44, %v901_v9  ;;  %vm1387_vm3 = vc.u32 %v1385_v40, %v1381_v13  ;;  %v197_v15 = vadd.s32 192, %v10547_v20  ;;  %v922_v56 = vadd.s32 %v920_v18, %v914_v45 }
 0x2a0   : > { %v940_v8 = vmul.u32 43691, %v937_v60  ;;  %v13127_v58 = vmul.u32 43691, %v938_v31  ;;  %v944_v29 = vshll.u32 %v13115_v54, 16  ;;  %v1386_v38 = vadd.s32 %v1384_v23, %v1378_v2 }
 0x2a1   : > { %v924_v12 = vsel %vm923_vm6, 1, %v17145_v55  ;;  %v212_v39 = vadd.s32 312, %v10547_v20  ;;  %v13132_v46 = vadd.s32 1, %v197_v15  ;;  %v13136_v37 = vmul.f32 %v13102_v6, %v13123_v36 }
 0x2a2   : > { %v1807_v44 = vadd.s32 24, %v13105_v21  ;;  %v1365_v0 = vmul.u32 24, %v1364_v35  ;;  %v1388_v60 = vsel %vm1387_vm3, 1, %v17145_v55  ;;  %vm1885_vm13 = vcmp.ge.s32.totalorder %v1838_v57, 1 }
 0x2a3   : > { %v1380_v9 = vshrl.u32 %v13079_v63, 16  ;;  %v916_v22 = vshrl.u32 %v13073_v42, 16  ;;  %v966_v13 = vand.u32 65535, %v13132_v46  ;;  %v926_v40 = vadd.s32 %v924_v12, %v922_v56 }
 0x2a4   : > { %v946_v45 = vshll.u32 %v13127_v58, 16  ;;  %vm948_vm10 = vc.u32 %v940_v8, %v944_v29  ;;  %v950_v4 = vadd.s32 %v944_v29, %v940_v8  ;;  %vm1651_vm12 = vcmp.ne.s32.totalorder %v902_v62, 0 }
 0x2a5   : > { %v1390_v2 = vadd.s32 %v1388_v60, %v1386_v38  ;;  %v13144_v18 = vadd.s32 1, %v212_v39  ;;  %v967_v35 = vshrl.u32 %v13132_v46, 16  ;;  %vm1698_vm14 = vcmp.lt.s32.totalorder %v902_v62, 0 }
 0x2a6   : > { %v943_v23 = vmul.u32 43690, %v938_v31  ;;  %v969_v15 = vmul.u32 43691, %v966_v13  ;;  %v13147_v10 = vmul.u32 43690, %v966_v13  ;;  %vm1932_vm11 = vcmp.le.s32.totalorder %v1838_v57, 16  ;;  %vm1745_vm8 = vmand %vm1698_vm14, %vm1651_vm12 }
 0x2a7   : > { %v1792_v42 = vadd.s32 24, %v902_v62  ;;  %v918_v63 = vshrl.u32 %v13094_v11, 16  ;;  %v949_v56 = vsel %vm948_vm10, 1, %v17145_v55  ;;  %v927_v8 = vadd.s32 %v926_v40, %v916_v22  ;;  %vm1979_vm5 = vmand %vm1885_vm13, %vm1932_vm11 }
 0x2a8   : > { %vm13155_vm7 = vc.u32 %v950_v4, %v946_v45  ;;  %v13159_v31 = vmul.u32 43691, %v967_v35  ;;  %v973_v38 = vshll.u32 %v13147_v10, 16  ;;  %v1366_v12 = vsub.s32 %v12924_v43, %v1365_v0 }
 0x2a9   : > { %v1382_v11 = vshrl.u32 %v13098_v1, 16  ;;  %v1391_v39 = vadd.s32 %v1390_v2, %v1380_v9  ;;  %v1401_v60 = vand.u32 65535, %v13144_v18  ;;  %v951_v13 = vadd.s32 %v949_v56, %v943_v23 }
 0x2aa   : > { %v975_v22 = vshll.u32 %v13159_v31, 16  ;;  %vm977_vm15 = vc.u32 %v969_v15, %v973_v38  ;;  %v979_v40 = vadd.s32 %v973_v38, %v969_v15  ;;  %v4012_v45 = vadd.f32 %v13058_v61, %v13092_v34 }
 0x2ab   : > { %v13170_v4 = vsel %vm1760_vm1, %v1807_v44, %v13105_v21  ;;  %v953_v43 = vsel %vm13155_vm7, 1, %v17145_v55  ;;  %v972_v1 = vmul.u32 43690, %v967_v35  ;;  %v3967_v0 = vmul.f32 %v13136_v37, %v13123_v36  ;;  %v13183_v21 = vpop.f32.mrf.mxu0 }
 0x2ac   : > { %v1839_v9 = vsel %vm1745_vm8, %v1792_v42, %v902_v62  ;;  %v928_v2 = vadd.s32 %v927_v8, %v918_v63  ;;  %v978_v23 = vsel %vm977_vm15, 1, %v17145_v55  ;;  %vm1667_vm9 = vcmp.ne.s32.totalorder %v1366_v12, 0  ;;  %17520 = vst [vmem:[#allocation70_spill] sm:$0xff] %v13183_v21 }
 0x2ad   : > { %vm1714_vm6 = vcmp.lt.s32.totalorder %v1366_v12, 0  ;;  %v1392_v61 = vadd.s32 %v1391_v39, %v1382_v11  ;;  %vm981_vm3 = vc.u32 %v979_v40, %v975_v22  ;;  %v13181_v34 = vsel %vm1979_vm5, 1.0, %v17180_v3 }
 0x2ae   : > { %17519 = vst [vmem:[#allocation69_spill] sm:$0xff] %v13181_v34  ;;  %v13185_v57 = vmul.u32 43690, %v1401_v60  ;;  %v945_v44 = vshrl.u32 %v13115_v54, 16  ;;  %v955_v35 = vadd.s32 %v953_v43, %v951_v13  ;;  %vm1886_vm13 = vcmp.ge.s32.totalorder %v1839_v9, 1  ;;  %vm1761_vm12 = vmand %vm1714_vm6, %vm1667_vm9 }
 0x2af   : > { %vm1933_vm10 = vcmp.le.s32.totalorder %v1839_v9, 16  ;;  %v213_v62 = vadd.s32 320, %v10547_v20  ;;  %v980_v15 = vadd.s32 %v978_v23, %v972_v1  ;;  %v1808_v42 = vadd.s32 24, %v1366_v12 }
 0x2b0   : > { %v929_v63 = vshrl.u32 %v928_v2, 4  ;;  %v1402_v56 = vshrl.u32 %v13144_v18, 16  ;;  %v982_v8 = vsel %vm981_vm3, 1, %v17145_v55  ;;  %v3869_v29 = vmul.f32 %v13181_v34, %v13183_v21  ;;  %vm1980_vm14 = vmand %vm1886_vm13, %vm1933_vm10 }
 0x2b1   : > { %v3914_v54 = vadd.f32 %v13084_v41, %v13136_v37  ;;  %v1393_v38 = vshrl.u32 %v1392_v61, 4  ;;  %v1404_v11 = vmul.u32 43691, %v1401_v60  ;;  %v1408_v39 = vshll.u32 %v13185_v57, 16 }
 0x2b2   : > { %v947_v13 = vshrl.u32 %v13127_v58, 16  ;;  %v956_v22 = vadd.s32 %v955_v35, %v945_v44  ;;  %v198_v40 = vadd.s32 200, %v10547_v20  ;;  %v13200_v43 = vadd.f32 %v4012_v45, %v3967_v0 }
 0x2b3   : > { %v13202_v1 = vadd.s32 1, %v213_v62  ;;  %v974_v9 = vshrl.u32 %v13147_v10, 16  ;;  %v984_v2 = vadd.s32 %v982_v8, %v980_v15  ;;  %v13205_v23 = vsel %vm1761_vm12, %v1808_v42, %v1366_v12 }
 0x2b4   : > { %v930_v41 = vmul.u32 24, %v929_v63  ;;  %v13207_v37 = vmul.u32 43691, %v1402_v56  ;;  %v13209_v60 = vadd.s32 1, %v198_v40  ;;  %v13211_v61 = vadd.f32 %v3914_v54, %v3869_v29 }
 0x2b5   : > { %v13214_v58 = vmul.f32 %v3869_v29, %v13183_v21  ;;  %v13217_v45 = vsel %vm1980_vm14, 1.0, %v17180_v3  ;;  %v1394_v0 = vmul.u32 24, %v1393_v38  ;;  %v1407_v44 = vmul.u32 43690, %v1402_v56 }
 0x2b6   : > { %17521 = vst [vmem:[#allocation71_spill] sm:$0xff] %v13217_v45  ;;  %vm1412_vm11 = vc.u32 %v1404_v11, %v1408_v39  ;;  %v957_v10 = vadd.s32 %v956_v22, %v947_v13  ;;  %v995_v12 = vand.u32 65535, %v13209_v60  ;;  %v1430_v35 = vand.u32 65535, %v13202_v1 }
 0x2b7   : > { %v976_v62 = vshrl.u32 %v13159_v31, 16  ;;  %v985_v15 = vadd.s32 %v984_v2, %v974_v9  ;;  %v996_v42 = vshrl.u32 %v13209_v60, 16  ;;  %v931_v63 = vsub.s32 %v13029_v26, %v930_v41 }
 0x2b8   : > { %v1410_v8 = vshll.u32 %v13207_v37, 16  ;;  %v1414_v29 = vadd.s32 %v1408_v39, %v1404_v11  ;;  %v214_v54 = vadd.s32 328, %v10547_v20  ;;  %v13227_v56 = vsub.s32 %v13038_v28, %v1394_v0 }
 0x2b9   : > { %v1409_v38 = vshrl.u32 %v13185_v57, 16  ;;  %v1413_v13 = vsel %vm1412_vm11, 1, %v17145_v55  ;;  %v999_v22 = vmul.u32 43690, %v995_v12  ;;  %v958_v40 = vshrl.u32 %v957_v10, 4 }
 0x2ba   : > { %v1431_v31 = vshrl.u32 %v13202_v1, 16  ;;  %v998_v9 = vmul.u32 43691, %v995_v12  ;;  %v1000_v2 = vmul.u32 43691, %v996_v42  ;;  %v13233_v41 = vmul.u32 43690, %v1430_v35 }
 0x2bb   : > { %v986_v11 = vadd.s32 %v985_v15, %v976_v62  ;;  %v1002_v39 = vshll.u32 %v999_v22, 16  ;;  %vm1652_vm1 = vcmp.ne.s32.totalorder %v931_v63, 0  ;;  %vm1699_vm7 = vcmp.lt.s32.totalorder %v931_v63, 0 }
 0x2bc   : > { %vm1416_vm8 = vc.u32 %v1414_v29, %v1410_v8  ;;  %v13235_v28 = vadd.s32 1, %v214_v54  ;;  %v1793_v57 = vadd.s32 24, %v931_v63  ;;  %v1415_v0 = vadd.s32 %v1413_v13, %v1407_v44  ;;  %vm1746_vm5 = vmand %vm1699_vm7, %vm1652_vm1  ;;  %v13246_v29 = vpop.f32.mrf.mxu0 }
 0x2bd   : > { %v1001_v34 = vmul.u32 43690, %v996_v42  ;;  %v1004_v6 = vshll.u32 %v1000_v2, 16  ;;  %v959_v10 = vmul.u32 24, %v958_v40  ;;  %v13237_v7 = vmul.u32 43691, %v1431_v31  ;;  %17522 = vst [vmem:[#allocation72_spill] sm:$0xff] %v13246_v29 }
 0x2be   : > { %vm1006_vm15 = vc.u32 %v998_v9, %v1002_v39  ;;  %v1008_v12 = vadd.s32 %v1002_v39, %v998_v9  ;;  %v1417_v62 = vsel %vm1416_vm8, 1, %v17145_v55  ;;  %v1433_v15 = vmul.u32 43691, %v1430_v35 }
 0x2bf   : > { %v1437_v26 = vshll.u32 %v13233_v41, 16  ;;  %v987_v8 = vshrl.u32 %v986_v11, 4  ;;  %vm1668_vm9 = vcmp.ne.s32.totalorder %v13227_v56, 0  ;;  %v1459_v44 = vand.u32 65535, %v13235_v28 }
 0x2c0   : > { %v1007_v42 = vsel %vm1006_vm15, 1, %v17145_v55  ;;  %vm1010_vm6 = vc.u32 %v1008_v12, %v1004_v6  ;;  %v1003_v54 = vshrl.u32 %v999_v22, 16  ;;  %v215_v9 = vadd.s32 336, %v10547_v20 }
 0x2c1   : > { %v1009_v13 = vadd.s32 %v1007_v42, %v1001_v34  ;;  %v1011_v40 = vsel %vm1010_vm6, 1, %v17145_v55  ;;  %v1840_v39 = vsel %vm1746_vm5, %v1793_v57, %v931_v63  ;;  %v1419_v35 = vadd.s32 %v1417_v62, %v1415_v0  ;;  %v13258_v0 = vpop.f32.mrf.mxu3 }
 0x2c2   : > { %v960_v21 = vsub.s32 %v13082_v30, %v959_v10  ;;  %v1439_v11 = vshll.u32 %v13237_v7, 16  ;;  %v1443_v36 = vadd.s32 %v1437_v26, %v1433_v15  ;;  %v988_v49 = vmul.u32 24, %v987_v8 }
 0x2c3   : > { %v1005_v17 = vshrl.u32 %v1000_v2, 16  ;;  %v1013_v33 = vadd.s32 %v1011_v40, %v1009_v13  ;;  %vm1715_vm3 = vcmp.lt.s32.totalorder %v13227_v56, 0  ;;  %vm1441_vm13 = vc.u32 %v1433_v15, %v1437_v26 }
 0x2c4   : > { %v1460_v6 = vshrl.u32 %v13235_v28, 16  ;;  %v13254_v34 = vmul.u32 43690, %v1459_v44  ;;  %vm1887_vm10 = vcmp.ge.s32.totalorder %v1840_v39, 1  ;;  %vm1934_vm12 = vcmp.le.s32.totalorder %v1840_v39, 16  ;;  %v13273_v8 = vpop.f32.mrf.mxu0  ;;  %vm13283_vm8 = vmand %vm1715_vm3, %vm1668_vm9 }
 0x2c5   : > { %v1014_v22 = vadd.s32 %v1013_v33, %v1003_v54  ;;  %v13256_v63 = vadd.s32 1, %v215_v9  ;;  %v1420_v57 = vadd.s32 %v1419_v35, %v1409_v38  ;;  %vm1653_vm14 = vcmp.ne.s32.totalorder %v960_v21, 0  ;;  %17525 = vst [vmem:[#allocation73_spill] sm:$0xff] %v13273_v8  ;;  %vm1981_vm15 = vmand %vm1887_vm10, %vm1934_vm12 }
 0x2c6   : > { %vm1700_vm11 = vcmp.lt.s32.totalorder %v960_v21, 0  ;;  %v1436_v30 = vmul.u32 43690, %v1431_v31  ;;  %v1442_v2 = vsel %vm1441_vm13, 1, %v17145_v55  ;;  %vm13261_vm1 = vc.u32 %v1443_v36, %v1439_v11 }
 0x2c7   : > { %v989_v26 = vsub.s32 %v13132_v46, %v988_v49  ;;  %v1015_v12 = vadd.s32 %v1014_v22, %v1005_v17  ;;  %v1794_v62 = vadd.s32 24, %v960_v21  ;;  %v1462_v15 = vmul.u32 43691, %v1459_v44  ;;  %vm1747_vm7 = vmand %vm1700_vm11, %vm1653_vm14 }
 0x2c8   : > { %v13266_v33 = vmul.u32 43691, %v1460_v6  ;;  %v1466_v38 = vshll.u32 %v13254_v34, 16  ;;  %v13271_v31 = vadd.f32 %v13200_v43, %v13214_v58  ;;  %v1488_v42 = vand.u32 65535, %v13256_v63 }
 0x2c9   : > { %v1016_v36 = vshrl.u32 %v1015_v12, 4  ;;  %v216_v54 = vadd.s32 344, %v10547_v20  ;;  %v3870_v49 = vmul.f32 %v13217_v45, %v13246_v29  ;;  %v1809_v46 = vadd.s32 24, %v13227_v56 }
 0x2ca   : > { %v17528_v43 = vshrl.u32 %v13207_v37, 16  ;;  %v1444_v44 = vadd.s32 %v1442_v2, %v1436_v30  ;;  %v1446_v13 = vsel %vm13261_vm1, 1, %v17145_v55  ;;  %vm1654_vm5 = vcmp.ne.s32.totalorder %v989_v26, 0 }
 0x2cb   : > { %vm1701_vm6 = vcmp.lt.s32.totalorder %v989_v26, 0  ;;  %v1017_v40 = vmul.u32 24, %v1016_v36  ;;  %v1841_v9 = vsel %vm1747_vm7, %v1794_v62, %v960_v21  ;;  %v1468_v35 = vshll.u32 %v13266_v33, 16 }
 0x2cc   : > { %v1421_v58 = vadd.s32 %v1420_v57, %v17528_v43  ;;  %v1472_v11 = vadd.s32 %v1466_v38, %v1462_v15  ;;  %v1489_v22 = vshrl.u32 %v13256_v63, 16  ;;  %v1795_v12 = vadd.s32 24, %v989_v26  ;;  %vm1748_vm3 = vmand %vm1701_vm6, %vm1654_vm5 }
 0x2cd   : > { %vm1470_vm9 = vc.u32 %v1462_v15, %v1466_v38  ;;  %v13297_v37 = vmul.u32 43690, %v1488_v42  ;;  %v13299_v57 = vadd.s32 1, %v216_v54  ;;  %v13304_v39 = vsel %vm13283_vm8, %v1809_v46, %v13227_v56  ;;  %v13314_v56 = vpop.f32.mrf.mxu3 }
 0x2ce   : > { %v13307_v30 = vsel %vm1981_vm15, 1.0, %v17180_v3  ;;  %v1422_v21 = vshrl.u32 %v1421_v58, 4  ;;  %v1018_v2 = vsub.s32 %v13209_v60, %v1017_v40  ;;  %vm1888_vm13 = vcmp.ge.s32.totalorder %v1841_v9, 1 }
 0x2cf   : > { %17529 = vst [vmem:[#allocation74_spill] sm:$0xff] %v13307_v30  ;;  %v1438_v10 = vshrl.u32 %v13233_v41, 16  ;;  %v1448_v62 = vadd.s32 %v1446_v13, %v1444_v44  ;;  %v1465_v15 = vmul.u32 43690, %v1460_v6  ;;  %vm1935_vm10 = vcmp.le.s32.totalorder %v1841_v9, 16  ;;  %v13319_v41 = vpop.f32.mrf.mxu0 }
 0x2d0   : > { %v1471_v38 = vsel %vm1470_vm9, 1, %v17145_v55  ;;  %vm1474_vm12 = vc.u32 %v1472_v11, %v1468_v35  ;;  %v13312_v36 = vmul.u32 43691, %v1489_v22  ;;  %v1842_v54 = vsel %vm1748_vm3, %v1795_v12, %v989_v26  ;;  %17530 = vst [vmem:[#allocation75_spill] sm:$0xff] %v13319_v41  ;;  %vm1982_vm1 = vmand %vm1888_vm13, %vm1935_vm10 }
 0x2d1   : > { %v1491_v17 = vmul.u32 43691, %v1488_v42  ;;  %v1495_v46 = vshll.u32 %v13297_v37, 16  ;;  %v1517_v43 = vand.u32 65535, %v13299_v57  ;;  %v1423_v60 = vmul.u32 24, %v1422_v21 }
 0x2d2   : > { %v1440_v58 = vshrl.u32 %v13237_v7, 16  ;;  %vm1655_vm14 = vcmp.ne.s32.totalorder %v1018_v2, 0  ;;  %vm1702_vm11 = vcmp.lt.s32.totalorder %v1018_v2, 0  ;;  %v1449_v6 = vadd.s32 %v1448_v62, %v1438_v10 }
 0x2d3   : > { %v1473_v44 = vadd.s32 %v1471_v38, %v1465_v15  ;;  %v1475_v13 = vsel %vm1474_vm12, 1, %v17145_v55  ;;  %v217_v40 = vadd.s32 352, %v10547_v20  ;;  %vm1889_vm7 = vcmp.ge.s32.totalorder %v1842_v54, 1  ;;  %vm1749_vm15 = vmand %vm1702_vm11, %vm1655_vm14 }
 0x2d4   : > { %vm1936_vm8 = vcmp.le.s32.totalorder %v1842_v54, 16  ;;  %v1796_v26 = vadd.s32 24, %v1018_v2  ;;  %v1497_v42 = vshll.u32 %v13312_v36, 16  ;;  %vm1499_vm5 = vc.u32 %v1491_v17, %v1495_v46 }
 0x2d5   : > { %v1501_v7 = vadd.s32 %v1495_v46, %v1491_v17  ;;  %v13326_v35 = vmul.u32 43690, %v1517_v43  ;;  %v13328_v11 = vadd.s32 1, %v217_v40  ;;  %v3969_v12 = vmul.f32 %v3870_v49, %v13246_v29  ;;  %vm1983_vm6 = vmand %vm1889_vm7, %vm1936_vm8 }
 0x2d6   : > { %v3871_v21 = vmul.f32 %v13307_v30, %v13273_v8  ;;  %v3916_v9 = vadd.f32 %v13211_v61, %v3870_v49  ;;  %v13335_v10 = vsub.s32 %v13144_v18, %v1423_v60  ;;  %v13338_v62 = vsel %vm1982_vm1, 1.0, %v17180_v3  ;;  %v13347_v49 = vpop.f32.mrf.mxu3 }
 0x2d7   : > { %17531 = vst [vmem:[#allocation76_spill] sm:$0xff] %v13328_v11  ;;  %v13340_v15 = vadd.s32 %v1449_v6, %v1440_v58  ;;  %v1467_v38 = vshrl.u32 %v13254_v34, 16  ;;  %v1494_v17 = vmul.u32 43690, %v1489_v22  ;;  %v1477_v46 = vadd.s32 %v1475_v13, %v1473_v44  ;;  %v13361_v44 = vpop.f32.mrf.mxu0 }
 0x2d8   : > { %17532 = vst [vmem:[#allocation77_spill] sm:$0xff] %v13338_v62  ;;  %v1843_v40 = vsel %vm1749_vm15, %v1796_v26, %v1018_v2  ;;  %v1500_v30 = vsel %vm1499_vm5, 1, %v17145_v55  ;;  %v1518_v61 = vshrl.u32 %v13299_v57, 16  ;;  %vm1503_vm9 = vc.u32 %v1501_v7, %v1497_v42 }
 0x2d9   : > { %17533 = vst [vmem:[#allocation78_spill] sm:$0xff] %v13347_v49  ;;  %v1520_v18 = vmul.u32 43691, %v1517_v43  ;;  %v1524_v60 = vshll.u32 %v13326_v35, 16  ;;  %v1546_v58 = vand.u32 65535, %v13328_v11  ;;  %v3970_v34 = vmul.f32 %v3871_v21, %v13273_v8 }
 0x2da   : > { %v4015_v22 = vadd.f32 %v13271_v31, %v3969_v12  ;;  %v13354_v54 = vadd.s32 24, %v13335_v10  ;;  %v3872_v2 = vmul.f32 %v13338_v62, %v13319_v41  ;;  %v13359_v6 = vsel %vm1983_vm6, 1.0, %v17180_v3  ;;  %17535 = vst [vmem:[#allocation80_spill] sm:$0xff] %v13361_v44 }
 0x2db   : > { %17534 = vst [vmem:[#allocation79_spill] sm:$0xff] %v13359_v6  ;;  %vm1890_vm3 = vcmp.ge.s32.totalorder %v1843_v40, 1  ;;  %vm1937_vm13 = vcmp.le.s32.totalorder %v1843_v40, 16  ;;  %v1502_v43 = vadd.s32 %v1500_v30, %v1494_v17  ;;  %v1469_v13 = vshrl.u32 %v13266_v33, 16 }
 0x2dc   : > { %v1478_v26 = vadd.s32 %v1477_v46, %v1467_v38  ;;  %v1504_v42 = vsel %vm1503_vm9, 1, %v17145_v55  ;;  %v13365_v31 = vmul.u32 43691, %v1518_v61  ;;  %vm1528_vm10 = vc.u32 %v1520_v18, %v1524_v60  ;;  %vm1984_vm12 = vmand %vm1890_vm3, %vm1937_vm13 }
 0x2dd   : > { %v1547_v12 = vshrl.u32 %v13328_v11, 16  ;;  %v13369_v62 = vmul.u32 43690, %v1546_v58  ;;  %v3917_v45 = vadd.f32 %v3916_v9, %v3871_v21  ;;  %v3971_v8 = vmul.f32 %v3872_v2, %v13319_v41 }
 0x2de   : > { %v3873_v30 = vmul.f32 %v13359_v6, %v13361_v44  ;;  %v218_v33 = vadd.s32 360, %v10547_v20  ;;  %v4016_v38 = vadd.f32 %v4015_v22, %v3970_v34  ;;  %v1496_v17 = vshrl.u32 %v13297_v37, 16 }
 0x2df   : > { %v1506_v46 = vadd.s32 %v1504_v42, %v1502_v43  ;;  %v1523_v40 = vmul.u32 43690, %v1518_v61  ;;  %v13376_v7 = vadd.s32 %v1478_v26, %v1469_v13  ;;  %v1526_v29 = vshll.u32 %v13365_v31, 16  ;;  %v13389_v43 = vpop.f32.mrf.mxu3  ;;  %v13391_v13 = vpop.f32.mrf.mxu0 }
 0x2e0   : > { %v1529_v11 = vsel %vm1528_vm10, 1, %v17145_v55  ;;  %v1530_v21 = vadd.s32 %v1524_v60, %v1520_v18  ;;  %v13381_v9 = vsel %vm1984_vm12, 1.0, %v17180_v3  ;;  %v1549_v41 = vmul.u32 43691, %v1546_v58 }
 0x2e1   : > { %17536 = vst [vmem:[#allocation81_spill] sm:$0xff] %v13381_v9  ;;  %v13383_v6 = vmul.u32 43691, %v1547_v12  ;;  %v1553_v49 = vshll.u32 %v13369_v62, 16  ;;  %v3918_v34 = vadd.f32 %v3917_v45, %v3872_v2  ;;  %v3972_v37 = vmul.f32 %v3873_v30, %v13361_v44 }
 0x2e2   : > { %v4017_v22 = vadd.f32 %v4016_v38, %v3971_v8  ;;  %v13387_v61 = vadd.s32 1, %v218_v33  ;;  %v13394_v60 = vadd.s32 %v1506_v46, %v1496_v17  ;;  %v1525_v58 = vshrl.u32 %v13326_v35, 16 }
 0x2e3   : > { %v1531_v26 = vadd.s32 %v1529_v11, %v1523_v40  ;;  %v3919_v42 = vadd.f32 %v3918_v34, %v3873_v30  ;;  %v3874_v45 = vmul.f32 %v13381_v9, %v13391_v13  ;;  %vm1532_vm14 = vc.u32 %v1530_v21, %v1526_v29 }
 0x2e4   : > { %v1575_v8 = vand.u32 65535, %v13387_v61  ;;  %v1555_v2 = vshll.u32 %v13383_v6, 16  ;;  %vm1557_vm11 = vc.u32 %v1549_v41, %v1553_v49  ;;  %v1576_v33 = vshrl.u32 %v13387_v61, 16 }
 0x2e5   : > { %v219_v38 = vadd.s32 368, %v10547_v20  ;;  %v4018_v18 = vadd.f32 %v4017_v22, %v3972_v37  ;;  %v3920_v17 = vadd.f32 %v3919_v42, %v3874_v45  ;;  %v3973_v46 = vmul.f32 %v3874_v45, %v13391_v13 }
 0x2e6   : > { %v1559_v35 = vadd.s32 %v1553_v49, %v1549_v41  ;;  %v1533_v11 = vsel %vm1532_vm14, 1, %v17145_v55  ;;  %v1578_v30 = vmul.u32 43691, %v1575_v8  ;;  %v13405_v40 = vmul.u32 43690, %v1575_v8 }
 0x2e7   : > { %v13407_v29 = vmul.u32 43691, %v1576_v33  ;;  %v3921_v21 = vadd.f32 %v3920_v17, %v11945_v19  ;;  %v4019_v34 = vadd.f32 %v4018_v18, %v3973_v46  ;;  %v1552_v9 = vmul.u32 43690, %v1547_v12  ;;  %v13422_v12 = vpop.f32.mrf.mxu3 }
 0x2e8   : > { %v13410_v44 = vadd.s32 1, %v219_v38  ;;  %v1558_v20 = vsel %vm1557_vm11, 1, %v17145_v55  ;;  %v1581_v37 = vmul.u32 43690, %v1576_v33  ;;  %v1582_v22 = vshll.u32 %v13405_v40, 16 }
 0x2e9   : > { %v1584_v41 = vshll.u32 %v13407_v29, 16  ;;  %vm1901_vm1 = vcmp.ge.s32.totalorder %v13170_v4, 1  ;;  %vm1948_vm7 = vcmp.le.s32.totalorder %v13170_v4, 16  ;;  %v3922_v49 = vadd.f32 %v3921_v21, %v11952_v16  ;;  %v17542_v4 = vld [vmem:[#allocation56_spill] sm:$0xff] }
 0x2ea   : > { %v4020_v42 = vadd.f32 %v4019_v34, %v11968_v50  ;;  %vm1561_vm8 = vc.u32 %v1559_v35, %v1555_v2  ;;  %v1604_v19 = vand.u32 65535, %v13410_v44  ;;  %vm1902_vm15 = vcmp.ge.s32.totalorder %v13205_v23, 1  ;;  %vm13460_vm12 = vmand %vm1901_vm1, %vm1948_vm7 }
 0x2eb   : > { %vm1949_vm5 = vcmp.le.s32.totalorder %v13205_v23, 16  ;;  %v1535_v18 = vadd.s32 %v1533_v11, %v1531_v26  ;;  %vm1586_vm6 = vc.u32 %v1578_v30, %v1582_v22  ;;  %v1588_v45 = vadd.s32 %v1582_v22, %v1578_v30 }
 0x2ec   : > { %v1605_v8 = vshrl.u32 %v13410_v44, 16  ;;  %vm1669_vm9 = vcmp.ne.s32.totalorder %v13335_v10, 0  ;;  %vm1716_vm3 = vcmp.lt.s32.totalorder %v13335_v10, 0  ;;  %v3923_v16 = vadd.f32 %v3922_v49, %v12350_v59  ;;  %vm1996_vm11 = vmand %vm1902_vm15, %vm1949_vm5 }
 0x2ed   : > { %v4021_v50 = vadd.f32 %v4020_v42, %v12007_v48  ;;  %v1560_v2 = vadd.s32 %v1558_v20, %v1552_v9  ;;  %v1587_v33 = vsel %vm1586_vm6, 1, %v17145_v55  ;;  %v1562_v38 = vsel %vm1561_vm8, 1, %v17145_v55  ;;  %vm1763_vm1 = vmand %vm1716_vm3, %vm1669_vm9 }
 0x2ee   : > { %v1589_v17 = vadd.s32 %v1587_v33, %v1581_v37  ;;  %vm1590_vm13 = vc.u32 %v1588_v45, %v1584_v41  ;;  %v13431_v26 = vmul.u32 43690, %v1604_v19  ;;  %v3924_v46 = vadd.f32 %v3923_v16, %v12408_v5 }
 0x2ef   : > { %v4022_v35 = vadd.f32 %v4021_v50, %v12377_v53  ;;  %v1591_v11 = vsel %vm1590_vm13, 1, %v17145_v55  ;;  %v13436_v30 = vmul.u32 43691, %v1605_v8  ;;  %v1527_v59 = vshrl.u32 %v13365_v31, 16 }
 0x2f0   : > { %v1536_v48 = vadd.s32 %v1535_v18, %v1525_v58  ;;  %v1554_v9 = vshrl.u32 %v13369_v62, 16  ;;  %v1607_v21 = vmul.u32 43691, %v1604_v19  ;;  %v3925_v34 = vadd.f32 %v3924_v46, %v12605_v24 }
 0x2f1   : > { %v4023_v20 = vadd.f32 %v4022_v35, %v12590_v51  ;;  %v1564_v37 = vadd.s32 %v1562_v38, %v1560_v2  ;;  %v1611_v22 = vshll.u32 %v13431_v26, 16  ;;  %v17537_v5 = vshrl.u32 %v13340_v15, 4 }
 0x2f2   : > { %v1583_v41 = vshrl.u32 %v13405_v40, 16  ;;  %v1593_v49 = vadd.s32 %v1591_v11, %v1589_v17  ;;  %v1613_v42 = vshll.u32 %v13436_v30, 16  ;;  %v1480_v31 = vshrl.u32 %v13376_v7, 4  ;;  %v17543_v17 = vld [vmem:[#allocation59_spill] sm:$0xff] }
 0x2f3   : > { %v1452_v53 = vmul.u32 24, %v17537_v5  ;;  %v3926_v62 = vadd.f32 %v3925_v34, %v12644_v14  ;;  %v4024_v58 = vadd.f32 %v4023_v20, %v12635_v27  ;;  %v1610_v24 = vmul.u32 43690, %v1605_v8  ;;  %v13464_v14 = vpop.f32.mrf.mxu3 }
 0x2f4   : > { %v17538_v51 = vshrl.u32 %v13312_v36, 16  ;;  %v1537_v18 = vadd.s32 %v1536_v48, %v1527_v59  ;;  %vm1615_vm10 = vc.u32 %v1607_v21, %v1611_v22  ;;  %v1617_v15 = vadd.s32 %v1611_v22, %v1607_v21  ;;  %v17547_v22 = vld [vmem:[#allocation65_spill] sm:$0xff] }
 0x2f5   : > { %v3927_v45 = vadd.f32 %v3926_v62, %v12845_v25  ;;  %v4025_v40 = vadd.f32 %v4024_v58, %v12713_v32  ;;  %v1556_v16 = vshrl.u32 %v13383_v6, 16  ;;  %v1565_v50 = vadd.s32 %v1564_v37, %v1554_v9  ;;  %v17541_v32 = vld [vmem:[#allocation54_spill] sm:$0xff] }
 0x2f6   : > { %v1508_v19 = vadd.s32 %v13394_v60, %v17538_v51  ;;  %v1585_v36 = vshrl.u32 %v13407_v29, 16  ;;  %v1594_v7 = vadd.s32 %v1593_v49, %v1583_v41  ;;  %v1616_v25 = vsel %vm1615_vm10, 1, %v17145_v55  ;;  %v17546_v9 = vld [vmem:[#allocation62_spill] sm:$0xff] }
 0x2f7   : > { %vm1619_vm14 = vc.u32 %v1617_v15, %v1613_v42  ;;  %v4026_v6 = vadd.f32 %v4025_v40, %v17541_v32  ;;  %v3928_v60 = vadd.f32 %v3927_v45, %v17542_v4  ;;  %v1618_v8 = vadd.s32 %v1616_v25, %v1610_v24 }
 0x2f8   : > { %v1620_v2 = vsel %vm1619_vm14, 1, %v17145_v55  ;;  %v3884_v33 = vmul.f32 %v13087_v52, %v13239_v47  ;;  %v1453_v29 = vsub.s32 %v13202_v1, %v1452_v53  ;;  %v1481_v38 = vmul.u32 24, %v1480_v31 }
 0x2f9   : > { %v1509_v23 = vshrl.u32 %v1508_v19, 4  ;;  %v4027_v46 = vadd.f32 %v4026_v6, %v17543_v17  ;;  %v1566_v35 = vadd.s32 %v1565_v50, %v1556_v16  ;;  %v1612_v11 = vshrl.u32 %v13431_v26, 16  ;;  %v17551_v6 = vld [vmem:[#allocation76_spill] sm:$0xff] }
 0x2fa   : > { %v1622_v59 = vadd.s32 %v1620_v2, %v1618_v8  ;;  %v13487_v55 = vsel %vm13460_vm12, 1.0, %v17180_v3  ;;  %v13490_v48 = vsel %vm1996_vm11, 1.0, %v17180_v3  ;;  %vm1903_vm7 = vcmp.ge.s32.totalorder %v13304_v39, 1 }
 0x2fb   : > { %17544 = vst [vmem:[#allocation54_spill] sm:$0xff] %v13487_v55  ;;  %vm1950_vm8 = vcmp.le.s32.totalorder %v13304_v39, 16  ;;  %v1857_v1 = vsel %vm1763_vm1, %v13354_v54, %v13335_v10  ;;  %v3929_v21 = vadd.f32 %v3928_v60, %v17546_v9  ;;  %v1538_v34 = vshrl.u32 %v1537_v18, 4 }
 0x2fc   : > { %17545 = vst [vmem:[#allocation56_spill] sm:$0xff] %v13490_v48  ;;  %v1595_v26 = vadd.s32 %v1594_v7, %v1585_v36  ;;  %vm1670_vm15 = vcmp.ne.s32.totalorder %v1453_v29, 0  ;;  %vm1717_vm5 = vcmp.lt.s32.totalorder %v1453_v29, 0  ;;  %v1482_v20 = vsub.s32 %v13235_v28, %v1481_v38  ;;  %vm1997_vm6 = vmand %vm1903_vm7, %vm1950_vm8  ;;  %v13507_v28 = vpop.f32.mrf.mxu3  ;;  %v17549_v36 = vld [vmem:[#allocation78_spill] sm:$0xff] }
 0x2fd   : > { %v1510_v37 = vmul.u32 24, %v1509_v23  ;;  %v4028_v5 = vadd.f32 %v4027_v46, %v17547_v22  ;;  %v1567_v53 = vshrl.u32 %v1566_v35, 4  ;;  %v1614_v41 = vshrl.u32 %v13436_v30, 16  ;;  %vm1764_vm13 = vmand %vm1717_vm5, %vm1670_vm15 }
 0x2fe   : > { %v1623_v49 = vadd.s32 %v1622_v59, %v1612_v11  ;;  %v3983_v42 = vmul.f32 %v3884_v33, %v13239_v47  ;;  %v3885_v10 = vmul.f32 %v13487_v55, %v13258_v0  ;;  %vm1904_vm9 = vcmp.ge.s32.totalorder %v1857_v1, 1 }
 0x2ff   : > { %vm1951_vm3 = vcmp.le.s32.totalorder %v1857_v1, 16  ;;  %v1811_v54 = vadd.s32 24, %v1453_v29  ;;  %v3930_v31 = vadd.f32 %v3929_v21, %v3884_v33  ;;  %v1539_v62 = vmul.u32 24, %v1538_v34 }
 0x300   : > { %v1596_v58 = vshrl.u32 %v1595_v26, 4  ;;  %v3886_v30 = vmul.f32 %v13490_v48, %v13314_v56  ;;  %vm1671_vm10 = vcmp.ne.s32.totalorder %v1482_v20, 0  ;;  %vm1718_vm12 = vcmp.lt.s32.totalorder %v1482_v20, 0  ;;  %vm1998_vm14 = vmand %vm1904_vm9, %vm1951_vm3 }
 0x301   : > { %v1511_v24 = vsub.s32 %v13256_v63, %v1510_v37  ;;  %v13515_v39 = vsel %vm1997_vm6, 1.0, %v17180_v3  ;;  %v4029_v51 = vadd.f32 %v4028_v5, %v3983_v42  ;;  %v1568_v19 = vmul.u32 24, %v1567_v53  ;;  %vm1765_vm11 = vmand %vm1718_vm12, %vm1671_vm10 }
 0x302   : > { %17548 = vst [vmem:[#allocation59_spill] sm:$0xff] %v13515_v39  ;;  %v1624_v18 = vadd.s32 %v1623_v49, %v1614_v41  ;;  %v3984_v15 = vmul.f32 %v3885_v10, %v13258_v0  ;;  %v1812_v45 = vadd.s32 24, %v1482_v20  ;;  %v1858_v40 = vsel %vm1764_vm13, %v1811_v54, %v1453_v29 }
 0x303   : > { %v3931_v16 = vadd.f32 %v3930_v31, %v3885_v10  ;;  %v1540_v50 = vsub.s32 %v13299_v57, %v1539_v62  ;;  %v1597_v27 = vmul.u32 24, %v1596_v58  ;;  %v3985_v63 = vmul.f32 %v3886_v30, %v13314_v56 }
 0x304   : > { %v3887_v7 = vmul.f32 %v13515_v39, %v17549_v36  ;;  %vm1672_vm1 = vcmp.ne.s32.totalorder %v1511_v24, 0  ;;  %vm1719_vm7 = vcmp.lt.s32.totalorder %v1511_v24, 0  ;;  %v13525_v25 = vsel %vm1998_vm14, 1.0, %v17180_v3  ;;  %v13534_v17 = vpop.f32.mrf.mxu3 }
 0x305   : > { %17550 = vst [vmem:[#allocation62_spill] sm:$0xff] %v13525_v25  ;;  %v4030_v32 = vadd.f32 %v4029_v51, %v3984_v15  ;;  %v1569_v4 = vsub.s32 %v17551_v6, %v1568_v19  ;;  %v1625_v60 = vshrl.u32 %v1624_v18, 4  ;;  %vm1905_vm8 = vcmp.ge.s32.totalorder %v1858_v40, 1  ;;  %vm13528_vm5 = vmand %vm1719_vm7, %vm1672_vm1 }
 0x306   : > { %vm1952_vm15 = vcmp.le.s32.totalorder %v1858_v40, 16  ;;  %v1859_v8 = vsel %vm1765_vm11, %v1812_v45, %v1482_v20  ;;  %v1813_v2 = vadd.s32 24, %v1511_v24  ;;  %v3932_v33 = vadd.f32 %v3931_v16, %v3886_v30 }
 0x307   : > { %vm1673_vm6 = vcmp.ne.s32.totalorder %v1540_v50, 0  ;;  %vm1720_vm9 = vcmp.lt.s32.totalorder %v1540_v50, 0  ;;  %v1598_v29 = vsub.s32 %v13387_v61, %v1597_v27  ;;  %v3986_v38 = vmul.f32 %v3887_v7, %v17549_v36  ;;  %vm1999_vm3 = vmand %vm1905_vm8, %vm1952_vm15 }
 0x308   : > { %v1814_v23 = vadd.s32 24, %v1540_v50  ;;  %v4031_v46 = vadd.f32 %v4030_v32, %v3985_v63  ;;  %vm1674_vm13 = vcmp.ne.s32.totalorder %v1569_v4, 0  ;;  %vm1721_vm10 = vcmp.lt.s32.totalorder %v1569_v4, 0  ;;  %vm1767_vm11 = vmand %vm1720_vm9, %vm1673_vm6 }
 0x309   : > { %v1626_v35 = vmul.u32 24, %v1625_v60  ;;  %v3888_v11 = vmul.f32 %v13525_v25, %v13389_v43  ;;  %vm1906_vm12 = vcmp.ge.s32.totalorder %v1859_v8, 1  ;;  %vm1953_vm14 = vcmp.le.s32.totalorder %v1859_v8, 16  ;;  %vm1768_vm8 = vmand %vm1721_vm10, %vm1674_vm13  ;;  %v17594_v25 = vld [vmem:[#allocation61_spill] sm:$0xff] }
 0x30a   : > { %v1860_v59 = vsel %vm13528_vm5, %v1813_v2, %v1511_v24  ;;  %v3933_v61 = vadd.f32 %v3932_v33, %v3887_v7  ;;  %v1815_v1 = vadd.s32 24, %v1569_v4  ;;  %vm1675_vm1 = vcmp.ne.s32.totalorder %v1598_v29, 0  ;;  %vm2000_vm15 = vmand %vm1906_vm12, %vm1953_vm14 }
 0x30b   : > { %vm1722_vm7 = vcmp.lt.s32.totalorder %v1598_v29, 0  ;;  %v13542_v9 = vsel %vm1999_vm3, 1.0, %v17180_v3  ;;  %v4032_v21 = vadd.f32 %v4031_v46, %v3986_v38  ;;  %v1861_v34 = vsel %vm1767_vm11, %v1814_v23, %v1540_v50 }
 0x30c   : > { %17554 = vst [vmem:[#allocation65_spill] sm:$0xff] %v13542_v9  ;;  %v1816_v26 = vadd.s32 24, %v1598_v29  ;;  %v1627_v20 = vsub.s32 %v13410_v44, %v1626_v35  ;;  %vm1907_vm0 = vcmp.ge.s32.totalorder %v1860_v59, 1  ;;  %vm1954_vm4 = vcmp.le.s32.totalorder %v1860_v59, 16  ;;  %vm1769_vm2 = vmand %vm1722_vm7, %vm1675_vm1 }
 0x30d   : > { %v3987_v37 = vmul.f32 %v3888_v11, %v13389_v43  ;;  %v3889_v22 = vmul.f32 %v13542_v9, %v13422_v12  ;;  %v3934_v5 = vadd.f32 %v3933_v61, %v3888_v11  ;;  %v1862_v53 = vsel %vm1768_vm8, %v1815_v1, %v1569_v4  ;;  %vm2001_vm9 = vmand %vm1907_vm0, %vm1954_vm4  ;;  %v17593_v9 = vld [vmem:[#allocation55_spill] sm:$0xff] }
 0x30e   : > { %v13549_v41 = vsel %vm2000_vm15, 1.0, %v17180_v3  ;;  %vm1908_vm5 = vcmp.ge.s32.totalorder %v1861_v34, 1  ;;  %vm1955_vm6 = vcmp.le.s32.totalorder %v1861_v34, 16  ;;  %v13551_v49 = vpop.f32.mrf.mxu3  ;;  %v1863_v44 = vsel %vm1769_vm2, %v1816_v26, %v1598_v29 }
 0x30f   : > { %17555 = vst [vmem:[#allocation78_spill] sm:$0xff] %v13549_v41  ;;  %v4033_v42 = vadd.f32 %v4032_v21, %v3987_v37  ;;  %vm1676_vm3 = vcmp.ne.s32.totalorder %v1627_v20, 0  ;;  %vm1723_vm13 = vcmp.lt.s32.totalorder %v1627_v20, 0  ;;  %vm1909_vm10 = vcmp.ge.s32.totalorder %v1862_v53, 1  ;;  %vm2002_vm14 = vmand %vm1908_vm5, %vm1955_vm6 }
 0x310   : > { %vm1956_vm12 = vcmp.le.s32.totalorder %v1862_v53, 16  ;;  %v3988_v10 = vmul.f32 %v3889_v22, %v13422_v12  ;;  %v3890_v54 = vmul.f32 %v13549_v41, %v13464_v14  ;;  %v3935_v31 = vadd.f32 %v3934_v5, %v3889_v22  ;;  %vm1770_vm0 = vmand %vm1723_vm13, %vm1676_vm3  ;;  %v17592_v41 = vld [vmem:[#allocation51_spill] sm:$0xff] }
 0x311   : > { %v1817_v62 = vadd.s32 24, %v1627_v20  ;;  %v13557_v58 = vsel %vm2001_vm9, 1.0, %v17180_v3  ;;  %vm1910_vm11 = vcmp.ge.s32.totalorder %v1863_v44, 1  ;;  %vm1957_vm1 = vcmp.le.s32.totalorder %v1863_v44, 16  ;;  %vm2003_vm4 = vmand %vm1909_vm10, %vm1956_vm12 }
 0x312   : > { %17556 = vst [vmem:[#allocation76_spill] sm:$0xff] %v13557_v58  ;;  %v4034_v30 = vadd.f32 %v4033_v42, %v3988_v10  ;;  %v3989_v24 = vmul.f32 %v3890_v54, %v13464_v14  ;;  %v3891_v51 = vmul.f32 %v13557_v58, %v13507_v28  ;;  %v3936_v19 = vadd.f32 %v3935_v31, %v3890_v54  ;;  %vm2004_vm2 = vmand %vm1910_vm11, %vm1957_vm1  ;;  %v17591_v58 = vld [vmem:[#allocation45_spill] sm:$0xff] }
 0x313   : > { %v1864_v18 = vsel %vm1770_vm0, %v1817_v62, %v1627_v20  ;;  %v13563_v15 = vsel %vm2002_vm14, 1.0, %v17180_v3  ;;  %v13566_v45 = vsel %vm2003_vm4, 1.0, %v17180_v3  ;;  %v13569_v16 = vsel %vm2004_vm2, 1.0, %v17180_v3 }
 0x314   : > { %17557 = vst [vmem:[#allocation82_spill] sm:$0xff] %v13563_v15  ;;  %v4035_v40 = vadd.f32 %v4034_v30, %v3989_v24  ;;  %vm1911_vm7 = vcmp.ge.s32.totalorder %v1864_v18, 1  ;;  %vm1958_vm8 = vcmp.le.s32.totalorder %v1864_v18, 16  ;;  %v3937_v27 = vadd.f32 %v3936_v19, %v3891_v51 }
 0x315   : > { %17558 = vst [vmem:[#allocation83_spill] sm:$0xff] %v13566_v45  ;;  %v3990_v63 = vmul.f32 %v3891_v51, %v13507_v28  ;;  %v3892_v7 = vmul.f32 %v13563_v15, %v13534_v17  ;;  %v3893_v32 = vmul.f32 %v13566_v45, %v13551_v49  ;;  %vm2005_vm15 = vmand %vm1911_vm7, %vm1958_vm8  ;;  %vm4410_vm3 = vsmask.f32 4368 }
 0x316   : > { %17559 = vst [vmem:[#allocation84_spill] sm:$0xff] %v13569_v16  ;;  %v13571_v50 = vpop.f32.mrf.mxu3  ;;  %v13583_v57 = vsel %vm2005_vm15, 1.0, %v17180_v3  ;;  %vm17611_vm12 = vsmask.f32 256 }
 0x317   : > { %v4036_v6 = vadd.f32 %v4035_v40, %v3990_v63  ;;  %v3894_v4 = vmul.f32 %v13569_v16, %v13571_v50  ;;  %v3991_v60 = vmul.f32 %v3892_v7, %v13534_v17  ;;  %v3938_v8 = vadd.f32 %v3937_v27, %v3892_v7  ;;  %17560 = vst [vmem:[#allocation85_spill] sm:$0xff] %v13583_v57  ;;  %v17561_v63 = vld [vmem:[#allocation17_spill] sm:$0xff]  ;;  %vm13833_vm14 = vmor %vm17611_vm12, %vm4410_vm3 }
 0x318   : > { %v3992_v2 = vmul.f32 %v3893_v32, %v13551_v49 }
 0x319   : > { %v3939_v33 = vadd.f32 %v3938_v8, %v3893_v32  ;;  %v4037_v29 = vadd.f32 %v4036_v6, %v3991_v60  ;;  %v3993_v38 = vmul.f32 %v3894_v4, %v13571_v50  ;;  %v17562_v32 = vld [vmem:[#allocation19_spill] sm:$0xff]  ;;  %v17564_v8 = vld [vmem:[#allocation24_spill] sm:$0xff] }
 0x31b   : > { %v4038_v46 = vadd.f32 %v4037_v29, %v3992_v2  ;;  %v3940_v11 = vadd.f32 %v3939_v33, %v3894_v4  ;;  %v17563_v4 = vld [vmem:[#allocation21_spill] sm:$0xff]  ;;  %v17589_v33 = vld [vmem:[#allocation38_spill] sm:$0xff] }
 0x31d   : > { %v4039_v1 = vadd.f32 %v4038_v46, %v3993_v38 }
 0x322   : > { %v13586_v23 = vpop.f32.mrf.mxu3 }
 0x323   : > { %v3895_v35 = vmul.f32 %v13583_v57, %v13586_v23 }
 0x325   : > { %v3941_v59 = vadd.f32 %v3940_v11, %v3895_v35  ;;  %v3994_v61 = vmul.f32 %v3895_v35, %v13586_v23  ;;  %v17567_v35 = vld [vmem:[#allocation11_spill] sm:$0xff] }
 0x327   : > { %v3942_v21 = vrot.slane %v3941_v59, 4  ;;  %v4040_v34 = vadd.f32 %v4039_v1, %v3994_v61 }
 0x329   : > { %v3943_v26 = vadd.f32 %v3942_v21, %v3941_v59  ;;  %v4041_v3 = vrot.slane %v4040_v34, 4  ;;  %v17568_v59 = vld [vmem:[#allocation32_spill] sm:$0xff]  ;;  %v17569_v21 = vld [vmem:[#allocation6_spill] sm:$0xff] }
 0x32a   : > { %v3847_v20 = vpop.f32.mrf.mxu3 }
 0x32b   : > { %v3944_v37 = vrot.slane %v3943_v26, 2  ;;  %v4042_v22 = vadd.f32 %v4041_v3, %v4040_v34  ;;  %v17571_v20 = vld [vmem:[#allocation15_spill] sm:$0xff] }
 0x32d   : > { %v3945_v5 = vadd.f32 %v3944_v37, %v3943_v26  ;;  %v4043_v53 = vrot.slane %v4042_v22, 2  ;;  %v17570_v26 = vld [vmem:[#allocation13_spill] sm:$0xff] }
 0x32f   : > { %v3946_v42 = vrot.slane %v3945_v5, 1  ;;  %v4044_v44 = vadd.f32 %v4043_v53, %v4042_v22  ;;  %v17572_v22 = vld [vmem:[#allocation23_spill] sm:$0xff]  ;;  %v17573_v53 = vld [vmem:[#allocation36_spill] sm:$0xff] }
 0x331   : > { %v3947_v10 = vadd.f32 %v3946_v42, %v3945_v5  ;;  %v4045_v54 = vrot.slane %v4044_v44, 1 }
 0x333   : > { %v4046_v31 = vadd.f32 %v4045_v54, %v4044_v44  ;;  %v13591_v62 = vmul.f32 0.00390625, %v3947_v10  ;;  %v17574_v44 = vld [vmem:[#allocation40_spill] sm:$0xff]  ;;  %v17575_v54 = vld [vmem:[#allocation46_spill] sm:$0xff]  ;;  %v17587_v10 = vld [vmem:[#allocation9_spill] sm:$0xff] }
 0x335   : > { %v4048_v30 = vmul.f32 0.00390625, %v4046_v31  ;;  %v4049_v24 = vmul.f32 %v13591_v62, %v13591_v62  ;;  %v4097_v40 = vsub.f32 %v13571_v50, %v13591_v62  ;;  %v4098_v27 = vsub.f32 %v13586_v23, %v13591_v62  ;;  %v17565_v50 = vld [vmem:[#allocation27_spill] sm:$0xff]  ;;  %v17566_v23 = vld [vmem:[#allocation29_spill] sm:$0xff] }
 0x336   : > { %v4052_v7 = vsub.f32 %v17561_v63, %v13591_v62  ;;  %v4053_v6 = vsub.f32 %v17562_v32, %v13591_v62  ;;  %v4054_v60 = vsub.f32 %v17563_v4, %v13591_v62  ;;  %v4055_v2 = vsub.f32 %v17564_v8, %v13591_v62  ;;  %v17578_v32 = vld [vmem:[#allocation58_spill] sm:$0xff]  ;;  %v17579_v8 = vld [vmem:[#allocation64_spill] sm:$0xff]  ;;  %v17590_v31 = vld [vmem:[#allocation41_spill] sm:$0xff] }
 0x337   : > { %v4050_v51 = vsub.f32 %v4048_v30, %v4049_v24  ;;  %v4056_v38 = vsub.f32 %v17565_v50, %v13591_v62  ;;  %v4057_v46 = vsub.f32 %v17566_v23, %v13591_v62  ;;  %v4058_v11 = vsub.f32 %v17567_v35, %v13591_v62  ;;  %v17576_v24 = vld [vmem:[#allocation48_spill] sm:$0xff]  ;;  %v17586_v50 = vld [vmem:[#allocation30_spill] sm:$0xff] }
 0x338   : > { %v4059_v61 = vsub.f32 %v17568_v59, %v13591_v62  ;;  %v4060_v34 = vsub.f32 %v17569_v21, %v13591_v62  ;;  %v4061_v3 = vsub.f32 %v17570_v26, %v13591_v62  ;;  %v4062_v37 = vsub.f32 %v17571_v20, %v13591_v62  ;;  %v17580_v23 = vld [vmem:[#allocation68_spill] sm:$0xff]  ;;  %v17581_v59 = vld [vmem:[#allocation70_spill] sm:$0xff] }
 0x339   : > { %v4051_v19 = vmax.f32 %v4050_v51, 0.0  ;;  %v4063_v5 = vsub.f32 %v17572_v22, %v13591_v62  ;;  %v4067_v51 = vsub.f32 %v17576_v24, %v13591_v62  ;;  %v4069_v4 = vsub.f32 %v17578_v32, %v13591_v62  ;;  %v17583_v22 = vld [vmem:[#allocation73_spill] sm:$0xff]  ;;  %v17585_v32 = vld [vmem:[#allocation80_spill] sm:$0xff]  ;;  %v17588_v24 = vld [vmem:[#allocation34_spill] sm:$0xff] }
 0x33b   : > { %v4099_v18 = vadd.f32 1e-05, %v4051_v19  ;;  %v17577_v19 = vld [vmem:[#allocation50_spill] sm:$0xff] }
 0x33c   : > { %v4068_v63 = vsub.f32 %v17577_v19, %v13591_v62  ;;  %v17584_v19 = vld [vmem:[#allocation75_spill] sm:$0xff] }
 0x33d   : > { %9689 = vrsqrt.f32 %v4099_v18  ;;  %vm4106_vm5 = vweird.f32 %v4099_v18 }
 0x343   : > { %v9690_v29 = vpop.eup %9689 }
 0x344   : > { %v4101_v1 = vmul.f32 %v9690_v29, %v4099_v18  ;;  %vm4107_vm6 = vweird.f32 %v9690_v29 }
 0x345   : > { %vm4108_vm9 = vmor %vm4106_vm5, %vm4107_vm6 }
 0x346   : > { %v4102_v30 = vmul.f32 %v9690_v29, %v4101_v1  ;;  %v17582_v1 = vld [vmem:[#allocation72_spill] sm:$0xff] }
 0x348   : > { %v4103_v20 = vmul.f32 0.5, %v4102_v30 }
 0x34a   : > { %v4104_v30 = vsub.f32 1.5, %v4103_v20 }
 0x34c   : > { %v4105_v20 = vmul.f32 %v9690_v29, %v4104_v30 }
 0x34e   : > { %v13684_v26 = vsel %vm4108_vm9, %v9690_v29, %v4105_v20 }
 0x34f   : > { %v4155_v45 = vmul.f32 %v13684_v26, %v4097_v40  ;;  %v4156_v21 = vmul.f32 %v13684_v26, %v4098_v27  ;;  %v13695_v30 = vmul.f32 %v13684_v26, %v4052_v7  ;;  %v13698_v39 = vmul.f32 %v13684_v26, %v4053_v6 }
 0x350   : > { %v13701_v29 = vmul.f32 %v13684_v26, %v4054_v60  ;;  %v13704_v20 = vmul.f32 %v13684_v26, %v4055_v2  ;;  %v13707_v18 = vmul.f32 %v13684_v26, %v4056_v38  ;;  %v13710_v40 = vmul.f32 %v13684_v26, %v4057_v46 }
 0x351   : > { %vm4202_vm13 = vcmp.ge.f32.partialorder %v4155_v45, 0.0  ;;  %vm4203_vm10 = vcmp.ge.f32.partialorder %v4156_v21, 0.0  ;;  %v4249_v27 = vmul.f32 0.01, %v4155_v45  ;;  %v4250_v7 = vmul.f32 0.01, %v4156_v21 }
 0x352   : > { %v13713_v6 = vmul.f32 %v13684_v26, %v4058_v11  ;;  %v13716_v35 = vmul.f32 %v13684_v26, %v4059_v61  ;;  %v13719_v60 = vmul.f32 %v13684_v26, %v4060_v34  ;;  %v13722_v2 = vmul.f32 %v13684_v26, %v4061_v3 }
 0x353   : > { %v4296_v38 = vsel %vm4202_vm13, %v4155_v45, %v4249_v27  ;;  %v4297_v42 = vsel %vm4203_vm10, %v4156_v21, %v4250_v7  ;;  %v13725_v46 = vmul.f32 %v13684_v26, %v4062_v37  ;;  %v13728_v15 = vmul.f32 %v13684_v26, %v4063_v5 }
 0x354   : > { %v4343_v11 = vmul.f32 %v13569_v16, %v4296_v38  ;;  %v4344_v48 = vmul.f32 %v13583_v57, %v4297_v42  ;;  %v17595_v61 = vsub.f32 %v17573_v53, %v13591_v62  ;;  %v17596_v45 = vsub.f32 %v17574_v44, %v13591_v62 }
 0x355   : > { %v17597_v37 = vsub.f32 %v17575_v54, %v13591_v62  ;;  %v13751_v42 = vmul.f32 %v13684_v26, %v4067_v51  ;;  %v13754_v53 = vmul.f32 %v13684_v26, %v4068_v63  ;;  %v13757_v21 = vmul.f32 %v13684_v26, %v4069_v4 }
 0x356   : > { %v13736_v34 = vmul.f32 %v13684_v26, %v17595_v61  ;;  %v13742_v3 = vmul.f32 %v13684_v26, %v17596_v45  ;;  %v4408_v27 = vpack.c.bf16 %v4343_v11, %v4343_v11  ;;  %v4409_v44 = vpack.c.bf16 %v4344_v48, %v4344_v48 }
 0x357   : > { %v13748_v5 = vmul.f32 %v13684_v26, %v17597_v37  ;;  %v17598_v7 = vsub.f32 %v17579_v8, %v13591_v62  ;;  %v17599_v54 = vsub.f32 %v17580_v23, %v13591_v62  ;;  %v17600_v63 = vsub.f32 %v17581_v59, %v13591_v62 }
 0x358   : > { %v17601_v48 = vsub.f32 %v17582_v1, %v13591_v62  ;;  %v17602_v11 = vsub.f32 %v17583_v22, %v13591_v62  ;;  %v17603_v61 = vsub.f32 %v17584_v19, %v13591_v62  ;;  %v4817_v45 = vshrl.u32 %v4408_v27, 16 }
 0x359   : > { %v13763_v38 = vmul.f32 %v13684_v26, %v17598_v7  ;;  %v13769_v51 = vmul.f32 %v13684_v26, %v17599_v54  ;;  %v13775_v4 = vmul.f32 %v13684_v26, %v17600_v63  ;;  %v4826_v37 = vshrl.u32 %v4409_v44, 16 }
 0x35a   : > { %v13781_v8 = vmul.f32 %v13684_v26, %v17601_v48  ;;  %v13787_v23 = vmul.f32 %v13684_v26, %v17602_v11  ;;  %v13793_v59 = vmul.f32 %v13684_v26, %v17603_v61  ;;  %v4829_v7 = vshll.u32 %v4409_v44, 16 }
 0x35b   : > { %v4820_v54 = vshll.u32 %v4408_v27, 16  ;;  %v17604_v1 = vsub.f32 %v17585_v32, %v13591_v62  ;;  %v17605_v22 = vsub.f32 %v13391_v13, %v13591_v62  ;;  %v17606_v19 = vsub.f32 %v17586_v50, %v13591_v62 }
 0x35c   : > { %v17607_v27 = vsub.f32 %v17587_v10, %v13591_v62  ;;  %v4819_v44 = vrot.slane %v4817_v45, 7  ;;  %v4828_v61 = vrot.slane %v4826_v37, 7  ;;  %v17608_v13 = vsub.f32 %v17588_v24, %v13591_v62  ;;  %v4931_v45 = vld [vmem:[#allocation2 + $0xc8] sm:$0x1] }
 0x35d   : > { %v13799_v63 = vmul.f32 %v13684_v26, %v17604_v1  ;;  %v13805_v48 = vmul.f32 %v13684_v26, %v17605_v22  ;;  %v13811_v11 = vmul.f32 %v13684_v26, %v17606_v19  ;;  %v17610_v50 = vsub.f32 %v17589_v33, %v13591_v62 }
 0x35e   : > { %v13817_v32 = vmul.f32 %v13684_v26, %v17607_v27  ;;  %v13823_v1 = vmul.f32 %v13684_v26, %v17608_v13  ;;  %v17612_v10 = vmov 0  ;;  %v17615_v37 = vsub.f32 %v17590_v31, %v13591_v62 }
 0x35f   : > { %v13829_v22 = vmul.f32 %v13684_v26, %v17610_v50  ;;  %v17613_v10 = vsel %vm13833_vm14, 4294967295, %v17612_v10  ;;  %v17617_v19 = vsub.f32 %v17591_v58, %v13591_v62  ;;  %v17619_v27 = vsub.f32 %v17592_v41, %v13591_v62 }
 0x360   : > { %17609 = vst [vmem:[#allocation17_spill] sm:$0xff] %v13823_v1  ;;  %v13841_v24 = vmul.f32 %v13684_v26, %v17615_v37  ;;  %v17621_v50 = vsub.f32 %v17593_v9, %v13591_v62  ;;  %v4824_v37 = vrot.slane %v4819_v44, 4  ;;  %v4831_v57 = vor.u32 %v4829_v7, %v4828_v61 }
 0x361   : > { %17614 = vst [vmem:[#allocation19_spill] sm:$0xff] %v17613_v10  ;;  %v13847_v33 = vmul.f32 %v13684_v26, %v17617_v19  ;;  %v13853_v13 = vmul.f32 %v13684_v26, %v17619_v27  ;;  %v4833_v16 = vrot.slane %v4828_v61, 4  ;;  %v17623_v58 = vsub.f32 %v17594_v25, %v13591_v62 }
 0x362   : > { %17616 = vst [vmem:[#allocation21_spill] sm:$0xff] %v13841_v24  ;;  %v13859_v31 = vmul.f32 %v13684_v26, %v17621_v50  ;;  %v17625_v41 = vsub.f32 %v13239_v47, %v13591_v62  ;;  %v17626_v9 = vsub.f32 %v13258_v0, %v13591_v62  ;;  %v17628_v7 = vsub.f32 %v13314_v56, %v13591_v62 }
 0x363   : > { %17618 = vst [vmem:[#allocation24_spill] sm:$0xff] %v13847_v33  ;;  %v13865_v19 = vmul.f32 %v13684_v26, %v17623_v58  ;;  %v17630_v61 = vsub.f32 %v17549_v36, %v13591_v62  ;;  %v4832_v58 = vsel %vm13833_vm14, %v4824_v37, %v4831_v57  ;;  %v17639_v37 = vsub.f32 %v13551_v49, %v13591_v62 }
 0x364   : > { %17620 = vst [vmem:[#allocation27_spill] sm:$0xff] %v13853_v13  ;;  %v13871_v27 = vmul.f32 %v13684_v26, %v17625_v41  ;;  %v13877_v50 = vmul.f32 %v13684_v26, %v17626_v9  ;;  %v13883_v25 = vmul.f32 %v13684_v26, %v17628_v7  ;;  %v17631_v41 = vld [vmem:[#allocation10_spill] sm:$0xff]  ;;  %v17633_v9 = vsub.f32 %v13389_v43, %v13591_v62 }
 0x365   : > { %17622 = vst [vmem:[#allocation29_spill] sm:$0xff] %v13859_v31  ;;  %v13889_v47 = vmul.f32 %v13684_v26, %v17630_v61  ;;  %vm17632_vm11 = vnez %v17631_v41  ;;  %v17634_v7 = vsub.f32 %v13422_v12, %v13591_v62  ;;  %v17636_v61 = vsub.f32 %v13464_v14, %v13591_v62 }
 0x366   : > { %17624 = vst [vmem:[#allocation11_spill] sm:$0xff] %v13865_v19  ;;  %v4932_v0 = vsel %vm17632_vm11, %v4833_v16, %v4931_v45  ;;  %v13899_v56 = vmul.f32 %v13684_v26, %v17633_v9  ;;  %v17637_v16 = vsub.f32 %v13507_v28, %v13591_v62  ;;  %v17638_v45 = vsub.f32 %v13534_v17, %v13591_v62 }
 0x367   : > { %17627 = vst [vmem:[#allocation32_spill] sm:$0xff] %v13877_v50  ;;  %v13905_v36 = vmul.f32 %v13684_v26, %v17634_v7  ;;  %v13911_v57 = vmul.f32 %v13684_v26, %v17636_v61  ;;  %v13929_v14 = vmul.f32 %v13684_v26, %v17639_v37  ;;  %vm4157_vm1 = vcmp.ge.f32.partialorder %v13695_v30, 0.0 }
 0x368   : > { %17629 = vst [vmem:[#allocation6_spill] sm:$0xff] %v13883_v25  ;;  %v13917_v43 = vmul.f32 %v13684_v26, %v17637_v16  ;;  %v13923_v12 = vmul.f32 %v13684_v26, %v17638_v45  ;;  %vm4158_vm0 = vcmp.ge.f32.partialorder %v13698_v39, 0.0  ;;  %vm4159_vm4 = vcmp.ge.f32.partialorder %v13701_v29, 0.0 }
 0x369   : > { %17635 = vst [vmem:[#allocation13_spill] sm:$0xff] %v13905_v36  ;;  %vm4160_vm2 = vcmp.ge.f32.partialorder %v13704_v20, 0.0  ;;  %vm4161_vm7 = vcmp.ge.f32.partialorder %v13707_v18, 0.0  ;;  %vm4162_vm8 = vcmp.ge.f32.partialorder %v13710_v40, 0.0  ;;  %vm4163_vm15 = vcmp.ge.f32.partialorder %v13713_v6, 0.0 }
 0x36a   : > { %4930 = vst [vmem:[#allocation2 + $0xc4] sm:$0xf] %v4832_v58  ;;  %v13931_v58 = vor.u32 %v4820_v54, %v4819_v44  ;;  %vm4164_vm5 = vcmp.ge.f32.partialorder %v13716_v35, 0.0  ;;  %vm4165_vm6 = vcmp.ge.f32.partialorder %v13719_v60, 0.0  ;;  %vm4166_vm9 = vcmp.ge.f32.partialorder %v13722_v2, 0.0 }
 0x36b   : > { %4933 = vst [vmem:[#allocation2 + $0xc8] sm:$0x1] %v4932_v0  ;;  %v4204_v28 = vmul.f32 0.01, %v13695_v30  ;;  %v4205_v17 = vmul.f32 0.01, %v13698_v39 }
 0x36c   : > { %17640 = vst [vmem:[#allocation15_spill] sm:$0xff] %v13931_v58  ;;  %vm4167_vm3 = vcmp.ge.f32.partialorder %v13725_v46, 0.0  ;;  %v4206_v49 = vmul.f32 0.01, %v13701_v29  ;;  %v4207_v62 = vmul.f32 0.01, %v13704_v20 }
 0x36d   : > { %v4208_v26 = vmul.f32 0.01, %v13707_v18  ;;  %vm4168_vm13 = vcmp.ge.f32.partialorder %v13728_v15, 0.0  ;;  %v4209_v54 = vmul.f32 0.01, %v13710_v40  ;;  %v13956_v0 = vsel %vm4157_vm1, %v13695_v30, %v4204_v28 }
 0x36e   : > { %v4210_v44 = vmul.f32 0.01, %v13713_v6  ;;  %v4211_v41 = vmul.f32 0.01, %v13716_v35  ;;  %17641 = vst [vmem:[#allocation23_spill] sm:$0xff] %v13956_v0  ;;  %vm4169_vm10 = vcmp.ge.f32.partialorder %v13736_v34, 0.0  ;;  %v13969_v16 = vsel %vm4158_vm0, %v13698_v39, %v4205_v17 }
 0x36f   : > { %v4212_v9 = vmul.f32 0.01, %v13719_v60  ;;  %v13961_v7 = vmul.f32 0.01, %v13722_v2  ;;  %v13964_v61 = vmul.f32 0.01, %v13725_v46  ;;  %v13986_v39 = vsel %vm4159_vm4, %v13701_v29, %v4206_v49 }
 0x370   : > { %17642 = vst [vmem:[#allocation36_spill] sm:$0xff] %v13969_v16  ;;  %v13975_v30 = vmul.f32 0.01, %v13728_v15  ;;  %v13978_v45 = vmul.f32 0.01, %v13736_v34  ;;  %vm4173_vm0 = vcmp.ge.f32.partialorder %v13754_v53, 0.0  ;;  %v14004_v29 = vsel %vm4160_vm2, %v13704_v20, %v4207_v62 }
 0x371   : > { %v13981_v37 = vmul.f32 0.01, %v13742_v3  ;;  %17643 = vst [vmem:[#allocation40_spill] sm:$0xff] %v13986_v39  ;;  %v13993_v28 = vmul.f32 0.01, %v13748_v5  ;;  %vm4177_vm4 = vcmp.ge.f32.partialorder %v13775_v4, 0.0  ;;  %v14022_v20 = vsel %vm4161_vm7, %v13707_v18, %v4208_v26 }
 0x372   : > { %v13996_v17 = vmul.f32 0.01, %v13751_v42  ;;  %v13999_v58 = vmul.f32 0.01, %v13754_v53  ;;  %17644 = vst [vmem:[#allocation46_spill] sm:$0xff] %v14004_v29  ;;  %vm4184_vm1 = vcmp.ge.f32.partialorder %v13817_v32, 0.0  ;;  %v14034_v39 = vsel %vm4162_vm8, %v13710_v40, %v4209_v54 }
 0x373   : > { %v14011_v49 = vmul.f32 0.01, %v13757_v21  ;;  %v14014_v10 = vmul.f32 0.01, %v13763_v38  ;;  %v14017_v55 = vmul.f32 0.01, %v13769_v51  ;;  %v14046_v16 = vsel %vm4163_vm15, %v13713_v6, %v4210_v44 }
 0x374   : > { %17645 = vst [vmem:[#allocation48_spill] sm:$0xff] %v14022_v20  ;;  %v4224_v62 = vmul.f32 0.01, %v13775_v4  ;;  %v4225_v52 = vmul.f32 0.01, %v13781_v8  ;;  %vm4188_vm11 = vcmp.ge.f32.partialorder %v13847_v33, 0.0  ;;  %v14058_v0 = vsel %vm4164_vm5, %v13716_v35, %v4211_v41 }
 0x375   : > { %v4226_v29 = vmul.f32 0.01, %v13787_v23  ;;  %17646 = vst [vmem:[#allocation50_spill] sm:$0xff] %v14034_v39  ;;  %v4227_v18 = vmul.f32 0.01, %v13793_v59  ;;  %vm4192_vm12 = vcmp.ge.f32.partialorder %v13871_v27, 0.0 }
 0x376   : > { %v4228_v26 = vmul.f32 0.01, %v13799_v63  ;;  %v4229_v20 = vmul.f32 0.01, %v13805_v48  ;;  %17647 = vst [vmem:[#allocation58_spill] sm:$0xff] %v14046_v16  ;;  %vm4196_vm2 = vcmp.ge.f32.partialorder %v13899_v56, 0.0 }
 0x377   : > { %v4230_v40 = vmul.f32 0.01, %v13811_v11  ;;  %v4231_v54 = vmul.f32 0.01, %v13817_v32  ;;  %v4232_v39 = vmul.f32 0.01, %v13823_v1  ;;  %v14070_v1 = vsel %vm4165_vm6, %v13719_v60, %v4212_v9 }
 0x378   : > { %17648 = vst [vmem:[#allocation64_spill] sm:$0xff] %v14058_v0  ;;  %v4233_v6 = vmul.f32 0.01, %v13829_v22  ;;  %v4234_v44 = vmul.f32 0.01, %v13841_v24  ;;  %vm4197_vm5 = vcmp.ge.f32.partialorder %v13905_v36, 0.0  ;;  %v4260_v60 = vsel %vm4166_vm9, %v13722_v2, %v13961_v7 }
 0x379   : > { %v4235_v16 = vmul.f32 0.01, %v13847_v33  ;;  %17649 = vst [vmem:[#allocation68_spill] sm:$0xff] %v14070_v1  ;;  %vm4198_vm15 = vcmp.ge.f32.partialorder %v13911_v57, 0.0  ;;  %vm4199_vm8 = vcmp.ge.f32.partialorder %v13917_v43, 0.0  ;;  %vm4200_vm7 = vcmp.ge.f32.partialorder %v13923_v12, 0.0 }
 0x37a   : > { %v4236_v35 = vmul.f32 0.01, %v13853_v13  ;;  %v4237_v41 = vmul.f32 0.01, %v13859_v31  ;;  %v4238_v0 = vmul.f32 0.01, %v13865_v19  ;;  %v4261_v31 = vsel %vm4167_vm3, %v13725_v46, %v13964_v61 }
 0x37b   : > { %vm4201_vm6 = vcmp.ge.f32.partialorder %v13929_v14, 0.0  ;;  %v4239_v9 = vmul.f32 0.01, %v13871_v27  ;;  %v4240_v1 = vmul.f32 0.01, %v13877_v50  ;;  %v4262_v2 = vsel %vm4168_vm13, %v13728_v15, %v13975_v30 }
 0x37c   : > { %v4241_v33 = vmul.f32 0.01, %v13883_v25  ;;  %v4242_v19 = vmul.f32 0.01, %v13889_v47  ;;  %v4243_v13 = vmul.f32 0.01, %v13899_v56  ;;  %v4263_v46 = vsel %vm4169_vm10, %v13736_v34, %v13978_v45 }
 0x37d   : > { %v4244_v24 = vmul.f32 0.01, %v13905_v36  ;;  %v4245_v7 = vmul.f32 0.01, %v13911_v57  ;;  %v4246_v25 = vmul.f32 0.01, %v13917_v43  ;;  %v4267_v34 = vsel %vm4173_vm0, %v13754_v53, %v13999_v58 }
 0x37e   : > { %v4247_v50 = vmul.f32 0.01, %v13923_v12  ;;  %v4248_v61 = vmul.f32 0.01, %v13929_v14  ;;  %vm17650_vm9 = vcmp.ge.f32.partialorder %v13742_v3, 0.0  ;;  %vm17651_vm3 = vcmp.ge.f32.partialorder %v13748_v5, 0.0 }
 0x37f   : > { %v4264_v36 = vsel %vm17650_vm9, %v13742_v3, %v13981_v37  ;;  %v4265_v15 = vsel %vm17651_vm3, %v13748_v5, %v13993_v28  ;;  %vm17652_vm13 = vcmp.ge.f32.partialorder %v13751_v42, 0.0  ;;  %vm17653_vm10 = vcmp.ge.f32.partialorder %v13757_v21, 0.0  ;;  %v17668_v58 = vld [vmem:[#allocation27_spill] sm:$0xff]  ;;  %v17670_v37 = vld [vmem:[#allocation29_spill] sm:$0xff] }
 0x380   : > { %v4266_v30 = vsel %vm17652_vm13, %v13751_v42, %v13996_v17  ;;  %v4268_v3 = vsel %vm17653_vm10, %v13757_v21, %v14011_v49  ;;  %vm17654_vm9 = vcmp.ge.f32.partialorder %v13763_v38, 0.0  ;;  %vm17655_vm3 = vcmp.ge.f32.partialorder %v13769_v51, 0.0  ;;  %v17672_v28 = vld [vmem:[#allocation11_spill] sm:$0xff]  ;;  %v17676_v49 = vld [vmem:[#allocation6_spill] sm:$0xff] }
 0x381   : > { %v4269_v5 = vsel %vm17654_vm9, %v13763_v38, %v14014_v10  ;;  %v4270_v42 = vsel %vm17655_vm3, %v13769_v51, %v14017_v55  ;;  %v4271_v45 = vsel %vm4177_vm4, %v13775_v4, %v4224_v62  ;;  %vm17656_vm0 = vcmp.ge.f32.partialorder %v13781_v8, 0.0  ;;  %v17667_v10 = vld [vmem:[#allocation24_spill] sm:$0xff] }
 0x382   : > { %v4272_v53 = vsel %vm17656_vm0, %v13781_v8, %v4225_v52  ;;  %vm17657_vm13 = vcmp.ge.f32.partialorder %v13787_v23, 0.0  ;;  %vm17658_vm10 = vcmp.ge.f32.partialorder %v13793_v59, 0.0  ;;  %vm17659_vm9 = vcmp.ge.f32.partialorder %v13799_v63, 0.0  ;;  %v17662_v8 = vld [vmem:[#allocation17_spill] sm:$0xff] }
 0x383   : > { %v4273_v21 = vsel %vm17657_vm13, %v13787_v23, %v4226_v29  ;;  %v4274_v38 = vsel %vm17658_vm10, %v13793_v59, %v4227_v18  ;;  %v4275_v55 = vsel %vm17659_vm9, %v13799_v63, %v4228_v26  ;;  %vm17660_vm3 = vcmp.ge.f32.partialorder %v13805_v48, 0.0  ;;  %v17665_v63 = vld [vmem:[#allocation21_spill] sm:$0xff]  ;;  %v17674_v29 = vld [vmem:[#allocation32_spill] sm:$0xff] }
 0x384   : > { %v4276_v51 = vsel %vm17660_vm3, %v13805_v48, %v4229_v20  ;;  %vm17661_vm4 = vcmp.ge.f32.partialorder %v13811_v11, 0.0  ;;  %v4278_v4 = vsel %vm4184_vm1, %v13817_v32, %v4231_v54  ;;  %vm17663_vm0 = vcmp.ge.f32.partialorder %v17662_v8, 0.0  ;;  %v17679_v18 = vld [vmem:[#allocation13_spill] sm:$0xff] }
 0x385   : > { %v4277_v52 = vsel %vm17661_vm4, %v13811_v11, %v4230_v40  ;;  %v4279_v23 = vsel %vm17663_vm0, %v17662_v8, %v4232_v39  ;;  %vm17664_vm13 = vcmp.ge.f32.partialorder %v13829_v22, 0.0  ;;  %vm17666_vm10 = vcmp.ge.f32.partialorder %v17665_v63, 0.0  ;;  %v17683_v40 = vld [vmem:[#allocation18_spill] sm:$0xff] }
 0x386   : > { %v4280_v59 = vsel %vm17664_vm13, %v13829_v22, %v4233_v6  ;;  %v4281_v48 = vsel %vm17666_vm10, %v17665_v63, %v4234_v44  ;;  %v4282_v11 = vsel %vm4188_vm11, %v17667_v10, %v4235_v16  ;;  %vm17669_vm9 = vcmp.ge.f32.partialorder %v17668_v58, 0.0  ;;  %v17684_v6 = vld [vmem:[#allocation40_spill] sm:$0xff]  ;;  %v17692_v63 = vld [vmem:[#allocation58_spill] sm:$0xff] }
 0x387   : > { %v4283_v32 = vsel %vm17669_vm9, %v17668_v58, %v4236_v35  ;;  %vm17671_vm1 = vcmp.ge.f32.partialorder %v17670_v37, 0.0  ;;  %vm17673_vm3 = vcmp.ge.f32.partialorder %v17672_v28, 0.0  ;;  %v4286_v17 = vsel %vm4192_vm12, %v13871_v27, %v4239_v9  ;;  %v17686_v35 = vld [vmem:[#allocation46_spill] sm:$0xff]  ;;  %v17694_v10 = vld [vmem:[#allocation64_spill] sm:$0xff]  ;;  %v17695_v58 = vld [vmem:[#allocation33_spill] sm:$0xff] }
 0x388   : > { %v4284_v39 = vsel %vm17671_vm1, %v17670_v37, %v4237_v41  ;;  %v4285_v22 = vsel %vm17673_vm3, %v17672_v28, %v4238_v0  ;;  %vm17675_vm4 = vcmp.ge.f32.partialorder %v17674_v29, 0.0  ;;  %vm17677_vm11 = vcmp.ge.f32.partialorder %v17676_v49, 0.0  ;;  %v17687_v41 = vld [vmem:[#allocation25_spill] sm:$0xff]  ;;  %v17689_v9 = vld [vmem:[#allocation26_spill] sm:$0xff]  ;;  %v17696_v28 = vld [vmem:[#allocation68_spill] sm:$0xff] }
 0x389   : > { %v4287_v16 = vsel %vm17675_vm4, %v17674_v29, %v4240_v1  ;;  %v4288_v20 = vsel %vm17677_vm11, %v17676_v49, %v4241_v33  ;;  %vm17678_vm0 = vcmp.ge.f32.partialorder %v13889_v47, 0.0  ;;  %v4290_v0 = vsel %vm4196_vm2, %v13899_v56, %v4243_v13  ;;  %v17681_v56 = vld [vmem:[#allocation16_spill] sm:$0xff]  ;;  %v17697_v29 = vld [vmem:[#allocation7_spill] sm:$0xff] }
 0x38a   : > { %v4289_v62 = vsel %vm17678_vm0, %v13889_v47, %v4242_v19  ;;  %v4291_v27 = vsel %vm4197_vm5, %v17679_v18, %v4244_v24  ;;  %v4292_v1 = vsel %vm4198_vm15, %v13911_v57, %v4245_v7  ;;  %v4293_v33 = vsel %vm4199_vm8, %v13917_v43, %v4246_v25  ;;  %v17680_v47 = vld [vmem:[#allocation23_spill] sm:$0xff]  ;;  %v17682_v24 = vld [vmem:[#allocation36_spill] sm:$0xff] }
 0x38b   : > { %v4294_v19 = vsel %vm4200_vm7, %v13923_v12, %v4247_v50  ;;  %v4295_v13 = vsel %vm4201_vm6, %v13929_v14, %v4248_v61  ;;  %v4298_v26 = vmul.f32 %v17681_v56, %v17680_v47  ;;  %v4299_v54 = vmul.f32 %v17683_v40, %v17682_v24  ;;  %v17685_v57 = vld [vmem:[#allocation20_spill] sm:$0xff]  ;;  %v17690_v50 = vld [vmem:[#allocation50_spill] sm:$0xff]  ;;  %v17693_v14 = vld [vmem:[#allocation31_spill] sm:$0xff] }
 0x38c   : > { %v4300_v44 = vmul.f32 %v17685_v57, %v17684_v6  ;;  %v4301_v25 = vmul.f32 %v17687_v41, %v17686_v35  ;;  %v17688_v43 = vld [vmem:[#allocation48_spill] sm:$0xff]  ;;  %v4304_v61 = vmul.f32 %v17693_v14, %v17692_v63  ;;  %v4305_v37 = vmul.f32 %v17695_v58, %v17694_v10  ;;  %v17699_v24 = vld [vmem:[#allocation14_spill] sm:$0xff]  ;;  %v17701_v57 = vld [vmem:[#allocation35_spill] sm:$0xff] }
 0x38d   : > { %v4302_v7 = vmul.f32 %v17689_v9, %v17688_v43  ;;  %v17691_v12 = vld [vmem:[#allocation28_spill] sm:$0xff]  ;;  %v4306_v49 = vmul.f32 %v17697_v29, %v17696_v28  ;;  %v4308_v6 = vmul.f32 %v17699_v24, %v4261_v31  ;;  %v4310_v43 = vmul.f32 %v17701_v57, %v4263_v46  ;;  %v17702_v9 = vld [vmem:[#allocation39_spill] sm:$0xff]  ;;  %v17705_v14 = vld [vmem:[#allocation49_spill] sm:$0xff] }
 0x38e   : > { %v4303_v8 = vmul.f32 %v17691_v12, %v17690_v50  ;;  %v17698_v18 = vld [vmem:[#allocation12_spill] sm:$0xff]  ;;  %v4311_v56 = vmul.f32 %v17702_v9, %v4264_v36  ;;  %v17704_v40 = vld [vmem:[#allocation47_spill] sm:$0xff]  ;;  %v4314_v10 = vmul.f32 %v17705_v14, %v4267_v34  ;;  %v17706_v58 = vld [vmem:[#allocation57_spill] sm:$0xff]  ;;  %vm17741_vm2 = vsmask.f32 7424 }
 0x38f   : > { %v4307_v47 = vmul.f32 %v17698_v18, %v4260_v60  ;;  %v17700_v35 = vld [vmem:[#allocation8_spill] sm:$0xff]  ;;  %v4313_v63 = vmul.f32 %v17704_v40, %v4266_v30  ;;  %v4315_v28 = vmul.f32 %v17706_v58, %v4268_v3  ;;  %v17707_v29 = vld [vmem:[#allocation63_spill] sm:$0xff]  ;;  %v17709_v31 = vld [vmem:[#allocation69_spill] sm:$0xff] }
 0x390   : > { %v4309_v41 = vmul.f32 %v17700_v35, %v4262_v2  ;;  %v17703_v50 = vld [vmem:[#allocation44_spill] sm:$0xff]  ;;  %v4316_v18 = vmul.f32 %v17707_v29, %v4269_v5  ;;  %v17708_v60 = vld [vmem:[#allocation67_spill] sm:$0xff]  ;;  %v4318_v2 = vmul.f32 %v17709_v31, %v4271_v45  ;;  %v17711_v57 = vld [vmem:[#allocation74_spill] sm:$0xff] }
 0x391   : > { %v4312_v12 = vmul.f32 %v17703_v50, %v4265_v15  ;;  %v4317_v24 = vmul.f32 %v17708_v60, %v4270_v42  ;;  %v17710_v35 = vld [vmem:[#allocation71_spill] sm:$0xff]  ;;  %v4320_v9 = vmul.f32 %v17711_v57, %v4273_v21  ;;  %v17712_v36 = vld [vmem:[#allocation77_spill] sm:$0xff]  ;;  %v17716_v58 = vld [vmem:[#allocation4_spill] sm:$0xff] }
 0x392   : > { %v4319_v46 = vmul.f32 %v17710_v35, %v4272_v53  ;;  %v4321_v15 = vmul.f32 %v17712_v36, %v4274_v38  ;;  %v17713_v50 = vld [vmem:[#allocation79_spill] sm:$0xff]  ;;  %v17714_v40 = vld [vmem:[#allocation81_spill] sm:$0xff]  ;;  %v4325_v5 = vmul.f32 %v17716_v58, %v4278_v4  ;;  %v17717_v29 = vld [vmem:[#allocation22_spill] sm:$0xff] }
 0x393   : > { %v4322_v30 = vmul.f32 %v17713_v50, %v4275_v55  ;;  %v4323_v14 = vmul.f32 %v17714_v40, %v4276_v51  ;;  %v17715_v34 = vld [vmem:[#allocation5_spill] sm:$0xff]  ;;  %v4326_v42 = vmul.f32 %v17717_v29, %v4279_v23  ;;  %v17719_v45 = vld [vmem:[#allocation42_spill] sm:$0xff]  ;;  %v17720_v53 = vld [vmem:[#allocation43_spill] sm:$0xff] }
 0x394   : > { %v4324_v3 = vmul.f32 %v17715_v34, %v4277_v52  ;;  %v17718_v60 = vld [vmem:[#allocation37_spill] sm:$0xff]  ;;  %v4328_v35 = vmul.f32 %v17719_v45, %v4281_v48  ;;  %v4329_v21 = vmul.f32 %v17720_v53, %v4282_v11  ;;  %v17721_v57 = vld [vmem:[#allocation52_spill] sm:$0xff]  ;;  %v17724_v51 = vld [vmem:[#allocation66_spill] sm:$0xff] }
 0x395   : > { %v4327_v31 = vmul.f32 %v17718_v60, %v4280_v59  ;;  %v4330_v36 = vmul.f32 %v17721_v57, %v4283_v32  ;;  %v17722_v38 = vld [vmem:[#allocation53_spill] sm:$0xff]  ;;  %v17723_v55 = vld [vmem:[#allocation60_spill] sm:$0xff]  ;;  %v4333_v34 = vmul.f32 %v17724_v51, %v4286_v17  ;;  %v17725_v52 = vld [vmem:[#allocation54_spill] sm:$0xff]  ;;  %v14263_v51 = vpack.c.bf16 %v4298_v26, %v4298_v26 }
 0x396   : > { %v4331_v50 = vmul.f32 %v17722_v38, %v4284_v39  ;;  %v4332_v40 = vmul.f32 %v17723_v55, %v4285_v22  ;;  %v4334_v4 = vmul.f32 %v17725_v52, %v4287_v16  ;;  %v17726_v58 = vld [vmem:[#allocation56_spill] sm:$0xff]  ;;  %v17727_v29 = vld [vmem:[#allocation59_spill] sm:$0xff]  ;;  %v17728_v60 = vld [vmem:[#allocation62_spill] sm:$0xff]  ;;  %v14265_v16 = vpack.c.bf16 %v4299_v54, %v4299_v54 }
 0x397   : > { %v4335_v23 = vmul.f32 %v17726_v58, %v4288_v20  ;;  %v4336_v59 = vmul.f32 %v17727_v29, %v4289_v62  ;;  %v4337_v45 = vmul.f32 %v17728_v60, %v4290_v0  ;;  %v17729_v48 = vld [vmem:[#allocation65_spill] sm:$0xff]  ;;  %v17730_v53 = vld [vmem:[#allocation78_spill] sm:$0xff]  ;;  %v17731_v57 = vld [vmem:[#allocation76_spill] sm:$0xff]  ;;  %v14267_v52 = vpack.c.bf16 %v4300_v44, %v4300_v44 }
 0x398   : > { %v4338_v11 = vmul.f32 %v17729_v48, %v4291_v27  ;;  %v4339_v32 = vmul.f32 %v17730_v53, %v4292_v1  ;;  %v4340_v38 = vmul.f32 %v17731_v57, %v4293_v33  ;;  %v17732_v39 = vld [vmem:[#allocation82_spill] sm:$0xff]  ;;  %v17733_v55 = vld [vmem:[#allocation83_spill] sm:$0xff]  ;;  %v14269_v20 = vpack.c.bf16 %v4301_v25, %v4301_v25  ;;  %vm17742_vm7 = vmmov %vm17741_vm2 }
 0x399   : > { %v4341_v22 = vmul.f32 %v17732_v39, %v4294_v19  ;;  %v4342_v17 = vmul.f32 %v17733_v55, %v4295_v13  ;;  %v14271_v62 = vpack.c.bf16 %v4302_v7, %v4302_v7  ;;  %v14273_v0 = vpack.c.bf16 %v4303_v8, %v4303_v8 }
 0x39a   : > { %v14275_v27 = vpack.c.bf16 %v4304_v61, %v4304_v61  ;;  %v14277_v1 = vpack.c.bf16 %v4305_v37, %v4305_v37  ;;  %v14279_v33 = vpack.c.bf16 %v4306_v49, %v4306_v49  ;;  %v14281_v19 = vpack.c.bf16 %v4307_v47, %v4307_v47 }
 0x39b   : > { %v14283_v13 = vpack.c.bf16 %v4308_v6, %v4308_v6  ;;  %v14285_v26 = vpack.c.bf16 %v4309_v41, %v4309_v41  ;;  %v14287_v54 = vpack.c.bf16 %v4310_v43, %v4310_v43  ;;  %v14289_v44 = vpack.c.bf16 %v4311_v56, %v4311_v56 }
 0x39c   : > { %v14291_v25 = vpack.c.bf16 %v4312_v12, %v4312_v12  ;;  %v14293_v7 = vpack.c.bf16 %v4313_v63, %v4313_v63  ;;  %v14295_v8 = vpack.c.bf16 %v4314_v10, %v4314_v10  ;;  %v14297_v61 = vpack.c.bf16 %v4315_v28, %v4315_v28 }
 0x39d   : > { %v14299_v37 = vpack.c.bf16 %v4316_v18, %v4316_v18  ;;  %v14301_v49 = vpack.c.bf16 %v4317_v24, %v4317_v24  ;;  %v14303_v47 = vpack.c.bf16 %v4318_v2, %v4318_v2  ;;  %v14305_v41 = vpack.c.bf16 %v4319_v46, %v4319_v46 }
 0x39e   : > { %v14307_v6 = vpack.c.bf16 %v4320_v9, %v4320_v9  ;;  %v14309_v56 = vpack.c.bf16 %v4321_v15, %v4321_v15  ;;  %v14311_v12 = vpack.c.bf16 %v4322_v30, %v4322_v30  ;;  %v14313_v43 = vpack.c.bf16 %v4323_v14, %v4323_v14 }
 0x39f   : > { %v14315_v63 = vpack.c.bf16 %v4324_v3, %v4324_v3  ;;  %v14317_v10 = vpack.c.bf16 %v4325_v5, %v4325_v5  ;;  %v14319_v18 = vpack.c.bf16 %v4326_v42, %v4326_v42  ;;  %v14321_v24 = vpack.c.bf16 %v4327_v31, %v4327_v31 }
 0x3a0   : > { %v14323_v28 = vpack.c.bf16 %v4328_v35, %v4328_v35  ;;  %v14325_v2 = vpack.c.bf16 %v4329_v21, %v4329_v21  ;;  %v14327_v9 = vpack.c.bf16 %v4330_v36, %v4330_v36  ;;  %v14329_v46 = vpack.c.bf16 %v4331_v50, %v4331_v50  ;;  %v9042_v50 = vld [vmem:[%s16887_s2 + $0x38] sm:$0xff] }
 0x3a1   : > { %v14331_v15 = vpack.c.bf16 %v4332_v40, %v4332_v40  ;;  %v14333_v14 = vpack.c.bf16 %v4333_v34, %v4333_v34  ;;  %v14335_v30 = vpack.c.bf16 %v4334_v4, %v4334_v4  ;;  %v14337_v3 = vpack.c.bf16 %v4335_v23, %v4335_v23  ;;  %6819 = vmatpush.bf16.msra.mxu1 %v9042_v50 }
 0x3a2   : > { %v14339_v5 = vpack.c.bf16 %v4336_v59, %v4336_v59  ;;  %v14341_v31 = vpack.c.bf16 %v4337_v45, %v4337_v45  ;;  %v14343_v35 = vpack.c.bf16 %v4338_v11, %v4338_v11  ;;  %v14345_v42 = vpack.c.bf16 %v4339_v32, %v4339_v32  ;;  %9657 = vmatpush.bf16.msra.mxu2 %v9042_v50 }
 0x3a3   : > { %v14350_v40 = vpack.c.bf16 %v4340_v38, %v4340_v38  ;;  %v14352_v36 = vpack.c.bf16 %v4341_v22, %v4341_v22  ;;  %v14354_v34 = vpack.c.bf16 %v4342_v17, %v4342_v17  ;;  %v4413_v21 = vshrl.u32 %v14263_v51, 16 }
 0x3a4   : > { %v4416_v4 = vshll.u32 %v14263_v51, 16  ;;  %v4421_v45 = vshrl.u32 %v14265_v16, 16  ;;  %v4424_v23 = vshll.u32 %v14265_v16, 16  ;;  %v4430_v59 = vshrl.u32 %v14267_v52, 16  ;;  %v9041_v16 = vld [vmem:[%s16887_s2 + $0x30] sm:$0xff] }
 0x3a5   : > { %17734 = vst [vmem:[#allocation70_spill] sm:$0xff] %v14354_v34  ;;  %v4415_v11 = vrot.slane %v4413_v21, 7  ;;  %v4433_v38 = vshll.u32 %v14267_v52, 16  ;;  %v4439_v32 = vshrl.u32 %v14269_v20, 16  ;;  %v4442_v22 = vshll.u32 %v14269_v20, 16  ;;  %6820 = vmatpush.bf16.msra.mxu1 %v9041_v16 }
 0x3a6   : > { %v4423_v17 = vrot.slane %v4421_v45, 7  ;;  %v4432_v55 = vrot.slane %v4430_v59, 7  ;;  %v4448_v39 = vshrl.u32 %v14271_v62, 16  ;;  %v4451_v51 = vshll.u32 %v14271_v62, 16  ;;  %9658 = vmatpush.bf16.msra.mxu2 %v9041_v16 }
 0x3a7   : > { %v14369_v57 = vor.u32 %v4416_v4, %v4415_v11  ;;  %v4419_v50 = vrot.slane %v4415_v11, 4  ;;  %v4441_v21 = vrot.slane %v4439_v32, 7  ;;  %v4457_v52 = vshrl.u32 %v14273_v0, 16 }
 0x3a8   : > { %v4426_v53 = vor.u32 %v4424_v23, %v4423_v17  ;;  %v4428_v48 = vrot.slane %v4423_v17, 4  ;;  %v4435_v60 = vor.u32 %v4433_v38, %v4432_v55  ;;  %v4437_v20 = vrot.slane %v4432_v55, 4  ;;  %v9040_v55 = vld [vmem:[%s16887_s2 + $0x28] sm:$0xff] }
 0x3a9   : > { %v4444_v45 = vor.u32 %v4442_v22, %v4441_v21  ;;  %v4446_v59 = vrot.slane %v4441_v21, 4  ;;  %v4450_v29 = vrot.slane %v4448_v39, 7  ;;  %v4459_v62 = vrot.slane %v4457_v52, 7  ;;  %6821 = vmatpush.bf16.msra.mxu1 %v9040_v55  ;;  %v9039_v52 = vld [vmem:[%s16887_s2 + $0x20] sm:$0xff] }
 0x3aa   : > { %v4427_v34 = vsel %vm13833_vm14, %v4419_v50, %v4426_v53  ;;  %v4436_v4 = vsel %vm13833_vm14, %v4428_v48, %v4435_v60  ;;  %v4460_v11 = vshll.u32 %v14273_v0, 16  ;;  %v4466_v32 = vshrl.u32 %v14275_v27, 16  ;;  %9659 = vmatpush.bf16.msra.mxu2 %v9040_v55 }
 0x3ab   : > { %v4445_v23 = vsel %vm13833_vm14, %v4437_v20, %v4444_v45  ;;  %v4453_v38 = vor.u32 %v4451_v51, %v4450_v29  ;;  %v4455_v39 = vrot.slane %v4450_v29, 4  ;;  %v4464_v22 = vrot.slane %v4459_v62, 4  ;;  %4885 = vst [vmem:[#allocation2 + $0x10] sm:$0xf] %v4427_v34 }
 0x3ac   : > { %v4462_v17 = vor.u32 %v4460_v11, %v4459_v62  ;;  %v4468_v53 = vrot.slane %v4466_v32, 7  ;;  %v4469_v16 = vshll.u32 %v14275_v27, 16  ;;  %v4475_v60 = vshrl.u32 %v14277_v1, 16  ;;  %4886 = vst [vmem:[#allocation2 + $0x14] sm:$0xf] %v4436_v4 }
 0x3ad   : > { %v4454_v48 = vsel %vm13833_vm14, %v4446_v59, %v4453_v38  ;;  %v4478_v0 = vshll.u32 %v14277_v1, 16  ;;  %v4484_v50 = vshrl.u32 %v14279_v33, 16  ;;  %v4487_v29 = vshll.u32 %v14279_v33, 16  ;;  %4887 = vst [vmem:[#allocation2 + $0x18] sm:$0xf] %v4445_v23  ;;  %6822 = vmatpush.bf16.msra.mxu1 %v9039_v52 }
 0x3ae   : > { %v4463_v34 = vsel %vm13833_vm14, %v4455_v39, %v4462_v17  ;;  %v4471_v51 = vor.u32 %v4469_v16, %v4468_v53  ;;  %v4473_v27 = vrot.slane %v4468_v53, 4  ;;  %v4477_v21 = vrot.slane %v4475_v60, 7  ;;  %4888 = vst [vmem:[#allocation2 + $0x1c] sm:$0xf] %v4454_v48  ;;  %9660 = vmatpush.bf16.msra.mxu2 %v9039_v52  ;;  %v9058_v52 = vld [vmem:[%s16887_s2 + $0xb8] sm:$0xff] }
 0x3af   : > { %v4486_v20 = vrot.slane %v4484_v50, 7  ;;  %v4493_v45 = vshrl.u32 %v14281_v19, 16  ;;  %v4496_v1 = vshll.u32 %v14281_v19, 16  ;;  %v4502_v59 = vshrl.u32 %v14283_v13, 16  ;;  %4889 = vst [vmem:[#allocation2 + $0x20] sm:$0xf] %v4463_v34  ;;  %7075 = vmatpush.bf16.msrb.mxu3 %v9058_v52 }
 0x3b0   : > { %v4472_v33 = vsel %vm13833_vm14, %v4464_v22, %v4471_v51  ;;  %v4480_v62 = vor.u32 %v4478_v0, %v4477_v21  ;;  %v4482_v4 = vrot.slane %v4477_v21, 4  ;;  %v4505_v11 = vshll.u32 %v14283_v13, 16  ;;  %v9038_v13 = vld [vmem:[%s16887_s2 + $0x18] sm:$0xff] }
 0x3b1   : > { %v4489_v32 = vor.u32 %v4487_v29, %v4486_v20  ;;  %v4491_v55 = vrot.slane %v4486_v20, 4  ;;  %v4495_v23 = vrot.slane %v4493_v45, 7  ;;  %v4504_v38 = vrot.slane %v4502_v59, 7  ;;  %4890 = vst [vmem:[#allocation2 + $0x24] sm:$0xf] %v4472_v33  ;;  %6823 = vmatpush.bf16.msra.mxu1 %v9038_v13  ;;  %v9037_v59 = vld [vmem:[%s16887_s2 + $0x10] sm:$0xff] }
 0x3b2   : > { %v4481_v19 = vsel %vm13833_vm14, %v4473_v27, %v4480_v62  ;;  %v4511_v39 = vshrl.u32 %v14285_v26, 16  ;;  %v4514_v17 = vshll.u32 %v14285_v26, 16  ;;  %v4520_v22 = vshrl.u32 %v14287_v54, 16  ;;  %9661 = vmatpush.bf16.msra.mxu2 %v9038_v13  ;;  %v9066_v33 = vld [vmem:[%s16887_s2 + $0xf8] sm:$0xff] }
 0x3b3   : > { %v4490_v53 = vsel %vm13833_vm14, %v4482_v4, %v4489_v32  ;;  %v4498_v16 = vor.u32 %v4496_v1, %v4495_v23  ;;  %v4500_v60 = vrot.slane %v4495_v23, 4  ;;  %v4507_v48 = vor.u32 %v4505_v11, %v4504_v38  ;;  %4891 = vst [vmem:[#allocation2 + $0x28] sm:$0xf] %v4481_v19  ;;  %7203 = vmatpush.bf16.msrb.mxu0 %v9066_v33 }
 0x3b4   : > { %v4509_v0 = vrot.slane %v4504_v38, 4  ;;  %v4513_v50 = vrot.slane %v4511_v39, 7  ;;  %v4522_v29 = vrot.slane %v4520_v22, 7  ;;  %v4523_v34 = vshll.u32 %v14287_v54, 16  ;;  %4892 = vst [vmem:[#allocation2 + $0x2c] sm:$0xf] %v4490_v53 }
 0x3b5   : > { %v4499_v26 = vsel %vm13833_vm14, %v4491_v55, %v4498_v16  ;;  %v4508_v51 = vsel %vm13833_vm14, %v4500_v60, %v4507_v48  ;;  %v4529_v27 = vshrl.u32 %v14289_v44, 16  ;;  %v4532_v21 = vshll.u32 %v14289_v44, 16  ;;  %6824 = vmatpush.bf16.msra.mxu1 %v9037_v59  ;;  %v9057_v22 = vld [vmem:[%s16887_s2 + $0xb0] sm:$0xff] }
 0x3b6   : > { %v4516_v20 = vor.u32 %v4514_v17, %v4513_v50  ;;  %v4518_v45 = vrot.slane %v4513_v50, 4  ;;  %v4525_v54 = vor.u32 %v4523_v34, %v4522_v29  ;;  %v4527_v1 = vrot.slane %v4522_v29, 4  ;;  %4893 = vst [vmem:[#allocation2 + $0x30] sm:$0xf] %v4499_v26  ;;  %9662 = vmatpush.bf16.msra.mxu2 %v9037_v59  ;;  %7076 = vmatpush.bf16.msrb.mxu3 %v9057_v22  ;;  %v9036_v29 = vld [vmem:[%s16887_s2 + $0x8] sm:$0xff] }
 0x3b7   : > { %v4531_v62 = vrot.slane %v4529_v27, 7  ;;  %v4538_v44 = vshrl.u32 %v14291_v25, 16  ;;  %v4541_v4 = vshll.u32 %v14291_v25, 16  ;;  %v4547_v11 = vshrl.u32 %v14293_v7, 16  ;;  %4894 = vst [vmem:[#allocation2 + $0x34] sm:$0xf] %v4508_v51 }
 0x3b8   : > { %v4517_v32 = vsel %vm13833_vm14, %v4509_v0, %v4516_v20  ;;  %v4526_v55 = vsel %vm13833_vm14, %v4518_v45, %v4525_v54  ;;  %v4550_v23 = vshll.u32 %v14293_v7, 16  ;;  %v4556_v38 = vshrl.u32 %v14295_v8, 16  ;;  %v9056_v45 = vld [vmem:[%s16887_s2 + $0xa8] sm:$0xff] }
 0x3b9   : > { %v4534_v19 = vor.u32 %v4532_v21, %v4531_v62  ;;  %v4536_v39 = vrot.slane %v4531_v62, 4  ;;  %v4540_v17 = vrot.slane %v4538_v44, 7  ;;  %v4549_v25 = vrot.slane %v4547_v11, 7  ;;  %4895 = vst [vmem:[#allocation2 + $0x38] sm:$0xf] %v4517_v32  ;;  %6825 = vmatpush.bf16.msra.mxu1 %v9036_v29  ;;  %v9035_v62 = vld [vmem:[%s16887_s2] sm:$0xff] }
 0x3ba   : > { %v4558_v13 = vrot.slane %v4556_v38, 7  ;;  %v4559_v53 = vshll.u32 %v14295_v8, 16  ;;  %v4565_v16 = vshrl.u32 %v14297_v61, 16  ;;  %v4568_v7 = vshll.u32 %v14297_v61, 16  ;;  %4896 = vst [vmem:[#allocation2 + $0x3c] sm:$0xf] %v4526_v55  ;;  %9663 = vmatpush.bf16.msra.mxu2 %v9036_v29  ;;  %7077 = vmatpush.bf16.msrb.mxu3 %v9056_v45 }
 0x3bb   : > { %v4535_v60 = vsel %vm13833_vm14, %v4527_v1, %v4534_v19  ;;  %v4543_v48 = vor.u32 %v4541_v4, %v4540_v17  ;;  %v4545_v0 = vrot.slane %v4540_v17, 4  ;;  %v4552_v50 = vor.u32 %v4550_v23, %v4549_v25  ;;  %v9065_v8 = vld [vmem:[%s16887_s2 + $0xf0] sm:$0xff] }
 0x3bc   : > { %v4554_v34 = vrot.slane %v4549_v25, 4  ;;  %v4561_v26 = vor.u32 %v4559_v53, %v4558_v13  ;;  %v4563_v51 = vrot.slane %v4558_v13, 4  ;;  %v4567_v61 = vrot.slane %v4565_v16, 7  ;;  %4897 = vst [vmem:[#allocation2 + $0x40] sm:$0xf] %v4535_v60  ;;  %7204 = vmatpush.bf16.msrb.mxu0 %v9065_v8 }
 0x3bd   : > { %v4544_v27 = vsel %vm13833_vm14, %v4536_v39, %v4543_v48  ;;  %v4553_v21 = vsel %vm13833_vm14, %v4545_v0, %v4552_v50  ;;  %v4574_v52 = vshrl.u32 %v14299_v37, 16  ;;  %v4577_v20 = vshll.u32 %v14299_v37, 16  ;;  %v9064_v37 = vld [vmem:[%s16887_s2 + $0xe8] sm:$0xff]  ;;  %6826 = vmatpush.bf16.msra.mxu1 %v9035_v62 }
 0x3be   : > { %v4562_v54 = vsel %vm13833_vm14, %v4554_v34, %v4561_v26  ;;  %v4570_v1 = vor.u32 %v4568_v7, %v4567_v61  ;;  %v4572_v59 = vrot.slane %v4567_v61, 4  ;;  %v4583_v33 = vshrl.u32 %v14301_v49, 16  ;;  %4898 = vst [vmem:[#allocation2 + $0x44] sm:$0xf] %v4544_v27  ;;  %v14480_v7 = vld [vmem:[#allocation2] sm:$0xff]   ;;  %9664 = vmatpush.bf16.msra.mxu2 %v9035_v62 }
 0x3bf   : > { %v4576_v44 = vrot.slane %v4574_v52, 7  ;;  %v4586_v4 = vshll.u32 %v14301_v49, 16  ;;  %v4592_v11 = vshrl.u32 %v14303_v47, 16  ;;  %v4595_v32 = vshll.u32 %v14303_v47, 16  ;;  %4899 = vst [vmem:[#allocation2 + $0x48] sm:$0xf] %v4553_v21 }
 0x3c0   : > { %v4571_v55 = vsel %vm13833_vm14, %v4563_v51, %v4570_v1  ;;  %v4585_v23 = vrot.slane %v4583_v33, 7  ;;  %v4601_v38 = vshrl.u32 %v14305_v41, 16  ;;  %v4604_v19 = vshll.u32 %v14305_v41, 16  ;;  %4900 = vst [vmem:[#allocation2 + $0x4c] sm:$0xf] %v4562_v54  ;;  %7205 = vmatpush.bf16.msrb.mxu0 %v9064_v37  ;;  %v9055_v47 = vld [vmem:[%s16887_s2 + $0xa0] sm:$0xff]  ;;  %6827 = vmatmul.bf16.vlgmr.msra.gmra.mxu1 %v14480_v7 }
 0x3c1   : > { %v4579_v39 = vor.u32 %v4577_v20, %v4576_v44  ;;  %v4581_v17 = vrot.slane %v4576_v44, 4  ;;  %v4594_v25 = vrot.slane %v4592_v11, 7  ;;  %v4610_v49 = vshrl.u32 %v14307_v6, 16  ;;  %4901 = vst [vmem:[#allocation2 + $0x50] sm:$0xf] %v4571_v55  ;;  %v9063_v41 = vld [vmem:[%s16887_s2 + $0xe0] sm:$0xff]  ;;  %7078 = vmatpush.bf16.msrb.mxu3 %v9055_v47 }
 0x3c2   : > { %v4588_v22 = vor.u32 %v4586_v4, %v4585_v23  ;;  %v4590_v13 = vrot.slane %v4585_v23, 4  ;;  %v4603_v53 = vrot.slane %v4601_v38, 7  ;;  %v4613_v16 = vshll.u32 %v14307_v6, 16  ;;  %v9054_v21 = vld [vmem:[%s16887_s2 + $0x98] sm:$0xff] }
 0x3c3   : > { %v4580_v60 = vsel %vm13833_vm14, %v4572_v59, %v4579_v39  ;;  %v4597_v48 = vor.u32 %v4595_v32, %v4594_v25  ;;  %v4599_v0 = vrot.slane %v4594_v25, 4  ;;  %v4612_v50 = vrot.slane %v4610_v49, 7  ;;  %v9062_v1 = vld [vmem:[%s16887_s2 + $0xd8] sm:$0xff] }
 0x3c4   : > { %v4589_v29 = vsel %vm13833_vm14, %v4581_v17, %v4588_v22  ;;  %v4606_v8 = vor.u32 %v4604_v19, %v4603_v53  ;;  %v4608_v34 = vrot.slane %v4603_v53, 4  ;;  %v4619_v6 = vshrl.u32 %v14309_v56, 16  ;;  %4902 = vst [vmem:[#allocation2 + $0x54] sm:$0xf] %v4580_v60  ;;  %7206 = vmatpush.bf16.msrb.mxu0 %v9063_v41  ;;  %v9052_v22 = vld [vmem:[%s16887_s2 + $0x88] sm:$0xff] }
 0x3c5   : > { %v4598_v26 = vsel %vm13833_vm14, %v4590_v13, %v4597_v48  ;;  %v4615_v51 = vor.u32 %v4613_v16, %v4612_v50  ;;  %v4617_v61 = vrot.slane %v4612_v50, 4  ;;  %v4622_v27 = vshll.u32 %v14309_v56, 16  ;;  %4903 = vst [vmem:[#allocation2 + $0x58] sm:$0xf] %v4589_v29  ;;  %7079 = vmatpush.bf16.msrb.mxu3 %v9054_v21  ;;  %v9060_v29 = vld [vmem:[%s16887_s2 + $0xc8] sm:$0xff] }
 0x3c6   : > { %v4607_v52 = vsel %vm13833_vm14, %v4599_v0, %v4606_v8  ;;  %v4621_v20 = vrot.slane %v4619_v6, 7  ;;  %v4628_v45 = vshrl.u32 %v14311_v12, 16  ;;  %v4631_v54 = vshll.u32 %v14311_v12, 16  ;;  %4904 = vst [vmem:[#allocation2 + $0x5c] sm:$0xf] %v4598_v26  ;;  %v9050_v26 = vld [vmem:[%s16887_s2 + $0x78] sm:$0xff] }
 0x3c7   : > { %v4616_v56 = vsel %vm13833_vm14, %v4608_v34, %v4615_v51  ;;  %v4637_v59 = vshrl.u32 %v14313_v43, 16  ;;  %v4640_v33 = vshll.u32 %v14313_v43, 16  ;;  %v4646_v62 = vshrl.u32 %v14315_v63, 16  ;;  %4905 = vst [vmem:[#allocation2 + $0x60] sm:$0xf] %v4607_v52  ;;  %v9053_v43 = vld [vmem:[%s16887_s2 + $0x90] sm:$0xff]  ;;  %6947 = vmatpush.bf16.msrb.mxu2 %v9050_v26 }
 0x3c8   : > { %v4624_v37 = vor.u32 %v4622_v27, %v4621_v20  ;;  %v4626_v44 = vrot.slane %v4621_v20, 4  ;;  %v4630_v4 = vrot.slane %v4628_v45, 7  ;;  %v4649_v12 = vshll.u32 %v14315_v63, 16  ;;  %4906 = vst [vmem:[#allocation2 + $0x64] sm:$0xf] %v4616_v56  ;;  %7207 = vmatpush.bf16.msrb.mxu0 %v9062_v1  ;;  %v9061_v63 = vld [vmem:[%s16887_s2 + $0xd0] sm:$0xff] }
 0x3c9   : > { %v4639_v11 = vrot.slane %v4637_v59, 7  ;;  %v4648_v32 = vrot.slane %v4646_v62, 7  ;;  %v4655_v55 = vshrl.u32 %v14317_v10, 16  ;;  %v4658_v23 = vshll.u32 %v14317_v10, 16  ;;  %7080 = vmatpush.bf16.msrb.mxu3 %v9053_v43  ;;  %v9051_v51 = vld [vmem:[%s16887_s2 + $0x80] sm:$0xff] }
 0x3ca   : > { %v4625_v38 = vsel %vm13833_vm14, %v4617_v61, %v4624_v37  ;;  %v4633_v19 = vor.u32 %v4631_v54, %v4630_v4  ;;  %v4635_v39 = vrot.slane %v4630_v4, 4  ;;  %v4664_v17 = vshrl.u32 %v14319_v18, 16  ;;  %v9059_v62 = vld [vmem:[%s16887_s2 + $0xc0] sm:$0xff] }
 0x3cb   : > { %v4642_v25 = vor.u32 %v4640_v33, %v4639_v11  ;;  %v4644_v49 = vrot.slane %v4639_v11, 4  ;;  %v4651_v47 = vor.u32 %v4649_v12, %v4648_v32  ;;  %v4653_v10 = vrot.slane %v4648_v32, 4  ;;  %4907 = vst [vmem:[#allocation2 + $0x68] sm:$0xf] %v4625_v38 }
 0x3cc   : > { %v4634_v13 = vsel %vm13833_vm14, %v4626_v44, %v4633_v19  ;;  %v4657_v53 = vrot.slane %v4655_v55, 7  ;;  %v4666_v16 = vrot.slane %v4664_v17, 7  ;;  %v4667_v41 = vshll.u32 %v14319_v18, 16  ;;  %7208 = vmatpush.bf16.msrb.mxu0 %v9061_v63 }
 0x3cd   : > { %v4643_v60 = vsel %vm13833_vm14, %v4635_v39, %v4642_v25  ;;  %v4652_v48 = vsel %vm13833_vm14, %v4644_v49, %v4651_v47  ;;  %v4673_v0 = vshrl.u32 %v14321_v24, 16  ;;  %v4676_v50 = vshll.u32 %v14321_v24, 16  ;;  %4908 = vst [vmem:[#allocation2 + $0x6c] sm:$0xf] %v4634_v13  ;;  %7081 = vmatpush.bf16.msrb.mxu3 %v9052_v22 }
 0x3ce   : > { %v4660_v8 = vor.u32 %v4658_v23, %v4657_v53  ;;  %v4662_v34 = vrot.slane %v4657_v53, 4  ;;  %v4669_v6 = vor.u32 %v4667_v41, %v4666_v16  ;;  %v4671_v18 = vrot.slane %v4666_v16, 4  ;;  %4909 = vst [vmem:[#allocation2 + $0x70] sm:$0xf] %v4643_v60  ;;  %v9074_v23 = vld [vmem:[%s16887_s2 + $0x138] sm:$0xff] }
 0x3cf   : > { %v4675_v24 = vrot.slane %v4673_v0, 7  ;;  %v4682_v61 = vshrl.u32 %v14323_v28, 16  ;;  %v4685_v27 = vshll.u32 %v14323_v28, 16  ;;  %v4691_v21 = vshrl.u32 %v14325_v2, 16  ;;  %4910 = vst [vmem:[#allocation2 + $0x74] sm:$0xf] %v4652_v48  ;;  %7331 = vmatpush.bf16.msrb.mxu1 %v9074_v23 }
 0x3d0   : > { %v4661_v52 = vsel %vm13833_vm14, %v4653_v10, %v4660_v8  ;;  %v4670_v20 = vsel %vm13833_vm14, %v4662_v34, %v4669_v6  ;;  %v4694_v45 = vshll.u32 %v14325_v2, 16  ;;  %v4700_v54 = vshrl.u32 %v14327_v9, 16  ;;  %v14551_v1 = vld [vmem:[#allocation2 + $0x60] sm:$0xff]   ;;  %7209 = vmatpush.bf16.msrb.mxu0 %v9060_v29 }
 0x3d1   : > { %v4678_v56 = vor.u32 %v4676_v50, %v4675_v24  ;;  %v4680_v59 = vrot.slane %v4675_v24, 4  ;;  %v4684_v28 = vrot.slane %v4682_v61, 7  ;;  %v4693_v33 = vrot.slane %v4691_v21, 7  ;;  %4911 = vst [vmem:[#allocation2 + $0x78] sm:$0xf] %v4661_v52  ;;  %6887 = vmatmul.bf16.vlgmr.msra.gmra.mxu2 %v14551_v1  ;;  %7082 = vmatpush.bf16.msrb.mxu3 %v9051_v51 }
 0x3d2   : > { %v4702_v37 = vrot.slane %v4700_v54, 7  ;;  %v4703_v2 = vshll.u32 %v14327_v9, 16  ;;  %v4709_v44 = vshrl.u32 %v14329_v46, 16  ;;  %v4712_v4 = vshll.u32 %v14329_v46, 16  ;;  %4912 = vst [vmem:[#allocation2 + $0x7c] sm:$0xf] %v4670_v20 }
 0x3d3   : > { %v4679_v12 = vsel %vm13833_vm14, %v4671_v18, %v4678_v56  ;;  %v4687_v11 = vor.u32 %v4685_v27, %v4684_v28  ;;  %v4689_v32 = vrot.slane %v4684_v28, 4  ;;  %v4696_v55 = vor.u32 %v4694_v45, %v4693_v33 }
 0x3d4   : > { %v4698_v43 = vrot.slane %v4693_v33, 4  ;;  %v4705_v38 = vor.u32 %v4703_v2, %v4702_v37  ;;  %v4707_v19 = vrot.slane %v4702_v37, 4  ;;  %v4711_v9 = vrot.slane %v4709_v44, 7  ;;  %4913 = vst [vmem:[#allocation2 + $0x80] sm:$0xf] %v4679_v12  ;;  %7210 = vmatpush.bf16.msrb.mxu0 %v9059_v62 }
 0x3d5   : > { %v4688_v46 = vsel %vm13833_vm14, %v4680_v59, %v4687_v11  ;;  %v4697_v39 = vsel %vm13833_vm14, %v4689_v32, %v4696_v55  ;;  %v4718_v17 = vshrl.u32 %v14331_v15, 16  ;;  %v4721_v63 = vshll.u32 %v14331_v15, 16  ;;  %v14601_v11 = vld [vmem:[#allocation2 + $0x68] sm:$0xff]  }
 0x3d6   : > { %v4706_v25 = vsel %vm13833_vm14, %v4698_v43, %v4705_v38  ;;  %v4714_v49 = vor.u32 %v4712_v4, %v4711_v9  ;;  %v4716_v47 = vrot.slane %v4711_v9, 4  ;;  %v4727_v10 = vshrl.u32 %v14333_v14, 16  ;;  %4914 = vst [vmem:[#allocation2 + $0x84] sm:$0xf] %v4688_v46  ;;  %v17736_v9 = vld [vmem:[#allocation70_spill] sm:$0xff] }
 0x3d7   : > { %v4720_v22 = vrot.slane %v4718_v17, 7  ;;  %v4730_v13 = vshll.u32 %v14333_v14, 16  ;;  %v4736_v53 = vshrl.u32 %v14335_v30, 16  ;;  %v4739_v16 = vshll.u32 %v14335_v30, 16  ;;  %4915 = vst [vmem:[#allocation2 + $0x88] sm:$0xf] %v4697_v39 }
 0x3d8   : > { %v4715_v15 = vsel %vm13833_vm14, %v4707_v19, %v4714_v49  ;;  %v4729_v41 = vrot.slane %v4727_v10, 7  ;;  %v4745_v60 = vshrl.u32 %v14337_v3, 16  ;;  %v4748_v48 = vshll.u32 %v14337_v3, 16  ;;  %4916 = vst [vmem:[#allocation2 + $0x8c] sm:$0xf] %v4706_v25 }
 0x3d9   : > { %v4723_v0 = vor.u32 %v4721_v63, %v4720_v22  ;;  %v4725_v50 = vrot.slane %v4720_v22, 4  ;;  %v4738_v29 = vrot.slane %v4736_v53, 7  ;;  %v4754_v8 = vshrl.u32 %v14339_v5, 16  ;;  %4917 = vst [vmem:[#allocation2 + $0x90] sm:$0xf] %v4715_v15  ;;  %v17737_v53 = vld [vmem:[#allocation3_spill] sm:$0xff] }
 0x3da   : > { %v4732_v14 = vor.u32 %v4730_v13, %v4729_v41  ;;  %v4734_v34 = vrot.slane %v4729_v41, 4  ;;  %v4747_v6 = vrot.slane %v4745_v60, 7  ;;  %v4757_v30 = vshll.u32 %v14339_v5, 16  ;;  %v9458_v15 = vld [vmem:[#allocation2] sm:$0xf0] }
 0x3db   : > { %v4724_v18 = vsel %vm13833_vm14, %v4716_v47, %v4723_v0  ;;  %v4741_v26 = vor.u32 %v4739_v16, %v4738_v29  ;;  %v4743_v51 = vrot.slane %v4738_v29, 4  ;;  %v4756_v24 = vrot.slane %v4754_v8, 7  ;;  %v9459_v41 = vld [vmem:[#allocation2] sm:$0xe] }
 0x3dc   : > { %v4733_v3 = vsel %vm13833_vm14, %v4725_v50, %v4732_v14  ;;  %v4750_v61 = vor.u32 %v4748_v48, %v4747_v6  ;;  %v4752_v27 = vrot.slane %v4747_v6, 4  ;;  %v4763_v21 = vshrl.u32 %v14341_v31, 16  ;;  %4918 = vst [vmem:[#allocation2 + $0x94] sm:$0xf] %v4724_v18 }
 0x3dd   : > { %v4742_v52 = vsel %vm13833_vm14, %v4734_v34, %v4741_v26  ;;  %v4759_v20 = vor.u32 %v4757_v30, %v4756_v24  ;;  %v4761_v45 = vrot.slane %v4756_v24, 4  ;;  %v4766_v5 = vshll.u32 %v14341_v31, 16  ;;  %4919 = vst [vmem:[#allocation2 + $0x98] sm:$0xf] %v4733_v3  ;;  %v17739_v34 = vld [vmem:[#allocation15_spill] sm:$0xff]  ;;  %v14630_v30 = vld [vmem:[#allocation2 + $0x10] sm:$0xff]  }
 0x3de   : > { %v4751_v54 = vsel %vm13833_vm14, %v4743_v51, %v4750_v61  ;;  %v4765_v56 = vrot.slane %v4763_v21, 7  ;;  %v4772_v59 = vshrl.u32 %v14343_v35, 16  ;;  %v4775_v28 = vshll.u32 %v14343_v35, 16  ;;  %4920 = vst [vmem:[#allocation2 + $0x9c] sm:$0xf] %v4742_v52 }
 0x3df   : > { %v4760_v33 = vsel %vm13833_vm14, %v4752_v27, %v4759_v20  ;;  %v4781_v62 = vshrl.u32 %v14345_v42, 16  ;;  %v4784_v37 = vshll.u32 %v14345_v42, 16  ;;  %v4790_v2 = vshrl.u32 %v14350_v40, 16  ;;  %4921 = vst [vmem:[#allocation2 + $0xa0] sm:$0xf] %v4751_v54 }
 0x3e0   : > { %v4768_v31 = vor.u32 %v4766_v5, %v4765_v56  ;;  %v4770_v44 = vrot.slane %v4765_v56, 4  ;;  %v4774_v4 = vrot.slane %v4772_v59, 7  ;;  %v4793_v12 = vshll.u32 %v14350_v40, 16  ;;  %4922 = vst [vmem:[#allocation2 + $0xa4] sm:$0xf] %v4760_v33  ;;  %v9049_v40 = vld [vmem:[%s16887_s2 + $0x70] sm:$0xff] }
 0x3e1   : > { %v4783_v35 = vrot.slane %v4781_v62, 7  ;;  %v4792_v32 = vrot.slane %v4790_v2, 7  ;;  %v4799_v55 = vshrl.u32 %v14352_v36, 16  ;;  %v4802_v23 = vshll.u32 %v14352_v36, 16  ;;  %6892 = vmatmul.bf16.gmra.mxu2 %v14601_v11  ;;  %v4882_v42 = vld [vmem:[#allocation2 + $0xc] sm:$0xf] }
 0x3e2   : > { %v4769_v43 = vsel %vm13833_vm14, %v4761_v45, %v4768_v31  ;;  %v4777_v38 = vor.u32 %v4775_v28, %v4774_v4  ;;  %v4779_v19 = vrot.slane %v4774_v4, 4  ;;  %v4808_v46 = vshrl.u32 %v17736_v9, 16  ;;  %6948 = vmatpush.bf16.msrb.mxu2 %v9049_v40  ;;  %v14639_v45 = vld [vmem:[#allocation2 + $0x70] sm:$0xff]   ;;  %v9048_v2 = vld [vmem:[%s16887_s2 + $0x68] sm:$0xff]  ;;  %v14664_v4 = vld [vmem:[#allocation2 + $0x78] sm:$0xff]  }
 0x3e3   : > { %v4786_v39 = vor.u32 %v4784_v37, %v4783_v35  ;;  %v4788_v17 = vrot.slane %v4783_v35, 4  ;;  %v4795_v63 = vor.u32 %v4793_v12, %v4792_v32  ;;  %v4797_v25 = vrot.slane %v4792_v32, 4  ;;  %4923 = vst [vmem:[#allocation2 + $0xa8] sm:$0xf] %v4769_v43  ;;  %v9072_v12 = vld [vmem:[%s16887_s2 + $0x128] sm:$0xff]  ;;  %v14671_v35 = vld [vmem:[#allocation2 + $0x18] sm:$0xff]  }
 0x3e4   : > { %v4778_v36 = vsel %vm13833_vm14, %v4770_v44, %v4777_v38  ;;  %v4801_v49 = vrot.slane %v4799_v55, 7  ;;  %v4810_v47 = vrot.slane %v4808_v46, 7  ;;  %v4811_v10 = vshll.u32 %v17736_v9, 16  ;;  %v14662_v44 = vld [vmem:[#allocation2 + $0x14] sm:$0xff]   ;;  %v9047_v43 = vld [vmem:[%s16887_s2 + $0x60] sm:$0xff]  ;;  %v14692_v40 = vld [vmem:[#allocation2 + $0x88] sm:$0xff]  }
 0x3e5   : > { %v4787_v22 = vsel %vm13833_vm14, %v4779_v19, %v4786_v39  ;;  %v4796_v13 = vsel %vm13833_vm14, %v4788_v17, %v4795_v63  ;;  %vm17738_vm12 = vnez %v17737_v53  ;;  %4924 = vst [vmem:[#allocation2 + $0xac] sm:$0xf] %v4778_v36  ;;  %v5188_v29 = vshll.u32 %v14480_v7, 16  ;;  %v14685_v38 = vld [vmem:[#allocation2 + $0x20] sm:$0xff]   ;;  %v14699_v17 = vld [vmem:[#allocation2 + $0x28] sm:$0xff]  }
 0x3e6   : > { %v4883_v16 = vsel %vm17738_vm12, %v14369_v57, %v4882_v42  ;;  %v4804_v60 = vor.u32 %v4802_v23, %v4801_v49  ;;  %v4806_v48 = vrot.slane %v4801_v49, 4  ;;  %v4813_v0 = vor.u32 %v4811_v10, %v4810_v47  ;;  %4925 = vst [vmem:[#allocation2 + $0xb0] sm:$0xf] %v4787_v22  ;;  %6949 = vmatpush.bf16.msrb.mxu2 %v9048_v2  ;;  %v14676_v23 = vld [vmem:[#allocation2 + $0x1c] sm:$0xff]   ;;  %v14690_v46 = vld [vmem:[#allocation2 + $0x24] sm:$0xff]   ;;  %v14707_v49 = vld [vmem:[#allocation2 + $0x2c] sm:$0xff]  }
 0x3e7   : > { %v4815_v50 = vrot.slane %v4810_v47, 4  ;;  %4884 = vst [vmem:[#allocation2 + $0xc] sm:$0xf] %v4883_v16  ;;  %v9460_v6 = vor.u32 %v9459_v41, %v9458_v15  ;;  %v5186_v18 = vshrl.u32 %v14480_v7, 16  ;;  %v5190_v26 = vrot.slane %v5188_v29, 1  ;;  %v9073_v7 = vld [vmem:[%s16887_s2 + $0x130] sm:$0xff] }
 0x3e8   : > { %v4805_v8 = vsel %vm13833_vm14, %v4797_v25, %v4804_v60  ;;  %v4814_v14 = vsel %vm13833_vm14, %v4806_v48, %v4813_v0  ;;  %4926 = vst [vmem:[#allocation2 + $0xb4] sm:$0xf] %v4796_v13  ;;  %v17110_v24 = vunpack.c.l.b16 %v14630_v30  ;;  %7332 = vmatpush.bf16.msrb.mxu1 %v9073_v7  ;;  %v5201_v28 = vshll.u32 %v14630_v30, 16  ;;  %v14678_v42 = vld [vmem:[#allocation2 + $0x80] sm:$0xff]   ;;  %v9046_v25 = vld [vmem:[%s16887_s2 + $0x58] sm:$0xff]  ;;  %v14709_v47 = vld [vmem:[#allocation2 + $0x90] sm:$0xff]  }
 0x3e9   : > { %v4823_v57 = vsel %vm13833_vm14, %v4815_v50, %v17739_v34  ;;  %4927 = vst [vmem:[#allocation2 + $0xb8] sm:$0xf] %v4805_v8  ;;  %v5403_v51 = vrot.slane %v9460_v6, 1  ;;  %v5191_v58 = vor.u32 %v5190_v26, %v5186_v18  ;;  %vm17740_vm14 = vcmask 1046528   ;;  %v9071_v39 = vld [vmem:[%s16887_s2 + $0x120] sm:$0xff]  ;;  %v9070_v10 = vld [vmem:[%s16887_s2 + $0x118] sm:$0xff] }
 0x3ea   : > { %4928 = vst [vmem:[#allocation2 + $0xbc] sm:$0xf] %v4814_v14  ;;  %v14650_v33 = vrot.slane %v5201_v28, 1  ;;  %v5406_v37 = vrot.slane %v14630_v30, 1  ;;  %vm17743_vm8 = vmmov %vm17740_vm14  ;;  %v5408_v32 = vrot.slane %v14671_v35, 1  ;;  %6950 = vmatpush.bf16.msrb.mxu2 %v9047_v43  ;;  %v5410_v19 = vrot.slane %v14685_v38, 1 }
 0x3eb   : > { %4929 = vst [vmem:[#allocation2 + $0xc0] sm:$0xf] %v4823_v57  ;;  %vm17744_vm15 = vmmov %vm17743_vm8  ;;  %v5412_v63 = vrot.slane %v14699_v17, 1  ;;  %v14716_v22 = vld [vmem:[#allocation2 + $0x30] sm:$0xff]   ;;  %v14719_v53 = vld [vmem:[#allocation2 + $0x20] sm:$0xff] }
 0x3ec   : > { %7333 = vmatpush.bf16.msrb.mxu1 %v9072_v12  ;;  %v5409_v55 = vsel %vm17744_vm15, %v5406_v37, %v5408_v32  ;;  %vm17745_vm5 = vmmov %vm17743_vm8  ;;  %v5414_v13 = vrot.slane %v14716_v22, 1  ;;  %v9013_v16 = vld [vmem:[#allocation2 + $0x28] sm:$0xff]  ;;  %v14723_v41 = vld [vmem:[#allocation2 + $0x34] sm:$0xff]   ;;  %v17109_v0 = vrot.slane %v14719_v53, 1 }
 0x3ed   : > { %v5411_v9 = vsel %vm17745_vm5, %v5408_v32, %v5410_v19  ;;  %vm17746_vm6 = vmmov %vm17745_vm5  ;;  %v14725_v60 = vld [vmem:[#allocation2 + $0x98] sm:$0xff]   ;;  %v9014_v48 = vld [vmem:[#allocation2 + $0x30] sm:$0xff]  ;;  %v6175_v29 = vrot.slane %v9013_v16, 1 }
 0x3ee   : > { %v9433_v3 = vld [vmem:[#allocation2 + $0x8] sm:$0xff]   ;;  %v5413_v36 = vsel %vm17746_vm6, %v5410_v19, %v5412_v63  ;;  %6951 = vmatpush.bf16.msrb.mxu2 %v9046_v25  ;;  %vm17747_vm13 = vmmov %vm17745_vm5  ;;  %v9045_v50 = vld [vmem:[%s16887_s2 + $0x50] sm:$0xff]  ;;  %v6177_v34 = vrot.slane %v9014_v48, 1 }
 0x3ef   : > { %6832 = vmatmul.bf16.gmra.mxu1 %v9433_v3  ;;  %v5404_v61 = vrot.slane %v9433_v3, 1  ;;  %v9214_v27 = vunpack.c.h.b16 %v9433_v3  ;;  %v5193_v21 = vshll.u32 %v9433_v3, 16  ;;  %v5197_v54 = vshrl.u32 %v9433_v3, 16  ;;  %v9015_v8 = vld [vmem:[#allocation2 + $0x38] sm:$0xff]  ;;  %vm17748_vm10 = vmmov %vm17745_vm5  ;;  %v9016_v57 = vld [vmem:[#allocation2 + $0x40] sm:$0xff] }
 0x3f0   : > { %7334 = vmatpush.bf16.msrb.mxu1 %v9071_v39  ;;  %v5415_v15 = vsel %vm17747_vm13, %v5412_v63, %v5414_v13  ;;  %v14736_v14 = vsel %vm17748_vm10, %v17109_v0, %v6175_v29  ;;  %vm17749_vm9 = vmmov %vm17745_vm5  ;;  %v9017_v18 = vld [vmem:[#allocation2 + $0x48] sm:$0xff]  ;;  %v6179_v26 = vrot.slane %v9015_v8, 1  ;;  %v14757_v2 = vld [vmem:[#allocation2 + $0xa0] sm:$0xff]  }
 0x3f1   : > { %v5405_v52 = vsel %vm17740_vm14, %v5403_v51, %v5404_v61  ;;  %v14637_v20 = vpack.c.b16 %v17110_v24, %v9214_v27  ;;  %v5195_v5 = vrot.slane %v5193_v21, 1  ;;  %6897 = vmatmul.bf16.gmra.mxu2 %v14639_v45  ;;  %v5407_v31 = vsel %vm17743_vm8, %v5404_v61, %v5406_v37  ;;  %v14741_v51 = vld [vmem:[#allocation2 + $0x38] sm:$0xff]   ;;  %vm17750_vm1 = vmmov %vm17745_vm5  ;;  %v9018_v27 = vld [vmem:[#allocation2 + $0x50] sm:$0xff] }
 0x3f2   : > { %7083 = vmatmul.bf16.vlgmr.msrb.gmra.mxu3 %v5405_v52  ;;  %6952 = vmatpush.bf16.msrb.mxu2 %v9045_v50  ;;  %v14739_v6 = vsel %vm17749_vm9, %v6175_v29, %v6177_v34  ;;  %v14744_v3 = vsel %vm17750_vm1, %v6177_v34, %v6179_v26  ;;  %v6181_v61 = vrot.slane %v9016_v57, 1  ;;  %vm17751_vm3 = vmmov %vm17750_vm1  ;;  %v5416_v52 = vrot.slane %v14741_v51, 1  ;;  %v14755_v37 = vld [vmem:[#allocation2 + $0x3c] sm:$0xff]   ;;  %v9025_v48 = vld [vmem:[#allocation2 + $0x88] sm:$0xff] }
 0x3f3   : > { %7211 = vmatmul.bf16.vlgmr.msrb.gmra.mxu0 %v14637_v20  ;;  %v14647_v56 = vsel %vm17741_vm2, %v5191_v58, %v5195_v5  ;;  %v5199_v59 = vor.u32 %v5197_v54, %v5195_v5  ;;  %v6183_v58 = vrot.slane %v9017_v18, 1  ;;  %v9019_v5 = vld [vmem:[#allocation2 + $0x58] sm:$0xff]  ;;  %vm17752_vm4 = vmmov %vm17750_vm1  ;;  %v9020_v54 = vld [vmem:[#allocation2 + $0x60] sm:$0xff] }
 0x3f4   : > { %7335 = vmatpush.bf16.msrb.mxu1 %v9070_v10  ;;  %v14747_v21 = vsel %vm17751_vm3, %v6179_v26, %v6181_v61  ;;  %vm17753_vm11 = vmmov %vm17750_vm1  ;;  %v6187_v32 = vrot.slane %v9019_v5, 1  ;;  %v6189_v19 = vrot.slane %v9020_v54, 1  ;;  %v9024_v16 = vld [vmem:[#allocation2 + $0x80] sm:$0xff]  ;;  %v9026_v34 = vld [vmem:[#allocation2 + $0x90] sm:$0xff]  ;;  %v6199_v5 = vrot.slane %v9025_v48, 1 }
 0x3f5   : > { %v14654_v62 = vsel %vm17742_vm7, %v5199_v59, %v14650_v33  ;;  %v14751_v7 = vsel %vm17752_vm4, %v6181_v61, %v6183_v58  ;;  %v6185_v59 = vrot.slane %v9018_v27, 1  ;;  %v5417_v28 = vsel %vm17753_vm11, %v5414_v13, %v5416_v52  ;;  %vm17754_vm0 = vmmov %vm17750_vm1  ;;  %v14780_v50 = vld [vmem:[#allocation2 + $0x40] sm:$0xff]   ;;  %v9027_v57 = vld [vmem:[#allocation2 + $0x98] sm:$0xff] }
 0x3f6   : > { %vm17755_vm12 = vmmov %vm17754_vm0  ;;  %v6197_v26 = vrot.slane %v9024_v16, 1  ;;  %v5418_v61 = vrot.slane %v14780_v50, 1  ;;  %v9029_v54 = vld [vmem:[#allocation2 + $0xa8] sm:$0xff] }
 0x3f7   : > { %v14760_v12 = vsel %vm17754_vm0, %v6183_v58, %v6185_v59  ;;  %v14768_v43 = vsel %vm17755_vm12, %v6185_v59, %v6187_v32  ;;  %vm17757_vm14 = vmmov %vm17754_vm0  ;;  %v9028_v58 = vld [vmem:[#allocation2 + $0xa0] sm:$0xff]  ;;  %v14804_v16 = vld [vmem:[#allocation2 + $0xa8] sm:$0xff]  }
 0x3f8   : > { %v14773_v63 = vsel %vm17757_vm14, %v6187_v32, %v6189_v19  ;;  %vm17759_vm2 = vmmov %vm17754_vm0 }
 0x3f9   : > { %17758 = vst [vmem:[#allocation73_spill] sm:$0xff] %v14773_v63  ;;  %vm17761_vm7 = vmmov %vm17754_vm0 }
 0x3fa   : > { %vm17763_vm8 = vmmov %vm17754_vm0 }
 0x3fb   : > { %vm17766_vm15 = vmmov %vm17754_vm0 }
 0x3fc   : > { %vm17768_vm5 = vmmov %vm17754_vm0 }
 0x3fd   : > { %v14799_v32 = vsel %vm17768_vm5, %v6197_v26, %v6199_v5  ;;  %vm17770_vm6 = vmmov %vm17754_vm0 }
 0x3fe   : > { %17769 = vst [vmem:[#allocation38_spill] sm:$0xff] %v14799_v32  ;;  %vm17771_vm13 = vmmov %vm17754_vm0  ;;  %v14892_v32 = vld [vmem:[#allocation2 + $0x54] sm:$0xff]  }
 0x3ff   : > { %6837 = vmatmul.bf16.gmra.mxu1 %v14630_v30  ;;  %vm17774_vm10 = vmmov %vm17754_vm0 }
 0x400   : > { %vm17776_vm9 = vmmov %vm17754_vm0 }
 0x401   : > { %6902 = vmatmul.bf16.gmra.mxu2 %v14664_v4  ;;  %vm17778_vm1 = vmmov %vm17754_vm0 }
 0x402   : > { %7088 = vmatmul.bf16.gmra.mxu3 %v5407_v31  ;;  %v9021_v31 = vld [vmem:[#allocation2 + $0x68] sm:$0xff]  ;;  %vm17781_vm3 = vmmov %vm17754_vm0 }
 0x403   : > { %7216 = vmatmul.bf16.gmra.mxu0 %v14662_v44  ;;  %v6191_v25 = vrot.slane %v9021_v31, 1  ;;  %v9030_v31 = vld [vmem:[#allocation2 + $0xb0] sm:$0xff]  ;;  %vm17783_vm4 = vmmov %vm17754_vm0 }
 0x404   : > { %vm17785_vm11 = vmmov %vm17754_vm0 }
 0x405   : > { %v14776_v10 = vsel %vm17759_vm2, %v6189_v19, %v6191_v25  ;;  %v9031_v19 = vld [vmem:[#allocation2 + $0xb8] sm:$0xff]  ;;  %vm17789_vm12 = vmmov %vm17754_vm0 }
 0x406   : > { %17760 = vst [vmem:[#allocation75_spill] sm:$0xff] %v14776_v10  ;;  %vm17796_vm14 = vmmov %vm17754_vm0 }
 0x407   : > { %vm17805_vm2 = vmmov %vm17754_vm0 }
 0x408   : > { %vm17824_vm5 = vmmov %vm17754_vm0 }
 0x40f   : > { %6842 = vmatmul.bf16.gmra.mxu1 %v14671_v35 }
 0x411   : > { %6907 = vmatmul.bf16.gmra.mxu2 %v14678_v42 }
 0x412   : > { %7093 = vmatmul.bf16.gmra.mxu3 %v5409_v55  ;;  %v9069_v55 = vld [vmem:[%s16887_s2 + $0x110] sm:$0xff] }
 0x413   : > { %7221 = vmatmul.bf16.gmra.mxu0 %v14676_v23  ;;  %7336 = vmatpush.bf16.msrb.mxu1 %v9069_v55  ;;  %v6201_v55 = vrot.slane %v9026_v34, 1  ;;  %v14812_v34 = vld [vmem:[#allocation2 + $0xc8] sm:$0xff] }
 0x414   : > { %17773 = vst [vmem:[#allocation45_spill] sm:$0xff] %v14812_v34 }
 0x415   : > { %v14807_v48 = vsel %vm17771_vm13, %v6199_v5, %v6201_v55 }
 0x416   : > { %17772 = vst [vmem:[#allocation41_spill] sm:$0xff] %v14807_v48 }
 0x41f   : > { %6847 = vmatmul.bf16.gmra.mxu1 %v14685_v38 }
 0x421   : > { %6912 = vmatmul.bf16.gmra.mxu2 %v14692_v40 }
 0x422   : > { %7098 = vmatmul.bf16.gmra.mxu3 %v5411_v9  ;;  %v9022_v9 = vld [vmem:[#allocation2 + $0x70] sm:$0xff] }
 0x423   : > { %7226 = vmatmul.bf16.gmra.mxu0 %v14690_v46 }
 0x42f   : > { %6852 = vmatmul.bf16.gmra.mxu1 %v14699_v17 }
 0x431   : > { %6917 = vmatmul.bf16.gmra.mxu2 %v14709_v47 }
 0x432   : > { %7103 = vmatmul.bf16.gmra.mxu3 %v5413_v36  ;;  %v9023_v36 = vld [vmem:[#allocation2 + $0x78] sm:$0xff] }
 0x433   : > { %7231 = vmatmul.bf16.gmra.mxu0 %v14707_v49  ;;  %v6195_v8 = vrot.slane %v9023_v36, 1  ;;  %v14802_v36 = vld [vmem:[#allocation2 + $0x44] sm:$0xff]  }
 0x435   : > { %v14792_v59 = vsel %vm17766_vm15, %v6195_v8, %v6197_v26 }
 0x436   : > { %17767 = vst [vmem:[#allocation34_spill] sm:$0xff] %v14792_v59 }
 0x43d   : > { %v14778_v13 = vpop.f32.mrf.mxu1 }
 0x43f   : > { %6857 = vmatmul.bf16.gmra.mxu1 %v14716_v22 }
 0x441   : > { %6922 = vmatmul.bf16.gmra.mxu2 %v14725_v60 }
 0x442   : > { %7108 = vmatmul.bf16.gmra.mxu3 %v5415_v15  ;;  %v6193_v15 = vrot.slane %v9022_v9, 1  ;;  %v6203_v9 = vrot.slane %v9027_v57, 1 }
 0x443   : > { %7236 = vmatmul.bf16.gmra.mxu0 %v14723_v41 }
 0x444   : > { %v14783_v29 = vsel %vm17761_vm7, %v6191_v25, %v6193_v15  ;;  %v14786_v18 = vsel %vm17763_vm8, %v6193_v15, %v6195_v8  ;;  %v5419_v25 = vsel %vm17770_vm6, %v5416_v52, %v5418_v61  ;;  %v9032_v15 = vld [vmem:[#allocation2 + $0xc0] sm:$0xff]  ;;  %v6205_v8 = vrot.slane %v9028_v58, 1  ;;  %vm17814_vm8 = vmmov %vm17754_vm0 }
 0x445   : > { %17762 = vst [vmem:[#allocation80_spill] sm:$0xff] %v14783_v29  ;;  %v14809_v0 = vpop.f32.mrf.mxu1  ;;  %v14815_v57 = vsel %vm17774_vm10, %v6201_v55, %v6203_v9  ;;  %v6207_v52 = vrot.slane %v9029_v54, 1  ;;  %v6211_v58 = vrot.slane %v9031_v19, 1  ;;  %v17112_v54 = vrot.slane %v14812_v34, 1  ;;  %v14857_v34 = vld [vmem:[#allocation2 + $0xb0] sm:$0xff]   ;;  %vm17835_vm10 = vmmov %vm17754_vm0 }
 0x446   : > { %17764 = vst [vmem:[#allocation30_spill] sm:$0xff] %v14786_v18  ;;  %v14819_v26 = vsel %vm17776_vm9, %v6203_v9, %v6205_v8  ;;  %v14844_v9 = vld [vmem:[#allocation2 + $0x48] sm:$0xff]   ;;  %v14903_v18 = vld [vmem:[#allocation2 + $0x58] sm:$0xff]   ;;  %vm17812_vm7 = vsmask.f32 7424 }
 0x447   : > { %17775 = vst [vmem:[#allocation51_spill] sm:$0xff] %v14815_v57  ;;  %v14822_v5 = vsel %vm17778_vm1, %v6205_v8, %v6207_v52  ;;  %v5420_v8 = vrot.slane %v14844_v9, 1  ;;  %vm17822_vm15 = vmmov %vm17812_vm7 }
 0x448   : > { %17777 = vst [vmem:[#allocation55_spill] sm:$0xff] %v14819_v26  ;;  %vm17825_vm6 = vmmov %vm17812_vm7 }
 0x449   : > { %17779 = vst [vmem:[#allocation61_spill] sm:$0xff] %v14822_v5  ;;  %vm17833_vm13 = vmmov %vm17825_vm6 }
 0x44a   : > { %vm17836_vm9 = vmmov %vm17825_vm6 }
 0x44b   : > { %vm17844_vm1 = vmmov %vm17825_vm6 }
 0x44f   : > { %6862 = vmatmul.bf16.gmra.mxu1 %v14741_v51 }
 0x451   : > { %6927 = vmatmul.bf16.gmra.mxu2 %v14757_v2 }
 0x452   : > { %7113 = vmatmul.bf16.gmra.mxu3 %v5417_v28  ;;  %v9044_v28 = vld [vmem:[%s16887_s2 + $0x48] sm:$0xff] }
 0x453   : > { %7241 = vmatmul.bf16.gmra.mxu0 %v14755_v37  ;;  %6953 = vmatpush.bf16.msrb.mxu2 %v9044_v28  ;;  %v6209_v28 = vrot.slane %v9030_v31, 1  ;;  %v9068_v31 = vld [vmem:[%s16887_s2 + $0x108] sm:$0xff] }
 0x454   : > { %v14770_v39 = vpop.f32.mrf.mxu2  ;;  %7337 = vmatpush.bf16.msrb.mxu1 %v9068_v31 }
 0x455   : > { %17756 = vst [vmem:[#allocation72_spill] sm:$0xff] %v14770_v39  ;;  %v14827_v24 = vsel %vm17781_vm3, %v6207_v52, %v6209_v28  ;;  %v14830_v55 = vsel %vm17783_vm4, %v6209_v28, %v6211_v58  ;;  %vm17846_vm3 = vmmov %vm17754_vm0 }
 0x456   : > { %17782 = vst [vmem:[#allocation17_spill] sm:$0xff] %v14827_v24  ;;  %vm17847_vm4 = vmmov %vm17844_vm1 }
 0x457   : > { %17784 = vst [vmem:[#allocation21_spill] sm:$0xff] %v14830_v55  ;;  %v9067_v55 = vld [vmem:[%s16887_s2 + $0x100] sm:$0xff] }
 0x458   : > { %7338 = vmatpush.bf16.msrb.mxu1 %v9067_v55 }
 0x45c   : > { %v14789_v27 = vpop.f32.mrf.mxu2 }
 0x45d   : > { %17765 = vst [vmem:[#allocation9_spill] sm:$0xff] %v14789_v27  ;;  %v6213_v27 = vrot.slane %v9032_v15, 1 }
 0x45f   : > { %6867 = vmatmul.bf16.gmra.mxu1 %v14780_v50  ;;  %v14834_v39 = vsel %vm17785_vm11, %v6211_v58, %v6213_v27  ;;  %v14842_v19 = vsel %vm17754_vm0, %v6213_v27, %v17112_v54  ;;  %v5421_v58 = vsel %vm17789_vm12, %v5418_v61, %v5420_v8  ;;  %vm17855_vm11 = vmmov %vm17844_vm1 }
 0x460   : > { %17786 = vst [vmem:[#allocation24_spill] sm:$0xff] %v14834_v39  ;;  %v14855_v39 = vld [vmem:[#allocation2 + $0x4c] sm:$0xff]   ;;  %vm17857_vm12 = vmmov %vm17844_vm1 }
 0x461   : > { %6932 = vmatmul.bf16.gmra.mxu2 %v14804_v16  ;;  %17787 = vst [vmem:[#allocation27_spill] sm:$0xff] %v14842_v19  ;;  %v9043_v19 = vld [vmem:[%s16887_s2 + $0x40] sm:$0xff] }
 0x462   : > { %7118 = vmatmul.bf16.gmra.mxu3 %v5419_v25  ;;  %6954 = vmatpush.bf16.msrb.mxu2 %v9043_v19 }
 0x463   : > { %7246 = vmatmul.bf16.gmra.mxu0 %v14802_v36 }
 0x464   : > { %v14824_v25 = vpop.f32.mrf.mxu2 }
 0x465   : > { %17780 = vst [vmem:[#allocation10_spill] sm:$0xff] %v14824_v25  ;;  %v14872_v25 = vld [vmem:[#allocation2 + $0x50] sm:$0xff]  }
 0x46c   : > { %v14846_v15 = vpop.f32.mrf.mxu1  ;;  %v14849_v52 = vpop.f32.mrf.mxu2 }
 0x46d   : > { %17788 = vst [vmem:[#allocation29_spill] sm:$0xff] %v14849_v52  ;;  %v9455_v52 = vld [vmem:[#allocation2 + $0xb8] sm:$0xff]  }
 0x46e   : > { %v14879_v24 = vunpack.c.l.b16 %v9455_v52 }
 0x46f   : > { %6872 = vmatmul.bf16.gmra.mxu1 %v14844_v9 }
 0x470   : > { %v14852_v28 = vpop.f32.mrf.mxu0  ;;  %v5157_v57 = vpack.c.b16 %v14879_v24, %v14879_v24 }
 0x471   : > { %6937 = vmatmul.bf16.gmra.mxu2 %v14857_v34 }
 0x472   : > { %7123 = vmatmul.bf16.gmra.mxu3 %v5421_v58 }
 0x473   : > { %7251 = vmatmul.bf16.gmra.mxu0 %v14855_v39 }
 0x474   : > { %v14861_v27 = vpop.f32.mrf.mxu1  ;;  %v14865_v54 = vpop.f32.mrf.mxu2 }
 0x475   : > { %17790 = vst [vmem:[#allocation11_spill] sm:$0xff] %v14861_v27  ;;  %v14863_v31 = vpop.f32.mrf.mxu3 }
 0x476   : > { %17791 = vst [vmem:[#allocation32_spill] sm:$0xff] %v14865_v54  ;;  %v5422_v54 = vrot.slane %v14872_v25, 1 }
 0x478   : > { %v14870_v61 = vpop.f32.mrf.mxu0  ;;  %v5423_v48 = vsel %vm17796_vm14, %v5420_v8, %v5422_v54  ;;  %v5424_v8 = vrot.slane %v14903_v18, 1  ;;  %vm17865_vm14 = vmmov %vm17844_vm1 }
 0x479   : > { %17792 = vst [vmem:[#allocation6_spill] sm:$0xff] %v14870_v61  ;;  %v14954_v61 = vld [vmem:[#allocation2 + $0x64] sm:$0xff]  }
 0x47c   : > { %v14874_v58 = vpop.f32.mrf.mxu1  ;;  %v14884_v26 = vpop.f32.mrf.mxu2 }
 0x47d   : > { %17793 = vst [vmem:[#allocation13_spill] sm:$0xff] %v14874_v58  ;;  %v14881_v5 = vpop.f32.mrf.mxu3 }
 0x47e   : > { %17794 = vst [vmem:[#allocation23_spill] sm:$0xff] %v14884_v26 }
 0x47f   : > { %6877 = vmatmul.bf16.gmra.mxu1 %v14872_v25 }
 0x480   : > { %v14887_v19 = vpop.f32.mrf.mxu0 }
 0x481   : > { %17795 = vst [vmem:[#allocation36_spill] sm:$0xff] %v14887_v19  ;;  %6942 = vmatmul.bf16.gmra.mxu2 %v5157_v57  ;;  %v9082_v57 = vld [vmem:[%s16887_s2 + $0x178] sm:$0xff] }
 0x482   : > { %7128 = vmatmul.bf16.gmra.mxu3 %v5423_v48  ;;  %7459 = vmatpush.bf16.msra.mxu2 %v9082_v57 }
 0x483   : > { %7256 = vmatmul.bf16.gmra.mxu0 %v14892_v32 }
 0x484   : > { %v14895_v52 = vpop.f32.mrf.mxu1  ;;  %v14899_v55 = vpop.f32.mrf.mxu2 }
 0x485   : > { %17797 = vst [vmem:[#allocation40_spill] sm:$0xff] %v14895_v52  ;;  %v14897_v59 = vpop.f32.mrf.mxu3 }
 0x486   : > { %17798 = vst [vmem:[#allocation46_spill] sm:$0xff] %v14897_v59 }
 0x487   : > { %17799 = vst [vmem:[#allocation48_spill] sm:$0xff] %v14899_v55  ;;  %v9090_v55 = vld [vmem:[%s16887_s2 + $0x1b8] sm:$0xff] }
 0x488   : > { %v14901_v26 = vpop.f32.mrf.mxu0  ;;  %7587 = vmatpush.bf16.msra.mxu3 %v9090_v55  ;;  %v9106_v55 = vld [vmem:[%s16887_s2 + $0x238] sm:$0xff] }
 0x489   : > { %17800 = vst [vmem:[#allocation50_spill] sm:$0xff] %v14901_v26  ;;  %v14922_v26 = vld [vmem:[#allocation2 + $0x5c] sm:$0xff]   ;;  %7843 = vmatpush.bf16.msra.mxu1 %v9106_v55  ;;  %v5205_v55 = vshrl.u32 %v14630_v30, 16 }
 0x48c   : > { %v14905_v29 = vpop.f32.mrf.mxu1  ;;  %v14910_v48 = vpop.f32.mrf.mxu2 }
 0x48d   : > { %17801 = vst [vmem:[#allocation58_spill] sm:$0xff] %v14905_v29  ;;  %v14907_v10 = vpop.f32.mrf.mxu3  ;;  %v5425_v29 = vsel %vm17805_vm2, %v5422_v54, %v5424_v8  ;;  %v5532_v54 = vshrl.u32 %v14637_v20, 16  ;;  %vm17867_vm2 = vmmov %vm17754_vm0 }
 0x48e   : > { %17802 = vst [vmem:[#allocation64_spill] sm:$0xff] %v14907_v10 }
 0x48f   : > { %17803 = vst [vmem:[#allocation68_spill] sm:$0xff] %v14910_v48  ;;  %6882 = vmatmul.bf16.gmra.mxu1 %v14903_v18  ;;  %v5534_v48 = vshll.u32 %v14637_v20, 16  ;;  %v5426_v20 = vrot.slane %v14551_v1, 1 }
 0x490   : > { %v14916_v52 = vpop.f32.mrf.mxu0 }
 0x491   : > { %17804 = vst [vmem:[#allocation19_spill] sm:$0xff] %v14916_v52  ;;  %6955 = vmatmul.bf16.vlgmr.msrb.gmra.mxu2 %v14647_v56  ;;  %v5536_v19 = vrot.slane %v5534_v48, 1  ;;  %v9098_v56 = vld [vmem:[%s16887_s2 + $0x1f8] sm:$0xff]  ;;  %v5427_v59 = vsel %vm17814_vm8, %v5424_v8, %v5426_v20  ;;  %vm17876_vm8 = vmmov %vm17844_vm1 }
 0x492   : > { %7133 = vmatmul.bf16.gmra.mxu3 %v5425_v29  ;;  %v5539_v29 = vshll.u32 %v14662_v44, 16  ;;  %7715 = vmatpush.bf16.msra.mxu0 %v9098_v56  ;;  %v5547_v56 = vshll.u32 %v14676_v23, 16 }
 0x493   : > { %7261 = vmatmul.bf16.gmra.mxu0 %v14922_v26  ;;  %v5537_v57 = vor.u32 %v5536_v19, %v5532_v54 }
 0x494   : > { %v14927_v58 = vpop.f32.mrf.mxu1  ;;  %v14931_v10 = vpop.f32.mrf.mxu2  ;;  %v5541_v48 = vrot.slane %v5539_v29, 1 }
 0x495   : > { %17806 = vst [vmem:[#allocation70_spill] sm:$0xff] %v14927_v58  ;;  %v14929_v52 = vpop.f32.mrf.mxu3 }
 0x496   : > { %17807 = vst [vmem:[#allocation3_spill] sm:$0xff] %v14929_v52  ;;  %v5542_v52 = vsel %vm17812_vm7, %v5537_v57, %v5541_v48  ;;  %v5549_v57 = vrot.slane %v5547_v56, 1  ;;  %vm17868_vm7 = vmmov %vm17844_vm1 }
 0x497   : > { %17808 = vst [vmem:[#allocation15_spill] sm:$0xff] %v14931_v10 }
 0x498   : > { %v14933_v27 = vpop.f32.mrf.mxu0 }
 0x499   : > { %17809 = vst [vmem:[#allocation86_spill] sm:$0xff] %v14933_v27 }
 0x49c   : > { %v14943_v58 = vpop.f32.mrf.mxu1  ;;  %v14948_v27 = vpop.f32.mrf.mxu2 }
 0x49d   : > { %17810 = vst [vmem:[#allocation87_spill] sm:$0xff] %v14943_v58  ;;  %v14945_v10 = vpop.f32.mrf.mxu3 }
 0x49e   : > { %17811 = vst [vmem:[#allocation88_spill] sm:$0xff] %v14948_v27 }
 0x49f   : > { %7339 = vmatmul.bf16.vlgmr.msrb.gmra.mxu1 %v5542_v52  ;;  %v5543_v52 = vshrl.u32 %v14662_v44, 16 }
 0x4a0   : > { %v14951_v63 = vpop.f32.mrf.mxu0 }
 0x4a1   : > { %17813 = vst [vmem:[#allocation89_spill] sm:$0xff] %v14951_v63  ;;  %6960 = vmatmul.bf16.gmra.mxu2 %v14654_v62  ;;  %v5545_v8 = vor.u32 %v5543_v52, %v5541_v48  ;;  %v14982_v63 = vld [vmem:[#allocation2 + $0x6c] sm:$0xff]  }
 0x4a2   : > { %7138 = vmatmul.bf16.gmra.mxu3 %v5427_v59  ;;  %v5209_v59 = vshll.u32 %v14671_v35, 16 }
 0x4a3   : > { %7266 = vmatmul.bf16.gmra.mxu0 %v14954_v61  ;;  %v5550_v44 = vsel %vm17822_vm15, %v5545_v8, %v5549_v57  ;;  %vm17878_vm15 = vmmov %vm17754_vm0 }
 0x4a4   : > { %v14958_v19 = vpop.f32.mrf.mxu1  ;;  %v14962_v1 = vpop.f32.mrf.mxu2 }
 0x4a5   : > { %17815 = vst [vmem:[#allocation90_spill] sm:$0xff] %v14958_v19  ;;  %v14960_v54 = vpop.f32.mrf.mxu3  ;;  %v5428_v19 = vrot.slane %v14601_v11, 1 }
 0x4a6   : > { %17816 = vst [vmem:[#allocation91_spill] sm:$0xff] %v14960_v54 }
 0x4a7   : > { %17817 = vst [vmem:[#allocation92_spill] sm:$0xff] %v14962_v1  ;;  %v5207_v1 = vor.u32 %v5205_v55, %v14650_v33  ;;  %v5429_v52 = vsel %vm17824_vm5, %v5426_v20, %v5428_v19  ;;  %v5551_v55 = vshrl.u32 %v14676_v23, 16  ;;  %v5555_v20 = vshll.u32 %v14690_v46, 16  ;;  %vm17879_vm5 = vmmov %vm17844_vm1 }
 0x4a8   : > { %v14964_v29 = vpop.f32.mrf.mxu0 }
 0x4a9   : > { %17818 = vst [vmem:[#allocation93_spill] sm:$0xff] %v14964_v29  ;;  %v5211_v29 = vrot.slane %v5209_v59, 1  ;;  %v5553_v59 = vor.u32 %v5551_v55, %v5549_v57  ;;  %v9089_v55 = vld [vmem:[%s16887_s2 + $0x1b0] sm:$0xff] }
 0x4aa   : > { %7588 = vmatpush.bf16.msra.mxu3 %v9089_v55 }
 0x4ab   : > { %v5212_v56 = vsel %vm17825_vm6, %v5207_v1, %v5211_v29  ;;  %v5217_v1 = vshll.u32 %v14685_v38, 16  ;;  %vm17886_vm6 = vmmov %vm17844_vm1 }
 0x4ac   : > { %v14970_v62 = vpop.f32.mrf.mxu1  ;;  %v14975_v58 = vpop.f32.mrf.mxu2 }
 0x4ad   : > { %17819 = vst [vmem:[#allocation94_spill] sm:$0xff] %v14970_v62  ;;  %v14972_v27 = vpop.f32.mrf.mxu3  ;;  %v5219_v23 = vrot.slane %v5217_v1, 1 }
 0x4ae   : > { %17820 = vst [vmem:[#allocation95_spill] sm:$0xff] %v14972_v27 }
 0x4af   : > { %17821 = vst [vmem:[#allocation96_spill] sm:$0xff] %v14975_v58  ;;  %7344 = vmatmul.bf16.gmra.mxu1 %v5550_v44  ;;  %v5213_v44 = vshrl.u32 %v14671_v35, 16  ;;  %v9081_v35 = vld [vmem:[%s16887_s2 + $0x170] sm:$0xff] }
 0x4b0   : > { %v14979_v48 = vpop.f32.mrf.mxu0  ;;  %7460 = vmatpush.bf16.msra.mxu2 %v9081_v35  ;;  %v9105_v35 = vld [vmem:[%s16887_s2 + $0x230] sm:$0xff] }
 0x4b1   : > { %17823 = vst [vmem:[#allocation97_spill] sm:$0xff] %v14979_v48  ;;  %6965 = vmatmul.bf16.gmra.mxu2 %v5212_v56  ;;  %v5557_v56 = vrot.slane %v5555_v20, 1  ;;  %7844 = vmatpush.bf16.msra.mxu1 %v9105_v35 }
 0x4b2   : > { %7143 = vmatmul.bf16.gmra.mxu3 %v5429_v52 }
 0x4b3   : > { %7271 = vmatmul.bf16.gmra.mxu0 %v14982_v63 }
 0x4b4   : > { %v14986_v11 = vpop.f32.mrf.mxu1  ;;  %v14990_v33 = vpop.f32.mrf.mxu2 }
 0x4b5   : > { %17826 = vst [vmem:[#allocation98_spill] sm:$0xff] %v14986_v11  ;;  %v14988_v58 = vpop.f32.mrf.mxu3  ;;  %v5430_v11 = vrot.slane %v14639_v45, 1  ;;  %v15015_v45 = vld [vmem:[#allocation2 + $0x74] sm:$0xff]  }
 0x4b6   : > { %17827 = vst [vmem:[#allocation99_spill] sm:$0xff] %v14988_v58 }
 0x4b7   : > { %17828 = vst [vmem:[#allocation100_spill] sm:$0xff] %v14990_v33  ;;  %v5215_v33 = vor.u32 %v5213_v44, %v5211_v29  ;;  %v5431_v20 = vsel %vm17835_vm10, %v5428_v19, %v5430_v11  ;;  %v5559_v19 = vshrl.u32 %v14690_v46, 16  ;;  %vm17889_vm10 = vmmov %vm17844_vm1 }
 0x4b8   : > { %v14992_v8 = vpop.f32.mrf.mxu0 }
 0x4b9   : > { %17829 = vst [vmem:[#allocation101_spill] sm:$0xff] %v14992_v8  ;;  %v5558_v8 = vsel %vm17833_vm13, %v5553_v59, %v5557_v56  ;;  %v5220_v29 = vsel %vm17836_vm9, %v5215_v33, %v5219_v23  ;;  %v9097_v33 = vld [vmem:[%s16887_s2 + $0x1f0] sm:$0xff]  ;;  %v5561_v55 = vor.u32 %v5559_v19, %v5557_v56  ;;  %vm17888_vm13 = vmmov %vm17754_vm0 }
 0x4ba   : > { %7716 = vmatpush.bf16.msra.mxu0 %v9097_v33  ;;  %v15048_v33 = vld [vmem:[#allocation2 + $0x7c] sm:$0xff]   ;;  %vm17894_vm9 = vmmov %vm17844_vm1 }
 0x4bc   : > { %v14998_v52 = vpop.f32.mrf.mxu1  ;;  %v15003_v48 = vpop.f32.mrf.mxu2 }
 0x4bd   : > { %17830 = vst [vmem:[#allocation102_spill] sm:$0xff] %v14998_v52  ;;  %v15000_v62 = vpop.f32.mrf.mxu3 }
 0x4be   : > { %17831 = vst [vmem:[#allocation103_spill] sm:$0xff] %v15000_v62 }
 0x4bf   : > { %17832 = vst [vmem:[#allocation104_spill] sm:$0xff] %v15003_v48  ;;  %7349 = vmatmul.bf16.gmra.mxu1 %v5558_v8  ;;  %v5563_v48 = vshll.u32 %v14707_v49, 16 }
 0x4c0   : > { %v15009_v57 = vpop.f32.mrf.mxu0 }
 0x4c1   : > { %17834 = vst [vmem:[#allocation105_spill] sm:$0xff] %v15009_v57  ;;  %6970 = vmatmul.bf16.gmra.mxu2 %v5220_v29  ;;  %v5225_v29 = vshll.u32 %v14699_v17, 16  ;;  %v5565_v46 = vrot.slane %v5563_v48, 1 }
 0x4c2   : > { %7148 = vmatmul.bf16.gmra.mxu3 %v5431_v20  ;;  %v5221_v20 = vshrl.u32 %v14685_v38, 16 }
 0x4c3   : > { %7276 = vmatmul.bf16.gmra.mxu0 %v15015_v45  ;;  %v5227_v56 = vrot.slane %v5225_v29, 1  ;;  %v5229_v29 = vshrl.u32 %v14699_v17, 16 }
 0x4c4   : > { %v15019_v8 = vpop.f32.mrf.mxu1  ;;  %v15023_v44 = vpop.f32.mrf.mxu2  ;;  %v5223_v57 = vor.u32 %v5221_v20, %v5219_v23 }
 0x4c5   : > { %17837 = vst [vmem:[#allocation106_spill] sm:$0xff] %v15019_v8  ;;  %v15021_v59 = vpop.f32.mrf.mxu3 }
 0x4c6   : > { %17838 = vst [vmem:[#allocation107_spill] sm:$0xff] %v15021_v59  ;;  %v5566_v59 = vsel %vm17844_vm1, %v5561_v55, %v5565_v46  ;;  %v5228_v35 = vsel %vm17847_vm4, %v5223_v57, %v5227_v56  ;;  %v5567_v55 = vshrl.u32 %v14707_v49, 16  ;;  %v5233_v57 = vshll.u32 %v14716_v22, 16  ;;  %vm17896_vm1 = vmmov %vm17754_vm0 }
 0x4c7   : > { %17839 = vst [vmem:[#allocation108_spill] sm:$0xff] %v15023_v44 }
 0x4c8   : > { %v15025_v1 = vpop.f32.mrf.mxu0  ;;  %v5569_v20 = vor.u32 %v5567_v55, %v5565_v46  ;;  %v5235_v49 = vrot.slane %v5233_v57, 1  ;;  %v15075_v46 = vld [vmem:[#allocation2 + $0x84] sm:$0xff]   ;;  %v5237_v57 = vshrl.u32 %v14716_v22, 16 }
 0x4c9   : > { %17840 = vst [vmem:[#allocation109_spill] sm:$0xff] %v15025_v1  ;;  %v5432_v1 = vrot.slane %v14664_v4, 1  ;;  %v9080_v22 = vld [vmem:[%s16887_s2 + $0x168] sm:$0xff] }
 0x4ca   : > { %7461 = vmatpush.bf16.msra.mxu2 %v9080_v22  ;;  %v9104_v22 = vld [vmem:[%s16887_s2 + $0x228] sm:$0xff] }
 0x4cb   : > { %v5433_v38 = vsel %vm17846_vm3, %v5430_v11, %v5432_v1  ;;  %v5571_v11 = vshll.u32 %v14723_v41, 16  ;;  %7845 = vmatpush.bf16.msra.mxu1 %v9104_v22  ;;  %vm17897_vm3 = vmmov %vm17847_vm4 }
 0x4cc   : > { %v15037_v44 = vpop.f32.mrf.mxu1  ;;  %v15042_v52 = vpop.f32.mrf.mxu2  ;;  %vm17901_vm4 = vmmov %vm17897_vm3 }
 0x4cd   : > { %17841 = vst [vmem:[#allocation110_spill] sm:$0xff] %v15037_v44  ;;  %v15039_v8 = vpop.f32.mrf.mxu3 }
 0x4ce   : > { %17842 = vst [vmem:[#allocation111_spill] sm:$0xff] %v15039_v8  ;;  %v5635_v8 = vshll.u32 %v15015_v45, 16 }
 0x4cf   : > { %17843 = vst [vmem:[#allocation112_spill] sm:$0xff] %v15042_v52  ;;  %7354 = vmatmul.bf16.gmra.mxu1 %v5566_v59 }
 0x4d0   : > { %v15045_v19 = vpop.f32.mrf.mxu0 }
 0x4d1   : > { %17845 = vst [vmem:[#allocation113_spill] sm:$0xff] %v15045_v19  ;;  %6975 = vmatmul.bf16.gmra.mxu2 %v5228_v35  ;;  %v5573_v35 = vrot.slane %v5571_v11, 1 }
 0x4d2   : > { %7153 = vmatmul.bf16.gmra.mxu3 %v5433_v38 }
 0x4d3   : > { %7281 = vmatmul.bf16.gmra.mxu0 %v15048_v33 }
 0x4d4   : > { %v15052_v4 = vpop.f32.mrf.mxu1  ;;  %v15056_v23 = vpop.f32.mrf.mxu2 }
 0x4d5   : > { %17848 = vst [vmem:[#allocation114_spill] sm:$0xff] %v15052_v4  ;;  %v15054_v48 = vpop.f32.mrf.mxu3  ;;  %v5434_v4 = vrot.slane %v14678_v42, 1 }
 0x4d6   : > { %17849 = vst [vmem:[#allocation115_spill] sm:$0xff] %v15054_v48  ;;  %v9083_v48 = vld [vmem:[%s16887_s2 + $0x180] sm:$0xff] }
 0x4d7   : > { %17850 = vst [vmem:[#allocation116_spill] sm:$0xff] %v15056_v23  ;;  %v5231_v23 = vor.u32 %v5229_v29, %v5227_v56  ;;  %v5435_v17 = vsel %vm17754_vm0, %v5432_v1, %v5434_v4  ;;  %v5579_v1 = vshll.u32 %v14755_v37, 16 }
 0x4d8   : > { %v15058_v59 = vpop.f32.mrf.mxu0 }
 0x4d9   : > { %17851 = vst [vmem:[#allocation117_spill] sm:$0xff] %v15058_v59  ;;  %v5574_v59 = vsel %vm17855_vm11, %v5569_v20, %v5573_v35  ;;  %v5236_v55 = vsel %vm17857_vm12, %v5231_v23, %v5235_v49  ;;  %v5575_v20 = vshrl.u32 %v14723_v41, 16  ;;  %v5241_v23 = vshll.u32 %v14741_v51, 16  ;;  %vm17903_vm11 = vmmov %vm17754_vm0 }
 0x4da   : > { %vm17904_vm0 = vmmov %vm17897_vm3 }
 0x4db   : > { %v5577_v29 = vor.u32 %v5575_v20, %v5573_v35  ;;  %v5243_v41 = vrot.slane %v5241_v23, 1  ;;  %v9088_v20 = vld [vmem:[%s16887_s2 + $0x1a8] sm:$0xff]  ;;  %vm17908_vm12 = vmmov %vm17904_vm0 }
 0x4dc   : > { %v15064_v38 = vpop.f32.mrf.mxu1  ;;  %v15069_v44 = vpop.f32.mrf.mxu2  ;;  %7589 = vmatpush.bf16.msra.mxu3 %v9088_v20 }
 0x4dd   : > { %17852 = vst [vmem:[#allocation118_spill] sm:$0xff] %v15064_v38  ;;  %v15066_v52 = vpop.f32.mrf.mxu3 }
 0x4de   : > { %17853 = vst [vmem:[#allocation119_spill] sm:$0xff] %v15066_v52 }
 0x4df   : > { %17854 = vst [vmem:[#allocation120_spill] sm:$0xff] %v15069_v44  ;;  %7359 = vmatmul.bf16.gmra.mxu1 %v5574_v59 }
 0x4e0   : > { %v15072_v19 = vpop.f32.mrf.mxu0 }
 0x4e1   : > { %17856 = vst [vmem:[#allocation121_spill] sm:$0xff] %v15072_v19  ;;  %6980 = vmatmul.bf16.gmra.mxu2 %v5236_v55  ;;  %v5581_v55 = vrot.slane %v5579_v1, 1 }
 0x4e2   : > { %7158 = vmatmul.bf16.gmra.mxu3 %v5435_v17 }
 0x4e3   : > { %7286 = vmatmul.bf16.gmra.mxu0 %v15075_v46 }
 0x4e4   : > { %v15079_v42 = vpop.f32.mrf.mxu1  ;;  %v15083_v56 = vpop.f32.mrf.mxu2 }
 0x4e5   : > { %17858 = vst [vmem:[#allocation122_spill] sm:$0xff] %v15079_v42  ;;  %v15081_v11 = vpop.f32.mrf.mxu3  ;;  %v5436_v42 = vrot.slane %v14692_v40, 1  ;;  %v15108_v40 = vld [vmem:[#allocation2 + $0x8c] sm:$0xff]  }
 0x4e6   : > { %17859 = vst [vmem:[#allocation123_spill] sm:$0xff] %v15081_v11 }
 0x4e7   : > { %17860 = vst [vmem:[#allocation124_spill] sm:$0xff] %v15083_v56  ;;  %v5239_v56 = vor.u32 %v5237_v57, %v5235_v49  ;;  %v5437_v1 = vsel %vm17867_vm2, %v5434_v4, %v5436_v42  ;;  %v5583_v4 = vshrl.u32 %v14755_v37, 16  ;;  %vm17912_vm2 = vmmov %vm17904_vm0 }
 0x4e8   : > { %v15085_v59 = vpop.f32.mrf.mxu0 }
 0x4e9   : > { %17861 = vst [vmem:[#allocation125_spill] sm:$0xff] %v15085_v59  ;;  %v5582_v59 = vsel %vm17865_vm14, %v5577_v29, %v5581_v55  ;;  %v5244_v49 = vsel %vm17868_vm7, %v5239_v56, %v5243_v41  ;;  %v9096_v56 = vld [vmem:[%s16887_s2 + $0x1e8] sm:$0xff]  ;;  %v5585_v20 = vor.u32 %v5583_v4, %v5581_v55  ;;  %vm17910_vm14 = vmmov %vm17896_vm1 }
 0x4ea   : > { %7717 = vmatpush.bf16.msra.mxu0 %v9096_v56  ;;  %v15141_v56 = vld [vmem:[#allocation2 + $0x94] sm:$0xff]   ;;  %vm17920_vm7 = vmmov %vm17904_vm0 }
 0x4ec   : > { %v15091_v17 = vpop.f32.mrf.mxu1  ;;  %v15096_v38 = vpop.f32.mrf.mxu2 }
 0x4ed   : > { %17862 = vst [vmem:[#allocation126_spill] sm:$0xff] %v15091_v17  ;;  %v15093_v44 = vpop.f32.mrf.mxu3 }
 0x4ee   : > { %17863 = vst [vmem:[#allocation127_spill] sm:$0xff] %v15093_v44 }
 0x4ef   : > { %17864 = vst [vmem:[#allocation128_spill] sm:$0xff] %v15096_v38  ;;  %7364 = vmatmul.bf16.gmra.mxu1 %v5582_v59  ;;  %v5587_v38 = vshll.u32 %v14802_v36, 16 }
 0x4f0   : > { %v15102_v35 = vpop.f32.mrf.mxu0 }
 0x4f1   : > { %17866 = vst [vmem:[#allocation129_spill] sm:$0xff] %v15102_v35  ;;  %6985 = vmatmul.bf16.gmra.mxu2 %v5244_v49  ;;  %v5249_v49 = vshll.u32 %v14780_v50, 16  ;;  %v5589_v37 = vrot.slane %v5587_v38, 1 }
 0x4f2   : > { %7163 = vmatmul.bf16.gmra.mxu3 %v5437_v1  ;;  %v5245_v1 = vshrl.u32 %v14741_v51, 16 }
 0x4f3   : > { %7291 = vmatmul.bf16.gmra.mxu0 %v15108_v40  ;;  %v5251_v55 = vrot.slane %v5249_v49, 1  ;;  %v5253_v49 = vshrl.u32 %v14780_v50, 16  ;;  %v15166_v50 = vld [vmem:[#allocation2 + $0x9c] sm:$0xff]  }
 0x4f4   : > { %v15112_v59 = vpop.f32.mrf.mxu1  ;;  %v15116_v57 = vpop.f32.mrf.mxu2  ;;  %v5247_v35 = vor.u32 %v5245_v1, %v5243_v41 }
 0x4f5   : > { %17869 = vst [vmem:[#allocation130_spill] sm:$0xff] %v15112_v59  ;;  %v15114_v29 = vpop.f32.mrf.mxu3 }
 0x4f6   : > { %17870 = vst [vmem:[#allocation131_spill] sm:$0xff] %v15114_v29  ;;  %v5590_v29 = vsel %vm17876_vm8, %v5585_v20, %v5589_v37  ;;  %v5252_v22 = vsel %vm17879_vm5, %v5247_v35, %v5251_v55  ;;  %v5591_v20 = vshrl.u32 %v14802_v36, 16  ;;  %v5257_v35 = vshll.u32 %v14844_v9, 16  ;;  %vm17922_vm8 = vmmov %vm17896_vm1 }
 0x4f7   : > { %17871 = vst [vmem:[#allocation132_spill] sm:$0xff] %v15116_v57  ;;  %vm17931_vm5 = vmmov %vm17904_vm0 }
 0x4f8   : > { %v15118_v23 = vpop.f32.mrf.mxu0  ;;  %v5593_v1 = vor.u32 %v5591_v20, %v5589_v37  ;;  %v5259_v36 = vrot.slane %v5257_v35, 1 }
 0x4f9   : > { %17872 = vst [vmem:[#allocation133_spill] sm:$0xff] %v15118_v23  ;;  %v5438_v23 = vrot.slane %v14709_v47, 1 }
 0x4fb   : > { %v5439_v51 = vsel %vm17878_vm15, %v5436_v42, %v5438_v23  ;;  %v5595_v42 = vshll.u32 %v14855_v39, 16  ;;  %vm17923_vm15 = vmmov %vm17904_vm0 }
 0x4fc   : > { %v15130_v57 = vpop.f32.mrf.mxu1  ;;  %v15135_v17 = vpop.f32.mrf.mxu2 }
 0x4fd   : > { %17873 = vst [vmem:[#allocation134_spill] sm:$0xff] %v15130_v57  ;;  %v15132_v59 = vpop.f32.mrf.mxu3 }
 0x4fe   : > { %17874 = vst [vmem:[#allocation135_spill] sm:$0xff] %v15132_v59 }
 0x4ff   : > { %17875 = vst [vmem:[#allocation136_spill] sm:$0xff] %v15135_v17  ;;  %7369 = vmatmul.bf16.gmra.mxu1 %v5590_v29 }
 0x500   : > { %v15138_v4 = vpop.f32.mrf.mxu0 }
 0x501   : > { %17877 = vst [vmem:[#allocation137_spill] sm:$0xff] %v15138_v4  ;;  %6990 = vmatmul.bf16.gmra.mxu2 %v5252_v22  ;;  %v5597_v22 = vrot.slane %v5595_v42, 1 }
 0x502   : > { %7168 = vmatmul.bf16.gmra.mxu3 %v5439_v51 }
 0x503   : > { %7296 = vmatmul.bf16.gmra.mxu0 %v15141_v56 }
 0x504   : > { %v15145_v47 = vpop.f32.mrf.mxu1  ;;  %v15149_v41 = vpop.f32.mrf.mxu2 }
 0x505   : > { %17880 = vst [vmem:[#allocation138_spill] sm:$0xff] %v15145_v47  ;;  %v15147_v38 = vpop.f32.mrf.mxu3  ;;  %v5440_v47 = vrot.slane %v14725_v60, 1 }
 0x506   : > { %17881 = vst [vmem:[#allocation139_spill] sm:$0xff] %v15147_v38 }
 0x507   : > { %17882 = vst [vmem:[#allocation140_spill] sm:$0xff] %v15149_v41  ;;  %v5255_v41 = vor.u32 %v5253_v49, %v5251_v55  ;;  %v5441_v37 = vsel %vm17888_vm13, %v5438_v23, %v5440_v47  ;;  %v5603_v23 = vshll.u32 %v14892_v32, 16  ;;  %v5261_v49 = vshrl.u32 %v14844_v9, 16  ;;  %v9079_v9 = vld [vmem:[%s16887_s2 + $0x160] sm:$0xff]  ;;  %vm17940_vm13 = vmmov %vm17904_vm0 }
 0x508   : > { %v15151_v29 = vpop.f32.mrf.mxu0  ;;  %7462 = vmatpush.bf16.msra.mxu2 %v9079_v9  ;;  %v9103_v9 = vld [vmem:[%s16887_s2 + $0x220] sm:$0xff] }
 0x509   : > { %17883 = vst [vmem:[#allocation141_spill] sm:$0xff] %v15151_v29  ;;  %v5598_v29 = vsel %vm17886_vm6, %v5593_v1, %v5597_v22  ;;  %v5260_v20 = vsel %vm17889_vm10, %v5255_v41, %v5259_v36  ;;  %v5265_v41 = vshll.u32 %v14872_v25, 16  ;;  %7846 = vmatpush.bf16.msra.mxu1 %v9103_v9  ;;  %vm17933_vm6 = vmmov %vm17904_vm0 }
 0x50a   : > { %vm17942_vm10 = vmmov %vm17904_vm0 }
 0x50c   : > { %v15157_v51 = vpop.f32.mrf.mxu1  ;;  %v6945_v57 = vpop.f32.mrf.mxu2 }
 0x50d   : > { %17884 = vst [vmem:[#allocation142_spill] sm:$0xff] %v15157_v51  ;;  %v15159_v17 = vpop.f32.mrf.mxu3 }
 0x50e   : > { %17885 = vst [vmem:[#allocation143_spill] sm:$0xff] %v15159_v17 }
 0x50f   : > { %7374 = vmatmul.bf16.gmra.mxu1 %v5598_v29  ;;  %v5599_v29 = vshrl.u32 %v14855_v39, 16  ;;  %v5267_v39 = vrot.slane %v5265_v41, 1 }
 0x510   : > { %v15163_v4 = vpop.f32.mrf.mxu0 }
 0x511   : > { %17887 = vst [vmem:[#allocation144_spill] sm:$0xff] %v15163_v4  ;;  %6995 = vmatmul.bf16.gmra.mxu2 %v5260_v20  ;;  %v5601_v1 = vor.u32 %v5599_v29, %v5597_v22  ;;  %v5263_v4 = vor.u32 %v5261_v49, %v5259_v36  ;;  %v9087_v29 = vld [vmem:[%s16887_s2 + $0x1a0] sm:$0xff] }
 0x512   : > { %7173 = vmatmul.bf16.gmra.mxu3 %v5441_v37  ;;  %v5605_v37 = vrot.slane %v5603_v23, 1 }
 0x513   : > { %7301 = vmatmul.bf16.gmra.mxu0 %v15166_v50  ;;  %v5268_v36 = vsel %vm17897_vm3, %v5263_v4, %v5267_v39  ;;  %7590 = vmatpush.bf16.msra.mxu3 %v9087_v29  ;;  %v9095_v4 = vld [vmem:[%s16887_s2 + $0x1e0] sm:$0xff]  ;;  %vm17953_vm3 = vmmov %vm17904_vm0 }
 0x514   : > { %v15170_v42 = vpop.f32.mrf.mxu1  ;;  %v15174_v57 = vpop.f32.mrf.mxu2  ;;  %7718 = vmatpush.bf16.msra.mxu0 %v9095_v4  ;;  %v15232_v4 = vld [vmem:[#allocation2 + $0xac] sm:$0xff]  }
 0x515   : > { %17890 = vst [vmem:[#allocation145_spill] sm:$0xff] %v15170_v42  ;;  %v15172_v60 = vpop.f32.mrf.mxu3  ;;  %v5442_v42 = vrot.slane %v14757_v2, 1  ;;  %v15199_v2 = vld [vmem:[#allocation2 + $0xa4] sm:$0xff]  }
 0x516   : > { %17891 = vst [vmem:[#allocation146_spill] sm:$0xff] %v15172_v60 }
 0x517   : > { %v5443_v23 = vsel %vm17896_vm1, %v5440_v47, %v5442_v42  ;;  %v5607_v47 = vshrl.u32 %v14892_v32, 16  ;;  %vm17951_vm1 = vmmov %vm17904_vm0 }
 0x518   : > { %v15176_v55 = vpop.f32.mrf.mxu0 }
 0x519   : > { %17892 = vst [vmem:[#allocation147_spill] sm:$0xff] %v15176_v55  ;;  %v5606_v55 = vsel %vm17894_vm9, %v5601_v1, %v5605_v37  ;;  %v5609_v29 = vor.u32 %v5607_v47, %v5605_v37  ;;  %vm17943_vm9 = vmmov %vm17904_vm0 }
 0x51c   : > { %v15182_v35 = vpop.f32.mrf.mxu1  ;;  %v15187_v51 = vpop.f32.mrf.mxu2 }
 0x51d   : > { %v15184_v20 = vpop.f32.mrf.mxu3 }
 0x51e   : > { %17893 = vst [vmem:[#allocation148_spill] sm:$0xff] %v15184_v20  ;;  %v5444_v20 = vrot.slane %v14804_v16, 1 }
 0x51f   : > { %7379 = vmatmul.bf16.gmra.mxu1 %v5606_v55 }
 0x520   : > { %v15193_v22 = vpop.f32.mrf.mxu0 }
 0x521   : > { %17895 = vst [vmem:[#allocation149_spill] sm:$0xff] %v15193_v22  ;;  %7000 = vmatmul.bf16.gmra.mxu2 %v5268_v36  ;;  %v5611_v22 = vshll.u32 %v14922_v26, 16  ;;  %v5273_v36 = vshll.u32 %v14903_v18, 16 }
 0x522   : > { %7178 = vmatmul.bf16.gmra.mxu3 %v5443_v23  ;;  %v5269_v23 = vshrl.u32 %v14872_v25, 16  ;;  %v5445_v25 = vsel %vm17903_vm11, %v5442_v42, %v5444_v20  ;;  %v5619_v42 = vshll.u32 %v14954_v61, 16  ;;  %vm17962_vm11 = vmmov %vm17904_vm0 }
 0x523   : > { %7306 = vmatmul.bf16.gmra.mxu0 %v15199_v2  ;;  %v5613_v32 = vrot.slane %v5611_v22, 1  ;;  %v5275_v37 = vrot.slane %v5273_v36, 1  ;;  %v5277_v36 = vshrl.u32 %v14903_v18, 16 }
 0x524   : > { %v15203_v55 = vpop.f32.mrf.mxu1  ;;  %v15207_v49 = vpop.f32.mrf.mxu2  ;;  %v5271_v17 = vor.u32 %v5269_v23, %v5267_v39 }
 0x525   : > { %v15205_v1 = vpop.f32.mrf.mxu3  ;;  %v5614_v38 = vsel %vm17901_vm4, %v5609_v29, %v5613_v32  ;;  %v5615_v29 = vshrl.u32 %v14922_v26, 16  ;;  %v5279_v26 = vor.u32 %v5277_v36, %v5275_v37  ;;  %vm17954_vm4 = vmmov %vm17904_vm0 }
 0x526   : > { %17898 = vst [vmem:[#allocation150_spill] sm:$0xff] %v15205_v1  ;;  %v5276_v9 = vsel %vm17904_vm0, %v5271_v17, %v5275_v37  ;;  %v15247_v17 = vld [vmem:[#allocation2 + $0x60] sm:$0xff]  }
 0x527   : > { %v5617_v23 = vor.u32 %v5615_v29, %v5613_v32 }
 0x528   : > { %v15209_v41 = vpop.f32.mrf.mxu0 }
 0x529   : > { %17899 = vst [vmem:[#allocation151_spill] sm:$0xff] %v15209_v41 }
 0x52c   : > { %v15221_v41 = vpop.f32.mrf.mxu1  ;;  %v15226_v60 = vpop.f32.mrf.mxu2 }
 0x52d   : > { %v15223_v1 = vpop.f32.mrf.mxu3 }
 0x52e   : > { %17900 = vst [vmem:[#allocation152_spill] sm:$0xff] %v15223_v1 }
 0x52f   : > { %7384 = vmatmul.bf16.gmra.mxu1 %v5614_v38 }
 0x530   : > { %v15229_v47 = vpop.f32.mrf.mxu0 }
 0x531   : > { %17902 = vst [vmem:[#allocation153_spill] sm:$0xff] %v15229_v47  ;;  %7005 = vmatmul.bf16.gmra.mxu2 %v5276_v9  ;;  %v5621_v47 = vrot.slane %v5619_v42, 1 }
 0x532   : > { %7183 = vmatmul.bf16.gmra.mxu3 %v5445_v25  ;;  %v5281_v25 = vshll.u32 %v15247_v17, 16 }
 0x533   : > { %7311 = vmatmul.bf16.gmra.mxu0 %v15232_v4  ;;  %v5622_v32 = vsel %vm17908_vm12, %v5617_v23, %v5621_v47  ;;  %vm17964_vm12 = vmmov %vm17904_vm0 }
 0x534   : > { %v15236_v16 = vpop.f32.mrf.mxu1  ;;  %v15240_v39 = vpop.f32.mrf.mxu2  ;;  %v5283_v18 = vrot.slane %v5281_v25, 1 }
 0x535   : > { %v15238_v22 = vpop.f32.mrf.mxu3 }
 0x536   : > { %17905 = vst [vmem:[#allocation154_spill] sm:$0xff] %v15238_v22  ;;  %v5446_v22 = vrot.slane %v14857_v34, 1  ;;  %v5284_v42 = vsel %vm17912_vm2, %v5279_v26, %v5283_v18  ;;  %v5623_v26 = vshrl.u32 %v14954_v61, 16  ;;  %vm17974_vm2 = vmmov %vm17904_vm0 }
 0x538   : > { %v15242_v38 = vpop.f32.mrf.mxu0  ;;  %v5447_v44 = vsel %vm17910_vm14, %v5444_v20, %v5446_v22  ;;  %v9094_v20 = vld [vmem:[%s16887_s2 + $0x1d8] sm:$0xff]  ;;  %vm17972_vm14 = vmmov %vm17904_vm0 }
 0x539   : > { %17906 = vst [vmem:[#allocation155_spill] sm:$0xff] %v15242_v38  ;;  %v9298_v38 = vunpack.c.h.b16 %v14857_v34  ;;  %v9086_v34 = vld [vmem:[%s16887_s2 + $0x198] sm:$0xff]  ;;  %7719 = vmatpush.bf16.msra.mxu0 %v9094_v20  ;;  %v5285_v20 = vshrl.u32 %v15247_v17, 16 }
 0x53a   : > { %7591 = vmatpush.bf16.msra.mxu3 %v9086_v34  ;;  %v9084_v34 = vld [vmem:[%s16887_s2 + $0x188] sm:$0xff] }
 0x53b   : > { %v15263_v19 = vpack.c.b16 %v14879_v24, %v9298_v38 }
 0x53c   : > { %v15250_v9 = vpop.f32.mrf.mxu1  ;;  %v15256_v59 = vpop.f32.mrf.mxu2 }
 0x53d   : > { %v15252_v1 = vpop.f32.mrf.mxu3  ;;  %17911 = vst [vmem:[#allocation158_spill] sm:$0xff] %v15263_v19 }
 0x53e   : > { %17907 = vst [vmem:[#allocation156_spill] sm:$0xff] %v15252_v1  ;;  %v4981_v1 = vld [vmem:[#allocation2 + $0xbc] sm:$0x1] }
 0x53f   : > { %7389 = vmatmul.bf16.gmra.mxu1 %v5622_v32  ;;  %v5183_v23 = vunpack.c.l.b16 %v4981_v1  ;;  %v5627_v32 = vshll.u32 %v14982_v63, 16  ;;  %v9093_v1 = vld [vmem:[%s16887_s2 + $0x1d0] sm:$0xff] }
 0x540   : > { %v15259_v29 = vpop.f32.mrf.mxu0  ;;  %7720 = vmatpush.bf16.msra.mxu0 %v9093_v1 }
 0x541   : > { %17909 = vst [vmem:[#allocation157_spill] sm:$0xff] %v15259_v29  ;;  %7010 = vmatmul.bf16.gmra.mxu2 %v5284_v42  ;;  %v15290_v42 = vpack.c.b16 %v5183_v23, %v14879_v24  ;;  %v5625_v29 = vor.u32 %v5623_v26, %v5621_v47  ;;  %v5629_v11 = vrot.slane %v5627_v32, 1  ;;  %v9092_v24 = vld [vmem:[%s16887_s2 + $0x1c8] sm:$0xff]  ;;  %v5287_v47 = vor.u32 %v5285_v20, %v5283_v18  ;;  %v9078_v32 = vld [vmem:[%s16887_s2 + $0x158] sm:$0xff] }
 0x542   : > { %7188 = vmatmul.bf16.gmra.mxu3 %v5447_v44  ;;  %v9085_v44 = vld [vmem:[%s16887_s2 + $0x190] sm:$0xff]  ;;  %7463 = vmatpush.bf16.msra.mxu2 %v9078_v32  ;;  %v9456_v32 = vld [vmem:[#allocation2 + $0xc0] sm:$0xff]  }
 0x543   : > { %7316 = vmatmul.bf16.gmra.mxu0 %v15263_v19  ;;  %7592 = vmatpush.bf16.msra.mxu3 %v9085_v44  ;;  %v5448_v44 = vrot.slane %v15290_v42, 1  ;;  %v5630_v26 = vsel %vm17920_vm7, %v5625_v29, %v5629_v11  ;;  %v15322_v29 = vld [vmem:[#allocation2 + $0xbc] sm:$0xff]   ;;  %vm17975_vm7 = vmmov %vm17904_vm0 }
 0x544   : > { %v15270_v37 = vpop.f32.mrf.mxu1  ;;  %v15277_v36 = vpop.f32.mrf.mxu2  ;;  %7721 = vmatpush.bf16.msra.mxu0 %v9092_v24 }
 0x545   : > { %17913 = vst [vmem:[#allocation159_spill] sm:$0xff] %v15270_v37  ;;  %v15275_v38 = vpop.f32.mrf.mxu3  ;;  %v5449_v18 = vsel %vm17922_vm8, %v5446_v22, %v5448_v44  ;;  %v5631_v22 = vshrl.u32 %v14982_v63, 16  ;;  %v15347_v63 = vunpack.c.h.b16 %v9456_v32  ;;  %vm17983_vm8 = vmmov %vm17904_vm0 }
 0x546   : > { %17914 = vst [vmem:[#allocation160_spill] sm:$0xff] %v15275_v38 }
 0x547   : > { %17915 = vst [vmem:[#allocation161_spill] sm:$0xff] %v15277_v36  ;;  %7593 = vmatpush.bf16.msra.mxu3 %v9084_v34  ;;  %v9091_v34 = vld [vmem:[%s16887_s2 + $0x1c0] sm:$0xff]  ;;  %v9716_v36 = vld [vmem:[#allocation2 + $0x18] sm:$0xff]  }
 0x548   : > { %v15282_v25 = vpop.f32.mrf.mxu0  ;;  %7722 = vmatpush.bf16.msra.mxu0 %v9091_v34  ;;  %v15340_v34 = vld [vmem:[#allocation2 + $0x70] sm:$0xff]  }
 0x549   : > { %17916 = vst [vmem:[#allocation162_spill] sm:$0xff] %v15282_v25  ;;  %v15296_v25 = vld [vmem:[#allocation2 + $0x68] sm:$0xff]  }
 0x54a   : > { %v5289_v61 = vshll.u32 %v15296_v25, 16 }
 0x54b   : > { %7594 = vmatpush.bf16.msra.mxu3 %v9083_v48  ;;  %v9102_v48 = vld [vmem:[%s16887_s2 + $0x218] sm:$0xff] }
 0x54c   : > { %v15299_v38 = vpop.f32.mrf.mxu1  ;;  %v15307_v52 = vpop.f32.mrf.mxu2  ;;  %v5291_v1 = vrot.slane %v5289_v61, 1  ;;  %7847 = vmatpush.bf16.msra.mxu1 %v9102_v48 }
 0x54d   : > { %17917 = vst [vmem:[#allocation163_spill] sm:$0xff] %v15299_v38  ;;  %v15304_v23 = vpop.f32.mrf.mxu3 }
 0x54e   : > { %17918 = vst [vmem:[#allocation164_spill] sm:$0xff] %v15304_v23  ;;  %v5292_v20 = vsel %vm17923_vm15, %v5287_v47, %v5291_v1  ;;  %v5633_v47 = vor.u32 %v5631_v22, %v5629_v11  ;;  %vm17985_vm15 = vmmov %vm17904_vm0 }
 0x54f   : > { %17919 = vst [vmem:[#allocation165_spill] sm:$0xff] %v15307_v52  ;;  %7394 = vmatmul.bf16.gmra.mxu1 %v5630_v26 }
 0x550   : > { %v15316_v23 = vpop.f32.mrf.mxu0 }
 0x551   : > { %17921 = vst [vmem:[#allocation166_spill] sm:$0xff] %v15316_v23  ;;  %7015 = vmatmul.bf16.gmra.mxu2 %v5292_v20  ;;  %v5297_v20 = vshll.u32 %v15340_v34, 16 }
 0x552   : > { %7193 = vmatmul.bf16.gmra.mxu3 %v5449_v18  ;;  %v5293_v18 = vshrl.u32 %v15296_v25, 16 }
 0x553   : > { %7321 = vmatmul.bf16.gmra.mxu0 %v15322_v29  ;;  %v5299_v22 = vrot.slane %v5297_v20, 1  ;;  %v5639_v20 = vshrl.u32 %v15015_v45, 16 }
 0x554   : > { %v15326_v61 = vpop.f32.mrf.mxu1  ;;  %v15330_v26 = vpop.f32.mrf.mxu2  ;;  %v5295_v58 = vor.u32 %v5293_v18, %v5291_v1 }
 0x555   : > { %17924 = vst [vmem:[#allocation167_spill] sm:$0xff] %v15326_v61  ;;  %v15328_v24 = vpop.f32.mrf.mxu3 }
 0x556   : > { %17925 = vst [vmem:[#allocation168_spill] sm:$0xff] %v15328_v24  ;;  %v5300_v38 = vsel %vm17933_vm6, %v5295_v58, %v5299_v22  ;;  %v9714_v58 = vld [vmem:[#allocation2 + $0x20] sm:$0xff]  ;;  %vm17994_vm6 = vmmov %vm17904_vm0 }
 0x557   : > { %17926 = vst [vmem:[#allocation169_spill] sm:$0xff] %v15330_v26  ;;  %v5503_v26 = vpack.c.b16 %v15347_v63, %v15347_v63 }
 0x558   : > { %v15332_v23 = vpop.f32.mrf.mxu0 }
 0x559   : > { %17927 = vst [vmem:[#allocation170_spill] sm:$0xff] %v15332_v23  ;;  %v5637_v23 = vrot.slane %v5635_v8, 1  ;;  %v9457_v8 = vld [vmem:[#allocation2 + $0x18] sm:$0xff]  }
 0x55b   : > { %v5638_v11 = vsel %vm17931_vm5, %v5633_v47, %v5637_v23  ;;  %v5957_v47 = vshll.u32 %v9457_v8, 16  ;;  %vm17986_vm5 = vmmov %vm17904_vm0 }
 0x55c   : > { %v15343_v24 = vpop.f32.mrf.mxu1  ;;  %v15349_v61 = vpop.f32.mrf.mxu2 }
 0x55d   : > { %17928 = vst [vmem:[#allocation171_spill] sm:$0xff] %v15343_v24  ;;  %v15345_v62 = vpop.f32.mrf.mxu3  ;;  %v5959_v24 = vrot.slane %v5957_v47, 1 }
 0x55e   : > { %17929 = vst [vmem:[#allocation172_spill] sm:$0xff] %v15345_v62 }
 0x55f   : > { %17930 = vst [vmem:[#allocation173_spill] sm:$0xff] %v15349_v61  ;;  %7399 = vmatmul.bf16.gmra.mxu1 %v5638_v11  ;;  %v5643_v11 = vshll.u32 %v15048_v33, 16  ;;  %v5955_v61 = vshrl.u32 %v9457_v8, 16 }
 0x560   : > { %v15352_v48 = vpop.f32.mrf.mxu0 }
 0x561   : > { %17932 = vst [vmem:[#allocation174_spill] sm:$0xff] %v15352_v48  ;;  %7020 = vmatmul.bf16.gmra.mxu2 %v5300_v38  ;;  %v5641_v48 = vor.u32 %v5639_v20, %v5637_v23  ;;  %v5301_v38 = vshrl.u32 %v15340_v34, 16  ;;  %v5960_v47 = vor.u32 %v5959_v24, %v5955_v61  ;;  %v5647_v24 = vshrl.u32 %v15048_v33, 16 }
 0x562   : > { %7198 = vmatmul.bf16.gmra.mxu3 %v5448_v44  ;;  %v5962_v44 = vshll.u32 %v9714_v58, 16 }
 0x563   : > { %7326 = vmatmul.bf16.gmra.mxu0 %v5503_v26  ;;  %v15368_v26 = vld [vmem:[#allocation2 + $0x78] sm:$0xff]   ;;  %v5303_v45 = vor.u32 %v5301_v38, %v5299_v22 }
 0x564   : > { %v15357_v32 = vpop.f32.mrf.mxu1  ;;  %v15361_v1 = vpop.f32.mrf.mxu2  ;;  %v5964_v20 = vrot.slane %v5962_v44, 1  ;;  %v5309_v44 = vshrl.u32 %v15368_v26, 16 }
 0x565   : > { %17934 = vst [vmem:[#allocation175_spill] sm:$0xff] %v15357_v32  ;;  %v15359_v62 = vpop.f32.mrf.mxu3  ;;  %v5305_v32 = vshll.u32 %v15368_v26, 16 }
 0x566   : > { %17935 = vst [vmem:[#allocation176_spill] sm:$0xff] %v15359_v62 }
 0x567   : > { %17936 = vst [vmem:[#allocation177_spill] sm:$0xff] %v15361_v1  ;;  %v5645_v1 = vrot.slane %v5643_v11, 1  ;;  %v5307_v52 = vrot.slane %v5305_v32, 1  ;;  %v5965_v11 = vsel %vm17943_vm9, %v5960_v47, %v5964_v20  ;;  %v9718_v47 = vld [vmem:[#allocation2 + $0x28] sm:$0xff]  ;;  %vm18005_vm9 = vmmov %vm17904_vm0 }
 0x568   : > { %v15363_v18 = vpop.f32.mrf.mxu0 }
 0x569   : > { %17937 = vst [vmem:[#allocation178_spill] sm:$0xff] %v15363_v18  ;;  %v5646_v23 = vsel %vm17940_vm13, %v5641_v48, %v5645_v1  ;;  %v5308_v54 = vsel %vm17942_vm10, %v5303_v45, %v5307_v52  ;;  %v5651_v48 = vshll.u32 %v15075_v46, 16  ;;  %v5649_v32 = vor.u32 %v5647_v24, %v5645_v1  ;;  %vm17996_vm13 = vmmov %vm17904_vm0 }
 0x56a   : > { %v5311_v33 = vor.u32 %v5309_v44, %v5307_v52  ;;  %v5655_v44 = vshrl.u32 %v15075_v46, 16  ;;  %vm17997_vm10 = vmmov %vm17904_vm0 }
 0x56b   : > { %v5653_v45 = vrot.slane %v5651_v48, 1 }
 0x56c   : > { %v15371_v62 = vpop.f32.mrf.mxu1  ;;  %v15375_v18 = vpop.f32.mrf.mxu2 }
 0x56d   : > { %17938 = vst [vmem:[#allocation179_spill] sm:$0xff] %v15371_v62  ;;  %v15373_v27 = vpop.f32.mrf.mxu3 }
 0x56e   : > { %17939 = vst [vmem:[#allocation180_spill] sm:$0xff] %v15373_v27 }
 0x56f   : > { %7404 = vmatmul.bf16.gmra.mxu1 %v5646_v23  ;;  %v5966_v23 = vshrl.u32 %v9714_v58, 16 }
 0x570   : > { %v15378_v37 = vpop.f32.mrf.mxu0 }
 0x571   : > { %17941 = vst [vmem:[#allocation181_spill] sm:$0xff] %v15378_v37  ;;  %7025 = vmatmul.bf16.gmra.mxu2 %v5308_v54  ;;  %v5968_v1 = vor.u32 %v5966_v23, %v5964_v20  ;;  %v15424_v23 = vld [vmem:[#allocation2 + $0x88] sm:$0xff]  }
 0x572   : > { %7595 = vmatmul.bf16.vlgmr.msra.gmra.mxu3 %v9716_v36  ;;  %v15393_v36 = vld [vmem:[#allocation2 + $0x80] sm:$0xff]  }
 0x573   : > { %7723 = vmatmul.bf16.vlgmr.msra.gmra.mxu0 %v5965_v11  ;;  %v5313_v54 = vshll.u32 %v15393_v36, 16  ;;  %v5970_v11 = vshll.u32 %v9718_v47, 16 }
 0x574   : > { %v15382_v8 = vpop.f32.mrf.mxu1  ;;  %v15386_v22 = vpop.f32.mrf.mxu2 }
 0x575   : > { %17944 = vst [vmem:[#allocation182_spill] sm:$0xff] %v15382_v8  ;;  %v15384_v27 = vpop.f32.mrf.mxu3  ;;  %v5315_v24 = vrot.slane %v5313_v54, 1  ;;  %v9077_v8 = vld [vmem:[%s16887_s2 + $0x150] sm:$0xff]  ;;  %v5972_v48 = vrot.slane %v5970_v11, 1  ;;  %v5659_v54 = vshll.u32 %v15108_v40, 16  ;;  %v5321_v11 = vshll.u32 %v15424_v23, 16 }
 0x576   : > { %17945 = vst [vmem:[#allocation183_spill] sm:$0xff] %v15384_v27  ;;  %v5654_v27 = vsel %vm17951_vm1, %v5649_v32, %v5653_v45  ;;  %7464 = vmatpush.bf16.msra.mxu2 %v9077_v8  ;;  %v9101_v8 = vld [vmem:[%s16887_s2 + $0x210] sm:$0xff]  ;;  %vm18007_vm1 = vmmov %vm17904_vm0 }
 0x577   : > { %17946 = vst [vmem:[#allocation184_spill] sm:$0xff] %v15386_v22  ;;  %v5316_v58 = vsel %vm17953_vm3, %v5311_v33, %v5315_v24  ;;  %7848 = vmatpush.bf16.msra.mxu1 %v9101_v8  ;;  %v5323_v8 = vrot.slane %v5321_v11, 1  ;;  %vm18008_vm3 = vmmov %vm17904_vm0 }
 0x578   : > { %v15388_v61 = vpop.f32.mrf.mxu0 }
 0x579   : > { %17947 = vst [vmem:[#allocation185_spill] sm:$0xff] %v15388_v61 }
 0x57c   : > { %v15396_v38 = vpop.f32.mrf.mxu1  ;;  %v15400_v61 = vpop.f32.mrf.mxu2 }
 0x57d   : > { %17948 = vst [vmem:[#allocation186_spill] sm:$0xff] %v15396_v38  ;;  %v15398_v37 = vpop.f32.mrf.mxu3  ;;  %v9719_v38 = vld [vmem:[#allocation2 + $0x20] sm:$0xff]  }
 0x57e   : > { %17949 = vst [vmem:[#allocation187_spill] sm:$0xff] %v15398_v37  ;;  %v5973_v37 = vsel %vm17954_vm4, %v5968_v1, %v5972_v48  ;;  %v5661_v1 = vrot.slane %v5659_v54, 1  ;;  %vm18016_vm4 = vmmov %vm17904_vm0 }
 0x57f   : > { %17950 = vst [vmem:[#allocation188_spill] sm:$0xff] %v15400_v61  ;;  %7409 = vmatmul.bf16.gmra.mxu1 %v5654_v27 }
 0x580   : > { %v15406_v22 = vpop.f32.mrf.mxu0 }
 0x581   : > { %17952 = vst [vmem:[#allocation189_spill] sm:$0xff] %v15406_v22  ;;  %7030 = vmatmul.bf16.gmra.mxu2 %v5316_v58  ;;  %v5974_v58 = vshrl.u32 %v9718_v47, 16 }
 0x582   : > { %7600 = vmatmul.bf16.gmra.mxu3 %v9719_v38  ;;  %v5657_v38 = vor.u32 %v5655_v44, %v5653_v45 }
 0x583   : > { %7728 = vmatmul.bf16.gmra.mxu0 %v5973_v37  ;;  %v5317_v37 = vshrl.u32 %v15393_v36, 16  ;;  %v5976_v44 = vor.u32 %v5974_v58, %v5972_v48 }
 0x584   : > { %v15410_v52 = vpop.f32.mrf.mxu1  ;;  %v15414_v20 = vpop.f32.mrf.mxu2  ;;  %v5662_v45 = vsel %vm17962_vm11, %v5657_v38, %v5661_v1  ;;  %v5663_v38 = vshrl.u32 %v15108_v40, 16  ;;  %vm18018_vm11 = vmmov %vm17904_vm0 }
 0x585   : > { %17955 = vst [vmem:[#allocation190_spill] sm:$0xff] %v15410_v52  ;;  %v15412_v27 = vpop.f32.mrf.mxu3  ;;  %v5319_v52 = vor.u32 %v5317_v37, %v5315_v24  ;;  %v5667_v37 = vshll.u32 %v15141_v56, 16 }
 0x586   : > { %17956 = vst [vmem:[#allocation191_spill] sm:$0xff] %v15412_v27  ;;  %v5665_v11 = vor.u32 %v5663_v38, %v5661_v1 }
 0x587   : > { %17957 = vst [vmem:[#allocation192_spill] sm:$0xff] %v15414_v20  ;;  %v5324_v62 = vsel %vm17904_vm0, %v5319_v52, %v5323_v8  ;;  %v5325_v52 = vshrl.u32 %v15424_v23, 16 }
 0x588   : > { %v15416_v32 = vpop.f32.mrf.mxu0 }
 0x589   : > { %17958 = vst [vmem:[#allocation193_spill] sm:$0xff] %v15416_v32  ;;  %v9721_v32 = vld [vmem:[#allocation2 + $0x30] sm:$0xff]  ;;  %v5327_v40 = vor.u32 %v5325_v52, %v5323_v8 }
 0x58a   : > { %v5978_v46 = vshll.u32 %v9721_v32, 16 }
 0x58c   : > { %v15427_v33 = vpop.f32.mrf.mxu1  ;;  %v15431_v27 = vpop.f32.mrf.mxu2  ;;  %v5980_v61 = vrot.slane %v5978_v46, 1  ;;  %v5669_v46 = vrot.slane %v5667_v37, 1 }
 0x58d   : > { %17959 = vst [vmem:[#allocation194_spill] sm:$0xff] %v15427_v33  ;;  %v15429_v22 = vpop.f32.mrf.mxu3  ;;  %v9722_v33 = vld [vmem:[#allocation2 + $0x28] sm:$0xff]  }
 0x58e   : > { %17960 = vst [vmem:[#allocation195_spill] sm:$0xff] %v15429_v22  ;;  %v5981_v47 = vsel %vm17964_vm12, %v5976_v44, %v5980_v61  ;;  %v9724_v44 = vld [vmem:[#allocation2 + $0x38] sm:$0xff]  ;;  %vm18024_vm12 = vmmov %vm17904_vm0 }
 0x58f   : > { %17961 = vst [vmem:[#allocation196_spill] sm:$0xff] %v15431_v27  ;;  %7414 = vmatmul.bf16.gmra.mxu1 %v5662_v45  ;;  %v5982_v45 = vshrl.u32 %v9721_v32, 16 }
 0x590   : > { %v15434_v20 = vpop.f32.mrf.mxu0 }
 0x591   : > { %17963 = vst [vmem:[#allocation197_spill] sm:$0xff] %v15434_v20  ;;  %7035 = vmatmul.bf16.gmra.mxu2 %v5324_v62  ;;  %v5984_v1 = vor.u32 %v5982_v45, %v5980_v61 }
 0x592   : > { %7605 = vmatmul.bf16.gmra.mxu3 %v9722_v33  ;;  %v15449_v33 = vld [vmem:[#allocation2 + $0x90] sm:$0xff]  }
 0x593   : > { %7733 = vmatmul.bf16.gmra.mxu0 %v5981_v47  ;;  %v5329_v62 = vshll.u32 %v15449_v33, 16  ;;  %v5986_v47 = vshll.u32 %v9724_v44, 16 }
 0x594   : > { %v15438_v54 = vpop.f32.mrf.mxu1  ;;  %v15442_v24 = vpop.f32.mrf.mxu2 }
 0x595   : > { %17965 = vst [vmem:[#allocation198_spill] sm:$0xff] %v15438_v54  ;;  %v15440_v22 = vpop.f32.mrf.mxu3  ;;  %v5331_v38 = vrot.slane %v5329_v62, 1  ;;  %v5333_v62 = vshrl.u32 %v15449_v33, 16 }
 0x596   : > { %17966 = vst [vmem:[#allocation199_spill] sm:$0xff] %v15440_v22  ;;  %v5670_v22 = vsel %vm17972_vm14, %v5665_v11, %v5669_v46  ;;  %v5675_v11 = vshll.u32 %v15166_v50, 16  ;;  %vm18025_vm14 = vmmov %vm17904_vm0 }
 0x597   : > { %17967 = vst [vmem:[#allocation200_spill] sm:$0xff] %v15442_v24  ;;  %v5988_v24 = vrot.slane %v5986_v47, 1  ;;  %v5332_v27 = vsel %vm17974_vm2, %v5327_v40, %v5331_v38  ;;  %v5990_v40 = vshrl.u32 %v9724_v44, 16  ;;  %vm18027_vm2 = vmmov %vm17904_vm0 }
 0x598   : > { %v15444_v48 = vpop.f32.mrf.mxu0  ;;  %v5677_v47 = vrot.slane %v5675_v11, 1 }
 0x599   : > { %17968 = vst [vmem:[#allocation201_spill] sm:$0xff] %v15444_v48  ;;  %v5989_v32 = vsel %vm17975_vm7, %v5984_v1, %v5988_v24  ;;  %v9727_v1 = vld [vmem:[#allocation2 + $0x40] sm:$0xff]  ;;  %vm18032_vm7 = vmmov %vm17904_vm0 }
 0x59c   : > { %v15452_v58 = vpop.f32.mrf.mxu1  ;;  %v15456_v48 = vpop.f32.mrf.mxu2 }
 0x59d   : > { %17969 = vst [vmem:[#allocation202_spill] sm:$0xff] %v15452_v58  ;;  %v15454_v20 = vpop.f32.mrf.mxu3  ;;  %v9725_v58 = vld [vmem:[#allocation2 + $0x30] sm:$0xff]  }
 0x59e   : > { %17970 = vst [vmem:[#allocation203_spill] sm:$0xff] %v15454_v20 }
 0x59f   : > { %17971 = vst [vmem:[#allocation204_spill] sm:$0xff] %v15456_v48  ;;  %7419 = vmatmul.bf16.gmra.mxu1 %v5670_v22  ;;  %v5671_v22 = vshrl.u32 %v15141_v56, 16  ;;  %v5335_v56 = vor.u32 %v5333_v62, %v5331_v38  ;;  %v5679_v62 = vshrl.u32 %v15166_v50, 16 }
 0x5a0   : > { %v15459_v54 = vpop.f32.mrf.mxu0 }
 0x5a1   : > { %17973 = vst [vmem:[#allocation205_spill] sm:$0xff] %v15459_v54  ;;  %7040 = vmatmul.bf16.gmra.mxu2 %v5332_v27  ;;  %v5673_v52 = vor.u32 %v5671_v22, %v5669_v46  ;;  %v5992_v46 = vor.u32 %v5990_v40, %v5988_v24  ;;  %v15505_v40 = vld [vmem:[#allocation2 + $0xa0] sm:$0xff]  }
 0x5a2   : > { %7610 = vmatmul.bf16.gmra.mxu3 %v9725_v58  ;;  %v15474_v58 = vld [vmem:[#allocation2 + $0x98] sm:$0xff]  }
 0x5a3   : > { %7738 = vmatmul.bf16.gmra.mxu0 %v5989_v32  ;;  %v5337_v27 = vshll.u32 %v15474_v58, 16  ;;  %v5994_v32 = vshll.u32 %v9727_v1, 16 }
 0x5a4   : > { %v15463_v37 = vpop.f32.mrf.mxu1  ;;  %v15467_v8 = vpop.f32.mrf.mxu2 }
 0x5a5   : > { %17976 = vst [vmem:[#allocation206_spill] sm:$0xff] %v15463_v37  ;;  %v15465_v20 = vpop.f32.mrf.mxu3  ;;  %v5339_v22 = vrot.slane %v5337_v27, 1  ;;  %v9076_v37 = vld [vmem:[%s16887_s2 + $0x148] sm:$0xff]  ;;  %v5996_v11 = vrot.slane %v5994_v32, 1  ;;  %v5683_v27 = vshll.u32 %v15199_v2, 16  ;;  %v5345_v32 = vshll.u32 %v15505_v40, 16 }
 0x5a6   : > { %17977 = vst [vmem:[#allocation207_spill] sm:$0xff] %v15465_v20  ;;  %v5678_v20 = vsel %vm17983_vm8, %v5673_v52, %v5677_v47  ;;  %7465 = vmatpush.bf16.msra.mxu2 %v9076_v37  ;;  %v9100_v37 = vld [vmem:[%s16887_s2 + $0x208] sm:$0xff]  ;;  %vm18033_vm8 = vmmov %vm17904_vm0 }
 0x5a7   : > { %17978 = vst [vmem:[#allocation208_spill] sm:$0xff] %v15467_v8  ;;  %v5340_v44 = vsel %vm17985_vm15, %v5335_v56, %v5339_v22  ;;  %7849 = vmatpush.bf16.msra.mxu1 %v9100_v37  ;;  %v5347_v37 = vrot.slane %v5345_v32, 1  ;;  %vm18039_vm15 = vcmask 1046528  }
 0x5a8   : > { %v15469_v61 = vpop.f32.mrf.mxu0 }
 0x5a9   : > { %17979 = vst [vmem:[#allocation209_spill] sm:$0xff] %v15469_v61 }
 0x5ac   : > { %v15477_v45 = vpop.f32.mrf.mxu1  ;;  %v15481_v61 = vpop.f32.mrf.mxu2 }
 0x5ad   : > { %17980 = vst [vmem:[#allocation210_spill] sm:$0xff] %v15477_v45  ;;  %v15479_v54 = vpop.f32.mrf.mxu3  ;;  %v9728_v45 = vld [vmem:[#allocation2 + $0x38] sm:$0xff]  }
 0x5ae   : > { %17981 = vst [vmem:[#allocation211_spill] sm:$0xff] %v15479_v54  ;;  %v5997_v54 = vsel %vm17986_vm5, %v5992_v46, %v5996_v11  ;;  %v5685_v46 = vrot.slane %v5683_v27, 1  ;;  %vm18040_vm5 = vmmov %vm17904_vm0 }
 0x5af   : > { %17982 = vst [vmem:[#allocation212_spill] sm:$0xff] %v15481_v61  ;;  %7424 = vmatmul.bf16.gmra.mxu1 %v5678_v20 }
 0x5b0   : > { %v15487_v8 = vpop.f32.mrf.mxu0 }
 0x5b1   : > { %17984 = vst [vmem:[#allocation213_spill] sm:$0xff] %v15487_v8  ;;  %7045 = vmatmul.bf16.gmra.mxu2 %v5340_v44  ;;  %v5998_v44 = vshrl.u32 %v9727_v1, 16 }
 0x5b2   : > { %7615 = vmatmul.bf16.gmra.mxu3 %v9728_v45  ;;  %v5681_v45 = vor.u32 %v5679_v62, %v5677_v47 }
 0x5b3   : > { %7743 = vmatmul.bf16.gmra.mxu0 %v5997_v54  ;;  %v5341_v54 = vshrl.u32 %v15474_v58, 16  ;;  %v6000_v62 = vor.u32 %v5998_v44, %v5996_v11 }
 0x5b4   : > { %v15491_v38 = vpop.f32.mrf.mxu1  ;;  %v15495_v24 = vpop.f32.mrf.mxu2  ;;  %v5686_v47 = vsel %vm17994_vm6, %v5681_v45, %v5685_v46  ;;  %v5687_v45 = vshrl.u32 %v15199_v2, 16  ;;  %vm18046_vm6 = vmmov %vm18039_vm15 }
 0x5b5   : > { %17987 = vst [vmem:[#allocation214_spill] sm:$0xff] %v15491_v38  ;;  %v15493_v20 = vpop.f32.mrf.mxu3  ;;  %v5343_v38 = vor.u32 %v5341_v54, %v5339_v22  ;;  %v5691_v54 = vshll.u32 %v15232_v4, 16 }
 0x5b6   : > { %17988 = vst [vmem:[#allocation215_spill] sm:$0xff] %v15493_v20  ;;  %v5689_v32 = vor.u32 %v5687_v45, %v5685_v46 }
 0x5b7   : > { %17989 = vst [vmem:[#allocation216_spill] sm:$0xff] %v15495_v24  ;;  %v5348_v48 = vsel %vm17996_vm13, %v5343_v38, %v5347_v37  ;;  %v5349_v38 = vshrl.u32 %v15505_v40, 16  ;;  %vm18047_vm13 = vmmov %vm18046_vm6 }
 0x5b8   : > { %v15497_v52 = vpop.f32.mrf.mxu0 }
 0x5b9   : > { %17990 = vst [vmem:[#allocation217_spill] sm:$0xff] %v15497_v52  ;;  %v9730_v52 = vld [vmem:[#allocation2 + $0x48] sm:$0xff]  ;;  %v5351_v2 = vor.u32 %v5349_v38, %v5347_v37 }
 0x5ba   : > { %v6002_v50 = vshll.u32 %v9730_v52, 16 }
 0x5bc   : > { %v15508_v56 = vpop.f32.mrf.mxu1  ;;  %v15512_v20 = vpop.f32.mrf.mxu2  ;;  %v6004_v61 = vrot.slane %v6002_v50, 1  ;;  %v5693_v50 = vrot.slane %v5691_v54, 1 }
 0x5bd   : > { %17991 = vst [vmem:[#allocation218_spill] sm:$0xff] %v15508_v56  ;;  %v15510_v8 = vpop.f32.mrf.mxu3  ;;  %v9731_v56 = vld [vmem:[#allocation2 + $0x40] sm:$0xff]  }
 0x5be   : > { %17992 = vst [vmem:[#allocation219_spill] sm:$0xff] %v15510_v8  ;;  %v6005_v1 = vsel %vm17997_vm10, %v6000_v62, %v6004_v61  ;;  %v9733_v62 = vld [vmem:[#allocation2 + $0x50] sm:$0xff]  ;;  %vm18048_vm10 = vmmov %vm17904_vm0 }
 0x5bf   : > { %17993 = vst [vmem:[#allocation220_spill] sm:$0xff] %v15512_v20  ;;  %7429 = vmatmul.bf16.gmra.mxu1 %v5686_v47  ;;  %v6006_v47 = vshrl.u32 %v9730_v52, 16 }
 0x5c0   : > { %v15515_v24 = vpop.f32.mrf.mxu0 }
 0x5c1   : > { %17995 = vst [vmem:[#allocation221_spill] sm:$0xff] %v15515_v24  ;;  %7050 = vmatmul.bf16.gmra.mxu2 %v5348_v48  ;;  %v6008_v46 = vor.u32 %v6006_v47, %v6004_v61  ;;  %v15555_v47 = vld [vmem:[#allocation2 + $0xb0] sm:$0xff]  }
 0x5c2   : > { %7620 = vmatmul.bf16.gmra.mxu3 %v9731_v56  ;;  %v15530_v56 = vld [vmem:[#allocation2 + $0xa8] sm:$0xff]  }
 0x5c3   : > { %7748 = vmatmul.bf16.gmra.mxu0 %v6005_v1  ;;  %v5353_v48 = vshll.u32 %v15530_v56, 16  ;;  %v6010_v1 = vshll.u32 %v9733_v62, 16 }
 0x5c4   : > { %v15519_v27 = vpop.f32.mrf.mxu1  ;;  %v15523_v22 = vpop.f32.mrf.mxu2 }
 0x5c5   : > { %17998 = vst [vmem:[#allocation222_spill] sm:$0xff] %v15519_v27  ;;  %v15521_v8 = vpop.f32.mrf.mxu3  ;;  %v5355_v45 = vrot.slane %v5353_v48, 1 }
 0x5c6   : > { %17999 = vst [vmem:[#allocation223_spill] sm:$0xff] %v15521_v8  ;;  %v5694_v8 = vsel %vm18005_vm9, %v5689_v32, %v5693_v50  ;;  %v5695_v32 = vshrl.u32 %v15232_v4, 16  ;;  %vm18053_vm9 = vmmov %vm18046_vm6 }
 0x5c7   : > { %18000 = vst [vmem:[#allocation224_spill] sm:$0xff] %v15523_v22  ;;  %v6012_v22 = vrot.slane %v6010_v1, 1  ;;  %v5356_v20 = vsel %vm18007_vm1, %v5351_v2, %v5355_v45  ;;  %v6014_v2 = vshrl.u32 %v9733_v62, 16  ;;  %vm18054_vm1 = vmmov %vm17904_vm0 }
 0x5c8   : > { %v15525_v11 = vpop.f32.mrf.mxu0  ;;  %v5697_v38 = vor.u32 %v5695_v32, %v5693_v50  ;;  %v9075_v32 = vld [vmem:[%s16887_s2 + $0x140] sm:$0xff] }
 0x5c9   : > { %18001 = vst [vmem:[#allocation225_spill] sm:$0xff] %v15525_v11  ;;  %v6013_v52 = vsel %vm18008_vm3, %v6008_v46, %v6012_v22  ;;  %v9736_v46 = vld [vmem:[#allocation2 + $0x58] sm:$0xff]  ;;  %v6016_v50 = vor.u32 %v6014_v2, %v6012_v22  ;;  %7466 = vmatpush.bf16.msra.mxu2 %v9075_v32  ;;  %v5707_v2 = vshll.u32 %v15322_v29, 16  ;;  %vm18059_vm3 = vmmov %vm18046_vm6 }
 0x5ca   : > { %v6022_v32 = vshrl.u32 %v9736_v46, 16 }
 0x5cc   : > { %v15533_v44 = vpop.f32.mrf.mxu1  ;;  %v15537_v11 = vpop.f32.mrf.mxu2 }
 0x5cd   : > { %18002 = vst [vmem:[#allocation226_spill] sm:$0xff] %v15533_v44  ;;  %v15535_v24 = vpop.f32.mrf.mxu3  ;;  %v9734_v44 = vld [vmem:[#allocation2 + $0x48] sm:$0xff]  }
 0x5ce   : > { %18003 = vst [vmem:[#allocation227_spill] sm:$0xff] %v15535_v24 }
 0x5cf   : > { %18004 = vst [vmem:[#allocation228_spill] sm:$0xff] %v15537_v11  ;;  %7434 = vmatmul.bf16.gmra.mxu1 %v5694_v8  ;;  %v5699_v8 = vshll.u32 %v15263_v19, 16 }
 0x5d0   : > { %v15540_v27 = vpop.f32.mrf.mxu0 }
 0x5d1   : > { %18006 = vst [vmem:[#allocation229_spill] sm:$0xff] %v15540_v27  ;;  %7055 = vmatmul.bf16.gmra.mxu2 %v5356_v20  ;;  %v5701_v48 = vrot.slane %v5699_v8, 1  ;;  %v5361_v20 = vshll.u32 %v15555_v47, 16 }
 0x5d2   : > { %7625 = vmatmul.bf16.gmra.mxu3 %v9734_v44  ;;  %v5357_v44 = vshrl.u32 %v15530_v56, 16 }
 0x5d3   : > { %7753 = vmatmul.bf16.gmra.mxu0 %v6013_v52  ;;  %v6018_v52 = vshll.u32 %v9736_v46, 16  ;;  %v5702_v4 = vsel %vm18016_vm4, %v5697_v38, %v5701_v48  ;;  %v5363_v8 = vrot.slane %v5361_v20, 1  ;;  %v5703_v20 = vshrl.u32 %v15263_v19, 16  ;;  %v9739_v46 = vld [vmem:[#allocation2 + $0x58] sm:$0xff]   ;;  %vm18060_vm4 = vmmov %vm17904_vm0 }
 0x5d4   : > { %v15544_v54 = vpop.f32.mrf.mxu1  ;;  %v15548_v37 = vpop.f32.mrf.mxu2 }
 0x5d5   : > { %18009 = vst [vmem:[#allocation230_spill] sm:$0xff] %v15544_v54  ;;  %v15546_v24 = vpop.f32.mrf.mxu3 }
 0x5d6   : > { %18010 = vst [vmem:[#allocation231_spill] sm:$0xff] %v15546_v24 }
 0x5d7   : > { %18011 = vst [vmem:[#allocation232_spill] sm:$0xff] %v15548_v37  ;;  %v9737_v37 = vld [vmem:[#allocation2 + $0x50] sm:$0xff]  }
 0x5d8   : > { %v15551_v61 = vpop.f32.mrf.mxu0 }
 0x5d9   : > { %18012 = vst [vmem:[#allocation233_spill] sm:$0xff] %v15551_v61  ;;  %v5359_v61 = vor.u32 %v5357_v44, %v5355_v45 }
 0x5db   : > { %v5364_v62 = vsel %vm18018_vm11, %v5359_v61, %v5363_v8  ;;  %v9099_v61 = vld [vmem:[%s16887_s2 + $0x200] sm:$0xff]  ;;  %vm18065_vm11 = vmmov %vm18059_vm3 }
 0x5dc   : > { %v15558_v1 = vpop.f32.mrf.mxu1  ;;  %v15562_v24 = vpop.f32.mrf.mxu2  ;;  %7850 = vmatpush.bf16.msra.mxu1 %v9099_v61 }
 0x5dd   : > { %18013 = vst [vmem:[#allocation234_spill] sm:$0xff] %v15558_v1  ;;  %v15560_v27 = vpop.f32.mrf.mxu3  ;;  %v6020_v1 = vrot.slane %v6018_v52, 1  ;;  %v5705_v52 = vor.u32 %v5703_v20, %v5701_v48 }
 0x5de   : > { %18014 = vst [vmem:[#allocation235_spill] sm:$0xff] %v15560_v27 }
 0x5df   : > { %18015 = vst [vmem:[#allocation236_spill] sm:$0xff] %v15562_v24  ;;  %7439 = vmatmul.bf16.gmra.mxu1 %v5702_v4  ;;  %v6021_v27 = vsel %vm17904_vm0, %v6016_v50, %v6020_v1  ;;  %v5709_v50 = vrot.slane %v5707_v2, 1  ;;  %v6024_v11 = vor.u32 %v6022_v32, %v6020_v1 }
 0x5e0   : > { %v15568_v54 = vpop.f32.mrf.mxu0 }
 0x5e1   : > { %18017 = vst [vmem:[#allocation237_spill] sm:$0xff] %v15568_v54  ;;  %7060 = vmatmul.bf16.gmra.mxu2 %v5364_v62  ;;  %v9738_v62 = vld [vmem:[#allocation2 + $0x60] sm:$0xff]  ;;  %v5710_v19 = vsel %vm18024_vm12, %v5705_v52, %v5709_v50  ;;  %vm18070_vm12 = vmmov %vm18059_vm3 }
 0x5e2   : > { %7630 = vmatmul.bf16.gmra.mxu3 %v9737_v37  ;;  %v5369_v37 = vshll.u32 %v15290_v42, 16  ;;  %v6026_v54 = vshll.u32 %v9738_v62, 16 }
 0x5e3   : > { %7758 = vmatmul.bf16.gmra.mxu0 %v6021_v27  ;;  %v4986_v27 = vld [vmem:[#allocation2 + $0xc8] sm:$0x1] }
 0x5e4   : > { %v15572_v45 = vpop.f32.mrf.mxu1  ;;  %v15576_v38 = vpop.f32.mrf.mxu2  ;;  %v5529_v24 = vunpack.c.l.b16 %v4986_v27  ;;  %v6028_v20 = vrot.slane %v6026_v54, 1 }
 0x5e5   : > { %18019 = vst [vmem:[#allocation238_spill] sm:$0xff] %v15572_v45  ;;  %v15574_v22 = vpop.f32.mrf.mxu3  ;;  %v5365_v45 = vshrl.u32 %v15555_v47, 16 }
 0x5e6   : > { %18020 = vst [vmem:[#allocation239_spill] sm:$0xff] %v15574_v22  ;;  %v15592_v2 = vpack.c.b16 %v5529_v24, %v15347_v63  ;;  %v6030_v63 = vshrl.u32 %v9738_v62, 16  ;;  %v9740_v24 = vld [vmem:[#allocation2 + $0x68] sm:$0xff] }
 0x5e7   : > { %18021 = vst [vmem:[#allocation240_spill] sm:$0xff] %v15576_v38  ;;  %v5371_v38 = vrot.slane %v5369_v37, 1  ;;  %v5367_v48 = vor.u32 %v5365_v45, %v5363_v8  ;;  %v6034_v52 = vshll.u32 %v9740_v24, 16  ;;  %v4987_v62 = vld [vmem:[#allocation2 + $0xc] sm:$0xe] }
 0x5e8   : > { %v7329_v44 = vpop.f32.mrf.mxu0  ;;  %18026 = vst [vmem:[#allocation243_spill] sm:$0xff] %v15592_v2  ;;  %v5715_v1 = vshll.u32 %v15592_v2, 16  ;;  %v6032_v32 = vor.u32 %v6030_v63, %v6028_v20 }
 0x5e9   : > { %v5372_v61 = vsel %vm18025_vm14, %v5367_v48, %v5371_v38  ;;  %v5373_v48 = vshrl.u32 %v15290_v42, 16  ;;  %v18036_v42 = vunpack.c.l.b16 %v14630_v30  ;;  %vm18071_vm14 = vmmov %vm17904_vm0 }
 0x5ea   : > { %v5717_v8 = vrot.slane %v5715_v1, 1 }
 0x5ec   : > { %v15584_v4 = vpop.f32.mrf.mxu1  ;;  %v15586_v22 = vpop.f32.mrf.mxu2 }
 0x5ed   : > { %18022 = vst [vmem:[#allocation241_spill] sm:$0xff] %v15584_v4  ;;  %v7201_v44 = vpop.f32.mrf.mxu3 }
 0x5ee   : > { %18023 = vst [vmem:[#allocation242_spill] sm:$0xff] %v15586_v22  ;;  %v6029_v44 = vsel %vm18027_vm2, %v6024_v11, %v6028_v20  ;;  %v5747_v20 = vunpack.c.l.b16 %v4987_v62  ;;  %v9742_v62 = vld [vmem:[#allocation2 + $0x14] sm:$0xff]   ;;  %vm18077_vm2 = vmmov %vm18059_vm3 }
 0x5ef   : > { %7444 = vmatmul.bf16.gmra.mxu1 %v5710_v19  ;;  %v5711_v19 = vshrl.u32 %v15322_v29, 16  ;;  %v5750_v30 = vrot.slane %v9742_v62, 1 }
 0x5f0   : > { %v15609_v29 = vpop.f32.mrf.mxu0 }
 0x5f1   : > { %7065 = vmatmul.bf16.gmra.mxu2 %v5372_v61  ;;  %v5713_v54 = vor.u32 %v5711_v19, %v5709_v50 }
 0x5f2   : > { %7635 = vmatmul.bf16.gmra.mxu3 %v9739_v46  ;;  %v6036_v46 = vrot.slane %v6034_v52, 1  ;;  %v5719_v52 = vshrl.u32 %v15592_v2, 16 }
 0x5f3   : > { %7763 = vmatmul.bf16.gmra.mxu0 %v6029_v44  ;;  %v5718_v11 = vsel %vm18032_vm7, %v5713_v54, %v5717_v8  ;;  %v5375_v44 = vor.u32 %v5373_v48, %v5371_v38  ;;  %v5748_v54 = vpack.c.b16 %v18036_v42, %v5747_v20  ;;  %vm18078_vm7 = vmmov %vm17904_vm0 }
 0x5f4   : > { %v15595_v4 = vpop.f32.mrf.mxu1  ;;  %v15597_v37 = vpop.f32.mrf.mxu2  ;;  %v6037_v50 = vsel %vm18033_vm8, %v6032_v32, %v6036_v46  ;;  %v9741_v32 = vld [vmem:[#allocation2 + $0x70] sm:$0xff]  ;;  %vm18083_vm8 = vmmov %vm18077_vm2 }
 0x5f5   : > { %18028 = vst [vmem:[#allocation244_spill] sm:$0xff] %v15595_v4  ;;  %v15607_v61 = vpop.f32.mrf.mxu3  ;;  %v6042_v48 = vshll.u32 %v9741_v32, 16 }
 0x5f6   : > { %18029 = vst [vmem:[#allocation245_spill] sm:$0xff] %v15597_v37 }
 0x5f7   : > { %v6044_v20 = vrot.slane %v6042_v48, 1 }
 0x5f8   : > { %v15621_v38 = vpop.f32.mrf.mxu0 }
 0x5fc   : > { %v15601_v45 = vpop.f32.mrf.mxu1  ;;  %v15603_v27 = vpop.f32.mrf.mxu2 }
 0x5fd   : > { %18030 = vst [vmem:[#allocation246_spill] sm:$0xff] %v15601_v45  ;;  %v15619_v63 = vpop.f32.mrf.mxu3 }
 0x5fe   : > { %18031 = vst [vmem:[#allocation247_spill] sm:$0xff] %v15603_v27 }
 0x5ff   : > { %7449 = vmatmul.bf16.gmra.mxu1 %v5718_v11  ;;  %v6038_v11 = vshrl.u32 %v9740_v24, 16  ;;  %v9561_v24 = vld [vmem:[#allocation2 + $0x18] sm:$0xf0] }
 0x601   : > { %7070 = vmatmul.bf16.gmra.mxu2 %v5375_v44  ;;  %v5721_v44 = vor.u32 %v5719_v52, %v5717_v8 }
 0x602   : > { %7640 = vmatmul.bf16.gmra.mxu3 %v15247_v17 }
 0x603   : > { %7768 = vmatmul.bf16.gmra.mxu0 %v6037_v50 }
 0x604   : > { %v15613_v1 = vpop.f32.mrf.mxu1  ;;  %v15615_v19 = vpop.f32.mrf.mxu2 }
 0x605   : > { %18034 = vst [vmem:[#allocation248_spill] sm:$0xff] %v15613_v1  ;;  %v5749_v1 = vrot.slane %v5748_v54, 1  ;;  %v15631_v27 = vpop.f32.mrf.mxu3  ;;  %v15635_v54 = vpop.f32.mrf.mxu0 }
 0x606   : > { %18035 = vst [vmem:[#allocation249_spill] sm:$0xff] %v15615_v19  ;;  %v6040_v19 = vor.u32 %v6038_v11, %v6036_v46 }
 0x607   : > { %v5751_v42 = vsel %vm18039_vm15, %v5749_v1, %v5750_v30  ;;  %v6046_v1 = vshrl.u32 %v9741_v32, 16  ;;  %vm18084_vm15 = vmmov %vm17904_vm0 }
 0x608   : > { %v6045_v45 = vsel %vm18040_vm5, %v6040_v19, %v6044_v20  ;;  %vm18089_vm5 = vmmov %vm18077_vm2 }
 0x609   : > { %v6048_v2 = vor.u32 %v6046_v1, %v6044_v20 }
 0x60c   : > { %v15624_v17 = vpop.f32.mrf.mxu1  ;;  %v15626_v50 = vpop.f32.mrf.mxu2 }
 0x60d   : > { %18037 = vst [vmem:[#allocation250_spill] sm:$0xff] %v15624_v17  ;;  %v9562_v17 = vld [vmem:[#allocation2 + $0x18] sm:$0xe]  ;;  %v15648_v4 = vpop.f32.mrf.mxu0 }
 0x60e   : > { %18038 = vst [vmem:[#allocation251_spill] sm:$0xff] %v15626_v50  ;;  %v9563_v52 = vor.u32 %v9562_v17, %v9561_v24  ;;  %v18045_v50 = vrot.slane %v14719_v53, 1 }
 0x60f   : > { %7454 = vmatmul.bf16.gmra.mxu1 %v5721_v44 }
 0x610   : > { %v6172_v11 = vrot.slane %v9563_v52, 1 }
 0x611   : > { %7467 = vmatmul.bf16.vlgmr.msra.gmra.mxu2 %v5751_v42  ;;  %v15643_v42 = vpop.f32.mrf.mxu3 }
 0x612   : > { %7645 = vmatmul.bf16.gmra.mxu3 %v15296_v25  ;;  %v9743_v25 = vld [vmem:[#allocation2 + $0x78] sm:$0xff] }
 0x613   : > { %7773 = vmatmul.bf16.gmra.mxu0 %v6045_v45  ;;  %v6050_v44 = vshll.u32 %v9743_v25, 16  ;;  %v9744_v45 = vld [vmem:[#allocation2 + $0x1c] sm:$0xff]  }
 0x614   : > { %v15633_v8 = vpop.f32.mrf.mxu1  ;;  %v15637_v46 = vpop.f32.mrf.mxu2  ;;  %v5752_v62 = vrot.slane %v9744_v45, 1 }
 0x615   : > { %18041 = vst [vmem:[#allocation252_spill] sm:$0xff] %v15633_v8  ;;  %v6174_v8 = vsel %vm18046_vm6, %v6172_v11, %v18045_v50  ;;  %v6052_v17 = vrot.slane %v6050_v44, 1  ;;  %v15659_v50 = vpop.f32.mrf.mxu0  ;;  %v9745_v11 = vld [vmem:[#allocation2 + $0x80] sm:$0xff]  ;;  %vm18090_vm6 = vmmov %vm17904_vm0 }
 0x616   : > { %18042 = vst [vmem:[#allocation253_spill] sm:$0xff] %v15637_v46  ;;  %v5753_v24 = vsel %vm18047_vm13, %v5750_v30, %v5752_v62  ;;  %v6058_v1 = vshll.u32 %v9745_v11, 16  ;;  %vm18097_vm13 = vmmov %vm18077_vm2 }
 0x617   : > { %v6053_v32 = vsel %vm18048_vm10, %v6048_v2, %v6052_v17  ;;  %vm18098_vm10 = vmmov %vm17904_vm0 }
 0x619   : > { %v15657_v53 = vpop.f32.mrf.mxu3 }
 0x61c   : > { %v15639_v48 = vpop.f32.mrf.mxu1  ;;  %v15641_v19 = vpop.f32.mrf.mxu2 }
 0x61d   : > { %18043 = vst [vmem:[#allocation254_spill] sm:$0xff] %v15639_v48 }
 0x61e   : > { %18044 = vst [vmem:[#allocation255_spill] sm:$0xff] %v15641_v19 }
 0x61f   : > { %7851 = vmatmul.bf16.vlgmr.msra.gmra.mxu1 %v6174_v8  ;;  %v6054_v8 = vshrl.u32 %v9743_v25, 16  ;;  %v15671_v25 = vpop.f32.mrf.mxu0 }
 0x621   : > { %7472 = vmatmul.bf16.gmra.mxu2 %v5753_v24  ;;  %v6056_v2 = vor.u32 %v6054_v8, %v6052_v17  ;;  %v6060_v24 = vrot.slane %v6058_v1, 1  ;;  %v6062_v8 = vshrl.u32 %v9745_v11, 16 }
 0x622   : > { %7650 = vmatmul.bf16.gmra.mxu3 %v15340_v34  ;;  %v9746_v34 = vld [vmem:[#allocation2 + $0x24] sm:$0xff]  }
 0x623   : > { %7778 = vmatmul.bf16.gmra.mxu0 %v6053_v32  ;;  %v5754_v44 = vrot.slane %v9746_v34, 1  ;;  %v6064_v48 = vor.u32 %v6062_v8, %v6060_v24  ;;  %v9749_v8 = vld [vmem:[#allocation2 + $0x90] sm:$0xff] }
 0x624   : > { %v15653_v52 = vpop.f32.mrf.mxu1  ;;  %v15655_v45 = vpop.f32.mrf.mxu2 }
 0x625   : > { %18049 = vst [vmem:[#allocation256_spill] sm:$0xff] %v15653_v52  ;;  %v5755_v32 = vsel %vm18053_vm9, %v5752_v62, %v5754_v44  ;;  %v15667_v52 = vpop.f32.mrf.mxu3  ;;  %v9747_v62 = vld [vmem:[#allocation2 + $0x88] sm:$0xff]  ;;  %vm18108_vm9 = vmmov %vm18077_vm2 }
 0x626   : > { %18050 = vst [vmem:[#allocation257_spill] sm:$0xff] %v15655_v45  ;;  %v6061_v45 = vsel %vm18054_vm1, %v6056_v2, %v6060_v24  ;;  %v6066_v1 = vshll.u32 %v9747_v62, 16  ;;  %v9748_v2 = vld [vmem:[#allocation2 + $0x2c] sm:$0xff]   ;;  %vm18109_vm1 = vmmov %vm17904_vm0 }
 0x627   : > { %v15681_v34 = vpop.f32.mrf.mxu0 }
 0x62c   : > { %v15661_v20 = vpop.f32.mrf.mxu1  ;;  %v15663_v30 = vpop.f32.mrf.mxu2 }
 0x62d   : > { %18051 = vst [vmem:[#allocation258_spill] sm:$0xff] %v15661_v20  ;;  %v15677_v17 = vpop.f32.mrf.mxu3 }
 0x62e   : > { %18052 = vst [vmem:[#allocation259_spill] sm:$0xff] %v15663_v30 }
 0x62f   : > { %7856 = vmatmul.bf16.gmra.mxu1 %v14736_v14 }
 0x631   : > { %7477 = vmatmul.bf16.gmra.mxu2 %v5755_v32  ;;  %v5756_v32 = vrot.slane %v9748_v2, 1 }
 0x632   : > { %7655 = vmatmul.bf16.gmra.mxu3 %v15368_v26 }
 0x633   : > { %7783 = vmatmul.bf16.gmra.mxu0 %v6061_v45  ;;  %v6068_v45 = vrot.slane %v6066_v1, 1  ;;  %v6074_v1 = vshll.u32 %v9749_v8, 16 }
 0x634   : > { %v15673_v20 = vpop.f32.mrf.mxu1  ;;  %v15675_v30 = vpop.f32.mrf.mxu2 }
 0x635   : > { %18055 = vst [vmem:[#allocation260_spill] sm:$0xff] %v15673_v20  ;;  %v5757_v20 = vsel %vm18059_vm3, %v5754_v44, %v5756_v32  ;;  %v15693_v19 = vpop.f32.mrf.mxu3  ;;  %vm18119_vm3 = vmmov %vm18077_vm2 }
 0x636   : > { %18056 = vst [vmem:[#allocation261_spill] sm:$0xff] %v15675_v30  ;;  %v6069_v30 = vsel %vm18060_vm4, %v6064_v48, %v6068_v45  ;;  %vm18120_vm4 = vmmov %vm17904_vm0 }
 0x63c   : > { %v15679_v14 = vpop.f32.mrf.mxu1  ;;  %v15683_v26 = vpop.f32.mrf.mxu2 }
 0x63d   : > { %18057 = vst [vmem:[#allocation262_spill] sm:$0xff] %v15679_v14 }
 0x63e   : > { %18058 = vst [vmem:[#allocation263_spill] sm:$0xff] %v15683_v26  ;;  %v15695_v26 = vpop.f32.mrf.mxu0 }
 0x63f   : > { %7861 = vmatmul.bf16.gmra.mxu1 %v14739_v6  ;;  %v6070_v6 = vshrl.u32 %v9747_v62, 16 }
 0x641   : > { %7482 = vmatmul.bf16.gmra.mxu2 %v5757_v20  ;;  %v6072_v48 = vor.u32 %v6070_v6, %v6068_v45  ;;  %v15702_v20 = vpop.f32.mrf.mxu3 }
 0x642   : > { %7660 = vmatmul.bf16.gmra.mxu3 %v15393_v36  ;;  %v9750_v36 = vld [vmem:[#allocation2 + $0x34] sm:$0xff]  }
 0x643   : > { %7788 = vmatmul.bf16.gmra.mxu0 %v6069_v30  ;;  %v5758_v2 = vrot.slane %v9750_v36, 1  ;;  %v6076_v30 = vrot.slane %v6074_v1, 1  ;;  %v6078_v1 = vshrl.u32 %v9749_v8, 16  ;;  %v9751_v36 = vld [vmem:[#allocation2 + $0x98] sm:$0xff] }
 0x644   : > { %v15689_v11 = vpop.f32.mrf.mxu1  ;;  %v15691_v14 = vpop.f32.mrf.mxu2  ;;  %v6082_v46 = vshll.u32 %v9751_v36, 16 }
 0x645   : > { %18061 = vst [vmem:[#allocation264_spill] sm:$0xff] %v15689_v11  ;;  %v6077_v62 = vsel %vm17904_vm0, %v6072_v48, %v6076_v30  ;;  %v6080_v48 = vor.u32 %v6078_v1, %v6076_v30 }
 0x646   : > { %18062 = vst [vmem:[#allocation265_spill] sm:$0xff] %v15691_v14  ;;  %v15704_v11 = vpop.f32.mrf.mxu0  ;;  %v5759_v14 = vsel %vm18065_vm11, %v5756_v32, %v5758_v2  ;;  %vm18132_vm11 = vmmov %vm18077_vm2 }
 0x649   : > { %v15713_v45 = vpop.f32.mrf.mxu3 }
 0x64c   : > { %v15697_v24 = vpop.f32.mrf.mxu1  ;;  %v15699_v44 = vpop.f32.mrf.mxu2 }
 0x64d   : > { %18063 = vst [vmem:[#allocation266_spill] sm:$0xff] %v15697_v24 }
 0x64e   : > { %18064 = vst [vmem:[#allocation267_spill] sm:$0xff] %v15699_v44 }
 0x64f   : > { %7866 = vmatmul.bf16.gmra.mxu1 %v14744_v3  ;;  %v15715_v3 = vpop.f32.mrf.mxu0 }
 0x651   : > { %7487 = vmatmul.bf16.gmra.mxu2 %v5759_v14  ;;  %v6084_v14 = vrot.slane %v6082_v46, 1  ;;  %v9753_v46 = vld [vmem:[#allocation2 + $0xa0] sm:$0xff] }
 0x652   : > { %7665 = vmatmul.bf16.gmra.mxu3 %v15424_v23  ;;  %v9752_v23 = vld [vmem:[#allocation2 + $0x3c] sm:$0xff]   ;;  %v6090_v1 = vshll.u32 %v9753_v46, 16 }
 0x653   : > { %7793 = vmatmul.bf16.gmra.mxu0 %v6077_v62  ;;  %v5760_v37 = vrot.slane %v9752_v23, 1 }
 0x654   : > { %v15709_v24 = vpop.f32.mrf.mxu1  ;;  %v15711_v44 = vpop.f32.mrf.mxu2 }
 0x655   : > { %18066 = vst [vmem:[#allocation268_spill] sm:$0xff] %v15709_v24  ;;  %v5761_v62 = vsel %vm18070_vm12, %v5758_v2, %v5760_v37  ;;  %v6085_v24 = vsel %vm18071_vm14, %v6080_v48, %v6084_v14  ;;  %vm18143_vm12 = vmmov %vm18077_vm2 }
 0x656   : > { %18067 = vst [vmem:[#allocation269_spill] sm:$0xff] %v15711_v44  ;;  %vm18156_vm14 = vmmov %vm18077_vm2 }
 0x657   : > { %v15729_v44 = vpop.f32.mrf.mxu0 }
 0x65c   : > { %v15717_v6 = vpop.f32.mrf.mxu1  ;;  %v15719_v32 = vpop.f32.mrf.mxu2 }
 0x65d   : > { %18068 = vst [vmem:[#allocation270_spill] sm:$0xff] %v15717_v6  ;;  %v15725_v6 = vpop.f32.mrf.mxu3 }
 0x65e   : > { %18069 = vst [vmem:[#allocation271_spill] sm:$0xff] %v15719_v32 }
 0x65f   : > { %7871 = vmatmul.bf16.gmra.mxu1 %v14747_v21  ;;  %v6086_v21 = vshrl.u32 %v9751_v36, 16 }
 0x661   : > { %7492 = vmatmul.bf16.gmra.mxu2 %v5761_v62  ;;  %v15739_v62 = vpop.f32.mrf.mxu0 }
 0x662   : > { %7670 = vmatmul.bf16.gmra.mxu3 %v15449_v33  ;;  %v9754_v33 = vld [vmem:[#allocation2 + $0x44] sm:$0xff]   ;;  %18076 = vst [vmem:[#allocation276_spill] sm:$0xff] %v15739_v62 }
 0x663   : > { %7798 = vmatmul.bf16.gmra.mxu0 %v6085_v24  ;;  %v5762_v23 = vrot.slane %v9754_v33, 1  ;;  %v6088_v24 = vor.u32 %v6086_v21, %v6084_v14 }
 0x664   : > { %v15727_v8 = vpop.f32.mrf.mxu1  ;;  %v15731_v32 = vpop.f32.mrf.mxu2 }
 0x665   : > { %18072 = vst [vmem:[#allocation272_spill] sm:$0xff] %v15727_v8  ;;  %v15737_v48 = vpop.f32.mrf.mxu3  ;;  %v6092_v8 = vrot.slane %v6090_v1, 1  ;;  %v5763_v22 = vsel %vm18077_vm2, %v5760_v37, %v5762_v23  ;;  %v9755_v1 = vld [vmem:[#allocation2 + $0xa8] sm:$0xff] }
 0x666   : > { %18073 = vst [vmem:[#allocation273_spill] sm:$0xff] %v15731_v32  ;;  %v6098_v32 = vshll.u32 %v9755_v1, 16 }
 0x667   : > { %v6093_v36 = vsel %vm18078_vm7, %v6088_v24, %v6092_v8  ;;  %vm18182_vm7 = vmmov %vm18077_vm2 }
 0x669   : > { %v15751_v14 = vpop.f32.mrf.mxu0 }
 0x66c   : > { %v15733_v30 = vpop.f32.mrf.mxu1  ;;  %v15735_v2 = vpop.f32.mrf.mxu2 }
 0x66d   : > { %18074 = vst [vmem:[#allocation274_spill] sm:$0xff] %v15733_v30  ;;  %v15749_v33 = vpop.f32.mrf.mxu3 }
 0x66e   : > { %18075 = vst [vmem:[#allocation275_spill] sm:$0xff] %v15735_v2 }
 0x66f   : > { %7876 = vmatmul.bf16.gmra.mxu1 %v14751_v7  ;;  %v6094_v7 = vshrl.u32 %v9753_v46, 16 }
 0x671   : > { %7497 = vmatmul.bf16.gmra.mxu2 %v5763_v22  ;;  %v6096_v24 = vor.u32 %v6094_v7, %v6092_v8  ;;  %v6100_v22 = vrot.slane %v6098_v32, 1  ;;  %v15763_v46 = vpop.f32.mrf.mxu0  ;;  %v9757_v7 = vld [vmem:[#allocation2 + $0xb0] sm:$0xff] }
 0x672   : > { %7675 = vmatmul.bf16.gmra.mxu3 %v15474_v58  ;;  %v9756_v58 = vld [vmem:[#allocation2 + $0x4c] sm:$0xff]   ;;  %18085 = vst [vmem:[#allocation281_spill] sm:$0xff] %v15763_v46 }
 0x673   : > { %7803 = vmatmul.bf16.gmra.mxu0 %v6093_v36  ;;  %v5764_v62 = vrot.slane %v9756_v58, 1  ;;  %v6106_v58 = vshll.u32 %v9757_v7, 16 }
 0x674   : > { %v15745_v30 = vpop.f32.mrf.mxu1  ;;  %v15747_v2 = vpop.f32.mrf.mxu2 }
 0x675   : > { %18079 = vst [vmem:[#allocation277_spill] sm:$0xff] %v15745_v30  ;;  %v5765_v36 = vsel %vm18083_vm8, %v5762_v23, %v5764_v62  ;;  %v15759_v30 = vpop.f32.mrf.mxu3  ;;  %vm18194_vm8 = vmmov %vm18077_vm2 }
 0x676   : > { %18080 = vst [vmem:[#allocation278_spill] sm:$0xff] %v15747_v2  ;;  %v6101_v2 = vsel %vm18084_vm15, %v6096_v24, %v6100_v22  ;;  %vm18207_vm15 = vmmov %vm18077_vm2 }
 0x679   : > { %v15776_v24 = vpop.f32.mrf.mxu0 }
 0x67c   : > { %v15753_v21 = vpop.f32.mrf.mxu1  ;;  %v15755_v37 = vpop.f32.mrf.mxu2 }
 0x67d   : > { %18081 = vst [vmem:[#allocation279_spill] sm:$0xff] %v15753_v21  ;;  %v15772_v8 = vpop.f32.mrf.mxu3 }
 0x67e   : > { %18082 = vst [vmem:[#allocation280_spill] sm:$0xff] %v15755_v37 }
 0x67f   : > { %7881 = vmatmul.bf16.gmra.mxu1 %v14760_v12  ;;  %v6957_v12 = vadd.f32 %v15174_v57, %v14778_v13  ;;  %v6959_v13 = vadd.f32 %v15187_v51, %v14809_v0  ;;  %v6108_v57 = vrot.slane %v6106_v58, 1  ;;  %v18092_v58 = vld [vmem:[#allocation46_spill] sm:$0xff] }
 0x681   : > { %7502 = vmatmul.bf16.gmra.mxu2 %v5765_v36  ;;  %v7085_v32 = vadd.f32 %v14863_v31, %v6957_v12  ;;  %v15789_v51 = vpop.f32.mrf.mxu0 }
 0x682   : > { %7680 = vmatmul.bf16.gmra.mxu3 %v15505_v40  ;;  %v6102_v40 = vshrl.u32 %v9755_v1, 16 }
 0x683   : > { %7808 = vmatmul.bf16.gmra.mxu0 %v6101_v2  ;;  %v9758_v2 = vld [vmem:[#allocation2 + $0x54] sm:$0xff]   ;;  %v7213_v31 = vadd.f32 %v14852_v28, %v7085_v32  ;;  %v6962_v28 = vadd.f32 %v15207_v49, %v14846_v15 }
 0x684   : > { %v15765_v21 = vpop.f32.mrf.mxu1  ;;  %v15767_v37 = vpop.f32.mrf.mxu2  ;;  %v5766_v46 = vrot.slane %v9758_v2, 1 }
 0x685   : > { %18086 = vst [vmem:[#allocation282_spill] sm:$0xff] %v15765_v21  ;;  %v6104_v21 = vor.u32 %v6102_v40, %v6100_v22  ;;  %v7341_v22 = vadd.f32 %v15182_v35, %v7213_v31  ;;  %v15787_v40 = vpop.f32.mrf.mxu3  ;;  %v9759_v35 = vld [vmem:[#allocation2 + $0xb8] sm:$0xff] }
 0x686   : > { %18087 = vst [vmem:[#allocation283_spill] sm:$0xff] %v15767_v37  ;;  %v5767_v12 = vsel %vm18089_vm5, %v5764_v62, %v5766_v46  ;;  %v18091_v62 = vld [vmem:[#allocation6_spill] sm:$0xff]  ;;  %v6114_v31 = vshll.u32 %v9759_v35, 16  ;;  %vm18219_vm5 = vmmov %vm18077_vm2 }
 0x687   : > { %v6109_v1 = vsel %vm18090_vm6, %v6104_v21, %v6108_v57  ;;  %vm18232_vm6 = vmmov %vm18077_vm2 }
 0x68c   : > { %v15774_v23 = vpop.f32.mrf.mxu1  ;;  %v7073_v36 = vpop.f32.mrf.mxu2 }
 0x68d   : > { %18088 = vst [vmem:[#allocation284_spill] sm:$0xff] %v15774_v23  ;;  %v7087_v36 = vadd.f32 %v14881_v5, %v6959_v13  ;;  %v7090_v5 = vadd.f32 %v18092_v58, %v6962_v28  ;;  %v6116_v28 = vrot.slane %v6114_v31, 1 }
 0x68f   : > { %7886 = vmatmul.bf16.gmra.mxu1 %v14768_v43  ;;  %v7215_v21 = vadd.f32 %v18091_v62, %v7087_v36  ;;  %v18095_v36 = vld [vmem:[#allocation11_spill] sm:$0xff] }
 0x691   : > { %7507 = vmatmul.bf16.gmra.mxu2 %v5767_v12  ;;  %v6110_v12 = vshrl.u32 %v9757_v7, 16 }
 0x692   : > { %7685 = vmatmul.bf16.gmra.mxu3 %v15530_v56 }
 0x693   : > { %7813 = vmatmul.bf16.gmra.mxu0 %v6109_v1  ;;  %v7343_v1 = vadd.f32 %v15203_v55, %v7215_v21  ;;  %v6112_v15 = vor.u32 %v6110_v12, %v6108_v57  ;;  %v15807_v55 = vpop.f32.mrf.mxu0 }
 0x694   : > { %v7457_v2 = vpop.f32.mrf.mxu1  ;;  %v7468_v43 = vpop.f32.mrf.mxu2 }
 0x695   : > { %v7469_v0 = vadd.f32 %v7468_v43, %v7341_v22  ;;  %v9760_v43 = vld [vmem:[#allocation2 + $0x5c] sm:$0xff]   ;;  %v6117_v57 = vsel %vm18098_vm10, %v6112_v15, %v6116_v28  ;;  %vm18259_vm10 = vmmov %vm18077_vm2 }
 0x696   : > { %v5768_v23 = vrot.slane %v9760_v43, 1 }
 0x697   : > { %v7597_v56 = vadd.f32 %v15607_v61, %v7469_v0  ;;  %v18094_v61 = vld [vmem:[#allocation73_spill] sm:$0xff]  ;;  %v15803_v0 = vpop.f32.mrf.mxu3 }
 0x698   : > { %v5769_v21 = vsel %vm18097_vm13, %v5766_v46, %v5768_v23  ;;  %vm18244_vm13 = vmmov %vm18077_vm2 }
 0x699   : > { %v7725_v32 = vadd.f32 %v15609_v29, %v7597_v56  ;;  %v6964_v29 = vadd.f32 %v15226_v60, %v18095_v36  ;;  %v18096_v56 = vld [vmem:[#allocation36_spill] sm:$0xff] }
 0x69a   : > { %v7218_v62 = vadd.f32 %v18096_v56, %v7090_v5  ;;  %v18099_v60 = vld [vmem:[#allocation64_spill] sm:$0xff] }
 0x69b   : > { %v7092_v58 = vadd.f32 %v18099_v60, %v6964_v29  ;;  %v6118_v29 = vshrl.u32 %v9759_v35, 16  ;;  %v18107_v35 = vld [vmem:[#allocation19_spill] sm:$0xff] }
 0x69c   : > { %v7852_v13 = vpop.f32.mrf.mxu1  ;;  %v7470_v22 = vpop.f32.mrf.mxu2  ;;  %v7346_v12 = vadd.f32 %v15221_v41, %v7218_v62 }
 0x69d   : > { %v15798_v2 = vadd.f32 %v7852_v13, %v7725_v32  ;;  %v7471_v49 = vadd.f32 %v7470_v22, %v7343_v1  ;;  %v18101_v1 = vld [vmem:[#allocation13_spill] sm:$0xff]  ;;  %v18102_v22 = vld [vmem:[#allocation50_spill] sm:$0xff] }
 0x69e   : > { %v6967_v46 = vadd.f32 %v15240_v39, %v18101_v1  ;;  %v7220_v43 = vadd.f32 %v18102_v22, %v7092_v58  ;;  %v18105_v58 = vld [vmem:[#allocation75_spill] sm:$0xff] }
 0x69f   : > { %18093 = vst [vmem:[#allocation6_spill] sm:$0xff] %v15798_v2  ;;  %7891 = vmatmul.bf16.gmra.mxu1 %v18094_v61  ;;  %v7599_v7 = vadd.f32 %v15619_v63, %v7471_v49  ;;  %v15821_v15 = vpop.f32.mrf.mxu3  ;;  %v15824_v49 = vpop.f32.mrf.mxu0  ;;  %v18103_v61 = vld [vmem:[#allocation3_spill] sm:$0xff] }
 0x6a0   : > { %v7095_v36 = vadd.f32 %v18103_v61, %v6967_v46  ;;  %v7348_v62 = vadd.f32 %v15236_v16, %v7220_v43  ;;  %v9763_v16 = vld [vmem:[#allocation2 + $0xb8] sm:$0xff]  }
 0x6a1   : > { %v7727_v32 = vadd.f32 %v15621_v38, %v7599_v7  ;;  %7512 = vmatmul.bf16.gmra.mxu2 %v5769_v21  ;;  %v9761_v7 = vld [vmem:[#allocation2 + $0xc0] sm:$0xff] }
 0x6a2   : > { %7690 = vmatmul.bf16.gmra.mxu3 %v15555_v47  ;;  %v6122_v56 = vshll.u32 %v9761_v7, 16 }
 0x6a3   : > { %7818 = vmatmul.bf16.gmra.mxu0 %v6117_v57 }
 0x6a4   : > { %v7854_v13 = vpop.f32.mrf.mxu1  ;;  %v7473_v5 = vpop.f32.mrf.mxu2 }
 0x6a5   : > { %v15815_v63 = vadd.f32 %v7854_v13, %v7727_v32  ;;  %v7474_v31 = vadd.f32 %v7473_v5, %v7346_v12  ;;  %v6120_v32 = vor.u32 %v6118_v29, %v6116_v28  ;;  %v6124_v12 = vrot.slane %v6122_v56, 1  ;;  %v18112_v56 = vld [vmem:[#allocation86_spill] sm:$0xff] }
 0x6a7   : > { %18100 = vst [vmem:[#allocation46_spill] sm:$0xff] %v15815_v63  ;;  %v7602_v47 = vadd.f32 %v15631_v27, %v7474_v31  ;;  %v9762_v27 = vld [vmem:[#allocation2 + $0x64] sm:$0xff]   ;;  %v7223_v31 = vadd.f32 %v18107_v35, %v7095_v36  ;;  %v6125_v46 = vsel %vm18109_vm1, %v6120_v32, %v6124_v12  ;;  %v15839_v22 = vpop.f32.mrf.mxu3  ;;  %v18110_v36 = vld [vmem:[#allocation58_spill] sm:$0xff] }
 0x6a8   : > { %v5770_v57 = vrot.slane %v9762_v27, 1 }
 0x6a9   : > { %v7730_v38 = vadd.f32 %v15635_v54, %v7602_v47  ;;  %v18106_v54 = vld [vmem:[#allocation40_spill] sm:$0xff]  ;;  %v7351_v43 = vadd.f32 %v15250_v9, %v7223_v31  ;;  %v9764_v9 = vld [vmem:[#allocation2 + $0xc8] sm:$0xff] }
 0x6aa   : > { %v6969_v13 = vadd.f32 %v15256_v59, %v18106_v54  ;;  %v5771_v1 = vsel %vm18108_vm9, %v5768_v23, %v5770_v57  ;;  %v18114_v54 = vld [vmem:[#allocation159_spill] sm:$0xff]  ;;  %v9765_v31 = vld [vmem:[#allocation2 + $0x6c] sm:$0xff]   ;;  %vm18271_vm9 = vmmov %vm18077_vm2 }
 0x6ac   : > { %v7857_v41 = vpop.f32.mrf.mxu1  ;;  %v7475_v39 = vpop.f32.mrf.mxu2  ;;  %v7097_v28 = vadd.f32 %v14945_v10, %v6969_v13 }
 0x6ad   : > { %v15828_v21 = vadd.f32 %v7857_v41, %v7730_v38  ;;  %v7476_v60 = vadd.f32 %v7475_v39, %v7348_v62  ;;  %v18111_v41 = vld [vmem:[#allocation161_spill] sm:$0xff]  ;;  %v18113_v39 = vld [vmem:[#allocation91_spill] sm:$0xff] }
 0x6ae   : > { %v6972_v29 = vadd.f32 %v18111_v41, %v18110_v36  ;;  %v7225_v62 = vadd.f32 %v18112_v56, %v7097_v28  ;;  %v18116_v28 = vld [vmem:[#allocation70_spill] sm:$0xff]  ;;  %v18121_v56 = vld [vmem:[#allocation95_spill] sm:$0xff] }
 0x6af   : > { %18104 = vst [vmem:[#allocation73_spill] sm:$0xff] %v15828_v21  ;;  %7896 = vmatmul.bf16.gmra.mxu1 %v18105_v58  ;;  %v7604_v5 = vadd.f32 %v15643_v42, %v7476_v60  ;;  %v15842_v42 = vpop.f32.mrf.mxu0  ;;  %v6126_v60 = vshrl.u32 %v9761_v7, 16  ;;  %v6130_v58 = vshll.u32 %v9764_v9, 16 }
 0x6b0   : > { %v7100_v27 = vadd.f32 %v18113_v39, %v6972_v29  ;;  %v7353_v13 = vadd.f32 %v18114_v54, %v7225_v62  ;;  %v9766_v29 = vld [vmem:[#allocation2 + $0xc0] sm:$0xff]   ;;  %v18122_v39 = vld [vmem:[#allocation163_spill] sm:$0xff] }
 0x6b1   : > { %v7732_v47 = vadd.f32 %v15648_v4, %v7604_v5  ;;  %7517 = vmatmul.bf16.gmra.mxu2 %v5771_v1  ;;  %v5772_v1 = vrot.slane %v9765_v31, 1 }
 0x6b2   : > { %7695 = vmatmul.bf16.gmra.mxu3 %v9763_v16  ;;  %v15855_v16 = vpop.f32.mrf.mxu3 }
 0x6b3   : > { %7823 = vmatmul.bf16.gmra.mxu0 %v6125_v46  ;;  %v5773_v41 = vsel %vm18119_vm3, %v5770_v57, %v5772_v1  ;;  %v18123_v57 = vld [vmem:[#allocation87_spill] sm:$0xff] }
 0x6b4   : > { %v7859_v59 = vpop.f32.mrf.mxu1  ;;  %v7478_v23 = vpop.f32.mrf.mxu2 }
 0x6b5   : > { %v15844_v38 = vadd.f32 %v7859_v59, %v7732_v47  ;;  %v7479_v61 = vadd.f32 %v7478_v23, %v7351_v43  ;;  %v18117_v59 = vld [vmem:[#allocation165_spill] sm:$0xff]  ;;  %v6132_v43 = vrot.slane %v6130_v58, 1  ;;  %v9034_v58 = vld [vmem:[#allocation2 + $0xd0] sm:$0x10] }
 0x6b6   : > { %v6974_v7 = vadd.f32 %v18117_v59, %v18116_v28 }
 0x6b7   : > { %v7607_v4 = vadd.f32 %v15657_v53, %v7479_v61  ;;  %v6128_v53 = vor.u32 %v6126_v60, %v6124_v12  ;;  %v15857_v47 = vpop.f32.mrf.mxu0  ;;  %v18118_v61 = vld [vmem:[#allocation89_spill] sm:$0xff]  ;;  %v8714_v60 = vld [vmem:[#allocation2 + $0xd0] sm:$0xf] }
 0x6b8   : > { %v7228_v36 = vadd.f32 %v18118_v61, %v7100_v27  ;;  %v7102_v62 = vadd.f32 %v18121_v56, %v6974_v7 }
 0x6b9   : > { %v7735_v10 = vadd.f32 %v15659_v50, %v7607_v4  ;;  %v18115_v50 = vld [vmem:[#allocation80_spill] sm:$0xff]  ;;  %v6133_v4 = vsel %vm18120_vm4, %v6128_v53, %v6132_v43  ;;  %v15875_v53 = vor.u32 %v9034_v58, %v8714_v60  ;;  %v18128_v60 = vld [vmem:[#allocation30_spill] sm:$0xff] }
 0x6ba   : > { %v15873_v31 = vpop.f32.mrf.mxu3  ;;  %v18129_v58 = vld [vmem:[#allocation90_spill] sm:$0xff] }
 0x6bb   : > { %v6138_v59 = vshll.u32 %v15875_v53, 16 }
 0x6bc   : > { %v7862_v32 = vpop.f32.mrf.mxu1  ;;  %v7480_v35 = vpop.f32.mrf.mxu2 }
 0x6bd   : > { %v15853_v5 = vadd.f32 %v7862_v32, %v7735_v10  ;;  %v7481_v46 = vadd.f32 %v7480_v35, %v7353_v13  ;;  %v7356_v32 = vadd.f32 %v18122_v39, %v7228_v36  ;;  %v18124_v13 = vld [vmem:[#allocation169_spill] sm:$0xff] }
 0x6be   : > { %v6977_v35 = vadd.f32 %v18124_v13, %v18123_v57 }
 0x6bf   : > { %7901 = vmatmul.bf16.gmra.mxu1 %v18115_v50  ;;  %v7609_v23 = vadd.f32 %v15667_v52, %v7481_v46  ;;  %v18125_v46 = vld [vmem:[#allocation93_spill] sm:$0xff]  ;;  %v15879_v28 = vpop.f32.mrf.mxu0 }
 0x6c0   : > { %v7230_v50 = vadd.f32 %v18125_v46, %v7102_v62 }
 0x6c1   : > { %v7737_v12 = vadd.f32 %v15671_v25, %v7609_v23  ;;  %7522 = vmatmul.bf16.gmra.mxu2 %v5773_v41  ;;  %v18126_v23 = vld [vmem:[#allocation99_spill] sm:$0xff]  ;;  %v6134_v41 = vshrl.u32 %v9764_v9, 16  ;;  %v18131_v9 = vld [vmem:[#allocation97_spill] sm:$0xff] }
 0x6c2   : > { %7700 = vmatmul.bf16.gmra.mxu3 %v9766_v29  ;;  %v7105_v61 = vadd.f32 %v18126_v23, %v6977_v35  ;;  %v18127_v29 = vld [vmem:[#allocation167_spill] sm:$0xff] }
 0x6c3   : > { %7828 = vmatmul.bf16.gmra.mxu0 %v6133_v4  ;;  %v7358_v4 = vadd.f32 %v18127_v29, %v7230_v50  ;;  %v18135_v29 = vld [vmem:[#allocation94_spill] sm:$0xff] }
 0x6c4   : > { %v7864_v10 = vpop.f32.mrf.mxu1  ;;  %v7483_v27 = vpop.f32.mrf.mxu2  ;;  %v7233_v13 = vadd.f32 %v18131_v9, %v7105_v61 }
 0x6c5   : > { %v15869_v52 = vadd.f32 %v7864_v10, %v7737_v12  ;;  %v7484_v54 = vadd.f32 %v7483_v27, %v7356_v32  ;;  %v9767_v10 = vld [vmem:[#allocation2 + $0x74] sm:$0xff]   ;;  %v15887_v32 = vrot.slane %v6138_v59, 1  ;;  %v18130_v27 = vld [vmem:[#allocation173_spill] sm:$0xff] }
 0x6c6   : > { %v5774_v39 = vrot.slane %v9767_v10, 1  ;;  %v18133_v59 = vld [vmem:[#allocation103_spill] sm:$0xff] }
 0x6c7   : > { %v7612_v25 = vadd.f32 %v15677_v17, %v7484_v54  ;;  %v6136_v17 = vor.u32 %v6134_v41, %v6132_v43  ;;  %v9011_v54 = vld [vmem:[#allocation2 + $0xc8] sm:$0xff]  ;;  %v15900_v50 = vpop.f32.mrf.mxu0 }
 0x6c8   : > { %v5775_v35 = vsel %vm18132_vm11, %v5772_v1, %v5774_v39 }
 0x6c9   : > { %v7740_v7 = vadd.f32 %v15681_v34, %v7612_v25  ;;  %v6979_v34 = vadd.f32 %v18130_v27, %v18129_v58  ;;  %v15895_v25 = vpop.f32.mrf.mxu3  ;;  %v6141_v43 = vsel %vm17904_vm0, %v6136_v17, %v15887_v32  ;;  %v18137_v17 = vld [vmem:[#allocation101_spill] sm:$0xff] }
 0x6cc   : > { %v7867_v36 = vpop.f32.mrf.mxu1  ;;  %v7485_v56 = vpop.f32.mrf.mxu2 }
 0x6cd   : > { %v15885_v12 = vadd.f32 %v7867_v36, %v7740_v7  ;;  %v7486_v62 = vadd.f32 %v7485_v56, %v7358_v4  ;;  %v7107_v7 = vadd.f32 %v18133_v59, %v6979_v34  ;;  %v18136_v4 = vld [vmem:[#allocation177_spill] sm:$0xff]  ;;  %v18139_v34 = vld [vmem:[#allocation175_spill] sm:$0xff]  ;;  %v18141_v59 = vld [vmem:[#allocation98_spill] sm:$0xff] }
 0x6ce   : > { %v6982_v56 = vadd.f32 %v18136_v4, %v18135_v29  ;;  %v18145_v4 = vld [vmem:[#allocation179_spill] sm:$0xff] }
 0x6cf   : > { %7906 = vmatmul.bf16.gmra.mxu1 %v18128_v60  ;;  %v7614_v57 = vadd.f32 %v15693_v19, %v7486_v62  ;;  %v18134_v19 = vld [vmem:[#allocation171_spill] sm:$0xff] }
 0x6d0   : > { %v7361_v36 = vadd.f32 %v18134_v19, %v7233_v13  ;;  %v18138_v60 = vld [vmem:[#allocation107_spill] sm:$0xff] }
 0x6d1   : > { %v7742_v46 = vadd.f32 %v15695_v26, %v7614_v57  ;;  %7527 = vmatmul.bf16.gmra.mxu2 %v5775_v35  ;;  %v7235_v26 = vadd.f32 %v18137_v17, %v7107_v7  ;;  %v7110_v58 = vadd.f32 %v18138_v60, %v6982_v56  ;;  %v9768_v13 = vld [vmem:[#allocation2 + $0x7c] sm:$0xff]  }
 0x6d2   : > { %7705 = vmatmul.bf16.gmra.mxu3 %v9011_v54  ;;  %v5776_v35 = vrot.slane %v9768_v13, 1 }
 0x6d3   : > { %7833 = vmatmul.bf16.gmra.mxu0 %v6141_v43  ;;  %v7363_v54 = vadd.f32 %v18139_v34, %v7235_v26 }
 0x6d4   : > { %v7869_v23 = vpop.f32.mrf.mxu1  ;;  %v7488_v1 = vpop.f32.mrf.mxu2  ;;  %v5777_v19 = vsel %vm18143_vm12, %v5774_v39, %v5776_v35 }
 0x6d5   : > { %v15904_v61 = vadd.f32 %v7869_v23, %v7742_v46  ;;  %v7489_v41 = vadd.f32 %v7488_v1, %v7361_v36  ;;  %v18140_v46 = vld [vmem:[#allocation34_spill] sm:$0xff]  ;;  %v18142_v23 = vld [vmem:[#allocation105_spill] sm:$0xff]  ;;  %v18144_v1 = vld [vmem:[#allocation111_spill] sm:$0xff] }
 0x6d7   : > { %v7617_v10 = vadd.f32 %v15702_v20, %v7489_v41  ;;  %v6984_v20 = vadd.f32 %v15375_v18, %v18141_v59  ;;  %v18147_v18 = vld [vmem:[#allocation184_spill] sm:$0xff] }
 0x6d8   : > { %v9769_v59 = vld [vmem:[#allocation2 + $0x84] sm:$0xff]  }
 0x6d9   : > { %v7745_v62 = vadd.f32 %v15704_v11, %v7617_v10  ;;  %v7238_v11 = vadd.f32 %v18142_v23, %v7110_v58  ;;  %v7112_v41 = vadd.f32 %v18144_v1, %v6984_v20  ;;  %v18148_v58 = vld [vmem:[#allocation109_spill] sm:$0xff]  ;;  %v5778_v20 = vrot.slane %v9769_v59, 1  ;;  %v18152_v23 = vld [vmem:[#allocation38_spill] sm:$0xff] }
 0x6da   : > { %v18155_v1 = vld [vmem:[#allocation113_spill] sm:$0xff]  ;;  %v18164_v59 = vld [vmem:[#allocation190_spill] sm:$0xff] }
 0x6db   : > { %v7366_v56 = vadd.f32 %v18145_v4, %v7238_v11  ;;  %v18153_v11 = vld [vmem:[#allocation106_spill] sm:$0xff] }
 0x6dc   : > { %v7872_v27 = vpop.f32.mrf.mxu1  ;;  %v7490_v9 = vpop.f32.mrf.mxu2 }
 0x6dd   : > { %v15913_v57 = vadd.f32 %v7872_v27, %v7745_v62  ;;  %v7491_v43 = vadd.f32 %v7490_v9, %v7363_v54  ;;  %v18146_v62 = vld [vmem:[#allocation102_spill] sm:$0xff]  ;;  %v7240_v27 = vadd.f32 %v18148_v58, %v7112_v41  ;;  %v5779_v41 = vsel %vm18156_vm14, %v5776_v35, %v5778_v20 }
 0x6de   : > { %v6987_v60 = vadd.f32 %v18147_v18, %v18146_v62  ;;  %v18150_v9 = vld [vmem:[#allocation182_spill] sm:$0xff] }
 0x6df   : > { %7911 = vmatmul.bf16.gmra.mxu1 %v18140_v46  ;;  %v7619_v7 = vadd.f32 %v15713_v45, %v7491_v43  ;;  %v7368_v13 = vadd.f32 %v18150_v9, %v7240_v27  ;;  %v18159_v62 = vld [vmem:[#allocation186_spill] sm:$0xff]  ;;  %v18163_v9 = vld [vmem:[#allocation123_spill] sm:$0xff] }
 0x6e0   : > { %v18160_v27 = vld [vmem:[#allocation110_spill] sm:$0xff] }
 0x6e1   : > { %v7747_v36 = vadd.f32 %v15715_v3, %v7619_v7  ;;  %7532 = vmatmul.bf16.gmra.mxu2 %v5777_v19  ;;  %v18149_v3 = vld [vmem:[#allocation115_spill] sm:$0xff]  ;;  %v18154_v19 = vld [vmem:[#allocation188_spill] sm:$0xff] }
 0x6e2   : > { %v7115_v34 = vadd.f32 %v18149_v3, %v6987_v60 }
 0x6e4   : > { %v7874_v29 = vpop.f32.mrf.mxu1  ;;  %v7493_v17 = vpop.f32.mrf.mxu2 }
 0x6e5   : > { %v15924_v10 = vadd.f32 %v7874_v29, %v7747_v36  ;;  %v7494_v26 = vadd.f32 %v7493_v17, %v7366_v56  ;;  %v18157_v29 = vld [vmem:[#allocation276_spill] sm:$0xff]  ;;  %v18158_v56 = vld [vmem:[#allocation119_spill] sm:$0xff] }
 0x6e7   : > { %v7622_v45 = vadd.f32 %v15725_v6, %v7494_v26  ;;  %v6989_v6 = vadd.f32 %v18154_v19, %v18153_v11  ;;  %v9770_v19 = vld [vmem:[#allocation2 + $0x8c] sm:$0xff]  }
 0x6e9   : > { %v7750_v39 = vadd.f32 %v15729_v44, %v7622_v45  ;;  %v7243_v44 = vadd.f32 %v18155_v1, %v7115_v34  ;;  %v7117_v17 = vadd.f32 %v18158_v56, %v6989_v6  ;;  %v18162_v34 = vld [vmem:[#allocation117_spill] sm:$0xff]  ;;  %v5780_v6 = vrot.slane %v9770_v19, 1 }
 0x6ea   : > { %v18165_v1 = vld [vmem:[#allocation41_spill] sm:$0xff] }
 0x6eb   : > { %v7371_v18 = vadd.f32 %v18159_v62, %v7243_v44  ;;  %v18166_v44 = vld [vmem:[#allocation114_spill] sm:$0xff]  ;;  %v5781_v56 = vsel %vm18077_vm2, %v5778_v20, %v5780_v6  ;;  %v18170_v62 = vld [vmem:[#allocation127_spill] sm:$0xff] }
 0x6ec   : > { %v7877_v54 = vpop.f32.mrf.mxu1  ;;  %v7495_v46 = vpop.f32.mrf.mxu2 }
 0x6ed   : > { %v15933_v43 = vadd.f32 %v7877_v54, %v7750_v39  ;;  %v7496_v7 = vadd.f32 %v7495_v46, %v7368_v13  ;;  %v18161_v39 = vld [vmem:[#allocation192_spill] sm:$0xff]  ;;  %v7245_v54 = vadd.f32 %v18162_v34, %v7117_v17  ;;  %v18169_v17 = vld [vmem:[#allocation281_spill] sm:$0xff]  ;;  %v18172_v34 = vld [vmem:[#allocation118_spill] sm:$0xff] }
 0x6ee   : > { %v6992_v3 = vadd.f32 %v18161_v39, %v18160_v27 }
 0x6ef   : > { %18151 = vst [vmem:[#allocation11_spill] sm:$0xff] %v15933_v43  ;;  %7916 = vmatmul.bf16.gmra.mxu1 %v18152_v23  ;;  %v7624_v36 = vadd.f32 %v15737_v48, %v7496_v7  ;;  %v7373_v7 = vadd.f32 %v18164_v59, %v7245_v54  ;;  %v18173_v54 = vld [vmem:[#allocation200_spill] sm:$0xff] }
 0x6f0   : > { %v7120_v13 = vadd.f32 %v18163_v9, %v6992_v3  ;;  %v18174_v9 = vld [vmem:[#allocation125_spill] sm:$0xff] }
 0x6f1   : > { %v7752_v4 = vadd.f32 %v18157_v29, %v7624_v36  ;;  %7537 = vmatmul.bf16.gmra.mxu2 %v5779_v41  ;;  %v18167_v41 = vld [vmem:[#allocation196_spill] sm:$0xff] }
 0x6f4   : > { %v7879_v26 = vpop.f32.mrf.mxu1  ;;  %v7498_v45 = vpop.f32.mrf.mxu2 }
 0x6f5   : > { %v15944_v60 = vadd.f32 %v7879_v26, %v7752_v4  ;;  %v7499_v58 = vadd.f32 %v7498_v45, %v7371_v18  ;;  %v18168_v4 = vld [vmem:[#allocation121_spill] sm:$0xff] }
 0x6f7   : > { %v7627_v48 = vadd.f32 %v15749_v33, %v7499_v58  ;;  %v6994_v33 = vadd.f32 %v18167_v41, %v18166_v44  ;;  %v18171_v58 = vld [vmem:[#allocation194_spill] sm:$0xff] }
 0x6f8   : > { %v9771_v44 = vld [vmem:[#allocation2 + $0x94] sm:$0xff]  }
 0x6f9   : > { %v7755_v35 = vadd.f32 %v15751_v14, %v7627_v48  ;;  %v7248_v14 = vadd.f32 %v18168_v4, %v7120_v13  ;;  %v7122_v18 = vadd.f32 %v18170_v62, %v6994_v33  ;;  %v5782_v41 = vrot.slane %v9771_v44, 1  ;;  %v15975_v33 = vpop.f32.mrf.mxu3  ;;  %v15977_v4 = vpop.f32.mrf.mxu0  ;;  %v18189_v44 = vld [vmem:[#allocation206_spill] sm:$0xff] }
 0x6fb   : > { %v7376_v27 = vadd.f32 %v18171_v58, %v7248_v14  ;;  %v7250_v13 = vadd.f32 %v18174_v9, %v7122_v18  ;;  %v18179_v14 = vld [vmem:[#allocation122_spill] sm:$0xff]  ;;  %v5783_v18 = vsel %vm18182_vm7, %v5780_v6, %v5782_v41  ;;  %v18183_v58 = vld [vmem:[#allocation135_spill] sm:$0xff]  ;;  %v18187_v6 = vld [vmem:[#allocation133_spill] sm:$0xff] }
 0x6fc   : > { %v7882_v46 = vpop.f32.mrf.mxu1  ;;  %v7500_v11 = vpop.f32.mrf.mxu2  ;;  %v18185_v9 = vld [vmem:[#allocation126_spill] sm:$0xff] }
 0x6fd   : > { %v15953_v23 = vadd.f32 %v7882_v46, %v7755_v35  ;;  %v7501_v36 = vadd.f32 %v7500_v11, %v7373_v7  ;;  %v6997_v35 = vadd.f32 %v18173_v54, %v18172_v34  ;;  %v18175_v46 = vld [vmem:[#allocation131_spill] sm:$0xff]  ;;  %v18176_v11 = vld [vmem:[#allocation198_spill] sm:$0xff] }
 0x6fe   : > { %v7378_v19 = vadd.f32 %v18176_v11, %v7250_v13  ;;  %v18186_v13 = vld [vmem:[#allocation208_spill] sm:$0xff]  ;;  %v18188_v11 = vld [vmem:[#allocation139_spill] sm:$0xff] }
 0x6ff   : > { %7921 = vmatmul.bf16.gmra.mxu1 %v18165_v1  ;;  %v7629_v29 = vadd.f32 %v15759_v30, %v7501_v36  ;;  %v7125_v59 = vadd.f32 %v18175_v46, %v6997_v35 }
 0x701   : > { %v7757_v26 = vadd.f32 %v18169_v17, %v7629_v29  ;;  %7542 = vmatmul.bf16.gmra.mxu2 %v5781_v56  ;;  %v18180_v56 = vld [vmem:[#allocation204_spill] sm:$0xff] }
 0x704   : > { %v7884_v45 = vpop.f32.mrf.mxu1  ;;  %v7503_v3 = vpop.f32.mrf.mxu2 }
 0x705   : > { %v15964_v39 = vadd.f32 %v7884_v45, %v7757_v26  ;;  %v7504_v48 = vadd.f32 %v7503_v3, %v7376_v27  ;;  %v18181_v26 = vld [vmem:[#allocation129_spill] sm:$0xff] }
 0x706   : > { %v7253_v62 = vadd.f32 %v18181_v26, %v7125_v59  ;;  %v18190_v26 = vld [vmem:[#allocation55_spill] sm:$0xff] }
 0x707   : > { %v7632_v30 = vadd.f32 %v15772_v8, %v7504_v48  ;;  %v18178_v8 = vld [vmem:[#allocation51_spill] sm:$0xff]  ;;  %v18184_v48 = vld [vmem:[#allocation202_spill] sm:$0xff] }
 0x708   : > { %v7381_v34 = vadd.f32 %v18184_v48, %v7253_v62  ;;  %v18192_v62 = vld [vmem:[#allocation212_spill] sm:$0xff] }
 0x709   : > { %v7760_v20 = vadd.f32 %v15776_v24, %v7632_v30  ;;  %v6999_v24 = vadd.f32 %v18180_v56, %v18179_v14  ;;  %v9772_v56 = vld [vmem:[#allocation2 + $0x9c] sm:$0xff]  }
 0x70b   : > { %v7127_v27 = vadd.f32 %v18183_v58, %v6999_v24  ;;  %v5784_v24 = vrot.slane %v9772_v56, 1  ;;  %v18193_v58 = vld [vmem:[#allocation137_spill] sm:$0xff] }
 0x70c   : > { %v7887_v7 = vpop.f32.mrf.mxu1  ;;  %v7505_v1 = vpop.f32.mrf.mxu2 }
 0x70d   : > { %v15973_v36 = vadd.f32 %v7887_v7, %v7760_v20  ;;  %v7506_v29 = vadd.f32 %v7505_v1, %v7378_v19  ;;  %v7002_v20 = vadd.f32 %v18186_v13, %v18185_v9  ;;  %v7255_v59 = vadd.f32 %v18187_v6, %v7127_v27  ;;  %v18196_v13 = vld [vmem:[#allocation210_spill] sm:$0xff] }
 0x70e   : > { %v5785_v27 = vsel %vm18194_vm8, %v5782_v41, %v5784_v24 }
 0x70f   : > { %18177 = vst [vmem:[#allocation36_spill] sm:$0xff] %v15973_v36  ;;  %7926 = vmatmul.bf16.gmra.mxu1 %v18178_v8  ;;  %v7634_v17 = vadd.f32 %v15787_v40, %v7506_v29  ;;  %v15992_v40 = vpop.f32.mrf.mxu3  ;;  %v7130_v19 = vadd.f32 %v18188_v11, %v7002_v20  ;;  %v7383_v29 = vadd.f32 %v18189_v44, %v7255_v59  ;;  %v18197_v59 = vld [vmem:[#allocation134_spill] sm:$0xff] }
 0x710   : > { %v18200_v44 = vld [vmem:[#allocation146_spill] sm:$0xff] }
 0x711   : > { %v7762_v45 = vadd.f32 %v15789_v51, %v7634_v17  ;;  %7547 = vmatmul.bf16.gmra.mxu2 %v5783_v18  ;;  %v15996_v51 = vpop.f32.mrf.mxu0 }
 0x714   : > { %v7889_v3 = vpop.f32.mrf.mxu1  ;;  %v7508_v35 = vpop.f32.mrf.mxu2 }
 0x715   : > { %v15988_v54 = vadd.f32 %v7889_v3, %v7762_v45  ;;  %v7509_v30 = vadd.f32 %v7508_v35, %v7381_v34  ;;  %v18195_v35 = vld [vmem:[#allocation143_spill] sm:$0xff] }
 0x717   : > { %v7637_v46 = vadd.f32 %v15803_v0, %v7509_v30  ;;  %v18191_v0 = vld [vmem:[#allocation130_spill] sm:$0xff]  ;;  %v16009_v3 = vpop.f32.mrf.mxu3 }
 0x718   : > { %v7004_v18 = vadd.f32 %v18192_v62, %v18191_v0 }
 0x719   : > { %v7765_v7 = vadd.f32 %v15807_v55, %v7637_v46  ;;  %v7258_v55 = vadd.f32 %v18193_v58, %v7130_v19  ;;  %v16012_v34 = vpop.f32.mrf.mxu0  ;;  %v18199_v19 = vld [vmem:[#allocation141_spill] sm:$0xff] }
 0x71a   : > { %v7132_v30 = vadd.f32 %v18195_v35, %v7004_v18 }
 0x71b   : > { %v7386_v20 = vadd.f32 %v18196_v13, %v7258_v55 }
 0x71c   : > { %v7892_v1 = vpop.f32.mrf.mxu1  ;;  %v7510_v14 = vpop.f32.mrf.mxu2 }
 0x71d   : > { %v16001_v8 = vadd.f32 %v7892_v1, %v7765_v7  ;;  %v7511_v17 = vadd.f32 %v7510_v14, %v7383_v29  ;;  %v18198_v7 = vld [vmem:[#allocation216_spill] sm:$0xff]  ;;  %v7260_v1 = vadd.f32 %v18199_v19, %v7132_v30 }
 0x71e   : > { %v7007_v11 = vadd.f32 %v18198_v7, %v18197_v59  ;;  %v18206_v30 = vld [vmem:[#allocation144_spill] sm:$0xff]  ;;  %v18209_v7 = vld [vmem:[#allocation218_spill] sm:$0xff] }
 0x71f   : > { %7931 = vmatmul.bf16.gmra.mxu1 %v18190_v26  ;;  %v7639_v45 = vadd.f32 %v15821_v15, %v7511_v17  ;;  %v16024_v14 = vpop.f32.mrf.mxu3  ;;  %v18201_v17 = vld [vmem:[#allocation214_spill] sm:$0xff] }
 0x720   : > { %v7135_v29 = vadd.f32 %v18200_v44, %v7007_v11  ;;  %v7388_v26 = vadd.f32 %v18201_v17, %v7260_v1 }
 0x721   : > { %v7767_v48 = vadd.f32 %v15824_v49, %v7639_v45  ;;  %7552 = vmatmul.bf16.gmra.mxu2 %v5785_v27  ;;  %v16027_v0 = vpop.f32.mrf.mxu0  ;;  %v9773_v45 = vld [vmem:[#allocation2 + $0xa4] sm:$0xff]   ;;  %v18204_v27 = vld [vmem:[#allocation138_spill] sm:$0xff] }
 0x722   : > { %v5786_v58 = vrot.slane %v9773_v45, 1 }
 0x724   : > { %v7894_v9 = vpop.f32.mrf.mxu1  ;;  %v7513_v6 = vpop.f32.mrf.mxu2  ;;  %v5787_v13 = vsel %vm18207_vm15, %v5784_v24, %v5786_v58 }
 0x725   : > { %v16016_v46 = vadd.f32 %v7894_v9, %v7767_v48  ;;  %v7514_v15 = vadd.f32 %v7513_v6, %v7386_v20  ;;  %v18205_v48 = vld [vmem:[#allocation220_spill] sm:$0xff]  ;;  %v7263_v9 = vadd.f32 %v18206_v30, %v7135_v29 }
 0x726   : > { %v18208_v6 = vld [vmem:[#allocation148_spill] sm:$0xff] }
 0x727   : > { %v7642_v41 = vadd.f32 %v15839_v22, %v7514_v15  ;;  %v18203_v22 = vld [vmem:[#allocation61_spill] sm:$0xff]  ;;  %v7391_v11 = vadd.f32 %v18209_v7, %v7263_v9  ;;  %v16042_v1 = vpop.f32.mrf.mxu3  ;;  %v18211_v29 = vld [vmem:[#allocation224_spill] sm:$0xff] }
 0x729   : > { %v7770_v49 = vadd.f32 %v15842_v42, %v7642_v41  ;;  %v7009_v42 = vadd.f32 %v18205_v48, %v18204_v27  ;;  %v16044_v44 = vpop.f32.mrf.mxu0 }
 0x72b   : > { %v7137_v15 = vadd.f32 %v18208_v6, %v7009_v42  ;;  %v18217_v6 = vld [vmem:[#allocation228_spill] sm:$0xff] }
 0x72c   : > { %v7897_v56 = vpop.f32.mrf.mxu1  ;;  %v7515_v18 = vpop.f32.mrf.mxu2 }
 0x72d   : > { %v16029_v62 = vadd.f32 %v7897_v56, %v7770_v49  ;;  %v7516_v55 = vadd.f32 %v7515_v18, %v7388_v26  ;;  %v18213_v18 = vld [vmem:[#allocation150_spill] sm:$0xff] }
 0x72f   : > { %18202 = vst [vmem:[#allocation64_spill] sm:$0xff] %v16029_v62  ;;  %7936 = vmatmul.bf16.gmra.mxu1 %v18203_v22  ;;  %v7644_v35 = vadd.f32 %v15855_v16, %v7516_v55  ;;  %v18210_v16 = vld [vmem:[#allocation142_spill] sm:$0xff] }
 0x730   : > { %v7012_v56 = vadd.f32 %v18211_v29, %v18210_v16  ;;  %v18214_v22 = vld [vmem:[#allocation222_spill] sm:$0xff]  ;;  %v18220_v16 = vld [vmem:[#allocation152_spill] sm:$0xff] }
 0x731   : > { %v7772_v20 = vadd.f32 %v15857_v47, %v7644_v35  ;;  %7557 = vmatmul.bf16.gmra.mxu2 %v5787_v13  ;;  %v18212_v47 = vld [vmem:[#allocation147_spill] sm:$0xff]  ;;  %v9774_v35 = vld [vmem:[#allocation2 + $0xac] sm:$0xff]  }
 0x732   : > { %v7265_v17 = vadd.f32 %v18212_v47, %v7137_v15  ;;  %v7140_v45 = vadd.f32 %v18213_v18, %v7012_v56  ;;  %v5788_v30 = vrot.slane %v9774_v35, 1  ;;  %v18215_v13 = vld [vmem:[#allocation17_spill] sm:$0xff] }
 0x733   : > { %v18218_v15 = vld [vmem:[#allocation149_spill] sm:$0xff] }
 0x734   : > { %v7899_v59 = vpop.f32.mrf.mxu1  ;;  %v7518_v19 = vpop.f32.mrf.mxu2  ;;  %v7393_v27 = vadd.f32 %v18214_v22, %v7265_v17  ;;  %v7268_v7 = vadd.f32 %v18218_v15, %v7140_v45 }
 0x735   : > { %v16040_v41 = vadd.f32 %v7899_v59, %v7772_v20  ;;  %v7519_v49 = vadd.f32 %v7518_v19, %v7391_v11  ;;  %v18216_v20 = vld [vmem:[#allocation145_spill] sm:$0xff]  ;;  %v16058_v59 = vpop.f32.mrf.mxu3  ;;  %v16062_v11 = vpop.f32.mrf.mxu0  ;;  %v5789_v19 = vsel %vm18219_vm5, %v5786_v58, %v5788_v30 }
 0x737   : > { %v7647_v24 = vadd.f32 %v15873_v31, %v7519_v49  ;;  %v7014_v31 = vadd.f32 %v18217_v6, %v18216_v20  ;;  %v18226_v6 = vld [vmem:[#allocation230_spill] sm:$0xff] }
 0x739   : > { %v7775_v26 = vadd.f32 %v15879_v28, %v7647_v24  ;;  %v7142_v29 = vadd.f32 %v18220_v16, %v7014_v31  ;;  %v18221_v24 = vld [vmem:[#allocation226_spill] sm:$0xff]  ;;  %v18229_v16 = vld [vmem:[#allocation9_spill] sm:$0xff] }
 0x73a   : > { %v7396_v47 = vadd.f32 %v18221_v24, %v7268_v7  ;;  %v18227_v7 = vld [vmem:[#allocation158_spill] sm:$0xff]  ;;  %v18231_v24 = vld [vmem:[#allocation153_spill] sm:$0xff] }
 0x73c   : > { %v7902_v55 = vpop.f32.mrf.mxu1  ;;  %v7520_v42 = vpop.f32.mrf.mxu2 }
 0x73d   : > { %v16053_v48 = vadd.f32 %v7902_v55, %v7775_v26  ;;  %v7521_v9 = vadd.f32 %v7520_v42, %v7393_v27  ;;  %v18222_v55 = vld [vmem:[#allocation72_spill] sm:$0xff]  ;;  %v18224_v27 = vld [vmem:[#allocation151_spill] sm:$0xff]  ;;  %v16074_v58 = vpop.f32.mrf.mxu3  ;;  %v16077_v35 = vpop.f32.mrf.mxu0 }
 0x73e   : > { %v7270_v42 = vadd.f32 %v18224_v27, %v7142_v29  ;;  %v18230_v29 = vld [vmem:[#allocation236_spill] sm:$0xff]  ;;  %v18234_v27 = vld [vmem:[#allocation234_spill] sm:$0xff] }
 0x73f   : > { %7941 = vmatmul.bf16.gmra.mxu1 %v18215_v13  ;;  %v7649_v28 = vadd.f32 %v15895_v25, %v7521_v9  ;;  %v18223_v25 = vld [vmem:[#allocation232_spill] sm:$0xff]  ;;  %v18225_v9 = vld [vmem:[#allocation154_spill] sm:$0xff] }
 0x740   : > { %v7017_v22 = vadd.f32 %v18223_v25, %v18222_v55  ;;  %v7398_v31 = vadd.f32 %v18226_v6, %v7270_v42  ;;  %v18233_v55 = vld [vmem:[#allocation156_spill] sm:$0xff]  ;;  %v18235_v6 = vld [vmem:[#allocation10_spill] sm:$0xff] }
 0x741   : > { %v7777_v49 = vadd.f32 %v15900_v50, %v7649_v28  ;;  %7562 = vmatmul.bf16.gmra.mxu2 %v5789_v19  ;;  %v5790_v19 = vrot.slane %v18227_v7, 1 }
 0x742   : > { %v7145_v13 = vadd.f32 %v18225_v9, %v7017_v22 }
 0x744   : > { %v7904_v56 = vpop.f32.mrf.mxu1  ;;  %v7523_v26 = vpop.f32.mrf.mxu2 }
 0x745   : > { %v16068_v17 = vadd.f32 %v7904_v56, %v7777_v49  ;;  %v7524_v18 = vadd.f32 %v7523_v26, %v7396_v47  ;;  %v7019_v56 = vadd.f32 %v18230_v29, %v18229_v16  ;;  %v7273_v47 = vadd.f32 %v18231_v24, %v7145_v13  ;;  %v16092_v22 = vpop.f32.mrf.mxu3  ;;  %v18236_v13 = vld [vmem:[#allocation240_spill] sm:$0xff]  ;;  %v18239_v29 = vld [vmem:[#allocation238_spill] sm:$0xff] }
 0x746   : > { %v5791_v26 = vsel %vm18232_vm6, %v5788_v30, %v5790_v19 }
 0x747   : > { %v7652_v45 = vadd.f32 %v15975_v33, %v7524_v18  ;;  %v18228_v33 = vld [vmem:[#allocation21_spill] sm:$0xff]  ;;  %v7147_v25 = vadd.f32 %v18233_v55, %v7019_v56  ;;  %v7401_v42 = vadd.f32 %v18234_v27, %v7273_v47  ;;  %v18240_v55 = vld [vmem:[#allocation24_spill] sm:$0xff]  ;;  %v18242_v27 = vld [vmem:[#allocation242_spill] sm:$0xff] }
 0x749   : > { %v7780_v50 = vadd.f32 %v15977_v4, %v7652_v45 }
 0x74c   : > { %v7907_v20 = vpop.f32.mrf.mxu1  ;;  %v7525_v15 = vpop.f32.mrf.mxu2 }
 0x74d   : > { %v16081_v28 = vadd.f32 %v7907_v20, %v7780_v50  ;;  %v7526_v49 = vadd.f32 %v7525_v15, %v7398_v31  ;;  %v16095_v50 = vpop.f32.mrf.mxu0  ;;  %v7022_v31 = vadd.f32 %v18236_v13, %v18235_v6  ;;  %v16108_v47 = vpop.f32.mrf.mxu3 }
 0x74f   : > { %7946 = vmatmul.bf16.gmra.mxu1 %v18228_v33  ;;  %v7654_v4 = vadd.f32 %v15992_v40, %v7526_v49  ;;  %v18238_v49 = vld [vmem:[#allocation160_spill] sm:$0xff] }
 0x750   : > { %v7150_v33 = vadd.f32 %v18238_v49, %v7022_v31  ;;  %v18245_v31 = vld [vmem:[#allocation164_spill] sm:$0xff] }
 0x751   : > { %v7782_v18 = vadd.f32 %v15996_v51, %v7654_v4  ;;  %7567 = vmatmul.bf16.gmra.mxu2 %v5791_v26  ;;  %v18237_v51 = vld [vmem:[#allocation155_spill] sm:$0xff] }
 0x752   : > { %v7275_v15 = vadd.f32 %v18237_v51, %v7147_v25  ;;  %v18241_v25 = vld [vmem:[#allocation29_spill] sm:$0xff] }
 0x754   : > { %v7909_v45 = vpop.f32.mrf.mxu1  ;;  %v7528_v20 = vpop.f32.mrf.mxu2  ;;  %v7403_v56 = vadd.f32 %v18239_v29, %v7275_v15  ;;  %v18246_v15 = vld [vmem:[#allocation241_spill] sm:$0xff] }
 0x755   : > { %v16097_v9 = vadd.f32 %v7909_v45, %v7782_v18  ;;  %v7529_v40 = vadd.f32 %v7528_v20, %v7401_v42  ;;  %v16110_v18 = vpop.f32.mrf.mxu0  ;;  %v18243_v20 = vld [vmem:[#allocation157_spill] sm:$0xff] }
 0x757   : > { %v7657_v30 = vadd.f32 %v16009_v3, %v7529_v40  ;;  %v9775_v3 = vld [vmem:[#allocation2 + $0xbc] sm:$0xff]   ;;  %v7278_v40 = vadd.f32 %v18243_v20, %v7150_v33 }
 0x758   : > { %v5792_v45 = vrot.slane %v9775_v3, 1 }
 0x759   : > { %v7785_v7 = vadd.f32 %v16012_v34, %v7657_v30  ;;  %v7024_v34 = vadd.f32 %v18242_v27, %v18241_v25  ;;  %v18251_v25 = vld [vmem:[#allocation168_spill] sm:$0xff] }
 0x75a   : > { %v5793_v6 = vsel %vm18244_vm13, %v5790_v19, %v5792_v45  ;;  %v18250_v19 = vld [vmem:[#allocation162_spill] sm:$0xff] }
 0x75b   : > { %v7152_v30 = vadd.f32 %v18245_v31, %v7024_v34 }
 0x75c   : > { %v7912_v16 = vpop.f32.mrf.mxu1  ;;  %v7530_v24 = vpop.f32.mrf.mxu2 }
 0x75d   : > { %v16106_v4 = vadd.f32 %v7912_v16, %v7785_v7  ;;  %v7531_v26 = vadd.f32 %v7530_v24, %v7403_v56  ;;  %v7406_v7 = vadd.f32 %v18246_v15, %v7278_v40  ;;  %v18248_v56 = vld [vmem:[#allocation32_spill] sm:$0xff]  ;;  %v18249_v24 = vld [vmem:[#allocation245_spill] sm:$0xff]  ;;  %v18255_v15 = vld [vmem:[#allocation27_spill] sm:$0xff] }
 0x75f   : > { %7951 = vmatmul.bf16.gmra.mxu1 %v18240_v55  ;;  %v7659_v42 = vadd.f32 %v16024_v14, %v7531_v26  ;;  %v7027_v55 = vadd.f32 %v18249_v24, %v18248_v56  ;;  %v16125_v14 = vpop.f32.mrf.mxu3  ;;  %v7280_v26 = vadd.f32 %v18250_v19, %v7152_v30  ;;  %v18260_v19 = vld [vmem:[#allocation172_spill] sm:$0xff] }
 0x761   : > { %v7787_v13 = vadd.f32 %v16027_v0, %v7659_v42  ;;  %7572 = vmatmul.bf16.gmra.mxu2 %v5793_v6  ;;  %v16129_v0 = vpop.f32.mrf.mxu0  ;;  %v7155_v27 = vadd.f32 %v18251_v25, %v7027_v55  ;;  %v18252_v42 = vld [vmem:[#allocation244_spill] sm:$0xff]  ;;  %v18261_v25 = vld [vmem:[#allocation246_spill] sm:$0xff] }
 0x762   : > { %v7408_v20 = vadd.f32 %v18252_v42, %v7280_v26  ;;  %v4990_v42 = vld [vmem:[#allocation2 + $0xd0] sm:$0xf] }
 0x764   : > { %v7914_v51 = vpop.f32.mrf.mxu1  ;;  %v7533_v16 = vpop.f32.mrf.mxu2 }
 0x765   : > { %v16121_v49 = vadd.f32 %v7914_v51, %v7787_v13  ;;  %v7534_v29 = vadd.f32 %v7533_v16, %v7406_v7  ;;  %v18254_v13 = vld [vmem:[#allocation243_spill] sm:$0xff] }
 0x766   : > { %v5794_v31 = vrot.slane %v18254_v13, 1  ;;  %v18257_v7 = vld [vmem:[#allocation247_spill] sm:$0xff] }
 0x767   : > { %18247 = vst [vmem:[#allocation13_spill] sm:$0xff] %v16121_v49  ;;  %v7662_v33 = vadd.f32 %v16042_v1, %v7534_v29  ;;  %v18256_v1 = vld [vmem:[#allocation23_spill] sm:$0xff]  ;;  %v18258_v29 = vld [vmem:[#allocation166_spill] sm:$0xff]  ;;  %v16143_v24 = vpop.f32.mrf.mxu3 }
 0x768   : > { %v7029_v30 = vadd.f32 %v18257_v7, %v18256_v1  ;;  %v5795_v56 = vsel %vm18259_vm10, %v5792_v45, %v5794_v31  ;;  %v18263_v45 = vld [vmem:[#allocation48_spill] sm:$0xff]  ;;  %v18265_v1 = vld [vmem:[#allocation170_spill] sm:$0xff] }
 0x769   : > { %v7790_v3 = vadd.f32 %v16044_v44, %v7662_v33  ;;  %v7283_v44 = vadd.f32 %v18258_v29, %v7155_v27  ;;  %v16146_v33 = vpop.f32.mrf.mxu0  ;;  %v18266_v29 = vld [vmem:[#allocation176_spill] sm:$0xff] }
 0x76a   : > { %v7157_v26 = vadd.f32 %v18260_v19, %v7029_v30  ;;  %v6217_v30 = vrot.slane %v15875_v53, 1  ;;  %v18267_v19 = vld [vmem:[#allocation248_spill] sm:$0xff] }
 0x76c   : > { %v7917_v34 = vpop.f32.mrf.mxu1  ;;  %v7535_v6 = vpop.f32.mrf.mxu2  ;;  %v7285_v7 = vadd.f32 %v18265_v1, %v7157_v26  ;;  %v18269_v26 = vld [vmem:[#allocation45_spill] sm:$0xff] }
 0x76d   : > { %v16134_v40 = vadd.f32 %v7917_v34, %v7790_v3  ;;  %v7536_v51 = vadd.f32 %v7535_v6, %v7408_v20  ;;  %v7411_v34 = vadd.f32 %v18261_v25, %v7283_v44  ;;  %v5825_v6 = vunpack.c.l.b16 %v4990_v42 }
 0x76e   : > { %v6142_v25 = vshrl.u32 %v15875_v53, 16  ;;  %v18274_v53 = vld [vmem:[#allocation174_spill] sm:$0xff] }
 0x76f   : > { %18253 = vst [vmem:[#allocation50_spill] sm:$0xff] %v16134_v40  ;;  %7956 = vmatmul.bf16.gmra.mxu1 %v18255_v15  ;;  %v7664_v16 = vadd.f32 %v16058_v59, %v7536_v51  ;;  %v5829_v13 = vpack.c.b16 %v5825_v6, %v5825_v6  ;;  %v18264_v51 = vld [vmem:[#allocation249_spill] sm:$0xff] }
 0x770   : > { %v7032_v15 = vadd.f32 %v18264_v51, %v18263_v45  ;;  %v18273_v45 = vld [vmem:[#allocation251_spill] sm:$0xff] }
 0x771   : > { %v7792_v55 = vadd.f32 %v16062_v11, %v7664_v16  ;;  %7577 = vmatmul.bf16.gmra.mxu2 %v5795_v56  ;;  %7710 = vmatmul.bf16.gmra.mxu3 %v5829_v13  ;;  %v16159_v56 = vpop.f32.mrf.mxu3  ;;  %v18272_v13 = vld [vmem:[#allocation68_spill] sm:$0xff] }
 0x772   : > { %v7160_v44 = vadd.f32 %v18266_v29, %v7032_v15  ;;  %v7034_v51 = vadd.f32 %v18273_v45, %v18272_v13 }
 0x774   : > { %v7919_v3 = vpop.f32.mrf.mxu1  ;;  %v7538_v59 = vpop.f32.mrf.mxu2 }
 0x775   : > { %v16150_v20 = vadd.f32 %v7919_v3, %v7792_v55  ;;  %v7539_v27 = vadd.f32 %v7538_v59, %v7411_v34  ;;  %v7413_v3 = vadd.f32 %v18267_v19, %v7285_v7  ;;  %v16163_v34 = vpop.f32.mrf.mxu0  ;;  %v18270_v59 = vrot.slane %v18269_v26, 1  ;;  %v18275_v7 = vld [vmem:[#allocation180_spill] sm:$0xff] }
 0x777   : > { %18262 = vst [vmem:[#allocation3_spill] sm:$0xff] %v16150_v20  ;;  %v7667_v11 = vadd.f32 %v16074_v58, %v7539_v27  ;;  %v6218_v6 = vsel %vm18271_vm9, %v18270_v59, %v6217_v30  ;;  %v18279_v59 = vld [vmem:[#allocation253_spill] sm:$0xff] }
 0x779   : > { %v7795_v16 = vadd.f32 %v16077_v35, %v7667_v11  ;;  %v6144_v35 = vor.u32 %v6142_v25, %v15887_v32  ;;  %v7288_v11 = vadd.f32 %v18274_v53, %v7160_v44  ;;  %v16180_v25 = vpop.f32.mrf.mxu3 }
 0x77b   : > { %7838 = vmatmul.bf16.gmra.mxu0 %v6144_v35  ;;  %v18281_v35 = vld [vmem:[#allocation183_spill] sm:$0xff] }
 0x77c   : > { %v7922_v55 = vpop.f32.mrf.mxu1  ;;  %v7540_v58 = vpop.f32.mrf.mxu2 }
 0x77d   : > { %v16165_v42 = vadd.f32 %v7922_v55, %v7795_v16  ;;  %v7541_v27 = vadd.f32 %v7540_v58, %v7413_v3  ;;  %v7162_v16 = vadd.f32 %v18275_v7, %v7034_v51  ;;  %v18276_v55 = vld [vmem:[#allocation250_spill] sm:$0xff]  ;;  %v16182_v26 = vpop.f32.mrf.mxu0  ;;  %v18282_v51 = vld [vmem:[#allocation252_spill] sm:$0xff] }
 0x77e   : > { %v7416_v19 = vadd.f32 %v18276_v55, %v7288_v11  ;;  %v18284_v7 = vld [vmem:[#allocation88_spill] sm:$0xff] }
 0x77f   : > { %18268 = vst [vmem:[#allocation75_spill] sm:$0xff] %v16165_v42  ;;  %7961 = vmatmul.bf16.gmra.mxu1 %v6218_v6  ;;  %v7669_v15 = vadd.f32 %v16092_v22, %v7541_v27  ;;  %v18278_v22 = vld [vmem:[#allocation15_spill] sm:$0xff] }
 0x780   : > { %v7037_v6 = vadd.f32 %v18279_v59, %v18278_v22  ;;  %v18287_v22 = vld [vmem:[#allocation187_spill] sm:$0xff] }
 0x781   : > { %v7797_v1 = vadd.f32 %v16095_v50, %v7669_v15  ;;  %7582 = vmatmul.bf16.gmra.mxu2 %v5794_v31  ;;  %v18280_v50 = vld [vmem:[#allocation178_spill] sm:$0xff] }
 0x782   : > { %v7290_v31 = vadd.f32 %v18280_v50, %v7162_v16  ;;  %v7165_v13 = vadd.f32 %v18281_v35, %v7037_v6  ;;  %v18286_v16 = vld [vmem:[#allocation181_spill] sm:$0xff]  ;;  %v18290_v35 = vld [vmem:[#allocation92_spill] sm:$0xff] }
 0x784   : > { %v7924_v29 = vpop.f32.mrf.mxu1  ;;  %v7543_v32 = vpop.f32.mrf.mxu2  ;;  %v7418_v15 = vadd.f32 %v18282_v51, %v7290_v31 }
 0x785   : > { %v16178_v3 = vadd.f32 %v7924_v29, %v7797_v1  ;;  %v7544_v58 = vadd.f32 %v7543_v32, %v7416_v19  ;;  %v18285_v29 = vld [vmem:[#allocation255_spill] sm:$0xff]  ;;  %v16195_v19 = vpop.f32.mrf.mxu3  ;;  %v7293_v32 = vadd.f32 %v18286_v16, %v7165_v13 }
 0x786   : > { %v7039_v55 = vadd.f32 %v18285_v29, %v18284_v7  ;;  %v18293_v7 = vld [vmem:[#allocation191_spill] sm:$0xff] }
 0x787   : > { %18277 = vst [vmem:[#allocation40_spill] sm:$0xff] %v16178_v3  ;;  %v7672_v44 = vadd.f32 %v16108_v47, %v7544_v58 }
 0x788   : > { %v7167_v59 = vadd.f32 %v18287_v22, %v7039_v55  ;;  %v18296_v22 = vld [vmem:[#allocation18_spill] sm:$0xff] }
 0x789   : > { %v7800_v27 = vadd.f32 %v16110_v18, %v7672_v44  ;;  %v16199_v18 = vpop.f32.mrf.mxu0  ;;  %v18288_v44 = vld [vmem:[#allocation254_spill] sm:$0xff] }
 0x78a   : > { %v7421_v50 = vadd.f32 %v18288_v44, %v7293_v32  ;;  %v18297_v44 = vld [vmem:[#allocation96_spill] sm:$0xff] }
 0x78c   : > { %v7927_v45 = vpop.f32.mrf.mxu1  ;;  %v7545_v11 = vpop.f32.mrf.mxu2 }
 0x78d   : > { %v16191_v53 = vadd.f32 %v7927_v45, %v7800_v27  ;;  %v7546_v1 = vadd.f32 %v7545_v11, %v7418_v15  ;;  %v18291_v45 = vld [vmem:[#allocation257_spill] sm:$0xff]  ;;  %v16210_v11 = vpop.f32.mrf.mxu3 }
 0x78e   : > { %v7042_v51 = vadd.f32 %v18291_v45, %v18290_v35  ;;  %v18292_v15 = vld [vmem:[#allocation185_spill] sm:$0xff] }
 0x78f   : > { %18283 = vst [vmem:[#allocation19_spill] sm:$0xff] %v16191_v53  ;;  %7966 = vmatmul.bf16.gmra.mxu1 %v6217_v30  ;;  %v7674_v47 = vadd.f32 %v16125_v14, %v7546_v1  ;;  %v7295_v13 = vadd.f32 %v18292_v15, %v7167_v59  ;;  %v18298_v59 = vld [vmem:[#allocation259_spill] sm:$0xff] }
 0x790   : > { %v7170_v29 = vadd.f32 %v18293_v7, %v7042_v51  ;;  %v18301_v51 = vld [vmem:[#allocation189_spill] sm:$0xff] }
 0x791   : > { %v7802_v58 = vadd.f32 %v16129_v0, %v7674_v47  ;;  %v16213_v1 = vpop.f32.mrf.mxu0  ;;  %v18294_v47 = vld [vmem:[#allocation256_spill] sm:$0xff] }
 0x792   : > { %v7423_v16 = vadd.f32 %v18294_v47, %v7295_v13  ;;  %v18302_v13 = vld [vmem:[#allocation25_spill] sm:$0xff] }
 0x794   : > { %v7929_v6 = vpop.f32.mrf.mxu1  ;;  %v7548_v30 = vpop.f32.mrf.mxu2 }
 0x795   : > { %v16204_v31 = vadd.f32 %v7929_v6, %v7802_v58  ;;  %v7549_v27 = vadd.f32 %v7548_v30, %v7421_v50  ;;  %v7972_v6 = vmul.f32 %v18296_v22, %v15815_v63  ;;  %v7044_v50 = vadd.f32 %v18298_v59, %v18297_v44  ;;  %v18299_v30 = vld [vmem:[#allocation16_spill] sm:$0xff]  ;;  %v18304_v22 = vld [vmem:[#allocation26_spill] sm:$0xff]  ;;  %v16238_v59 = vpop.f32.mrf.mxu3 }
 0x796   : > { %v7975_v44 = vmul.f32 %v18304_v22, %v15853_v5  ;;  %v18308_v22 = vld [vmem:[#allocation261_spill] sm:$0xff] }
 0x797   : > { %18289 = vst [vmem:[#allocation58_spill] sm:$0xff] %v16204_v31  ;;  %v7677_v14 = vadd.f32 %v16143_v24, %v7549_v27  ;;  %v18300_v27 = vld [vmem:[#allocation20_spill] sm:$0xff]  ;;  %v8071_v15 = vmul.f32 %v7972_v6, %v15815_v63 }
 0x798   : > { %v7973_v35 = vmul.f32 %v18300_v27, %v15828_v21  ;;  %v18307_v63 = vld [vmem:[#allocation100_spill] sm:$0xff] }
 0x799   : > { %v7805_v0 = vadd.f32 %v16146_v33, %v7677_v14  ;;  %v7971_v33 = vmul.f32 %v18299_v30, %v15798_v2  ;;  %v7298_v14 = vadd.f32 %v18301_v51, %v7170_v29  ;;  %v18305_v29 = vld [vmem:[#allocation258_spill] sm:$0xff]  ;;  %v16241_v27 = vpop.f32.mrf.mxu0 }
 0x79b   : > { %v8018_v30 = vadd.f32 %v7972_v6, %v7971_v33  ;;  %v8074_v6 = vmul.f32 %v7975_v44, %v15853_v5 }
 0x79c   : > { %v7932_v55 = vpop.f32.mrf.mxu1  ;;  %v7550_v58 = vpop.f32.mrf.mxu2 }
 0x79d   : > { %v16217_v32 = vadd.f32 %v7932_v55, %v7805_v0  ;;  %v7551_v24 = vadd.f32 %v7550_v58, %v7423_v16  ;;  %v7974_v0 = vmul.f32 %v18302_v13, %v15844_v38  ;;  %v18303_v55 = vld [vmem:[#allocation195_spill] sm:$0xff]  ;;  %v8070_v16 = vmul.f32 %v7971_v33, %v15798_v2  ;;  %v18306_v13 = vld [vmem:[#allocation28_spill] sm:$0xff] }
 0x79e   : > { %v7172_v47 = vadd.f32 %v18303_v55, %v7044_v50  ;;  %v8072_v58 = vmul.f32 %v7973_v35, %v15828_v21  ;;  %v7976_v55 = vmul.f32 %v18306_v13, %v15869_v52  ;;  %v7047_v2 = vadd.f32 %v18308_v22, %v18307_v63  ;;  %v18310_v33 = vld [vmem:[#allocation31_spill] sm:$0xff] }
 0x79f   : > { %18295 = vst [vmem:[#allocation161_spill] sm:$0xff] %v16217_v32  ;;  %v7679_v45 = vadd.f32 %v16159_v56, %v7551_v24  ;;  %v7426_v24 = vadd.f32 %v18305_v29, %v7298_v14  ;;  %v8073_v50 = vmul.f32 %v7974_v0, %v15844_v38  ;;  %v8019_v37 = vadd.f32 %v8018_v30, %v7973_v35  ;;  %v18309_v32 = vld [vmem:[#allocation193_spill] sm:$0xff]  ;;  %v18312_v35 = vld [vmem:[#allocation199_spill] sm:$0xff] }
 0x7a0   : > { %v7300_v31 = vadd.f32 %v18309_v32, %v7172_v47  ;;  %v8075_v29 = vmul.f32 %v7976_v55, %v15869_v52  ;;  %v7175_v30 = vadd.f32 %v18312_v35, %v7047_v2 }
 0x7a1   : > { %v7807_v7 = vadd.f32 %v16163_v34, %v7679_v45  ;;  %v8117_v45 = vadd.f32 %v8071_v15, %v8070_v16  ;;  %v8020_v16 = vadd.f32 %v8019_v37, %v7974_v0  ;;  %v16273_v35 = vpop.f32.mrf.mxu0 }
 0x7a3   : > { %v8118_v14 = vadd.f32 %v8117_v45, %v8072_v58  ;;  %v8021_v32 = vadd.f32 %v8020_v16, %v7975_v44  ;;  %v18313_v45 = vld [vmem:[#allocation7_spill] sm:$0xff]  ;;  %v16269_v44 = vpop.f32.mrf.mxu3 }
 0x7a4   : > { %v7934_v56 = vpop.f32.mrf.mxu1  ;;  %v7553_v34 = vpop.f32.mrf.mxu2  ;;  %v7979_v13 = vmul.f32 %v18313_v45, %v15913_v57  ;;  %v18317_v16 = vld [vmem:[#allocation263_spill] sm:$0xff] }
 0x7a5   : > { %v16243_v51 = vadd.f32 %v7934_v56, %v7807_v7  ;;  %v7554_v21 = vadd.f32 %v7553_v34, %v7426_v24  ;;  %v7977_v7 = vmul.f32 %v18310_v33, %v15885_v12  ;;  %v8119_v56 = vadd.f32 %v8118_v14, %v8073_v50  ;;  %v18311_v24 = vld [vmem:[#allocation33_spill] sm:$0xff] }
 0x7a6   : > { %v7978_v34 = vmul.f32 %v18311_v24, %v15904_v61 }
 0x7a7   : > { %v7682_v15 = vadd.f32 %v16180_v25, %v7554_v21  ;;  %v8120_v47 = vadd.f32 %v8119_v56, %v8074_v6  ;;  %v8076_v58 = vmul.f32 %v7977_v7, %v15885_v12  ;;  %v18314_v21 = vld [vmem:[#allocation260_spill] sm:$0xff]  ;;  %v8022_v25 = vadd.f32 %v8021_v32, %v7976_v55 }
 0x7a8   : > { %v7428_v37 = vadd.f32 %v18314_v21, %v7300_v31  ;;  %v8077_v33 = vmul.f32 %v7978_v34, %v15904_v61  ;;  %v18318_v31 = vld [vmem:[#allocation197_spill] sm:$0xff]  ;;  %v8078_v32 = vmul.f32 %v7979_v13, %v15913_v57 }
 0x7a9   : > { %v7810_v63 = vadd.f32 %v16182_v26, %v7682_v15  ;;  %v8121_v14 = vadd.f32 %v8120_v47, %v8075_v29  ;;  %v18315_v26 = vld [vmem:[#allocation12_spill] sm:$0xff]  ;;  %v8023_v24 = vadd.f32 %v8022_v25, %v7977_v7  ;;  %v7303_v55 = vadd.f32 %v18318_v31, %v7175_v30  ;;  %v18319_v29 = vld [vmem:[#allocation14_spill] sm:$0xff]  ;;  %v18321_v25 = vld [vmem:[#allocation203_spill] sm:$0xff] }
 0x7aa   : > { %v7980_v2 = vmul.f32 %v18315_v26, %v15924_v10  ;;  %v18316_v15 = vld [vmem:[#allocation104_spill] sm:$0xff]  ;;  %v7981_v47 = vmul.f32 %v18319_v29, %v15933_v43 }
 0x7ab   : > { %v7049_v56 = vadd.f32 %v18317_v16, %v18316_v15  ;;  %v18322_v16 = vld [vmem:[#allocation35_spill] sm:$0xff] }
 0x7ac   : > { %v7937_v22 = vpop.f32.mrf.mxu1  ;;  %v7555_v50 = vpop.f32.mrf.mxu2  ;;  %v7983_v31 = vmul.f32 %v18322_v16, %v15953_v23 }
 0x7ad   : > { %v16264_v0 = vadd.f32 %v7937_v22, %v7810_v63  ;;  %v7556_v6 = vadd.f32 %v7555_v50, %v7428_v37  ;;  %v8122_v63 = vadd.f32 %v8121_v14, %v8076_v58  ;;  %v8024_v22 = vadd.f32 %v8023_v24, %v7978_v34  ;;  %v18320_v50 = vld [vmem:[#allocation8_spill] sm:$0xff] }
 0x7ae   : > { %v8079_v37 = vmul.f32 %v7980_v2, %v15924_v10  ;;  %v7982_v26 = vmul.f32 %v18320_v50, %v15944_v60  ;;  %v7177_v15 = vadd.f32 %v18321_v25, %v7049_v56  ;;  %v8080_v14 = vmul.f32 %v7981_v47, %v15933_v43  ;;  %v18327_v25 = vld [vmem:[#allocation201_spill] sm:$0xff] }
 0x7af   : > { %v7684_v45 = vadd.f32 %v16195_v19, %v7556_v6  ;;  %v8123_v21 = vadd.f32 %v8122_v63, %v8077_v33  ;;  %v8025_v30 = vadd.f32 %v8024_v22, %v7979_v13  ;;  %v18323_v19 = vld [vmem:[#allocation262_spill] sm:$0xff] }
 0x7b0   : > { %v7431_v34 = vadd.f32 %v18323_v19, %v7303_v55  ;;  %v8081_v50 = vmul.f32 %v7982_v26, %v15944_v60  ;;  %v7305_v16 = vadd.f32 %v18327_v25, %v7177_v15  ;;  %v8082_v55 = vmul.f32 %v7983_v31, %v15953_v23 }
 0x7b1   : > { %v7812_v7 = vadd.f32 %v16199_v18, %v7684_v45  ;;  %v8124_v58 = vadd.f32 %v8123_v21, %v8078_v32  ;;  %v8026_v33 = vadd.f32 %v8025_v30, %v7980_v2  ;;  %v18324_v18 = vld [vmem:[#allocation39_spill] sm:$0xff]  ;;  %v18325_v32 = vld [vmem:[#allocation108_spill] sm:$0xff]  ;;  %v18326_v45 = vld [vmem:[#allocation265_spill] sm:$0xff]  ;;  %v16300_v30 = vpop.f32.mrf.mxu3 }
 0x7b2   : > { %v7984_v56 = vmul.f32 %v18324_v18, %v15964_v39  ;;  %v7052_v22 = vadd.f32 %v18326_v45, %v18325_v32  ;;  %v18328_v2 = vld [vmem:[#allocation44_spill] sm:$0xff]  ;;  %v18331_v45 = vld [vmem:[#allocation49_spill] sm:$0xff] }
 0x7b3   : > { %v8125_v63 = vadd.f32 %v8124_v58, %v8079_v37  ;;  %v8027_v21 = vadd.f32 %v8026_v33, %v7981_v47  ;;  %v18329_v47 = vld [vmem:[#allocation47_spill] sm:$0xff] }
 0x7b4   : > { %v7939_v29 = vpop.f32.mrf.mxu1  ;;  %v7558_v24 = vpop.f32.mrf.mxu2  ;;  %v7986_v33 = vmul.f32 %v18329_v47, %v15988_v54 }
 0x7b5   : > { %v16289_v6 = vadd.f32 %v7939_v29, %v7812_v7  ;;  %v7559_v13 = vadd.f32 %v7558_v24, %v7431_v34  ;;  %v8126_v43 = vadd.f32 %v8125_v63, %v8080_v14  ;;  %v7985_v7 = vmul.f32 %v18328_v2, %v15973_v36  ;;  %v16303_v29 = vpop.f32.mrf.mxu0  ;;  %v18330_v14 = vld [vmem:[#allocation207_spill] sm:$0xff] }
 0x7b6   : > { %v8028_v58 = vadd.f32 %v8027_v21, %v7982_v26  ;;  %v8083_v34 = vmul.f32 %v7984_v56, %v15964_v39  ;;  %v7180_v24 = vadd.f32 %v18330_v14, %v7052_v22  ;;  %v8085_v47 = vmul.f32 %v7986_v33, %v15988_v54  ;;  %v18336_v14 = vld [vmem:[#allocation205_spill] sm:$0xff] }
 0x7b7   : > { %v7687_v37 = vadd.f32 %v16210_v11, %v7559_v13  ;;  %v8127_v19 = vadd.f32 %v8126_v43, %v8081_v50  ;;  %v8084_v32 = vmul.f32 %v7985_v7, %v15973_v36  ;;  %v7987_v11 = vmul.f32 %v18331_v45, %v16001_v8  ;;  %v18332_v13 = vld [vmem:[#allocation264_spill] sm:$0xff] }
 0x7b8   : > { %v8029_v63 = vadd.f32 %v8028_v58, %v7983_v31  ;;  %v7433_v21 = vadd.f32 %v18332_v13, %v7305_v16  ;;  %v7308_v45 = vadd.f32 %v18336_v14, %v7180_v24  ;;  %v18339_v24 = vld [vmem:[#allocation211_spill] sm:$0xff] }
 0x7b9   : > { %v7815_v15 = vadd.f32 %v16213_v1, %v7687_v37  ;;  %v8128_v18 = vadd.f32 %v8127_v19, %v8082_v55  ;;  %v18333_v1 = vld [vmem:[#allocation57_spill] sm:$0xff]  ;;  %v18334_v55 = vld [vmem:[#allocation112_spill] sm:$0xff]  ;;  %v18335_v37 = vld [vmem:[#allocation267_spill] sm:$0xff]  ;;  %v8086_v16 = vmul.f32 %v7987_v11, %v16001_v8 }
 0x7ba   : > { %v8030_v43 = vadd.f32 %v8029_v63, %v7984_v56  ;;  %v7988_v22 = vmul.f32 %v18333_v1, %v16016_v46  ;;  %v7054_v58 = vadd.f32 %v18335_v37, %v18334_v55  ;;  %v18337_v56 = vld [vmem:[#allocation63_spill] sm:$0xff] }
 0x7bb   : > { %v8129_v2 = vadd.f32 %v8128_v18, %v8083_v34 }
 0x7bc   : > { %v7942_v26 = vpop.f32.mrf.mxu1  ;;  %v7560_v25 = vpop.f32.mrf.mxu2  ;;  %v8031_v19 = vadd.f32 %v8030_v43, %v7985_v7  ;;  %v8087_v13 = vmul.f32 %v7988_v22, %v16016_v46 }
 0x7bd   : > { %v16314_v50 = vadd.f32 %v7942_v26, %v7815_v15  ;;  %v7561_v31 = vadd.f32 %v7560_v25, %v7433_v21  ;;  %v8130_v36 = vadd.f32 %v8129_v2, %v8084_v32  ;;  %v7989_v15 = vmul.f32 %v18337_v56, %v16029_v62  ;;  %v16326_v26 = vpop.f32.mrf.mxu3  ;;  %v18338_v21 = vld [vmem:[#allocation67_spill] sm:$0xff]  ;;  %v16333_v43 = vpop.f32.mrf.mxu0 }
 0x7be   : > { %v8032_v63 = vadd.f32 %v8031_v19, %v7986_v33  ;;  %v7990_v25 = vmul.f32 %v18338_v21, %v16040_v41  ;;  %v7182_v32 = vadd.f32 %v18339_v24, %v7054_v58  ;;  %v18342_v58 = vld [vmem:[#allocation71_spill] sm:$0xff]  ;;  %v18345_v24 = vld [vmem:[#allocation209_spill] sm:$0xff] }
 0x7bf   : > { %v7689_v34 = vadd.f32 %v16238_v59, %v7561_v31  ;;  %v8131_v18 = vadd.f32 %v8130_v36, %v8085_v47  ;;  %v8088_v55 = vmul.f32 %v7989_v15, %v16029_v62  ;;  %v18340_v59 = vld [vmem:[#allocation69_spill] sm:$0xff]  ;;  %v18341_v47 = vld [vmem:[#allocation266_spill] sm:$0xff] }
 0x7c0   : > { %v8033_v2 = vadd.f32 %v8032_v63, %v7987_v11  ;;  %v7991_v36 = vmul.f32 %v18340_v59, %v16053_v48  ;;  %v7436_v31 = vadd.f32 %v18341_v47, %v7308_v45  ;;  %v18344_v63 = vld [vmem:[#allocation269_spill] sm:$0xff]  ;;  %v7310_v59 = vadd.f32 %v18345_v24, %v7182_v32 }
 0x7c1   : > { %v7817_v7 = vadd.f32 %v16241_v27, %v7689_v34  ;;  %v8132_v1 = vadd.f32 %v8131_v18, %v8086_v16  ;;  %v8089_v27 = vmul.f32 %v7990_v25, %v16040_v41  ;;  %v7992_v34 = vmul.f32 %v18342_v58, %v16068_v17  ;;  %v18343_v16 = vld [vmem:[#allocation116_spill] sm:$0xff]  ;;  %v18347_v47 = vld [vmem:[#allocation77_spill] sm:$0xff] }
 0x7c2   : > { %v8034_v37 = vadd.f32 %v8033_v2, %v7988_v22  ;;  %v7057_v18 = vadd.f32 %v18344_v63, %v18343_v16  ;;  %v8090_v45 = vmul.f32 %v7991_v36, %v16053_v48  ;;  %v18346_v22 = vld [vmem:[#allocation74_spill] sm:$0xff]  ;;  %v18349_v16 = vld [vmem:[#allocation79_spill] sm:$0xff] }
 0x7c3   : > { %v8133_v56 = vadd.f32 %v8132_v1, %v8087_v13 }
 0x7c4   : > { %v7944_v33 = vpop.f32.mrf.mxu1  ;;  %v7563_v14 = vpop.f32.mrf.mxu2  ;;  %v8035_v21 = vadd.f32 %v8034_v37, %v7989_v15  ;;  %v18348_v15 = vld [vmem:[#allocation215_spill] sm:$0xff] }
 0x7c5   : > { %v16339_v19 = vadd.f32 %v7944_v33, %v7817_v7  ;;  %v7564_v11 = vadd.f32 %v7563_v14, %v7436_v31  ;;  %v8134_v62 = vadd.f32 %v8133_v56, %v8088_v55  ;;  %v7993_v7 = vmul.f32 %v18346_v22, %v16081_v28  ;;  %v16356_v55 = vpop.f32.mrf.mxu3 }
 0x7c6   : > { %v8036_v2 = vadd.f32 %v8035_v21, %v7990_v25  ;;  %v8091_v33 = vmul.f32 %v7992_v34, %v16068_v17  ;;  %v7994_v31 = vmul.f32 %v18347_v47, %v16097_v9  ;;  %v7185_v37 = vadd.f32 %v18348_v15, %v7057_v18  ;;  %v18351_v18 = vld [vmem:[#allocation81_spill] sm:$0xff] }
 0x7c7   : > { %v7692_v13 = vadd.f32 %v16269_v44, %v7564_v11  ;;  %v8135_v1 = vadd.f32 %v8134_v62, %v8089_v27  ;;  %v8092_v58 = vmul.f32 %v7993_v7, %v16081_v28  ;;  %v7995_v44 = vmul.f32 %v18349_v16, %v16106_v4  ;;  %v18350_v62 = vld [vmem:[#allocation268_spill] sm:$0xff]  ;;  %v16362_v11 = vpop.f32.mrf.mxu0  ;;  %v18354_v15 = vld [vmem:[#allocation213_spill] sm:$0xff] }
 0x7c8   : > { %v8037_v32 = vadd.f32 %v8036_v2, %v7991_v36  ;;  %v7438_v27 = vadd.f32 %v18350_v62, %v7310_v59  ;;  %v8093_v36 = vmul.f32 %v7994_v31, %v16097_v9  ;;  %v18353_v2 = vld [vmem:[#allocation271_spill] sm:$0xff]  ;;  %v7313_v16 = vadd.f32 %v18354_v15, %v7185_v37 }
 0x7c9   : > { %v7820_v14 = vadd.f32 %v16273_v35, %v7692_v13  ;;  %v8136_v56 = vadd.f32 %v8135_v1, %v8090_v45  ;;  %v7996_v45 = vmul.f32 %v18351_v18, %v16121_v49  ;;  %v18352_v13 = vld [vmem:[#allocation120_spill] sm:$0xff]  ;;  %v8094_v62 = vmul.f32 %v7995_v44, %v16106_v4 }
 0x7ca   : > { %v8038_v63 = vadd.f32 %v8037_v32, %v7992_v34  ;;  %v7059_v1 = vadd.f32 %v18353_v2, %v18352_v13  ;;  %v18355_v34 = vld [vmem:[#allocation5_spill] sm:$0xff]  ;;  %v18358_v13 = vld [vmem:[#allocation22_spill] sm:$0xff] }
 0x7cb   : > { %v8137_v24 = vadd.f32 %v8136_v56, %v8091_v33  ;;  %v7999_v2 = vmul.f32 %v18358_v13, %v16165_v42 }
 0x7cc   : > { %v7947_v25 = vpop.f32.mrf.mxu1  ;;  %v7565_v35 = vpop.f32.mrf.mxu2  ;;  %v8039_v47 = vadd.f32 %v8038_v63, %v7993_v7  ;;  %v18357_v7 = vld [vmem:[#allocation219_spill] sm:$0xff] }
 0x7cd   : > { %v16364_v21 = vadd.f32 %v7947_v25, %v7820_v14  ;;  %v7566_v22 = vadd.f32 %v7565_v35, %v7438_v27  ;;  %v8138_v59 = vadd.f32 %v8137_v24, %v8092_v58  ;;  %v7997_v14 = vmul.f32 %v18355_v34, %v16134_v40  ;;  %v18356_v27 = vld [vmem:[#allocation4_spill] sm:$0xff] }
 0x7ce   : > { %v8040_v32 = vadd.f32 %v8039_v47, %v7994_v31  ;;  %v8095_v25 = vmul.f32 %v7996_v45, %v16121_v49  ;;  %v7998_v35 = vmul.f32 %v18356_v27, %v16150_v20  ;;  %v7187_v63 = vadd.f32 %v18357_v7, %v7059_v1  ;;  %v18360_v1 = vld [vmem:[#allocation37_spill] sm:$0xff] }
 0x7cf   : > { %v7694_v33 = vadd.f32 %v16300_v30, %v7566_v22  ;;  %v8139_v56 = vadd.f32 %v8138_v59, %v8093_v36  ;;  %v8096_v24 = vmul.f32 %v7997_v14, %v16134_v40  ;;  %v18359_v30 = vld [vmem:[#allocation270_spill] sm:$0xff]  ;;  %v7701_v59 = vpop.f32.mrf.mxu3  ;;  %v16392_v27 = vpop.f32.mrf.mxu0 }
 0x7d0   : > { %v8041_v37 = vadd.f32 %v8040_v32, %v7995_v44  ;;  %v7441_v31 = vadd.f32 %v18359_v30, %v7313_v16  ;;  %v8000_v44 = vmul.f32 %v18360_v1, %v16178_v3  ;;  %v18362_v32 = vld [vmem:[#allocation273_spill] sm:$0xff]  ;;  %v18363_v16 = vld [vmem:[#allocation42_spill] sm:$0xff] }
 0x7d1   : > { %v7822_v18 = vadd.f32 %v16303_v29, %v7694_v33  ;;  %v8140_v58 = vadd.f32 %v8139_v56, %v8094_v62  ;;  %v8097_v29 = vmul.f32 %v7998_v35, %v16150_v20  ;;  %v18361_v33 = vld [vmem:[#allocation124_spill] sm:$0xff]  ;;  %v18365_v1 = vld [vmem:[#allocation58_spill] sm:$0xff]  ;;  %v18367_v20 = vld [vmem:[#allocation223_spill] sm:$0xff] }
 0x7d2   : > { %v8042_v36 = vadd.f32 %v8041_v37, %v7996_v45  ;;  %v7062_v56 = vadd.f32 %v18362_v32, %v18361_v33  ;;  %v8098_v45 = vmul.f32 %v7999_v2, %v16165_v42  ;;  %v18364_v37 = vld [vmem:[#allocation217_spill] sm:$0xff]  ;;  %v8099_v30 = vmul.f32 %v8000_v44, %v16178_v3 }
 0x7d3   : > { %v8141_v34 = vadd.f32 %v8140_v58, %v8095_v25  ;;  %v7315_v25 = vadd.f32 %v18364_v37, %v7187_v63 }
 0x7d4   : > { %v7949_v15 = vpop.f32.mrf.mxu1  ;;  %v7568_v47 = vpop.f32.mrf.mxu2  ;;  %v8043_v7 = vadd.f32 %v8042_v36, %v7997_v14  ;;  %v7190_v33 = vadd.f32 %v18367_v20, %v7062_v56  ;;  %v18369_v36 = vld [vmem:[#allocation52_spill] sm:$0xff] }
 0x7d5   : > { %v16385_v22 = vadd.f32 %v7949_v15, %v7822_v18  ;;  %v7569_v62 = vadd.f32 %v7568_v47, %v7441_v31  ;;  %v8142_v13 = vadd.f32 %v8141_v34, %v8096_v24  ;;  %v8001_v18 = vmul.f32 %v18363_v16, %v16191_v53  ;;  %v18366_v31 = vld [vmem:[#allocation43_spill] sm:$0xff]  ;;  %v18368_v24 = vld [vmem:[#allocation161_spill] sm:$0xff]  ;;  %v18370_v16 = vld [vmem:[#allocation272_spill] sm:$0xff] }
 0x7d6   : > { %v8044_v58 = vadd.f32 %v8043_v7, %v7998_v35  ;;  %v8002_v47 = vmul.f32 %v18366_v31, %v18365_v1  ;;  %v8003_v34 = vmul.f32 %v18369_v36, %v18368_v24  ;;  %v7443_v49 = vadd.f32 %v18370_v16, %v7315_v25  ;;  %v18372_v20 = vld [vmem:[#allocation128_spill] sm:$0xff] }
 0x7d7   : > { %v8143_v15 = vadd.f32 %v8142_v13, %v8097_v29  ;;  %v8100_v14 = vmul.f32 %v8001_v18, %v16191_v53  ;;  %v18371_v13 = vld [vmem:[#allocation53_spill] sm:$0xff]  ;;  %v7703_v53 = vpop.f32.mrf.mxu3  ;;  %v7697_v16 = vadd.f32 %v16326_v26, %v7569_v62 }
 0x7d8   : > { %v8045_v32 = vadd.f32 %v8044_v58, %v7999_v2  ;;  %v8101_v7 = vmul.f32 %v8002_v47, %v18365_v1  ;;  %v8004_v37 = vmul.f32 %v18371_v13, %v16243_v51  ;;  %v18373_v2 = vld [vmem:[#allocation275_spill] sm:$0xff]  ;;  %v18374_v58 = vld [vmem:[#allocation221_spill] sm:$0xff]  ;;  %v8102_v3 = vmul.f32 %v8003_v34, %v18368_v24 }
 0x7d9   : > { %v8144_v40 = vadd.f32 %v8143_v15, %v8098_v45  ;;  %v7064_v56 = vadd.f32 %v18373_v2, %v18372_v20  ;;  %v7318_v15 = vadd.f32 %v18374_v58, %v7190_v33 }
 0x7da   : > { %v8046_v63 = vadd.f32 %v8045_v32, %v8000_v44  ;;  %v18375_v44 = vld [vmem:[#allocation60_spill] sm:$0xff] }
 0x7db   : > { %v8145_v29 = vadd.f32 %v8144_v40, %v8099_v30  ;;  %v8005_v25 = vmul.f32 %v18375_v44, %v16264_v0  ;;  %v7831_v30 = vpop.f32.mrf.mxu0 }
 0x7dc   : > { %v7952_v42 = vpop.f32.mrf.mxu1  ;;  %v7570_v35 = vpop.f32.mrf.mxu2  ;;  %v8047_v45 = vadd.f32 %v8046_v63, %v8001_v18  ;;  %v18376_v18 = vld [vmem:[#allocation66_spill] sm:$0xff] }
 0x7dd   : > { %v7571_v31 = vadd.f32 %v7570_v35, %v7443_v49  ;;  %v8146_v36 = vadd.f32 %v8145_v29, %v8100_v14  ;;  %v8103_v35 = vmul.f32 %v8004_v37, %v16243_v51  ;;  %v8006_v63 = vmul.f32 %v18376_v18, %v16289_v6  ;;  %v18377_v14 = vld [vmem:[#allocation227_spill] sm:$0xff] }
 0x7de   : > { %v8048_v32 = vadd.f32 %v8047_v45, %v8002_v47  ;;  %v7192_v29 = vadd.f32 %v18377_v14, %v7064_v56  ;;  %v8104_v2 = vmul.f32 %v8005_v25, %v16264_v0  ;;  %v18379_v45 = vld [vmem:[#allocation274_spill] sm:$0xff] }
 0x7df   : > { %v7699_v40 = vadd.f32 %v16356_v55, %v7571_v31  ;;  %v8147_v49 = vadd.f32 %v8146_v36, %v8101_v7  ;;  %v18378_v55 = vld [vmem:[#allocation54_spill] sm:$0xff]  ;;  %v7446_v26 = vadd.f32 %v18379_v45, %v7318_v15  ;;  %v7825_v7 = vadd.f32 %v16333_v43, %v7697_v16  ;;  %v18383_v15 = vld [vmem:[#allocation225_spill] sm:$0xff]  ;;  %v18384_v43 = vld [vmem:[#allocation59_spill] sm:$0xff] }
 0x7e0   : > { %v8049_v13 = vadd.f32 %v8048_v32, %v8003_v34  ;;  %v8007_v31 = vmul.f32 %v18378_v55, %v16314_v50  ;;  %v8105_v44 = vmul.f32 %v8006_v63, %v16289_v6  ;;  %v18381_v56 = vld [vmem:[#allocation278_spill] sm:$0xff]  ;;  %v18382_v32 = vld [vmem:[#allocation56_spill] sm:$0xff]  ;;  %v8009_v16 = vmul.f32 %v18384_v43, %v16364_v21  ;;  %v18392_v43 = vld [vmem:[#allocation229_spill] sm:$0xff] }
 0x7e1   : > { %v7827_v33 = vadd.f32 %v16362_v11, %v7699_v40  ;;  %v8148_v20 = vadd.f32 %v8147_v49, %v8102_v3  ;;  %v18380_v40 = vld [vmem:[#allocation132_spill] sm:$0xff]  ;;  %v8008_v49 = vmul.f32 %v18382_v32, %v16339_v19 }
 0x7e2   : > { %v8050_v62 = vadd.f32 %v8049_v13, %v8004_v37  ;;  %v7067_v34 = vadd.f32 %v18381_v56, %v18380_v40  ;;  %v8106_v14 = vmul.f32 %v8007_v31, %v16314_v50  ;;  %v7320_v37 = vadd.f32 %v18383_v15, %v7192_v29  ;;  %v18386_v29 = vld [vmem:[#allocation231_spill] sm:$0xff]  ;;  %v18387_v56 = vld [vmem:[#allocation277_spill] sm:$0xff] }
 0x7e3   : > { %v8149_v36 = vadd.f32 %v8148_v20, %v8103_v35  ;;  %v16436_v35 = vadd.f32 %v7952_v42, %v7825_v7  ;;  %v7706_v20 = vpop.f32.mrf.mxu3 }
 0x7e4   : > { %v7954_v47 = vpop.f32.mrf.mxu1  ;;  %v7573_v58 = vpop.f32.mrf.mxu2  ;;  %v8051_v3 = vadd.f32 %v8050_v62, %v8005_v25  ;;  %v7448_v42 = vadd.f32 %v18387_v56, %v7320_v37 }
 0x7e5   : > { %v7574_v11 = vadd.f32 %v7573_v58, %v7446_v26  ;;  %v8150_v18 = vadd.f32 %v8149_v36, %v8104_v2  ;;  %v7834_v25 = vpop.f32.mrf.mxu0  ;;  %v8107_v58 = vmul.f32 %v8008_v49, %v16339_v19  ;;  %v18385_v2 = vld [vmem:[#allocation62_spill] sm:$0xff] }
 0x7e6   : > { %v8052_v13 = vadd.f32 %v8051_v3, %v8006_v63  ;;  %v8010_v36 = vmul.f32 %v18385_v2, %v16385_v22  ;;  %v7195_v63 = vadd.f32 %v18386_v29, %v7067_v34  ;;  %v18393_v29 = vld [vmem:[#allocation76_spill] sm:$0xff] }
 0x7e7   : > { %v7702_v55 = vadd.f32 %v7701_v59, %v7574_v11  ;;  %v8151_v45 = vadd.f32 %v8150_v18, %v8105_v44  ;;  %v16442_v59 = vadd.f32 %v7954_v47, %v7827_v33  ;;  %v8108_v44 = vmul.f32 %v8009_v16, %v16364_v21  ;;  %v18389_v47 = vld [vmem:[#allocation78_spill] sm:$0xff] }
 0x7e8   : > { %v8053_v62 = vadd.f32 %v8052_v13, %v8007_v31  ;;  %v8109_v33 = vmul.f32 %v8010_v36, %v16385_v22  ;;  %v18391_v13 = vld [vmem:[#allocation280_spill] sm:$0xff] }
 0x7e9   : > { %v7830_v26 = vadd.f32 %v16392_v27, %v7702_v55  ;;  %v8152_v11 = vadd.f32 %v8151_v45, %v8106_v14  ;;  %v18388_v27 = vld [vmem:[#allocation65_spill] sm:$0xff]  ;;  %v8012_v34 = vmul.f32 %v18389_v47, %v16442_v59  ;;  %v18390_v14 = vld [vmem:[#allocation136_spill] sm:$0xff]  ;;  %v7323_v45 = vadd.f32 %v18392_v43, %v7195_v63  ;;  %v18395_v47 = vld [vmem:[#allocation279_spill] sm:$0xff] }
 0x7ea   : > { %v8054_v7 = vadd.f32 %v8053_v62, %v8008_v49  ;;  %v8011_v3 = vmul.f32 %v18388_v27, %v16436_v35  ;;  %v7069_v37 = vadd.f32 %v18391_v13, %v18390_v14 }
 0x7eb   : > { %v8153_v55 = vadd.f32 %v8152_v11, %v8107_v58  ;;  %v8111_v56 = vmul.f32 %v8012_v34, %v16442_v59  ;;  %v7708_v27 = vpop.f32.mrf.mxu3 }
 0x7ec   : > { %v7957_v40 = vpop.f32.mrf.mxu1  ;;  %v7575_v32 = vpop.f32.mrf.mxu2  ;;  %v8055_v15 = vadd.f32 %v8054_v7, %v8009_v16 }
 0x7ed   : > { %v16449_v31 = vadd.f32 %v7957_v40, %v7830_v26  ;;  %v7576_v18 = vadd.f32 %v7575_v32, %v7448_v42  ;;  %v8154_v62 = vadd.f32 %v8153_v55, %v8108_v44  ;;  %v8110_v26 = vmul.f32 %v8011_v3, %v16436_v35  ;;  %v18394_v42 = vld [vmem:[#allocation235_spill] sm:$0xff] }
 0x7ee   : > { %v8056_v2 = vadd.f32 %v8055_v15, %v8010_v36  ;;  %v7197_v7 = vadd.f32 %v18394_v42, %v7069_v37  ;;  %v18398_v37 = vld [vmem:[#allocation283_spill] sm:$0xff] }
 0x7ef   : > { %v7704_v49 = vadd.f32 %v7703_v53, %v7576_v18  ;;  %v8013_v40 = vmul.f32 %v18393_v29, %v16449_v31  ;;  %v8155_v16 = vadd.f32 %v8154_v62, %v8109_v33  ;;  %v7451_v53 = vadd.f32 %v18395_v47, %v7323_v45  ;;  %v7836_v18 = vpop.f32.mrf.mxu0 }
 0x7f0   : > { %v8057_v11 = vadd.f32 %v8056_v2, %v8011_v3  ;;  %v18396_v3 = vld [vmem:[#allocation82_spill] sm:$0xff]  ;;  %v18399_v2 = vld [vmem:[#allocation233_spill] sm:$0xff] }
 0x7f1   : > { %v7832_v58 = vadd.f32 %v7831_v30, %v7704_v49  ;;  %v8156_v63 = vadd.f32 %v8155_v16, %v8110_v26  ;;  %v8112_v36 = vmul.f32 %v8013_v40, %v16449_v31  ;;  %v18397_v49 = vld [vmem:[#allocation140_spill] sm:$0xff]  ;;  %v7325_v45 = vadd.f32 %v18399_v2, %v7197_v7 }
 0x7f2   : > { %v8058_v44 = vadd.f32 %v8057_v11, %v8012_v34  ;;  %v7072_v43 = vadd.f32 %v18398_v37, %v18397_v49  ;;  %v18400_v11 = vld [vmem:[#allocation239_spill] sm:$0xff]  ;;  %v18404_v37 = vld [vmem:[#allocation284_spill] sm:$0xff] }
 0x7f3   : > { %v8157_v30 = vadd.f32 %v8156_v63, %v8111_v56  ;;  %v18401_v56 = vld [vmem:[#allocation282_spill] sm:$0xff] }
 0x7f4   : > { %v7959_v32 = vpop.f32.mrf.mxu1  ;;  %v7578_v15 = vpop.f32.mrf.mxu2  ;;  %v8059_v33 = vadd.f32 %v8058_v44, %v8013_v40  ;;  %v7200_v42 = vadd.f32 %v18400_v11, %v7072_v43  ;;  %v7453_v40 = vadd.f32 %v18401_v56, %v7325_v45 }
 0x7f5   : > { %v16464_v55 = vadd.f32 %v7959_v32, %v7832_v58  ;;  %v7579_v14 = vadd.f32 %v7578_v15, %v7451_v53  ;;  %v8158_v29 = vadd.f32 %v8157_v30, %v8112_v36  ;;  %v7711_v47 = vpop.f32.mrf.mxu3 }
 0x7f7   : > { %v8014_v13 = vmul.f32 %v18396_v3, %v16464_v55  ;;  %v7707_v62 = vadd.f32 %v7706_v20, %v7579_v14  ;;  %v18402_v20 = vld [vmem:[#allocation83_spill] sm:$0xff]  ;;  %v18403_v14 = vld [vmem:[#allocation237_spill] sm:$0xff] }
 0x7f8   : > { %v7839_v44 = vpop.f32.mrf.mxu0  ;;  %v7328_v30 = vadd.f32 %v18403_v14, %v7200_v42 }
 0x7f9   : > { %v8060_v26 = vadd.f32 %v8059_v33, %v8014_v13  ;;  %v8113_v34 = vmul.f32 %v8014_v13, %v16464_v55  ;;  %v7835_v16 = vadd.f32 %v7834_v25, %v7707_v62 }
 0x7fa   : > { %v7456_v43 = vadd.f32 %v18404_v37, %v7328_v30 }
 0x7fb   : > { %v8159_v58 = vadd.f32 %v8158_v29, %v8113_v34 }
 0x7fc   : > { %v7962_v32 = vpop.f32.mrf.mxu1  ;;  %v7580_v63 = vpop.f32.mrf.mxu2 }
 0x7fd   : > { %v16474_v53 = vadd.f32 %v7962_v32, %v7835_v16  ;;  %v7581_v15 = vadd.f32 %v7580_v63, %v7453_v40  ;;  %v7713_v62 = vpop.f32.mrf.mxu3  ;;  %v18405_v16 = vld [vmem:[#allocation84_spill] sm:$0xff]  ;;  %v18406_v63 = vld [vmem:[#allocation85_spill] sm:$0xff] }
 0x7ff   : > { %v8015_v7 = vmul.f32 %v18402_v20, %v16474_v53  ;;  %v7709_v36 = vadd.f32 %v7708_v27, %v7581_v15 }
 0x800   : > { %v7841_v29 = vpop.f32.mrf.mxu0 }
 0x801   : > { %v8061_v33 = vadd.f32 %v8060_v26, %v8015_v7  ;;  %v8114_v25 = vmul.f32 %v8015_v7, %v16474_v53  ;;  %v7837_v3 = vadd.f32 %v7836_v18, %v7709_v36 }
 0x803   : > { %v8160_v13 = vadd.f32 %v8159_v58, %v8114_v25 }
 0x804   : > { %v7964_v49 = vpop.f32.mrf.mxu1  ;;  %v7583_v45 = vpop.f32.mrf.mxu2 }
 0x805   : > { %v16481_v2 = vadd.f32 %v7964_v49, %v7837_v3  ;;  %v7584_v34 = vadd.f32 %v7583_v45, %v7456_v43 }
 0x807   : > { %v8016_v11 = vmul.f32 %v18405_v16, %v16481_v2  ;;  %v7712_v27 = vadd.f32 %v7711_v47, %v7584_v34 }
 0x809   : > { %v8062_v32 = vadd.f32 %v8061_v33, %v8016_v11  ;;  %v8115_v26 = vmul.f32 %v8016_v11, %v16481_v2  ;;  %v7840_v42 = vadd.f32 %v7839_v44, %v7712_v27 }
 0x80b   : > { %v8161_v56 = vadd.f32 %v8160_v13, %v8115_v26 }
 0x80c   : > { %v7967_v18 = vpop.f32.mrf.mxu1  ;;  %v7585_v40 = vpop.f32.mrf.mxu2 }
 0x80d   : > { %v16486_v58 = vadd.f32 %v7967_v18, %v7840_v42 }
 0x80f   : > { %v8017_v15 = vmul.f32 %v18406_v63, %v16486_v58  ;;  %v18407_v63 = vld [vmem:[#allocation6_spill] sm:$0xff] }
 0x811   : > { %v8063_v20 = vadd.f32 %v8062_v32, %v8017_v15  ;;  %v8116_v7 = vmul.f32 %v8017_v15, %v16486_v58 }
 0x813   : > { %v8064_v36 = vrot.slane %v8063_v20, 4  ;;  %v8162_v14 = vadd.f32 %v8161_v56, %v8116_v7 }
 0x814   : > { %v7969_v30 = vpop.f32.mrf.mxu1 }
 0x815   : > { %v8065_v25 = vadd.f32 %v8064_v36, %v8063_v20  ;;  %v8163_v47 = vrot.slane %v8162_v14, 4  ;;  %v18408_v20 = vld [vmem:[#allocation46_spill] sm:$0xff] }
 0x817   : > { %v8066_v33 = vrot.slane %v8065_v25, 2  ;;  %v8164_v3 = vadd.f32 %v8163_v47, %v8162_v14  ;;  %v18409_v14 = vld [vmem:[#allocation73_spill] sm:$0xff] }
 0x819   : > { %v8067_v49 = vadd.f32 %v8066_v33, %v8065_v25  ;;  %v8165_v44 = vrot.slane %v8164_v3, 2 }
 0x81b   : > { %v8068_v13 = vrot.slane %v8067_v49, 1  ;;  %v8166_v37 = vadd.f32 %v8165_v44, %v8164_v3 }
 0x81d   : > { %v8069_v43 = vadd.f32 %v8068_v13, %v8067_v49  ;;  %v8167_v62 = vrot.slane %v8166_v37, 1 }
 0x81f   : > { %v8168_v45 = vadd.f32 %v8167_v62, %v8166_v37  ;;  %v16491_v29 = vmul.f32 0.00390625, %v8069_v43 }
 0x821   : > { %v8170_v34 = vmul.f32 0.00390625, %v8168_v45  ;;  %v8171_v16 = vmul.f32 %v16491_v29, %v16491_v29  ;;  %v8216_v32 = vsub.f32 %v16449_v31, %v16491_v29  ;;  %v8217_v26 = vsub.f32 %v16464_v55, %v16491_v29 }
 0x822   : > { %v8174_v15 = vsub.f32 %v18407_v63, %v16491_v29  ;;  %v8175_v7 = vsub.f32 %v18408_v20, %v16491_v29  ;;  %v8176_v30 = vsub.f32 %v18409_v14, %v16491_v29  ;;  %v8177_v25 = vsub.f32 %v15844_v38, %v16491_v29  ;;  %v18410_v38 = vld [vmem:[#allocation11_spill] sm:$0xff]  ;;  %v18413_v63 = vld [vmem:[#allocation13_spill] sm:$0xff] }
 0x823   : > { %v8172_v11 = vsub.f32 %v8170_v34, %v8171_v16  ;;  %v8178_v47 = vsub.f32 %v15853_v5, %v16491_v29  ;;  %v8179_v33 = vsub.f32 %v15869_v52, %v16491_v29  ;;  %v8180_v3 = vsub.f32 %v15885_v12, %v16491_v29 }
 0x824   : > { %v8181_v49 = vsub.f32 %v15904_v61, %v16491_v29  ;;  %v8182_v44 = vsub.f32 %v15913_v57, %v16491_v29  ;;  %v8183_v37 = vsub.f32 %v15924_v10, %v16491_v29  ;;  %v8184_v43 = vsub.f32 %v18410_v38, %v16491_v29  ;;  %v18411_v61 = vld [vmem:[#allocation36_spill] sm:$0xff] }
 0x825   : > { %v8173_v27 = vmax.f32 %v8172_v11, 0.0  ;;  %v8185_v5 = vsub.f32 %v15944_v60, %v16491_v29  ;;  %v8186_v52 = vsub.f32 %v15953_v23, %v16491_v29  ;;  %v8187_v12 = vsub.f32 %v15964_v39, %v16491_v29  ;;  %v18412_v60 = vld [vmem:[#allocation64_spill] sm:$0xff] }
 0x826   : > { %v8188_v62 = vsub.f32 %v18411_v61, %v16491_v29  ;;  %v8189_v57 = vsub.f32 %v15988_v54, %v16491_v29  ;;  %v8190_v10 = vsub.f32 %v16001_v8, %v16491_v29  ;;  %v8191_v34 = vsub.f32 %v16016_v46, %v16491_v29  ;;  %v18417_v61 = vld [vmem:[#allocation40_spill] sm:$0xff] }
 0x827   : > { %v8221_v40 = vadd.f32 1e-05, %v8173_v27  ;;  %v8192_v16 = vsub.f32 %v18412_v60, %v16491_v29  ;;  %v8193_v23 = vsub.f32 %v16040_v41, %v16491_v29  ;;  %v8194_v39 = vsub.f32 %v16053_v48, %v16491_v29  ;;  %v18414_v41 = vld [vmem:[#allocation50_spill] sm:$0xff]  ;;  %v18415_v48 = vld [vmem:[#allocation3_spill] sm:$0xff] }
 0x828   : > { %v8195_v11 = vsub.f32 %v16068_v17, %v16491_v29  ;;  %v8196_v54 = vsub.f32 %v16081_v28, %v16491_v29  ;;  %v8197_v8 = vsub.f32 %v16097_v9, %v16491_v29  ;;  %v8198_v46 = vsub.f32 %v16106_v4, %v16491_v29  ;;  %v18416_v17 = vld [vmem:[#allocation75_spill] sm:$0xff] }
 0x829   : > { %9691 = vrsqrt.f32 %v8221_v40  ;;  %v8199_v20 = vsub.f32 %v18413_v63, %v16491_v29  ;;  %v8200_v14 = vsub.f32 %v18414_v41, %v16491_v29  ;;  %v8202_v38 = vsub.f32 %v18416_v17, %v16491_v29 }
 0x82a   : > { %v8203_v9 = vsub.f32 %v18417_v61, %v16491_v29  ;;  %v8205_v60 = vsub.f32 %v18365_v1, %v16491_v29  ;;  %v8206_v63 = vsub.f32 %v18368_v24, %v16491_v29  ;;  %v8207_v41 = vsub.f32 %v16243_v51, %v16491_v29 }
 0x82b   : > { %vm8228_vm3 = vweird.f32 %v8221_v40  ;;  %v8209_v17 = vsub.f32 %v16289_v6, %v16491_v29  ;;  %v8210_v61 = vsub.f32 %v16314_v50, %v16491_v29  ;;  %v8211_v1 = vsub.f32 %v16339_v19, %v16491_v29 }
 0x82c   : > { %v8212_v24 = vsub.f32 %v16364_v21, %v16491_v29  ;;  %v8213_v51 = vsub.f32 %v16385_v22, %v16491_v29  ;;  %v18421_v31 = vsub.f32 %v16486_v58, %v16491_v29 }
 0x82f   : > { %v9692_v36 = vpop.eup %9691 }
 0x830   : > { %v8223_v13 = vmul.f32 %v9692_v36, %v8221_v40  ;;  %vm8229_vm1 = vweird.f32 %v9692_v36  ;;  %v8215_v40 = vsub.f32 %v16442_v59, %v16491_v29 }
 0x831   : > { %vm8230_vm4 = vmor %vm8228_vm3, %vm8229_vm1 }
 0x832   : > { %v8224_v45 = vmul.f32 %v9692_v36, %v8223_v13  ;;  %v8201_v13 = vsub.f32 %v18415_v48, %v16491_v29  ;;  %v8208_v48 = vsub.f32 %v16264_v0, %v16491_v29  ;;  %v8214_v0 = vsub.f32 %v16436_v35, %v16491_v29 }
 0x834   : > { %v8225_v27 = vmul.f32 0.5, %v8224_v45  ;;  %v18418_v45 = vld [vmem:[#allocation19_spill] sm:$0xff] }
 0x835   : > { %v8204_v4 = vsub.f32 %v18418_v45, %v16491_v29 }
 0x836   : > { %v8226_v28 = vsub.f32 1.5, %v8225_v27 }
 0x838   : > { %v8227_v27 = vmul.f32 %v9692_v36, %v8226_v28 }
 0x83a   : > { %v8231_v6 = vsel %vm8230_vm4, %v9692_v36, %v8227_v27 }
 0x83b   : > { %v8232_v28 = vmul.f32 %v8231_v6, %v8174_v15  ;;  %v8233_v45 = vmul.f32 %v8231_v6, %v8175_v7  ;;  %v16589_v50 = vmul.f32 %v8231_v6, %v8176_v30  ;;  %v16591_v18 = vmul.f32 %v8231_v6, %v8177_v25 }
 0x83c   : > { %v16593_v19 = vmul.f32 %v8231_v6, %v8178_v47  ;;  %v16595_v21 = vmul.f32 %v8231_v6, %v8179_v33  ;;  %v16597_v56 = vmul.f32 %v8231_v6, %v8180_v3  ;;  %v16599_v22 = vmul.f32 %v8231_v6, %v8181_v49 }
 0x83d   : > { %v16601_v42 = vmul.f32 %v8231_v6, %v8182_v44  ;;  %v16603_v35 = vmul.f32 %v8231_v6, %v8183_v37  ;;  %v16605_v59 = vmul.f32 %v8231_v6, %v8184_v43  ;;  %v16607_v15 = vmul.f32 %v8231_v6, %v8185_v5 }
 0x83e   : > { %v16609_v7 = vmul.f32 %v8231_v6, %v8186_v52  ;;  %v16611_v36 = vmul.f32 %v8231_v6, %v8187_v12  ;;  %v16613_v30 = vmul.f32 %v8231_v6, %v8188_v62  ;;  %v16615_v25 = vmul.f32 %v8231_v6, %v8189_v57 }
 0x83f   : > { %v16617_v47 = vmul.f32 %v8231_v6, %v8190_v10  ;;  %v16619_v33 = vmul.f32 %v8231_v6, %v8191_v34  ;;  %v16621_v3 = vmul.f32 %v8231_v6, %v8192_v16  ;;  %v16623_v49 = vmul.f32 %v8231_v6, %v8193_v23 }
 0x840   : > { %v16625_v44 = vmul.f32 %v8231_v6, %v8194_v39  ;;  %v16627_v37 = vmul.f32 %v8231_v6, %v8195_v11  ;;  %v16629_v43 = vmul.f32 %v8231_v6, %v8196_v54  ;;  %v16631_v5 = vmul.f32 %v8231_v6, %v8197_v8 }
 0x841   : > { %v16633_v52 = vmul.f32 %v8231_v6, %v8198_v46  ;;  %v16635_v12 = vmul.f32 %v8231_v6, %v8199_v20  ;;  %v16637_v62 = vmul.f32 %v8231_v6, %v8200_v14  ;;  %v16639_v57 = vmul.f32 %v8231_v6, %v8201_v13 }
 0x842   : > { %v16641_v10 = vmul.f32 %v8231_v6, %v8202_v38  ;;  %v16643_v34 = vmul.f32 %v8231_v6, %v8203_v9  ;;  %v16645_v16 = vmul.f32 %v8231_v6, %v8204_v4  ;;  %v16647_v23 = vmul.f32 %v8231_v6, %v8205_v60 }
 0x843   : > { %v16649_v39 = vmul.f32 %v8231_v6, %v8206_v63  ;;  %v16651_v11 = vmul.f32 %v8231_v6, %v8207_v41  ;;  %v16653_v54 = vmul.f32 %v8231_v6, %v8208_v48  ;;  %v16655_v8 = vmul.f32 %v8231_v6, %v8209_v17 }
 0x844   : > { %v16657_v46 = vmul.f32 %v8231_v6, %v8210_v61  ;;  %v16659_v20 = vmul.f32 %v8231_v6, %v8211_v1  ;;  %v16661_v14 = vmul.f32 %v8231_v6, %v8212_v24  ;;  %v16663_v13 = vmul.f32 %v8231_v6, %v8213_v51 }
 0x845   : > { %v16665_v38 = vmul.f32 %v8231_v6, %v8214_v0  ;;  %v16667_v9 = vmul.f32 %v8231_v6, %v8215_v40  ;;  %v16672_v4 = vmul.f32 %v8231_v6, %v8216_v32  ;;  %v16677_v60 = vmul.f32 %v8231_v6, %v8217_v26 }
 0x846   : > { %v18419_v63 = vsub.f32 %v16474_v53, %v16491_v29  ;;  %v18420_v48 = vsub.f32 %v16481_v2, %v16491_v29  ;;  %v16692_v32 = vmul.f32 %v8231_v6, %v18421_v31  ;;  %vm8279_vm11 = vcmp.ge.f32.partialorder %v8232_v28, 0.0 }
 0x847   : > { %v8326_v55 = vmul.f32 0.01, %v8232_v28  ;;  %v8327_v26 = vmul.f32 0.01, %v8233_v45  ;;  %vm8280_vm0 = vcmp.ge.f32.partialorder %v8233_v45, 0.0  ;;  %vm8281_vm12 = vcmp.ge.f32.partialorder %v16589_v50, 0.0 }
 0x848   : > { %v16682_v41 = vmul.f32 %v8231_v6, %v18419_v63  ;;  %v16687_v27 = vmul.f32 %v8231_v6, %v18420_v48  ;;  %v8328_v2 = vmul.f32 0.01, %v16589_v50  ;;  %v8329_v58 = vmul.f32 0.01, %v16591_v18 }
 0x849   : > { %v8373_v53 = vsel %vm8279_vm11, %v8232_v28, %v8326_v55  ;;  %vm8282_vm14 = vcmp.ge.f32.partialorder %v16591_v18, 0.0  ;;  %v8330_v29 = vmul.f32 0.01, %v16593_v19  ;;  %vm8283_vm2 = vcmp.ge.f32.partialorder %v16593_v19, 0.0 }
 0x84a   : > { %8420 = vst [vmem:[%s16698_s6] sm:$0xff] %v8373_v53  ;;  %v8331_v17 = vmul.f32 0.01, %v16595_v21  ;;  %v8374_v61 = vsel %vm8280_vm0, %v8233_v45, %v8327_v26  ;;  %vm8284_vm7 = vcmp.ge.f32.partialorder %v16595_v21, 0.0  ;;  %v8332_v1 = vmul.f32 0.01, %v16597_v56 }
 0x84b   : > { %v8375_v24 = vsel %vm8281_vm12, %v16589_v50, %v8328_v2  ;;  %vm8285_vm8 = vcmp.ge.f32.partialorder %v16597_v56, 0.0  ;;  %v8333_v51 = vmul.f32 0.01, %v16599_v22  ;;  %v8376_v0 = vsel %vm8282_vm14, %v16591_v18, %v8329_v58  ;;  %8421 = vst [vmem:[%s16698_s6 + $0x8] sm:$0xff] %v8374_v61 }
 0x84c   : > { %vm8286_vm15 = vcmp.ge.f32.partialorder %v16599_v22, 0.0  ;;  %v8334_v40 = vmul.f32 0.01, %v16601_v42  ;;  %v8377_v6 = vsel %vm8283_vm2, %v16593_v19, %v8330_v29  ;;  %vm8287_vm5 = vcmp.ge.f32.partialorder %v16601_v42, 0.0  ;;  %8422 = vst [vmem:[%s16698_s6 + $0x10] sm:$0xff] %v8375_v24 }
 0x84d   : > { %v8335_v28 = vmul.f32 0.01, %v16603_v35  ;;  %v8378_v45 = vsel %vm8284_vm7, %v16595_v21, %v8331_v17  ;;  %vm8288_vm6 = vcmp.ge.f32.partialorder %v16603_v35, 0.0  ;;  %v8336_v18 = vmul.f32 0.01, %v16605_v59  ;;  %8423 = vst [vmem:[%s16698_s6 + $0x18] sm:$0xff] %v8376_v0 }
 0x84e   : > { %v8379_v50 = vsel %vm8285_vm8, %v16597_v56, %v8332_v1  ;;  %vm8289_vm13 = vcmp.ge.f32.partialorder %v16605_v59, 0.0  ;;  %v8337_v19 = vmul.f32 0.01, %v16607_v15  ;;  %v8380_v63 = vsel %vm8286_vm15, %v16599_v22, %v8333_v51  ;;  %8424 = vst [vmem:[%s16698_s6 + $0x20] sm:$0xff] %v8377_v6 }
 0x84f   : > { %vm8290_vm10 = vcmp.ge.f32.partialorder %v16607_v15, 0.0  ;;  %v8338_v21 = vmul.f32 0.01, %v16609_v7  ;;  %v8381_v48 = vsel %vm8287_vm5, %v16601_v42, %v8334_v40  ;;  %8425 = vst [vmem:[%s16698_s6 + $0x28] sm:$0xff] %v8378_v45  ;;  %vm8291_vm9 = vcmp.ge.f32.partialorder %v16609_v7, 0.0 }
 0x850   : > { %v8339_v56 = vmul.f32 0.01, %v16611_v36  ;;  %v8382_v31 = vsel %vm8288_vm6, %v16603_v35, %v8335_v28  ;;  %8426 = vst [vmem:[%s16698_s6 + $0x30] sm:$0xff] %v8379_v50  ;;  %vm8292_vm1 = vcmp.ge.f32.partialorder %v16611_v36, 0.0  ;;  %v8340_v22 = vmul.f32 0.01, %v16613_v30 }
 0x851   : > { %v8383_v55 = vsel %vm8289_vm13, %v16605_v59, %v8336_v18  ;;  %8427 = vst [vmem:[%s16698_s6 + $0x38] sm:$0xff] %v8380_v63  ;;  %vm8293_vm3 = vcmp.ge.f32.partialorder %v16613_v30, 0.0  ;;  %v8341_v42 = vmul.f32 0.01, %v16615_v25  ;;  %v8384_v53 = vsel %vm8290_vm10, %v16607_v15, %v8337_v19 }
 0x852   : > { %8428 = vst [vmem:[%s16698_s6 + $0x40] sm:$0xff] %v8381_v48  ;;  %vm8294_vm4 = vcmp.ge.f32.partialorder %v16615_v25, 0.0  ;;  %v8342_v35 = vmul.f32 0.01, %v16617_v47  ;;  %v8385_v26 = vsel %vm8291_vm9, %v16609_v7, %v8338_v21  ;;  %vm8295_vm11 = vcmp.ge.f32.partialorder %v16617_v47, 0.0 }
 0x853   : > { %8429 = vst [vmem:[%s16698_s6 + $0x48] sm:$0xff] %v8382_v31  ;;  %v8343_v59 = vmul.f32 0.01, %v16619_v33  ;;  %v8386_v2 = vsel %vm8292_vm1, %v16611_v36, %v8339_v56  ;;  %vm8296_vm0 = vcmp.ge.f32.partialorder %v16619_v33, 0.0  ;;  %v8344_v15 = vmul.f32 0.01, %v16621_v3 }
 0x854   : > { %8430 = vst [vmem:[%s16698_s6 + $0x50] sm:$0xff] %v8383_v55  ;;  %v8387_v58 = vsel %vm8293_vm3, %v16613_v30, %v8340_v22  ;;  %vm8297_vm12 = vcmp.ge.f32.partialorder %v16621_v3, 0.0  ;;  %v8345_v7 = vmul.f32 0.01, %v16623_v49  ;;  %v8388_v29 = vsel %vm8294_vm4, %v16615_v25, %v8341_v42 }
 0x855   : > { %8431 = vst [vmem:[%s16698_s6 + $0x58] sm:$0xff] %v8384_v53  ;;  %vm8298_vm14 = vcmp.ge.f32.partialorder %v16623_v49, 0.0  ;;  %v8346_v36 = vmul.f32 0.01, %v16625_v44  ;;  %v8389_v17 = vsel %vm8295_vm11, %v16617_v47, %v8342_v35  ;;  %vm8299_vm2 = vcmp.ge.f32.partialorder %v16625_v44, 0.0 }
 0x856   : > { %8432 = vst [vmem:[%s16698_s6 + $0x60] sm:$0xff] %v8385_v26  ;;  %v8347_v30 = vmul.f32 0.01, %v16627_v37  ;;  %v8390_v61 = vsel %vm8296_vm0, %v16619_v33, %v8343_v59  ;;  %vm8300_vm7 = vcmp.ge.f32.partialorder %v16627_v37, 0.0  ;;  %v8348_v25 = vmul.f32 0.01, %v16629_v43 }
 0x857   : > { %8433 = vst [vmem:[%s16698_s6 + $0x68] sm:$0xff] %v8386_v2  ;;  %v8391_v1 = vsel %vm8297_vm12, %v16621_v3, %v8344_v15  ;;  %vm8301_vm8 = vcmp.ge.f32.partialorder %v16629_v43, 0.0  ;;  %v8349_v47 = vmul.f32 0.01, %v16631_v5  ;;  %v8392_v24 = vsel %vm8298_vm14, %v16623_v49, %v8345_v7 }
 0x858   : > { %8434 = vst [vmem:[%s16698_s6 + $0x70] sm:$0xff] %v8387_v58  ;;  %vm8302_vm15 = vcmp.ge.f32.partialorder %v16631_v5, 0.0  ;;  %v8350_v33 = vmul.f32 0.01, %v16633_v52  ;;  %v8393_v51 = vsel %vm8299_vm2, %v16625_v44, %v8346_v36  ;;  %vm8303_vm5 = vcmp.ge.f32.partialorder %v16633_v52, 0.0 }
 0x859   : > { %8435 = vst [vmem:[%s16698_s6 + $0x78] sm:$0xff] %v8388_v29  ;;  %v8351_v3 = vmul.f32 0.01, %v16635_v12  ;;  %v8394_v0 = vsel %vm8300_vm7, %v16627_v37, %v8347_v30  ;;  %vm8304_vm6 = vcmp.ge.f32.partialorder %v16635_v12, 0.0  ;;  %v8352_v49 = vmul.f32 0.01, %v16637_v62 }
 0x85a   : > { %8436 = vst [vmem:[%s16698_s6 + $0x80] sm:$0xff] %v8389_v17  ;;  %v8395_v40 = vsel %vm8301_vm8, %v16629_v43, %v8348_v25  ;;  %vm8305_vm13 = vcmp.ge.f32.partialorder %v16637_v62, 0.0  ;;  %v8353_v44 = vmul.f32 0.01, %v16639_v57  ;;  %v8396_v6 = vsel %vm8302_vm15, %v16631_v5, %v8349_v47 }
 0x85b   : > { %8437 = vst [vmem:[%s16698_s6 + $0x88] sm:$0xff] %v8390_v61  ;;  %vm8306_vm10 = vcmp.ge.f32.partialorder %v16639_v57, 0.0  ;;  %v8354_v37 = vmul.f32 0.01, %v16641_v10  ;;  %v8397_v28 = vsel %vm8303_vm5, %v16633_v52, %v8350_v33  ;;  %vm8307_vm9 = vcmp.ge.f32.partialorder %v16641_v10, 0.0 }
 0x85c   : > { %8438 = vst [vmem:[%s16698_s6 + $0x90] sm:$0xff] %v8391_v1  ;;  %v8355_v43 = vmul.f32 0.01, %v16643_v34  ;;  %v8398_v45 = vsel %vm8304_vm6, %v16635_v12, %v8351_v3  ;;  %vm8308_vm1 = vcmp.ge.f32.partialorder %v16643_v34, 0.0  ;;  %v8356_v5 = vmul.f32 0.01, %v16645_v16 }
 0x85d   : > { %8439 = vst [vmem:[%s16698_s6 + $0x98] sm:$0xff] %v8392_v24  ;;  %v8399_v18 = vsel %vm8305_vm13, %v16637_v62, %v8352_v49  ;;  %vm8309_vm3 = vcmp.ge.f32.partialorder %v16645_v16, 0.0  ;;  %v8357_v52 = vmul.f32 0.01, %v16647_v23  ;;  %v8400_v50 = vsel %vm8306_vm10, %v16639_v57, %v8353_v44 }
 0x85e   : > { %8440 = vst [vmem:[%s16698_s6 + $0xa0] sm:$0xff] %v8393_v51  ;;  %vm8310_vm4 = vcmp.ge.f32.partialorder %v16647_v23, 0.0  ;;  %v8358_v12 = vmul.f32 0.01, %v16649_v39  ;;  %v8401_v19 = vsel %vm8307_vm9, %v16641_v10, %v8354_v37  ;;  %vm8311_vm11 = vcmp.ge.f32.partialorder %v16649_v39, 0.0 }
 0x85f   : > { %8441 = vst [vmem:[%s16698_s6 + $0xa8] sm:$0xff] %v8394_v0  ;;  %v8359_v62 = vmul.f32 0.01, %v16651_v11  ;;  %v8402_v63 = vsel %vm8308_vm1, %v16643_v34, %v8355_v43  ;;  %vm8312_vm0 = vcmp.ge.f32.partialorder %v16651_v11, 0.0  ;;  %v8360_v57 = vmul.f32 0.01, %v16653_v54 }
 0x860   : > { %8442 = vst [vmem:[%s16698_s6 + $0xb0] sm:$0xff] %v8395_v40  ;;  %v8403_v21 = vsel %vm8309_vm3, %v16645_v16, %v8356_v5  ;;  %vm8313_vm12 = vcmp.ge.f32.partialorder %v16653_v54, 0.0  ;;  %v8361_v10 = vmul.f32 0.01, %v16655_v8  ;;  %v8404_v48 = vsel %vm8310_vm4, %v16647_v23, %v8357_v52 }
 0x861   : > { %8443 = vst [vmem:[%s16698_s6 + $0xb8] sm:$0xff] %v8396_v6  ;;  %vm8314_vm14 = vcmp.ge.f32.partialorder %v16655_v8, 0.0  ;;  %v8362_v34 = vmul.f32 0.01, %v16657_v46  ;;  %v8405_v56 = vsel %vm8311_vm11, %v16649_v39, %v8358_v12  ;;  %vm8315_vm2 = vcmp.ge.f32.partialorder %v16657_v46, 0.0 }
 0x862   : > { %8444 = vst [vmem:[%s16698_s6 + $0xc0] sm:$0xff] %v8397_v28  ;;  %v8363_v16 = vmul.f32 0.01, %v16659_v20  ;;  %v8406_v31 = vsel %vm8312_vm0, %v16651_v11, %v8359_v62  ;;  %vm8316_vm7 = vcmp.ge.f32.partialorder %v16659_v20, 0.0  ;;  %v8364_v23 = vmul.f32 0.01, %v16661_v14 }
 0x863   : > { %8445 = vst [vmem:[%s16698_s6 + $0xc8] sm:$0xff] %v8398_v45  ;;  %v8407_v22 = vsel %vm8313_vm12, %v16653_v54, %v8360_v57  ;;  %vm8317_vm8 = vcmp.ge.f32.partialorder %v16661_v14, 0.0  ;;  %v8365_v39 = vmul.f32 0.01, %v16663_v13  ;;  %v8408_v55 = vsel %vm8314_vm14, %v16655_v8, %v8361_v10 }
 0x864   : > { %8446 = vst [vmem:[%s16698_s6 + $0xd0] sm:$0xff] %v8399_v18  ;;  %vm8318_vm15 = vcmp.ge.f32.partialorder %v16663_v13, 0.0  ;;  %v8366_v11 = vmul.f32 0.01, %v16665_v38  ;;  %v8409_v42 = vsel %vm8315_vm2, %v16657_v46, %v8362_v34  ;;  %vm8319_vm5 = vcmp.ge.f32.partialorder %v16665_v38, 0.0 }
 0x865   : > { %8447 = vst [vmem:[%s16698_s6 + $0xd8] sm:$0xff] %v8400_v50  ;;  %v8367_v54 = vmul.f32 0.01, %v16667_v9  ;;  %v8410_v53 = vsel %vm8316_vm7, %v16659_v20, %v8363_v16  ;;  %vm8320_vm6 = vcmp.ge.f32.partialorder %v16667_v9, 0.0  ;;  %v8368_v8 = vmul.f32 0.01, %v16672_v4 }
 0x866   : > { %8448 = vst [vmem:[%s16698_s6 + $0xe0] sm:$0xff] %v8401_v19  ;;  %v8411_v35 = vsel %vm8317_vm8, %v16661_v14, %v8364_v23  ;;  %vm8321_vm13 = vcmp.ge.f32.partialorder %v16672_v4, 0.0  ;;  %v8369_v46 = vmul.f32 0.01, %v16677_v60  ;;  %v8412_v26 = vsel %vm8318_vm15, %v16663_v13, %v8365_v39 }
 0x867   : > { %8449 = vst [vmem:[%s16698_s6 + $0xe8] sm:$0xff] %v8402_v63  ;;  %vm8322_vm10 = vcmp.ge.f32.partialorder %v16677_v60, 0.0  ;;  %v8370_v20 = vmul.f32 0.01, %v16682_v41  ;;  %v8413_v59 = vsel %vm8319_vm5, %v16665_v38, %v8366_v11  ;;  %vm8323_vm9 = vcmp.ge.f32.partialorder %v16682_v41, 0.0 }
 0x868   : > { %8450 = vst [vmem:[%s16698_s6 + $0xf0] sm:$0xff] %v8403_v21  ;;  %v8371_v14 = vmul.f32 0.01, %v16687_v27  ;;  %v8414_v2 = vsel %vm8320_vm6, %v16667_v9, %v8367_v54  ;;  %vm8324_vm1 = vcmp.ge.f32.partialorder %v16687_v27, 0.0  ;;  %v8372_v13 = vmul.f32 0.01, %v16692_v32 }
 0x869   : > { %8451 = vst [vmem:[%s16698_s6 + $0xf8] sm:$0xff] %v8404_v48  ;;  %v8415_v15 = vsel %vm8321_vm13, %v16672_v4, %v8368_v8  ;;  %vm8325_vm3 = vcmp.ge.f32.partialorder %v16692_v32, 0.0  ;;  %v8416_v38 = vsel %vm8322_vm10, %v16677_v60, %v8369_v46  ;;  %v8417_v58 = vsel %vm8323_vm9, %v16682_v41, %v8370_v20 }
 0x86a   : > { %8452 = vst [vmem:[%s16698_s6 + $0x100] sm:$0xff] %v8405_v56  ;;  %v8418_v9 = vsel %vm8324_vm1, %v16687_v27, %v8371_v14  ;;  %v8419_v7 = vsel %vm8325_vm3, %v16692_v32, %v8372_v13 }
 0x86b   : > { %8453 = vst [vmem:[%s16698_s6 + $0x108] sm:$0xff] %v8406_v31 }
 0x86c   : > { %8454 = vst [vmem:[%s16698_s6 + $0x110] sm:$0xff] %v8407_v22 }
 0x86d   : > { %8455 = vst [vmem:[%s16698_s6 + $0x118] sm:$0xff] %v8408_v55 }
 0x86e   : > { %8456 = vst [vmem:[%s16698_s6 + $0x120] sm:$0xff] %v8409_v42 }
 0x86f   : > { %8457 = vst [vmem:[%s16698_s6 + $0x128] sm:$0xff] %v8410_v53 }
 0x870   : > { %8458 = vst [vmem:[%s16698_s6 + $0x130] sm:$0xff] %v8411_v35 }
 0x871   : > { %8459 = vst [vmem:[%s16698_s6 + $0x138] sm:$0xff] %v8412_v26 }
 0x872   : > { %8460 = vst [vmem:[%s16698_s6 + $0x140] sm:$0xff] %v8413_v59 }
 0x873   : > { %8461 = vst [vmem:[%s16698_s6 + $0x148] sm:$0xff] %v8414_v2 }
 0x874   : > { %8462 = vst [vmem:[%s16698_s6 + $0x150] sm:$0xff] %v8415_v15 }
 0x875   : > { %8463 = vst [vmem:[%s16698_s6 + $0x158] sm:$0xff] %v8416_v38 }
 0x876   : > { %8464 = vst [vmem:[%s16698_s6 + $0x160] sm:$0xff] %v8417_v58 }
 0x877   : > { %8465 = vst [vmem:[%s16698_s6 + $0x168] sm:$0xff] %v8418_v9 }
 0x878   : > { %8466 = vst [vmem:[%s16698_s6 + $0x170] sm:$0xff] %v8419_v7 }
 0x879 PF: > { %s13_s12 = sadd.s32 1, %s9782_s12  }
 0x87a   : > { %p10_p4 = scmp.ge.s32.totalorder %s13_s12, 4  }
 0x87c   :  { %12 = sbr.rel (!%p10_p4) target bundleno = 1 (0x1), region = 62 }

</bundles_post_ra>
